<compile_context>
chip_gen: v6e
topology: v6e:2x2x1
jax: 0.10.0
libtpu: 0.0.40
codegen_flags: <defaults>
</compile_context>

<pallas_src>
import functools

import jax
import jax.numpy as jnp
from jax.experimental import pallas as pl
from jax.experimental.pallas import tpu as pltpu

LANE = 128
_VMEM_LIMIT = 32 * 1024 * 1024  # explicit scoped-VMEM budget (safe on v5e/v6e/v7x)


def _round_up(x, m):
    return ((x + m - 1) // m) * m


# ----------------------------- Pallas kernels -------------------------------------

def _matmul_bias_kernel(x_ref, w_ref, b_ref, o_ref, *, relu):
    """bf16 x bf16 -> f32 MXU matmul tile + bias (+ReLU).  BN scale pre-folded into W."""
    acc = jnp.dot(x_ref[...], w_ref[...], preferred_element_type=jnp.float32)
    y = acc + b_ref[...]
    if relu:
        y = jnp.maximum(y, 0.0)
    o_ref[...] = y


def _matmul_bias_res_relu_kernel(x_ref, w_ref, b_ref, r_ref, o_ref):
    """conv3 epilogue: matmul + bias + fused residual add + ReLU (no extra HBM pass)."""
    acc = jnp.dot(x_ref[...], w_ref[...], preferred_element_type=jnp.float32)
    o_ref[...] = jnp.maximum(acc + b_ref[...] + r_ref[...], 0.0)


def _gap_kernel(x_ref, o_ref):
    """x: (1, H*W, C) -> mean over spatial -> (1, 1, C)."""
    o_ref[...] = jnp.mean(x_ref[...], axis=1, keepdims=True)


# ----------------------------- fused conv launcher ---------------------------------

def _conv_matmul(patches_bf16, wmat_bf16, bias_f32, *, relu, residual=None):
    """Tiled (M, Kp) @ (Kp, Cp) matmul with bias / residual / ReLU epilogue."""
    m, k_pad = patches_bf16.shape
    _, cout_pad = wmat_bf16.shape
    tm = min(512, m)                       # row tile (multiple of 8 by construction)
    tn = min(256, cout_pad)                # lane-dense output tile (multiple of 128)
    grid = (pl.cdiv(m, tm), pl.cdiv(cout_pad, tn))

    in_specs = [
        pl.BlockSpec((tm, k_pad), lambda i, j: (i, 0)),   # patches: resident across j
        pl.BlockSpec((k_pad, tn), lambda i, j: (0, j)),   # weights
        pl.BlockSpec((1, tn), lambda i, j: (0, j)),       # bias
    ]
    args = [patches_bf16, wmat_bf16, bias_f32]
    if residual is not None:
        in_specs.append(pl.BlockSpec((tm, tn), lambda i, j: (i, j)))
        args.append(residual)
        kern = _matmul_bias_res_relu_kernel
    else:
        kern = functools.partial(_matmul_bias_kernel, relu=relu)

    return pl.pallas_call(
        kern,
        grid=grid,
        in_specs=in_specs,
        out_specs=pl.BlockSpec((tm, tn), lambda i, j: (i, j)),
        out_shape=jax.ShapeDtypeStruct((m, cout_pad), jnp.float32),
        compiler_params=pltpu.CompilerParams(
            dimension_semantics=("parallel", "parallel"),
            vmem_limit_bytes=_VMEM_LIMIT,
        ),
    )(*args)


# ----------------------------- glue: im2col / maxpool ------------------------------

def _im2col(x_nhwc, kh, kw, stride, padding):
    n, h, w, c = x_nhwc.shape
    ho = (h + 2 * padding - kh) // stride + 1
    wo = (w + 2 * padding - kw) // stride + 1
    xp = jnp.pad(x_nhwc, ((0, 0), (padding, padding), (padding, padding), (0, 0)))
    cols = []
    for i in range(kh):
        for j in range(kw):
            cols.append(
                jax.lax.slice(
                    xp,
                    (0, i, j, 0),
                    (n, i + (ho - 1) * stride + 1, j + (wo - 1) * stride + 1, c),
                    (1, stride, stride, 1),
                )
            )
    patches = jnp.concatenate(cols, axis=-1)          # (N, Ho, Wo, kh*kw*C)
    return patches.reshape(n * ho * wo, kh * kw * c), ho, wo


def _conv_bn(x_nhwc, prep, *, stride, padding, relu=True, residual=None):
    """Conv (as im2col matmul) + folded BN (+ residual) (+ ReLU).  Channel-padded I/O."""
    n = x_nhwc.shape[0]
    patches, ho, wo = _im2col(x_nhwc, prep["kh"], prep["kw"], stride, padding)
    m = patches.shape[0]
    patches = patches.astype(jnp.bfloat16)            # bf16 MXU inputs, f32 accumulate
    if prep["k_pad"] != prep["k"]:                    # pad K to a 128-multiple (stem)
        patches = jnp.pad(patches, ((0, 0), (0, prep["k_pad"] - prep["k"])))
    res2 = None if residual is None else residual.reshape(m, prep["cout_pad"])
    out = _conv_matmul(patches, prep["wmat"], prep["bias"], relu=relu, residual=res2)
    return out.reshape(n, ho, wo, prep["cout_pad"])


def _maxpool2d(x, k=3, stride=2, padding=1):
    # Fused tree of maxima over strided slices (no 9x materialized tap stack);
    # per performance review this stays in XLA to keep the op at minimal HBM traffic.
    n, h, w, c = x.shape
    ho = (h + 2 * padding - k) // stride + 1
    wo = (w + 2 * padding - k) // stride + 1
    xp = jnp.pad(x, ((0, 0), (padding, padding), (padding, padding), (0, 0)),
                 constant_values=-jnp.inf)
    out = None
    for i in range(k):
        for j in range(k):
            tap = jax.lax.slice(
                xp,
                (0, i, j, 0),
                (n, i + (ho - 1) * stride + 1, j + (wo - 1) * stride + 1, c),
                (1, stride, stride, 1),
            )
            out = tap if out is None else jnp.maximum(out, tap)
    return out


def _global_avg_pool(x):
    n, h, w, c = x.shape
    hw = h * w
    out = pl.pallas_call(
        _gap_kernel,
        grid=(n,),
        in_specs=[pl.BlockSpec((1, hw, c), lambda i: (i, 0, 0))],
        out_specs=pl.BlockSpec((1, 1, c), lambda i: (i, 0, 0)),
        out_shape=jax.ShapeDtypeStruct((n, 1, c), jnp.float32),
        compiler_params=pltpu.CompilerParams(
            dimension_semantics=("parallel",),
            vmem_limit_bytes=_VMEM_LIMIT,
        ),
    )(x.reshape(n, hw, c))
    return out.reshape(n, c)


# ----------------------------- parameter construction ------------------------------

def _init_conv(key, cout, cin, kh, kw):
    fan_in = cin * kh * kw
    std = (2.0 / fan_in) ** 0.5
    return std * jax.random.normal(key, (cout, cin, kh, kw), jnp.float32)


def _init_bn(key, c):
    k1, k2, k3, k4 = jax.random.split(key, 4)
    return dict(
        gamma=1.0 + 0.1 * jax.random.normal(k1, (c,), jnp.float32),
        beta=0.1 * jax.random.normal(k2, (c,), jnp.float32),
        mean=0.1 * jax.random.normal(k3, (c,), jnp.float32),
        var=1.0 + 0.1 * jax.random.uniform(k4, (c,), jnp.float32),
    )


def init_image_encoder_params(key, base_width=16, blocks=(1, 1, 1, 1)):
    keys = iter(jax.random.split(key, 512))
    params = {
        "stem": dict(w=_init_conv(next(keys), base_width, 3, 7, 7),
                     bn=_init_bn(next(keys), base_width)),
        "stages": [],
    }
    in_ch = base_width
    widths = [base_width, base_width * 2, base_width * 4, base_width * 8]
    for si, (width, nblocks) in enumerate(zip(widths, blocks)):
        stage_stride = 1 if si == 0 else 2
        blks = []
        for bi in range(nblocks):
            s = stage_stride if bi == 0 else 1
            out_ch = width * 4
            blk = dict(
                stride=s,
                conv1=dict(w=_init_conv(next(keys), width, in_ch, 1, 1),
                           bn=_init_bn(next(keys), width)),
                conv2=dict(w=_init_conv(next(keys), width, width, 3, 3),
                           bn=_init_bn(next(keys), width)),
                conv3=dict(w=_init_conv(next(keys), out_ch, width, 1, 1),
                           bn=_init_bn(next(keys), out_ch)),
            )
            if s != 1 or in_ch != out_ch:
                blk["downsample"] = dict(w=_init_conv(next(keys), out_ch, in_ch, 1, 1),
                                         bn=_init_bn(next(keys), out_ch))
            blks.append(blk)
            in_ch = out_ch
        params["stages"].append(blks)
    return params


# ----------------------------- one-time inference prep -----------------------------

def _prep_conv_bn(w, bn, cin_pad, eps=1e-5):
    """Fold eval-mode BN into the weight columns; pad K and Cout to 128-multiples; bf16."""
    cout, cin, kh, kw = w.shape
    scale = bn["gamma"] / jnp.sqrt(bn["var"] + eps)
    bias = bn["beta"] - bn["mean"] * scale
    cout_pad = _round_up(cout, LANE)
    w_ci = jnp.pad(w, ((0, 0), (0, cin_pad - cin), (0, 0), (0, 0)))   # zero pad-in channels
    wmat = jnp.transpose(w_ci, (2, 3, 1, 0)).reshape(kh * kw * cin_pad, cout)
    wmat = wmat * scale[None, :]                                       # fold BN scale
    k = kh * kw * cin_pad
    k_pad = _round_up(k, LANE)
    wmat = jnp.pad(wmat, ((0, k_pad - k), (0, cout_pad - cout)))       # zero pad K / Cout
    bias_p = jnp.pad(bias, (0, cout_pad - cout)).reshape(1, cout_pad)
    return dict(wmat=wmat.astype(jnp.bfloat16),
                bias=bias_p.astype(jnp.float32),
                kh=kh, kw=kw, k=k, k_pad=k_pad, cout_pad=cout_pad)


def prepare_image_encoder(params):
    prep = {"stem": _prep_conv_bn(params["stem"]["w"], params["stem"]["bn"], cin_pad=3)}
    stages = []
    for stage in params["stages"]:
        blks = []
        for blk in stage:
            def cp(sub):
                w = blk[sub]["w"]
                return _prep_conv_bn(w, blk[sub]["bn"], _round_up(w.shape[1], LANE))
            p = dict(stride=blk["stride"], conv1=cp("conv1"), conv2=cp("conv2"),
                     conv3=cp("conv3"))
            if "downsample" in blk:
                p["downsample"] = cp("downsample")
            blks.append(p)
        stages.append(blks)
    prep["stages"] = stages
    return prep


# ----------------------------- forward pass -----------------------------------------

def _bottleneck(x, blk):
    stride = blk["stride"]
    out = _conv_bn(x, blk["conv1"], stride=1, padding=0, relu=True)
    out = _conv_bn(out, blk["conv2"], stride=stride, padding=1, relu=True)
    if "downsample" in blk:
        identity = _conv_bn(x, blk["downsample"], stride=stride, padding=0, relu=False)
    else:
        identity = x
    # conv3 with residual add + ReLU fused into the matmul epilogue.
    return _conv_bn(out, blk["conv3"], stride=1, padding=0, relu=True, residual=identity)


def image_encoder_forward(prep, image_nchw):
    """image_nchw: float32 [N, 3, H, W] (PyTorch layout) -> float32 [N, 512] features."""
    x = jnp.transpose(image_nchw.astype(jnp.float32), (0, 2, 3, 1))  # NCHW -> NHWC
    x = _conv_bn(x, prep["stem"], stride=2, padding=3, relu=True)
    x = _maxpool2d(x, k=3, stride=2, padding=1)
    for stage in prep["stages"]:
        for blk in stage:
            x = _bottleneck(x, blk)
    feats = _global_avg_pool(x)          # adaptive avg-pool(1,1) + flatten; fc=Identity
    return feats                         # final width 512 is already lane-aligned


# ----------------------------- demo ---------------------------------------------------

if __name__ == "__main__":
    key = jax.random.PRNGKey(0)
    pkey, xkey = jax.random.split(key)
    params = init_image_encoder_params(pkey, base_width=16, blocks=(1, 1, 1, 1))
    prepared = prepare_image_encoder(params)           # folded/padded weights, built once

    # PyTorch-convention input: NCHW float32, 3 channels; small spatial for the demo.
    image = jax.random.normal(xkey, (2, 3, 64, 64), jnp.float32)

    fwd = jax.jit(lambda img: image_encoder_forward(prepared, img))
    feats = jax.block_until_ready(fwd(image))

    assert feats.shape == (2, 512), feats.shape
    assert feats.dtype == jnp.float32
    assert bool(jnp.all(jnp.isfinite(feats)))
    print("KERNEL_OK")
</pallas_src>

<mosaic_0001>
module attributes {stable_mosaic.version = 11 : i64} {
  func.func @_matmul_bias_kernel(%arg0: i32, %arg1: i32, %arg2: memref<512x256xbf16, #tpu.memory_space<vmem>>, %arg3: memref<256x128xbf16, #tpu.memory_space<vmem>>, %arg4: memref<1x128xf32, #tpu.memory_space<vmem>>, %arg5: memref<512x128xf32, #tpu.memory_space<vmem>>) attributes {dimension_semantics = [#tpu.dimension_semantics<parallel>, #tpu.dimension_semantics<parallel>], iteration_bounds = array<i64: 4, 1>, scalar_prefetch = 0 : i64, scratch_operands = 0 : i64, tpu.core_type = #tpu.core_type<tc>, window_params = [{transform_indices = @transform_0, window_bounds = array<i64: 512, 256>}, {transform_indices = @transform_1, window_bounds = array<i64: 256, 128>}, {transform_indices = @transform_2, window_bounds = array<i64: 1, 128>}, {transform_indices = @transform_3, window_bounds = array<i64: 512, 128>}]} {
    %c0 = arith.constant 0 : index
    %c0_0 = arith.constant 0 : index
    %0 = vector.load %arg2[%c0, %c0_0] : memref<512x256xbf16, #tpu.memory_space<vmem>>, vector<512x256xbf16>
    %c0_1 = arith.constant 0 : index
    %c0_2 = arith.constant 0 : index
    %1 = vector.load %arg3[%c0_1, %c0_2] : memref<256x128xbf16, #tpu.memory_space<vmem>>, vector<256x128xbf16>
    %cst = arith.constant dense<0.000000e+00> : vector<512x128xf32>
    %2 = tpu.matmul %0, %1, %cst {dimension_numbers = #tpu.dot_dimension_numbers<[1], [0], [0], [1], [0, 0, 1, 1], [], []>} : vector<512x256xbf16>, vector<256x128xbf16>, vector<512x128xf32> -> vector<512x128xf32>
    %c0_3 = arith.constant 0 : index
    %c0_4 = arith.constant 0 : index
    %3 = vector.load %arg4[%c0_3, %c0_4] : memref<1x128xf32, #tpu.memory_space<vmem>>, vector<1x128xf32>
    %4 = vector.broadcast %3 : vector<1x128xf32> to vector<512x128xf32>
    %5 = arith.addf %2, %4 : vector<512x128xf32>
    %cst_5 = arith.constant 0.000000e+00 : f32
    %6 = vector.broadcast %cst_5 : f32 to vector<512x128xf32>
    %7 = arith.maximumf %5, %6 : vector<512x128xf32>
    %c0_6 = arith.constant 0 : index
    %c0_7 = arith.constant 0 : index
    %8 = vector.load %arg5[%c0_6, %c0_7] : memref<512x128xf32, #tpu.memory_space<vmem>>, vector<512x128xf32>
    tpu.vector_store %arg5[%c0_6, %c0_7], %7 {strides = array<i32>} : memref<512x128xf32, #tpu.memory_space<vmem>>, vector<512x128xf32>,
    return
  }
  func.func @transform_0(%arg0: i32, %arg1: i32) -> (i32, i32) {
    %c0_i32 = arith.constant 0 : i32
    %c0_i32_0 = arith.constant 0 : i32
    return %arg0, %c0_i32 : i32, i32
  }
  func.func @transform_1(%arg0: i32, %arg1: i32) -> (i32, i32) {
    %c0_i32 = arith.constant 0 : i32
    %c0_i32_0 = arith.constant 0 : i32
    return %c0_i32, %arg1 : i32, i32
  }
  func.func @transform_2(%arg0: i32, %arg1: i32) -> (i32, i32) {
    %c0_i32 = arith.constant 0 : i32
    %c0_i32_0 = arith.constant 0 : i32
    return %c0_i32, %arg1 : i32, i32
  }
  func.func @transform_3(%arg0: i32, %arg1: i32) -> (i32, i32) {
    %c0_i32 = arith.constant 0 : i32
    return %arg0, %arg1 : i32, i32
  }
}

module attributes {stable_mosaic.version = 11 : i64} {
  func.func @_matmul_bias_kernel(%arg0: i32, %arg1: i32, %arg2: memref<512x128xbf16, #tpu.memory_space<vmem>>, %arg3: memref<128x128xbf16, #tpu.memory_space<vmem>>, %arg4: memref<1x128xf32, #tpu.memory_space<vmem>>, %arg5: memref<512x128xf32, #tpu.memory_space<vmem>>) attributes {dimension_semantics = [#tpu.dimension_semantics<parallel>, #tpu.dimension_semantics<parallel>], iteration_bounds = array<i64: 1, 1>, scalar_prefetch = 0 : i64, scratch_operands = 0 : i64, tpu.core_type = #tpu.core_type<tc>, window_params = [{transform_indices = @transform_0, window_bounds = array<i64: 512, 128>}, {transform_indices = @transform_1, window_bounds = array<i64: 128, 128>}, {transform_indices = @transform_2, window_bounds = array<i64: 1, 128>}, {transform_indices = @transform_3, window_bounds = array<i64: 512, 128>}]} {
    %c0 = arith.constant 0 : index
    %c0_0 = arith.constant 0 : index
    %0 = vector.load %arg2[%c0, %c0_0] : memref<512x128xbf16, #tpu.memory_space<vmem>>, vector<512x128xbf16>
    %c0_1 = arith.constant 0 : index
    %c0_2 = arith.constant 0 : index
    %1 = vector.load %arg3[%c0_1, %c0_2] : memref<128x128xbf16, #tpu.memory_space<vmem>>, vector<128x128xbf16>
    %cst = arith.constant dense<0.000000e+00> : vector<512x128xf32>
    %2 = tpu.matmul %0, %1, %cst {dimension_numbers = #tpu.dot_dimension_numbers<[1], [0], [0], [1], [0, 0, 1, 1], [], []>} : vector<512x128xbf16>, vector<128x128xbf16>, vector<512x128xf32> -> vector<512x128xf32>
    %c0_3 = arith.constant 0 : index
    %c0_4 = arith.constant 0 : index
    %3 = vector.load %arg4[%c0_3, %c0_4] : memref<1x128xf32, #tpu.memory_space<vmem>>, vector<1x128xf32>
    %4 = vector.broadcast %3 : vector<1x128xf32> to vector<512x128xf32>
    %5 = arith.addf %2, %4 : vector<512x128xf32>
    %cst_5 = arith.constant 0.000000e+00 : f32
    %6 = vector.broadcast %cst_5 : f32 to vector<512x128xf32>
    %7 = arith.maximumf %5, %6 : vector<512x128xf32>
    %c0_6 = arith.constant 0 : index
    %c0_7 = arith.constant 0 : index
    %8 = vector.load %arg5[%c0_6, %c0_7] : memref<512x128xf32, #tpu.memory_space<vmem>>, vector<512x128xf32>
    tpu.vector_store %arg5[%c0_6, %c0_7], %7 {strides = array<i32>} : memref<512x128xf32, #tpu.memory_space<vmem>>, vector<512x128xf32>,
    return
  }
  func.func @transform_0(%arg0: i32, %arg1: i32) -> (i32, i32) {
    %c0_i32 = arith.constant 0 : i32
    %c0_i32_0 = arith.constant 0 : i32
    return %arg0, %c0_i32 : i32, i32
  }
  func.func @transform_1(%arg0: i32, %arg1: i32) -> (i32, i32) {
    %c0_i32 = arith.constant 0 : i32
    %c0_i32_0 = arith.constant 0 : i32
    return %c0_i32, %arg1 : i32, i32
  }
  func.func @transform_2(%arg0: i32, %arg1: i32) -> (i32, i32) {
    %c0_i32 = arith.constant 0 : i32
    %c0_i32_0 = arith.constant 0 : i32
    return %c0_i32, %arg1 : i32, i32
  }
  func.func @transform_3(%arg0: i32, %arg1: i32) -> (i32, i32) {
    %c0_i32 = arith.constant 0 : i32
    return %arg0, %arg1 : i32, i32
  }
}

module attributes {stable_mosaic.version = 11 : i64} {
  func.func @_matmul_bias_kernel(%arg0: i32, %arg1: i32, %arg2: memref<512x128xbf16, #tpu.memory_space<vmem>>, %arg3: memref<128x128xbf16, #tpu.memory_space<vmem>>, %arg4: memref<1x128xf32, #tpu.memory_space<vmem>>, %arg5: memref<512x128xf32, #tpu.memory_space<vmem>>) attributes {dimension_semantics = [#tpu.dimension_semantics<parallel>, #tpu.dimension_semantics<parallel>], iteration_bounds = array<i64: 1, 1>, scalar_prefetch = 0 : i64, scratch_operands = 0 : i64, tpu.core_type = #tpu.core_type<tc>, window_params = [{transform_indices = @transform_0, window_bounds = array<i64: 512, 128>}, {transform_indices = @transform_1, window_bounds = array<i64: 128, 128>}, {transform_indices = @transform_2, window_bounds = array<i64: 1, 128>}, {transform_indices = @transform_3, window_bounds = array<i64: 512, 128>}]} {
    %c0 = arith.constant 0 : index
    %c0_0 = arith.constant 0 : index
    %0 = vector.load %arg2[%c0, %c0_0] : memref<512x128xbf16, #tpu.memory_space<vmem>>, vector<512x128xbf16>
    %c0_1 = arith.constant 0 : index
    %c0_2 = arith.constant 0 : index
    %1 = vector.load %arg3[%c0_1, %c0_2] : memref<128x128xbf16, #tpu.memory_space<vmem>>, vector<128x128xbf16>
    %cst = arith.constant dense<0.000000e+00> : vector<512x128xf32>
    %2 = tpu.matmul %0, %1, %cst {dimension_numbers = #tpu.dot_dimension_numbers<[1], [0], [0], [1], [0, 0, 1, 1], [], []>} : vector<512x128xbf16>, vector<128x128xbf16>, vector<512x128xf32> -> vector<512x128xf32>
    %c0_3 = arith.constant 0 : index
    %c0_4 = arith.constant 0 : index
    %3 = vector.load %arg4[%c0_3, %c0_4] : memref<1x128xf32, #tpu.memory_space<vmem>>, vector<1x128xf32>
    %4 = vector.broadcast %3 : vector<1x128xf32> to vector<512x128xf32>
    %5 = arith.addf %2, %4 : vector<512x128xf32>
    %c0_5 = arith.constant 0 : index
    %c0_6 = arith.constant 0 : index
    %6 = vector.load %arg5[%c0_5, %c0_6] : memref<512x128xf32, #tpu.memory_space<vmem>>, vector<512x128xf32>
    tpu.vector_store %arg5[%c0_5, %c0_6], %5 {strides = array<i32>} : memref<512x128xf32, #tpu.memory_space<vmem>>, vector<512x128xf32>,
    return
  }
  func.func @transform_0(%arg0: i32, %arg1: i32) -> (i32, i32) {
    %c0_i32 = arith.constant 0 : i32
    %c0_i32_0 = arith.constant 0 : i32
    return %arg0, %c0_i32 : i32, i32
  }
  func.func @transform_1(%arg0: i32, %arg1: i32) -> (i32, i32) {
    %c0_i32 = arith.constant 0 : i32
    %c0_i32_0 = arith.constant 0 : i32
    return %c0_i32, %arg1 : i32, i32
  }
  func.func @transform_2(%arg0: i32, %arg1: i32) -> (i32, i32) {
    %c0_i32 = arith.constant 0 : i32
    %c0_i32_0 = arith.constant 0 : i32
    return %c0_i32, %arg1 : i32, i32
  }
  func.func @transform_3(%arg0: i32, %arg1: i32) -> (i32, i32) {
    %c0_i32 = arith.constant 0 : i32
    return %arg0, %arg1 : i32, i32
  }
}

module attributes {stable_mosaic.version = 11 : i64} {
  func.func @_matmul_bias_kernel(%arg0: i32, %arg1: i32, %arg2: memref<512x1152xbf16, #tpu.memory_space<vmem>>, %arg3: memref<1152x128xbf16, #tpu.memory_space<vmem>>, %arg4: memref<1x128xf32, #tpu.memory_space<vmem>>, %arg5: memref<512x128xf32, #tpu.memory_space<vmem>>) attributes {dimension_semantics = [#tpu.dimension_semantics<parallel>, #tpu.dimension_semantics<parallel>], iteration_bounds = array<i64: 1, 1>, scalar_prefetch = 0 : i64, scratch_operands = 0 : i64, tpu.core_type = #tpu.core_type<tc>, window_params = [{transform_indices = @transform_0, window_bounds = array<i64: 512, 1152>}, {transform_indices = @transform_1, window_bounds = array<i64: 1152, 128>}, {transform_indices = @transform_2, window_bounds = array<i64: 1, 128>}, {transform_indices = @transform_3, window_bounds = array<i64: 512, 128>}]} {
    %c0 = arith.constant 0 : index
    %c0_0 = arith.constant 0 : index
    %0 = vector.load %arg2[%c0, %c0_0] : memref<512x1152xbf16, #tpu.memory_space<vmem>>, vector<512x1152xbf16>
    %c0_1 = arith.constant 0 : index
    %c0_2 = arith.constant 0 : index
    %1 = vector.load %arg3[%c0_1, %c0_2] : memref<1152x128xbf16, #tpu.memory_space<vmem>>, vector<1152x128xbf16>
    %cst = arith.constant dense<0.000000e+00> : vector<512x128xf32>
    %2 = tpu.matmul %0, %1, %cst {dimension_numbers = #tpu.dot_dimension_numbers<[1], [0], [0], [1], [0, 0, 1, 1], [], []>} : vector<512x1152xbf16>, vector<1152x128xbf16>, vector<512x128xf32> -> vector<512x128xf32>
    %c0_3 = arith.constant 0 : index
    %c0_4 = arith.constant 0 : index
    %3 = vector.load %arg4[%c0_3, %c0_4] : memref<1x128xf32, #tpu.memory_space<vmem>>, vector<1x128xf32>
    %4 = vector.broadcast %3 : vector<1x128xf32> to vector<512x128xf32>
    %5 = arith.addf %2, %4 : vector<512x128xf32>
    %cst_5 = arith.constant 0.000000e+00 : f32
    %6 = vector.broadcast %cst_5 : f32 to vector<512x128xf32>
    %7 = arith.maximumf %5, %6 : vector<512x128xf32>
    %c0_6 = arith.constant 0 : index
    %c0_7 = arith.constant 0 : index
    %8 = vector.load %arg5[%c0_6, %c0_7] : memref<512x128xf32, #tpu.memory_space<vmem>>, vector<512x128xf32>
    tpu.vector_store %arg5[%c0_6, %c0_7], %7 {strides = array<i32>} : memref<512x128xf32, #tpu.memory_space<vmem>>, vector<512x128xf32>,
    return
  }
  func.func @transform_0(%arg0: i32, %arg1: i32) -> (i32, i32) {
    %c0_i32 = arith.constant 0 : i32
    %c0_i32_0 = arith.constant 0 : i32
    return %arg0, %c0_i32 : i32, i32
  }
  func.func @transform_1(%arg0: i32, %arg1: i32) -> (i32, i32) {
    %c0_i32 = arith.constant 0 : i32
    %c0_i32_0 = arith.constant 0 : i32
    return %c0_i32, %arg1 : i32, i32
  }
  func.func @transform_2(%arg0: i32, %arg1: i32) -> (i32, i32) {
    %c0_i32 = arith.constant 0 : i32
    %c0_i32_0 = arith.constant 0 : i32
    return %c0_i32, %arg1 : i32, i32
  }
  func.func @transform_3(%arg0: i32, %arg1: i32) -> (i32, i32) {
    %c0_i32 = arith.constant 0 : i32
    return %arg0, %arg1 : i32, i32
  }
}

module attributes {stable_mosaic.version = 11 : i64} {
  func.func @_matmul_bias_res_relu_kernel(%arg0: i32, %arg1: i32, %arg2: memref<512x128xbf16, #tpu.memory_space<vmem>>, %arg3: memref<128x128xbf16, #tpu.memory_space<vmem>>, %arg4: memref<1x128xf32, #tpu.memory_space<vmem>>, %arg5: memref<512x128xf32, #tpu.memory_space<vmem>>, %arg6: memref<512x128xf32, #tpu.memory_space<vmem>>) attributes {dimension_semantics = [#tpu.dimension_semantics<parallel>, #tpu.dimension_semantics<parallel>], iteration_bounds = array<i64: 1, 1>, scalar_prefetch = 0 : i64, scratch_operands = 0 : i64, tpu.core_type = #tpu.core_type<tc>, window_params = [{transform_indices = @transform_0, window_bounds = array<i64: 512, 128>}, {transform_indices = @transform_1, window_bounds = array<i64: 128, 128>}, {transform_indices = @transform_2, window_bounds = array<i64: 1, 128>}, {transform_indices = @transform_3, window_bounds = array<i64: 512, 128>}, {transform_indices = @transform_4, window_bounds = array<i64: 512, 128>}]} {
    %c0 = arith.constant 0 : index
    %c0_0 = arith.constant 0 : index
    %0 = vector.load %arg2[%c0, %c0_0] : memref<512x128xbf16, #tpu.memory_space<vmem>>, vector<512x128xbf16>
    %c0_1 = arith.constant 0 : index
    %c0_2 = arith.constant 0 : index
    %1 = vector.load %arg3[%c0_1, %c0_2] : memref<128x128xbf16, #tpu.memory_space<vmem>>, vector<128x128xbf16>
    %cst = arith.constant dense<0.000000e+00> : vector<512x128xf32>
    %2 = tpu.matmul %0, %1, %cst {dimension_numbers = #tpu.dot_dimension_numbers<[1], [0], [0], [1], [0, 0, 1, 1], [], []>} : vector<512x128xbf16>, vector<128x128xbf16>, vector<512x128xf32> -> vector<512x128xf32>
    %c0_3 = arith.constant 0 : index
    %c0_4 = arith.constant 0 : index
    %3 = vector.load %arg4[%c0_3, %c0_4] : memref<1x128xf32, #tpu.memory_space<vmem>>, vector<1x128xf32>
    %4 = vector.broadcast %3 : vector<1x128xf32> to vector<512x128xf32>
    %5 = arith.addf %2, %4 : vector<512x128xf32>
    %c0_5 = arith.constant 0 : index
    %c0_6 = arith.constant 0 : index
    %6 = vector.load %arg5[%c0_5, %c0_6] : memref<512x128xf32, #tpu.memory_space<vmem>>, vector<512x128xf32>
    %7 = arith.addf %5, %6 : vector<512x128xf32>
    %cst_7 = arith.constant 0.000000e+00 : f32
    %8 = vector.broadcast %cst_7 : f32 to vector<512x128xf32>
    %9 = arith.maximumf %7, %8 : vector<512x128xf32>
    %c0_8 = arith.constant 0 : index
    %c0_9 = arith.constant 0 : index
    %10 = vector.load %arg6[%c0_8, %c0_9] : memref<512x128xf32, #tpu.memory_space<vmem>>, vector<512x128xf32>
    tpu.vector_store %arg6[%c0_8, %c0_9], %9 {strides = array<i32>} : memref<512x128xf32, #tpu.memory_space<vmem>>, vector<512x128xf32>,
    return
  }
  func.func @transform_0(%arg0: i32, %arg1: i32) -> (i32, i32) {
    %c0_i32 = arith.constant 0 : i32
    %c0_i32_0 = arith.constant 0 : i32
    return %arg0, %c0_i32 : i32, i32
  }
  func.func @transform_1(%arg0: i32, %arg1: i32) -> (i32, i32) {
    %c0_i32 = arith.constant 0 : i32
    %c0_i32_0 = arith.constant 0 : i32
    return %c0_i32, %arg1 : i32, i32
  }
  func.func @transform_2(%arg0: i32, %arg1: i32) -> (i32, i32) {
    %c0_i32 = arith.constant 0 : i32
    %c0_i32_0 = arith.constant 0 : i32
    return %c0_i32, %arg1 : i32, i32
  }
  func.func @transform_3(%arg0: i32, %arg1: i32) -> (i32, i32) {
    %c0_i32 = arith.constant 0 : i32
    return %arg0, %arg1 : i32, i32
  }
  func.func @transform_4(%arg0: i32, %arg1: i32) -> (i32, i32) {
    %c0_i32 = arith.constant 0 : i32
    return %arg0, %arg1 : i32, i32
  }
}

module attributes {stable_mosaic.version = 11 : i64} {
  func.func @_matmul_bias_kernel(%arg0: i32, %arg1: i32, %arg2: memref<128x128xbf16, #tpu.memory_space<vmem>>, %arg3: memref<128x128xbf16, #tpu.memory_space<vmem>>, %arg4: memref<1x128xf32, #tpu.memory_space<vmem>>, %arg5: memref<128x128xf32, #tpu.memory_space<vmem>>) attributes {dimension_semantics = [#tpu.dimension_semantics<parallel>, #tpu.dimension_semantics<parallel>], iteration_bounds = array<i64: 1, 1>, scalar_prefetch = 0 : i64, scratch_operands = 0 : i64, tpu.core_type = #tpu.core_type<tc>, window_params = [{transform_indices = @transform_0, window_bounds = array<i64: 128, 128>}, {transform_indices = @transform_1, window_bounds = array<i64: 128, 128>}, {transform_indices = @transform_2, window_bounds = array<i64: 1, 128>}, {transform_indices = @transform_3, window_bounds = array<i64: 128, 128>}]} {
    %c0 = arith.constant 0 : index
    %c0_0 = arith.constant 0 : index
    %0 = vector.load %arg2[%c0, %c0_0] : memref<128x128xbf16, #tpu.memory_space<vmem>>, vector<128x128xbf16>
    %c0_1 = arith.constant 0 : index
    %c0_2 = arith.constant 0 : index
    %1 = vector.load %arg3[%c0_1, %c0_2] : memref<128x128xbf16, #tpu.memory_space<vmem>>, vector<128x128xbf16>
    %cst = arith.constant dense<0.000000e+00> : vector<128x128xf32>
    %2 = tpu.matmul %0, %1, %cst {dimension_numbers = #tpu.dot_dimension_numbers<[1], [0], [0], [1], [0, 0, 1, 1], [], []>} : vector<128x128xbf16>, vector<128x128xbf16>, vector<128x128xf32> -> vector<128x128xf32>
    %c0_3 = arith.constant 0 : index
    %c0_4 = arith.constant 0 : index
    %3 = vector.load %arg4[%c0_3, %c0_4] : memref<1x128xf32, #tpu.memory_space<vmem>>, vector<1x128xf32>
    %4 = vector.broadcast %3 : vector<1x128xf32> to vector<128x128xf32>
    %5 = arith.addf %2, %4 : vector<128x128xf32>
    %c0_5 = arith.constant 0 : index
    %c0_6 = arith.constant 0 : index
    %6 = vector.load %arg5[%c0_5, %c0_6] : memref<128x128xf32, #tpu.memory_space<vmem>>, vector<128x128xf32>
    tpu.vector_store %arg5[%c0_5, %c0_6], %5 {strides = array<i32>} : memref<128x128xf32, #tpu.memory_space<vmem>>, vector<128x128xf32>,
    return
  }
  func.func @transform_0(%arg0: i32, %arg1: i32) -> (i32, i32) {
    %c0_i32 = arith.constant 0 : i32
    %c0_i32_0 = arith.constant 0 : i32
    return %arg0, %c0_i32 : i32, i32
  }
  func.func @transform_1(%arg0: i32, %arg1: i32) -> (i32, i32) {
    %c0_i32 = arith.constant 0 : i32
    %c0_i32_0 = arith.constant 0 : i32
    return %c0_i32, %arg1 : i32, i32
  }
  func.func @transform_2(%arg0: i32, %arg1: i32) -> (i32, i32) {
    %c0_i32 = arith.constant 0 : i32
    %c0_i32_0 = arith.constant 0 : i32
    return %c0_i32, %arg1 : i32, i32
  }
  func.func @transform_3(%arg0: i32, %arg1: i32) -> (i32, i32) {
    %c0_i32 = arith.constant 0 : i32
    return %arg0, %arg1 : i32, i32
  }
}

module attributes {stable_mosaic.version = 11 : i64} {
  func.func @_matmul_bias_res_relu_kernel(%arg0: i32, %arg1: i32, %arg2: memref<128x128xbf16, #tpu.memory_space<vmem>>, %arg3: memref<128x128xbf16, #tpu.memory_space<vmem>>, %arg4: memref<1x128xf32, #tpu.memory_space<vmem>>, %arg5: memref<128x128xf32, #tpu.memory_space<vmem>>, %arg6: memref<128x128xf32, #tpu.memory_space<vmem>>) attributes {dimension_semantics = [#tpu.dimension_semantics<parallel>, #tpu.dimension_semantics<parallel>], iteration_bounds = array<i64: 1, 1>, scalar_prefetch = 0 : i64, scratch_operands = 0 : i64, tpu.core_type = #tpu.core_type<tc>, window_params = [{transform_indices = @transform_0, window_bounds = array<i64: 128, 128>}, {transform_indices = @transform_1, window_bounds = array<i64: 128, 128>}, {transform_indices = @transform_2, window_bounds = array<i64: 1, 128>}, {transform_indices = @transform_3, window_bounds = array<i64: 128, 128>}, {transform_indices = @transform_4, window_bounds = array<i64: 128, 128>}]} {
    %c0 = arith.constant 0 : index
    %c0_0 = arith.constant 0 : index
    %0 = vector.load %arg2[%c0, %c0_0] : memref<128x128xbf16, #tpu.memory_space<vmem>>, vector<128x128xbf16>
    %c0_1 = arith.constant 0 : index
    %c0_2 = arith.constant 0 : index
    %1 = vector.load %arg3[%c0_1, %c0_2] : memref<128x128xbf16, #tpu.memory_space<vmem>>, vector<128x128xbf16>
    %cst = arith.constant dense<0.000000e+00> : vector<128x128xf32>
    %2 = tpu.matmul %0, %1, %cst {dimension_numbers = #tpu.dot_dimension_numbers<[1], [0], [0], [1], [0, 0, 1, 1], [], []>} : vector<128x128xbf16>, vector<128x128xbf16>, vector<128x128xf32> -> vector<128x128xf32>
    %c0_3 = arith.constant 0 : index
    %c0_4 = arith.constant 0 : index
    %3 = vector.load %arg4[%c0_3, %c0_4] : memref<1x128xf32, #tpu.memory_space<vmem>>, vector<1x128xf32>
    %4 = vector.broadcast %3 : vector<1x128xf32> to vector<128x128xf32>
    %5 = arith.addf %2, %4 : vector<128x128xf32>
    %c0_5 = arith.constant 0 : index
    %c0_6 = arith.constant 0 : index
    %6 = vector.load %arg5[%c0_5, %c0_6] : memref<128x128xf32, #tpu.memory_space<vmem>>, vector<128x128xf32>
    %7 = arith.addf %5, %6 : vector<128x128xf32>
    %cst_7 = arith.constant 0.000000e+00 : f32
    %8 = vector.broadcast %cst_7 : f32 to vector<128x128xf32>
    %9 = arith.maximumf %7, %8 : vector<128x128xf32>
    %c0_8 = arith.constant 0 : index
    %c0_9 = arith.constant 0 : index
    %10 = vector.load %arg6[%c0_8, %c0_9] : memref<128x128xf32, #tpu.memory_space<vmem>>, vector<128x128xf32>
    tpu.vector_store %arg6[%c0_8, %c0_9], %9 {strides = array<i32>} : memref<128x128xf32, #tpu.memory_space<vmem>>, vector<128x128xf32>,
    return
  }
  func.func @transform_0(%arg0: i32, %arg1: i32) -> (i32, i32) {
    %c0_i32 = arith.constant 0 : i32
    %c0_i32_0 = arith.constant 0 : i32
    return %arg0, %c0_i32 : i32, i32
  }
  func.func @transform_1(%arg0: i32, %arg1: i32) -> (i32, i32) {
    %c0_i32 = arith.constant 0 : i32
    %c0_i32_0 = arith.constant 0 : i32
    return %c0_i32, %arg1 : i32, i32
  }
  func.func @transform_2(%arg0: i32, %arg1: i32) -> (i32, i32) {
    %c0_i32 = arith.constant 0 : i32
    %c0_i32_0 = arith.constant 0 : i32
    return %c0_i32, %arg1 : i32, i32
  }
  func.func @transform_3(%arg0: i32, %arg1: i32) -> (i32, i32) {
    %c0_i32 = arith.constant 0 : i32
    return %arg0, %arg1 : i32, i32
  }
  func.func @transform_4(%arg0: i32, %arg1: i32) -> (i32, i32) {
    %c0_i32 = arith.constant 0 : i32
    return %arg0, %arg1 : i32, i32
  }
}

module attributes {stable_mosaic.version = 11 : i64} {
  func.func @_matmul_bias_kernel(%arg0: i32, %arg1: i32, %arg2: memref<128x1152xbf16, #tpu.memory_space<vmem>>, %arg3: memref<1152x128xbf16, #tpu.memory_space<vmem>>, %arg4: memref<1x128xf32, #tpu.memory_space<vmem>>, %arg5: memref<128x128xf32, #tpu.memory_space<vmem>>) attributes {dimension_semantics = [#tpu.dimension_semantics<parallel>, #tpu.dimension_semantics<parallel>], iteration_bounds = array<i64: 1, 1>, scalar_prefetch = 0 : i64, scratch_operands = 0 : i64, tpu.core_type = #tpu.core_type<tc>, window_params = [{transform_indices = @transform_0, window_bounds = array<i64: 128, 1152>}, {transform_indices = @transform_1, window_bounds = array<i64: 1152, 128>}, {transform_indices = @transform_2, window_bounds = array<i64: 1, 128>}, {transform_indices = @transform_3, window_bounds = array<i64: 128, 128>}]} {
    %c0 = arith.constant 0 : index
    %c0_0 = arith.constant 0 : index
    %0 = vector.load %arg2[%c0, %c0_0] : memref<128x1152xbf16, #tpu.memory_space<vmem>>, vector<128x1152xbf16>
    %c0_1 = arith.constant 0 : index
    %c0_2 = arith.constant 0 : index
    %1 = vector.load %arg3[%c0_1, %c0_2] : memref<1152x128xbf16, #tpu.memory_space<vmem>>, vector<1152x128xbf16>
    %cst = arith.constant dense<0.000000e+00> : vector<128x128xf32>
    %2 = tpu.matmul %0, %1, %cst {dimension_numbers = #tpu.dot_dimension_numbers<[1], [0], [0], [1], [0, 0, 1, 1], [], []>} : vector<128x1152xbf16>, vector<1152x128xbf16>, vector<128x128xf32> -> vector<128x128xf32>
    %c0_3 = arith.constant 0 : index
    %c0_4 = arith.constant 0 : index
    %3 = vector.load %arg4[%c0_3, %c0_4] : memref<1x128xf32, #tpu.memory_space<vmem>>, vector<1x128xf32>
    %4 = vector.broadcast %3 : vector<1x128xf32> to vector<128x128xf32>
    %5 = arith.addf %2, %4 : vector<128x128xf32>
    %cst_5 = arith.constant 0.000000e+00 : f32
    %6 = vector.broadcast %cst_5 : f32 to vector<128x128xf32>
    %7 = arith.maximumf %5, %6 : vector<128x128xf32>
    %c0_6 = arith.constant 0 : index
    %c0_7 = arith.constant 0 : index
    %8 = vector.load %arg5[%c0_6, %c0_7] : memref<128x128xf32, #tpu.memory_space<vmem>>, vector<128x128xf32>
    tpu.vector_store %arg5[%c0_6, %c0_7], %7 {strides = array<i32>} : memref<128x128xf32, #tpu.memory_space<vmem>>, vector<128x128xf32>,
    return
  }
  func.func @transform_0(%arg0: i32, %arg1: i32) -> (i32, i32) {
    %c0_i32 = arith.constant 0 : i32
    %c0_i32_0 = arith.constant 0 : i32
    return %arg0, %c0_i32 : i32, i32
  }
  func.func @transform_1(%arg0: i32, %arg1: i32) -> (i32, i32) {
    %c0_i32 = arith.constant 0 : i32
    %c0_i32_0 = arith.constant 0 : i32
    return %c0_i32, %arg1 : i32, i32
  }
  func.func @transform_2(%arg0: i32, %arg1: i32) -> (i32, i32) {
    %c0_i32 = arith.constant 0 : i32
    %c0_i32_0 = arith.constant 0 : i32
    return %c0_i32, %arg1 : i32, i32
  }
  func.func @transform_3(%arg0: i32, %arg1: i32) -> (i32, i32) {
    %c0_i32 = arith.constant 0 : i32
    return %arg0, %arg1 : i32, i32
  }
}

module attributes {stable_mosaic.version = 11 : i64} {
  func.func @_matmul_bias_kernel(%arg0: i32, %arg1: i32, %arg2: memref<32x128xbf16, #tpu.memory_space<vmem>>, %arg3: memref<128x256xbf16, #tpu.memory_space<vmem>>, %arg4: memref<1x256xf32, #tpu.memory_space<vmem>>, %arg5: memref<32x256xf32, #tpu.memory_space<vmem>>) attributes {dimension_semantics = [#tpu.dimension_semantics<parallel>, #tpu.dimension_semantics<parallel>], iteration_bounds = array<i64: 1, 1>, scalar_prefetch = 0 : i64, scratch_operands = 0 : i64, tpu.core_type = #tpu.core_type<tc>, window_params = [{transform_indices = @transform_0, window_bounds = array<i64: 32, 128>}, {transform_indices = @transform_1, window_bounds = array<i64: 128, 256>}, {transform_indices = @transform_2, window_bounds = array<i64: 1, 256>}, {transform_indices = @transform_3, window_bounds = array<i64: 32, 256>}]} {
    %c0 = arith.constant 0 : index
    %c0_0 = arith.constant 0 : index
    %0 = vector.load %arg2[%c0, %c0_0] : memref<32x128xbf16, #tpu.memory_space<vmem>>, vector<32x128xbf16>
    %c0_1 = arith.constant 0 : index
    %c0_2 = arith.constant 0 : index
    %1 = vector.load %arg3[%c0_1, %c0_2] : memref<128x256xbf16, #tpu.memory_space<vmem>>, vector<128x256xbf16>
    %cst = arith.constant dense<0.000000e+00> : vector<32x256xf32>
    %2 = tpu.matmul %0, %1, %cst {dimension_numbers = #tpu.dot_dimension_numbers<[1], [0], [0], [1], [0, 0, 1, 1], [], []>} : vector<32x128xbf16>, vector<128x256xbf16>, vector<32x256xf32> -> vector<32x256xf32>
    %c0_3 = arith.constant 0 : index
    %c0_4 = arith.constant 0 : index
    %3 = vector.load %arg4[%c0_3, %c0_4] : memref<1x256xf32, #tpu.memory_space<vmem>>, vector<1x256xf32>
    %4 = vector.broadcast %3 : vector<1x256xf32> to vector<32x256xf32>
    %5 = arith.addf %2, %4 : vector<32x256xf32>
    %c0_5 = arith.constant 0 : index
    %c0_6 = arith.constant 0 : index
    %6 = vector.load %arg5[%c0_5, %c0_6] : memref<32x256xf32, #tpu.memory_space<vmem>>, vector<32x256xf32>
    tpu.vector_store %arg5[%c0_5, %c0_6], %5 {strides = array<i32>} : memref<32x256xf32, #tpu.memory_space<vmem>>, vector<32x256xf32>,
    return
  }
  func.func @transform_0(%arg0: i32, %arg1: i32) -> (i32, i32) {
    %c0_i32 = arith.constant 0 : i32
    %c0_i32_0 = arith.constant 0 : i32
    return %arg0, %c0_i32 : i32, i32
  }
  func.func @transform_1(%arg0: i32, %arg1: i32) -> (i32, i32) {
    %c0_i32 = arith.constant 0 : i32
    %c0_i32_0 = arith.constant 0 : i32
    return %c0_i32, %arg1 : i32, i32
  }
  func.func @transform_2(%arg0: i32, %arg1: i32) -> (i32, i32) {
    %c0_i32 = arith.constant 0 : i32
    %c0_i32_0 = arith.constant 0 : i32
    return %c0_i32, %arg1 : i32, i32
  }
  func.func @transform_3(%arg0: i32, %arg1: i32) -> (i32, i32) {
    %c0_i32 = arith.constant 0 : i32
    return %arg0, %arg1 : i32, i32
  }
}

module attributes {stable_mosaic.version = 11 : i64} {
  func.func @_matmul_bias_kernel(%arg0: i32, %arg1: i32, %arg2: memref<128x128xbf16, #tpu.memory_space<vmem>>, %arg3: memref<128x128xbf16, #tpu.memory_space<vmem>>, %arg4: memref<1x128xf32, #tpu.memory_space<vmem>>, %arg5: memref<128x128xf32, #tpu.memory_space<vmem>>) attributes {dimension_semantics = [#tpu.dimension_semantics<parallel>, #tpu.dimension_semantics<parallel>], iteration_bounds = array<i64: 1, 1>, scalar_prefetch = 0 : i64, scratch_operands = 0 : i64, tpu.core_type = #tpu.core_type<tc>, window_params = [{transform_indices = @transform_0, window_bounds = array<i64: 128, 128>}, {transform_indices = @transform_1, window_bounds = array<i64: 128, 128>}, {transform_indices = @transform_2, window_bounds = array<i64: 1, 128>}, {transform_indices = @transform_3, window_bounds = array<i64: 128, 128>}]} {
    %c0 = arith.constant 0 : index
    %c0_0 = arith.constant 0 : index
    %0 = vector.load %arg2[%c0, %c0_0] : memref<128x128xbf16, #tpu.memory_space<vmem>>, vector<128x128xbf16>
    %c0_1 = arith.constant 0 : index
    %c0_2 = arith.constant 0 : index
    %1 = vector.load %arg3[%c0_1, %c0_2] : memref<128x128xbf16, #tpu.memory_space<vmem>>, vector<128x128xbf16>
    %cst = arith.constant dense<0.000000e+00> : vector<128x128xf32>
    %2 = tpu.matmul %0, %1, %cst {dimension_numbers = #tpu.dot_dimension_numbers<[1], [0], [0], [1], [0, 0, 1, 1], [], []>} : vector<128x128xbf16>, vector<128x128xbf16>, vector<128x128xf32> -> vector<128x128xf32>
    %c0_3 = arith.constant 0 : index
    %c0_4 = arith.constant 0 : index
    %3 = vector.load %arg4[%c0_3, %c0_4] : memref<1x128xf32, #tpu.memory_space<vmem>>, vector<1x128xf32>
    %4 = vector.broadcast %3 : vector<1x128xf32> to vector<128x128xf32>
    %5 = arith.addf %2, %4 : vector<128x128xf32>
    %cst_5 = arith.constant 0.000000e+00 : f32
    %6 = vector.broadcast %cst_5 : f32 to vector<128x128xf32>
    %7 = arith.maximumf %5, %6 : vector<128x128xf32>
    %c0_6 = arith.constant 0 : index
    %c0_7 = arith.constant 0 : index
    %8 = vector.load %arg5[%c0_6, %c0_7] : memref<128x128xf32, #tpu.memory_space<vmem>>, vector<128x128xf32>
    tpu.vector_store %arg5[%c0_6, %c0_7], %7 {strides = array<i32>} : memref<128x128xf32, #tpu.memory_space<vmem>>, vector<128x128xf32>,
    return
  }
  func.func @transform_0(%arg0: i32, %arg1: i32) -> (i32, i32) {
    %c0_i32 = arith.constant 0 : i32
    %c0_i32_0 = arith.constant 0 : i32
    return %arg0, %c0_i32 : i32, i32
  }
  func.func @transform_1(%arg0: i32, %arg1: i32) -> (i32, i32) {
    %c0_i32 = arith.constant 0 : i32
    %c0_i32_0 = arith.constant 0 : i32
    return %c0_i32, %arg1 : i32, i32
  }
  func.func @transform_2(%arg0: i32, %arg1: i32) -> (i32, i32) {
    %c0_i32 = arith.constant 0 : i32
    %c0_i32_0 = arith.constant 0 : i32
    return %c0_i32, %arg1 : i32, i32
  }
  func.func @transform_3(%arg0: i32, %arg1: i32) -> (i32, i32) {
    %c0_i32 = arith.constant 0 : i32
    return %arg0, %arg1 : i32, i32
  }
}

module attributes {stable_mosaic.version = 11 : i64} {
  func.func @_matmul_bias_kernel(%arg0: i32, %arg1: i32, %arg2: memref<32x1152xbf16, #tpu.memory_space<vmem>>, %arg3: memref<1152x128xbf16, #tpu.memory_space<vmem>>, %arg4: memref<1x128xf32, #tpu.memory_space<vmem>>, %arg5: memref<32x128xf32, #tpu.memory_space<vmem>>) attributes {dimension_semantics = [#tpu.dimension_semantics<parallel>, #tpu.dimension_semantics<parallel>], iteration_bounds = array<i64: 1, 1>, scalar_prefetch = 0 : i64, scratch_operands = 0 : i64, tpu.core_type = #tpu.core_type<tc>, window_params = [{transform_indices = @transform_0, window_bounds = array<i64: 32, 1152>}, {transform_indices = @transform_1, window_bounds = array<i64: 1152, 128>}, {transform_indices = @transform_2, window_bounds = array<i64: 1, 128>}, {transform_indices = @transform_3, window_bounds = array<i64: 32, 128>}]} {
    %c0 = arith.constant 0 : index
    %c0_0 = arith.constant 0 : index
    %0 = vector.load %arg2[%c0, %c0_0] : memref<32x1152xbf16, #tpu.memory_space<vmem>>, vector<32x1152xbf16>
    %c0_1 = arith.constant 0 : index
    %c0_2 = arith.constant 0 : index
    %1 = vector.load %arg3[%c0_1, %c0_2] : memref<1152x128xbf16, #tpu.memory_space<vmem>>, vector<1152x128xbf16>
    %cst = arith.constant dense<0.000000e+00> : vector<32x128xf32>
    %2 = tpu.matmul %0, %1, %cst {dimension_numbers = #tpu.dot_dimension_numbers<[1], [0], [0], [1], [0, 0, 1, 1], [], []>} : vector<32x1152xbf16>, vector<1152x128xbf16>, vector<32x128xf32> -> vector<32x128xf32>
    %c0_3 = arith.constant 0 : index
    %c0_4 = arith.constant 0 : index
    %3 = vector.load %arg4[%c0_3, %c0_4] : memref<1x128xf32, #tpu.memory_space<vmem>>, vector<1x128xf32>
    %4 = vector.broadcast %3 : vector<1x128xf32> to vector<32x128xf32>
    %5 = arith.addf %2, %4 : vector<32x128xf32>
    %cst_5 = arith.constant 0.000000e+00 : f32
    %6 = vector.broadcast %cst_5 : f32 to vector<32x128xf32>
    %7 = arith.maximumf %5, %6 : vector<32x128xf32>
    %c0_6 = arith.constant 0 : index
    %c0_7 = arith.constant 0 : index
    %8 = vector.load %arg5[%c0_6, %c0_7] : memref<32x128xf32, #tpu.memory_space<vmem>>, vector<32x128xf32>
    tpu.vector_store %arg5[%c0_6, %c0_7], %7 {strides = array<i32>} : memref<32x128xf32, #tpu.memory_space<vmem>>, vector<32x128xf32>,
    return
  }
  func.func @transform_0(%arg0: i32, %arg1: i32) -> (i32, i32) {
    %c0_i32 = arith.constant 0 : i32
    %c0_i32_0 = arith.constant 0 : i32
    return %arg0, %c0_i32 : i32, i32
  }
  func.func @transform_1(%arg0: i32, %arg1: i32) -> (i32, i32) {
    %c0_i32 = arith.constant 0 : i32
    %c0_i32_0 = arith.constant 0 : i32
    return %c0_i32, %arg1 : i32, i32
  }
  func.func @transform_2(%arg0: i32, %arg1: i32) -> (i32, i32) {
    %c0_i32 = arith.constant 0 : i32
    %c0_i32_0 = arith.constant 0 : i32
    return %c0_i32, %arg1 : i32, i32
  }
  func.func @transform_3(%arg0: i32, %arg1: i32) -> (i32, i32) {
    %c0_i32 = arith.constant 0 : i32
    return %arg0, %arg1 : i32, i32
  }
}

module attributes {stable_mosaic.version = 11 : i64} {
  func.func @_matmul_bias_res_relu_kernel(%arg0: i32, %arg1: i32, %arg2: memref<32x128xbf16, #tpu.memory_space<vmem>>, %arg3: memref<128x256xbf16, #tpu.memory_space<vmem>>, %arg4: memref<1x256xf32, #tpu.memory_space<vmem>>, %arg5: memref<32x256xf32, #tpu.memory_space<vmem>>, %arg6: memref<32x256xf32, #tpu.memory_space<vmem>>) attributes {dimension_semantics = [#tpu.dimension_semantics<parallel>, #tpu.dimension_semantics<parallel>], iteration_bounds = array<i64: 1, 1>, scalar_prefetch = 0 : i64, scratch_operands = 0 : i64, tpu.core_type = #tpu.core_type<tc>, window_params = [{transform_indices = @transform_0, window_bounds = array<i64: 32, 128>}, {transform_indices = @transform_1, window_bounds = array<i64: 128, 256>}, {transform_indices = @transform_2, window_bounds = array<i64: 1, 256>}, {transform_indices = @transform_3, window_bounds = array<i64: 32, 256>}, {transform_indices = @transform_4, window_bounds = array<i64: 32, 256>}]} {
    %c0 = arith.constant 0 : index
    %c0_0 = arith.constant 0 : index
    %0 = vector.load %arg2[%c0, %c0_0] : memref<32x128xbf16, #tpu.memory_space<vmem>>, vector<32x128xbf16>
    %c0_1 = arith.constant 0 : index
    %c0_2 = arith.constant 0 : index
    %1 = vector.load %arg3[%c0_1, %c0_2] : memref<128x256xbf16, #tpu.memory_space<vmem>>, vector<128x256xbf16>
    %cst = arith.constant dense<0.000000e+00> : vector<32x256xf32>
    %2 = tpu.matmul %0, %1, %cst {dimension_numbers = #tpu.dot_dimension_numbers<[1], [0], [0], [1], [0, 0, 1, 1], [], []>} : vector<32x128xbf16>, vector<128x256xbf16>, vector<32x256xf32> -> vector<32x256xf32>
    %c0_3 = arith.constant 0 : index
    %c0_4 = arith.constant 0 : index
    %3 = vector.load %arg4[%c0_3, %c0_4] : memref<1x256xf32, #tpu.memory_space<vmem>>, vector<1x256xf32>
    %4 = vector.broadcast %3 : vector<1x256xf32> to vector<32x256xf32>
    %5 = arith.addf %2, %4 : vector<32x256xf32>
    %c0_5 = arith.constant 0 : index
    %c0_6 = arith.constant 0 : index
    %6 = vector.load %arg5[%c0_5, %c0_6] : memref<32x256xf32, #tpu.memory_space<vmem>>, vector<32x256xf32>
    %7 = arith.addf %5, %6 : vector<32x256xf32>
    %cst_7 = arith.constant 0.000000e+00 : f32
    %8 = vector.broadcast %cst_7 : f32 to vector<32x256xf32>
    %9 = arith.maximumf %7, %8 : vector<32x256xf32>
    %c0_8 = arith.constant 0 : index
    %c0_9 = arith.constant 0 : index
    %10 = vector.load %arg6[%c0_8, %c0_9] : memref<32x256xf32, #tpu.memory_space<vmem>>, vector<32x256xf32>
    tpu.vector_store %arg6[%c0_8, %c0_9], %9 {strides = array<i32>} : memref<32x256xf32, #tpu.memory_space<vmem>>, vector<32x256xf32>,
    return
  }
  func.func @transform_0(%arg0: i32, %arg1: i32) -> (i32, i32) {
    %c0_i32 = arith.constant 0 : i32
    %c0_i32_0 = arith.constant 0 : i32
    return %arg0, %c0_i32 : i32, i32
  }
  func.func @transform_1(%arg0: i32, %arg1: i32) -> (i32, i32) {
    %c0_i32 = arith.constant 0 : i32
    %c0_i32_0 = arith.constant 0 : i32
    return %c0_i32, %arg1 : i32, i32
  }
  func.func @transform_2(%arg0: i32, %arg1: i32) -> (i32, i32) {
    %c0_i32 = arith.constant 0 : i32
    %c0_i32_0 = arith.constant 0 : i32
    return %c0_i32, %arg1 : i32, i32
  }
  func.func @transform_3(%arg0: i32, %arg1: i32) -> (i32, i32) {
    %c0_i32 = arith.constant 0 : i32
    return %arg0, %arg1 : i32, i32
  }
  func.func @transform_4(%arg0: i32, %arg1: i32) -> (i32, i32) {
    %c0_i32 = arith.constant 0 : i32
    return %arg0, %arg1 : i32, i32
  }
}

module attributes {stable_mosaic.version = 11 : i64} {
  func.func @_matmul_bias_kernel(%arg0: i32, %arg1: i32, %arg2: memref<32x256xbf16, #tpu.memory_space<vmem>>, %arg3: memref<256x128xbf16, #tpu.memory_space<vmem>>, %arg4: memref<1x128xf32, #tpu.memory_space<vmem>>, %arg5: memref<32x128xf32, #tpu.memory_space<vmem>>) attributes {dimension_semantics = [#tpu.dimension_semantics<parallel>, #tpu.dimension_semantics<parallel>], iteration_bounds = array<i64: 1, 1>, scalar_prefetch = 0 : i64, scratch_operands = 0 : i64, tpu.core_type = #tpu.core_type<tc>, window_params = [{transform_indices = @transform_0, window_bounds = array<i64: 32, 256>}, {transform_indices = @transform_1, window_bounds = array<i64: 256, 128>}, {transform_indices = @transform_2, window_bounds = array<i64: 1, 128>}, {transform_indices = @transform_3, window_bounds = array<i64: 32, 128>}]} {
    %c0 = arith.constant 0 : index
    %c0_0 = arith.constant 0 : index
    %0 = vector.load %arg2[%c0, %c0_0] : memref<32x256xbf16, #tpu.memory_space<vmem>>, vector<32x256xbf16>
    %c0_1 = arith.constant 0 : index
    %c0_2 = arith.constant 0 : index
    %1 = vector.load %arg3[%c0_1, %c0_2] : memref<256x128xbf16, #tpu.memory_space<vmem>>, vector<256x128xbf16>
    %cst = arith.constant dense<0.000000e+00> : vector<32x128xf32>
    %2 = tpu.matmul %0, %1, %cst {dimension_numbers = #tpu.dot_dimension_numbers<[1], [0], [0], [1], [0, 0, 1, 1], [], []>} : vector<32x256xbf16>, vector<256x128xbf16>, vector<32x128xf32> -> vector<32x128xf32>
    %c0_3 = arith.constant 0 : index
    %c0_4 = arith.constant 0 : index
    %3 = vector.load %arg4[%c0_3, %c0_4] : memref<1x128xf32, #tpu.memory_space<vmem>>, vector<1x128xf32>
    %4 = vector.broadcast %3 : vector<1x128xf32> to vector<32x128xf32>
    %5 = arith.addf %2, %4 : vector<32x128xf32>
    %cst_5 = arith.constant 0.000000e+00 : f32
    %6 = vector.broadcast %cst_5 : f32 to vector<32x128xf32>
    %7 = arith.maximumf %5, %6 : vector<32x128xf32>
    %c0_6 = arith.constant 0 : index
    %c0_7 = arith.constant 0 : index
    %8 = vector.load %arg5[%c0_6, %c0_7] : memref<32x128xf32, #tpu.memory_space<vmem>>, vector<32x128xf32>
    tpu.vector_store %arg5[%c0_6, %c0_7], %7 {strides = array<i32>} : memref<32x128xf32, #tpu.memory_space<vmem>>, vector<32x128xf32>,
    return
  }
  func.func @transform_0(%arg0: i32, %arg1: i32) -> (i32, i32) {
    %c0_i32 = arith.constant 0 : i32
    %c0_i32_0 = arith.constant 0 : i32
    return %arg0, %c0_i32 : i32, i32
  }
  func.func @transform_1(%arg0: i32, %arg1: i32) -> (i32, i32) {
    %c0_i32 = arith.constant 0 : i32
    %c0_i32_0 = arith.constant 0 : i32
    return %c0_i32, %arg1 : i32, i32
  }
  func.func @transform_2(%arg0: i32, %arg1: i32) -> (i32, i32) {
    %c0_i32 = arith.constant 0 : i32
    %c0_i32_0 = arith.constant 0 : i32
    return %c0_i32, %arg1 : i32, i32
  }
  func.func @transform_3(%arg0: i32, %arg1: i32) -> (i32, i32) {
    %c0_i32 = arith.constant 0 : i32
    return %arg0, %arg1 : i32, i32
  }
}

module attributes {stable_mosaic.version = 11 : i64} {
  func.func @_matmul_bias_kernel(%arg0: i32, %arg1: i32, %arg2: memref<8x256xbf16, #tpu.memory_space<vmem>>, %arg3: memref<256x256xbf16, #tpu.memory_space<vmem>>, %arg4: memref<1x256xf32, #tpu.memory_space<vmem>>, %arg5: memref<8x256xf32, #tpu.memory_space<vmem>>) attributes {dimension_semantics = [#tpu.dimension_semantics<parallel>, #tpu.dimension_semantics<parallel>], iteration_bounds = array<i64: 1, 2>, scalar_prefetch = 0 : i64, scratch_operands = 0 : i64, tpu.core_type = #tpu.core_type<tc>, window_params = [{transform_indices = @transform_0, window_bounds = array<i64: 8, 256>}, {transform_indices = @transform_1, window_bounds = array<i64: 256, 256>}, {transform_indices = @transform_2, window_bounds = array<i64: 1, 256>}, {transform_indices = @transform_3, window_bounds = array<i64: 8, 256>}]} {
    %c0 = arith.constant 0 : index
    %c0_0 = arith.constant 0 : index
    %0 = vector.load %arg2[%c0, %c0_0] : memref<8x256xbf16, #tpu.memory_space<vmem>>, vector<8x256xbf16>
    %c0_1 = arith.constant 0 : index
    %c0_2 = arith.constant 0 : index
    %1 = vector.load %arg3[%c0_1, %c0_2] : memref<256x256xbf16, #tpu.memory_space<vmem>>, vector<256x256xbf16>
    %cst = arith.constant dense<0.000000e+00> : vector<8x256xf32>
    %2 = tpu.matmul %0, %1, %cst {dimension_numbers = #tpu.dot_dimension_numbers<[1], [0], [0], [1], [0, 0, 1, 1], [], []>} : vector<8x256xbf16>, vector<256x256xbf16>, vector<8x256xf32> -> vector<8x256xf32>
    %c0_3 = arith.constant 0 : index
    %c0_4 = arith.constant 0 : index
    %3 = vector.load %arg4[%c0_3, %c0_4] : memref<1x256xf32, #tpu.memory_space<vmem>>, vector<1x256xf32>
    %4 = vector.broadcast %3 : vector<1x256xf32> to vector<8x256xf32>
    %5 = arith.addf %2, %4 : vector<8x256xf32>
    %c0_5 = arith.constant 0 : index
    %c0_6 = arith.constant 0 : index
    %6 = vector.load %arg5[%c0_5, %c0_6] : memref<8x256xf32, #tpu.memory_space<vmem>>, vector<8x256xf32>
    tpu.vector_store %arg5[%c0_5, %c0_6], %5 {strides = array<i32>} : memref<8x256xf32, #tpu.memory_space<vmem>>, vector<8x256xf32>,
    return
  }
  func.func @transform_0(%arg0: i32, %arg1: i32) -> (i32, i32) {
    %c0_i32 = arith.constant 0 : i32
    %c0_i32_0 = arith.constant 0 : i32
    return %arg0, %c0_i32 : i32, i32
  }
  func.func @transform_1(%arg0: i32, %arg1: i32) -> (i32, i32) {
    %c0_i32 = arith.constant 0 : i32
    %c0_i32_0 = arith.constant 0 : i32
    return %c0_i32, %arg1 : i32, i32
  }
  func.func @transform_2(%arg0: i32, %arg1: i32) -> (i32, i32) {
    %c0_i32 = arith.constant 0 : i32
    %c0_i32_0 = arith.constant 0 : i32
    return %c0_i32, %arg1 : i32, i32
  }
  func.func @transform_3(%arg0: i32, %arg1: i32) -> (i32, i32) {
    %c0_i32 = arith.constant 0 : i32
    return %arg0, %arg1 : i32, i32
  }
}

module attributes {stable_mosaic.version = 11 : i64} {
  func.func @_matmul_bias_kernel(%arg0: i32, %arg1: i32, %arg2: memref<8x1152xbf16, #tpu.memory_space<vmem>>, %arg3: memref<1152x128xbf16, #tpu.memory_space<vmem>>, %arg4: memref<1x128xf32, #tpu.memory_space<vmem>>, %arg5: memref<8x128xf32, #tpu.memory_space<vmem>>) attributes {dimension_semantics = [#tpu.dimension_semantics<parallel>, #tpu.dimension_semantics<parallel>], iteration_bounds = array<i64: 1, 1>, scalar_prefetch = 0 : i64, scratch_operands = 0 : i64, tpu.core_type = #tpu.core_type<tc>, window_params = [{transform_indices = @transform_0, window_bounds = array<i64: 8, 1152>}, {transform_indices = @transform_1, window_bounds = array<i64: 1152, 128>}, {transform_indices = @transform_2, window_bounds = array<i64: 1, 128>}, {transform_indices = @transform_3, window_bounds = array<i64: 8, 128>}]} {
    %c0 = arith.constant 0 : index
    %c0_0 = arith.constant 0 : index
    %0 = vector.load %arg2[%c0, %c0_0] : memref<8x1152xbf16, #tpu.memory_space<vmem>>, vector<8x1152xbf16>
    %c0_1 = arith.constant 0 : index
    %c0_2 = arith.constant 0 : index
    %1 = vector.load %arg3[%c0_1, %c0_2] : memref<1152x128xbf16, #tpu.memory_space<vmem>>, vector<1152x128xbf16>
    %cst = arith.constant dense<0.000000e+00> : vector<8x128xf32>
    %2 = tpu.matmul %0, %1, %cst {dimension_numbers = #tpu.dot_dimension_numbers<[1], [0], [0], [1], [0, 0, 1, 1], [], []>} : vector<8x1152xbf16>, vector<1152x128xbf16>, vector<8x128xf32> -> vector<8x128xf32>
    %c0_3 = arith.constant 0 : index
    %c0_4 = arith.constant 0 : index
    %3 = vector.load %arg4[%c0_3, %c0_4] : memref<1x128xf32, #tpu.memory_space<vmem>>, vector<1x128xf32>
    %4 = vector.broadcast %3 : vector<1x128xf32> to vector<8x128xf32>
    %5 = arith.addf %2, %4 : vector<8x128xf32>
    %cst_5 = arith.constant 0.000000e+00 : f32
    %6 = vector.broadcast %cst_5 : f32 to vector<8x128xf32>
    %7 = arith.maximumf %5, %6 : vector<8x128xf32>
    %c0_6 = arith.constant 0 : index
    %c0_7 = arith.constant 0 : index
    %8 = vector.load %arg5[%c0_6, %c0_7] : memref<8x128xf32, #tpu.memory_space<vmem>>, vector<8x128xf32>
    tpu.vector_store %arg5[%c0_6, %c0_7], %7 {strides = array<i32>} : memref<8x128xf32, #tpu.memory_space<vmem>>, vector<8x128xf32>,
    return
  }
  func.func @transform_0(%arg0: i32, %arg1: i32) -> (i32, i32) {
    %c0_i32 = arith.constant 0 : i32
    %c0_i32_0 = arith.constant 0 : i32
    return %arg0, %c0_i32 : i32, i32
  }
  func.func @transform_1(%arg0: i32, %arg1: i32) -> (i32, i32) {
    %c0_i32 = arith.constant 0 : i32
    %c0_i32_0 = arith.constant 0 : i32
    return %c0_i32, %arg1 : i32, i32
  }
  func.func @transform_2(%arg0: i32, %arg1: i32) -> (i32, i32) {
    %c0_i32 = arith.constant 0 : i32
    %c0_i32_0 = arith.constant 0 : i32
    return %c0_i32, %arg1 : i32, i32
  }
  func.func @transform_3(%arg0: i32, %arg1: i32) -> (i32, i32) {
    %c0_i32 = arith.constant 0 : i32
    return %arg0, %arg1 : i32, i32
  }
}

module attributes {stable_mosaic.version = 11 : i64} {
  func.func @_gap_kernel(%arg0: i32, %arg1: memref<1x4x512xf32, #tpu.memory_space<vmem>>, %arg2: memref<1x1x512xf32, #tpu.memory_space<vmem>>) attributes {dimension_semantics = [#tpu.dimension_semantics<parallel>], iteration_bounds = array<i64: 2>, scalar_prefetch = 0 : i64, scratch_operands = 0 : i64, tpu.core_type = #tpu.core_type<tc>, window_params = [{transform_indices = @transform_0, window_bounds = array<i64: 1, 4, 512>}, {transform_indices = @transform_1, window_bounds = array<i64: 1, 1, 512>}]} {
    %c0 = arith.constant 0 : index
    %c0_0 = arith.constant 0 : index
    %c0_1 = arith.constant 0 : index
    %0 = vector.load %arg1[%c0, %c0_0, %c0_1] : memref<1x4x512xf32, #tpu.memory_space<vmem>>, vector<1x4x512xf32>
    %cst = arith.constant dense<0.000000e+00> : vector<1x512xf32>
    %1 = vector.multi_reduction <add>, %0, %cst [1] : vector<1x4x512xf32> to vector<1x512xf32>
    %2 = vector.shape_cast %1 : vector<1x512xf32> to vector<1x1x512xf32>
    %cst_2 = arith.constant 4.000000e+00 : f32
    %3 = vector.broadcast %cst_2 : f32 to vector<1x1x512xf32>
    %4 = arith.divf %2, %3 : vector<1x1x512xf32>
    %c0_3 = arith.constant 0 : index
    %c0_4 = arith.constant 0 : index
    %c0_5 = arith.constant 0 : index
    %5 = vector.load %arg2[%c0_3, %c0_4, %c0_5] : memref<1x1x512xf32, #tpu.memory_space<vmem>>, vector<1x1x512xf32>
    tpu.vector_store %arg2[%c0_3, %c0_4, %c0_5], %4 {strides = array<i32>} : memref<1x1x512xf32, #tpu.memory_space<vmem>>, vector<1x1x512xf32>,
    return
  }
  func.func @transform_0(%arg0: i32) -> (i32, i32, i32) {
    %c0_i32 = arith.constant 0 : i32
    %c0_i32_0 = arith.constant 0 : i32
    %c0_i32_1 = arith.constant 0 : i32
    return %arg0, %c0_i32, %c0_i32_0 : i32, i32, i32
  }
  func.func @transform_1(%arg0: i32) -> (i32, i32, i32) {
    %c0_i32 = arith.constant 0 : i32
    %c0_i32_0 = arith.constant 0 : i32
    %c0_i32_1 = arith.constant 0 : i32
    return %arg0, %c0_i32, %c0_i32_0 : i32, i32, i32
  }
}

module attributes {stable_mosaic.version = 11 : i64} {
  func.func @_matmul_bias_res_relu_kernel(%arg0: i32, %arg1: i32, %arg2: memref<8x128xbf16, #tpu.memory_space<vmem>>, %arg3: memref<128x256xbf16, #tpu.memory_space<vmem>>, %arg4: memref<1x256xf32, #tpu.memory_space<vmem>>, %arg5: memref<8x256xf32, #tpu.memory_space<vmem>>, %arg6: memref<8x256xf32, #tpu.memory_space<vmem>>) attributes {dimension_semantics = [#tpu.dimension_semantics<parallel>, #tpu.dimension_semantics<parallel>], iteration_bounds = array<i64: 1, 2>, scalar_prefetch = 0 : i64, scratch_operands = 0 : i64, tpu.core_type = #tpu.core_type<tc>, window_params = [{transform_indices = @transform_0, window_bounds = array<i64: 8, 128>}, {transform_indices = @transform_1, window_bounds = array<i64: 128, 256>}, {transform_indices = @transform_2, window_bounds = array<i64: 1, 256>}, {transform_indices = @transform_3, window_bounds = array<i64: 8, 256>}, {transform_indices = @transform_4, window_bounds = array<i64: 8, 256>}]} {
    %c0 = arith.constant 0 : index
    %c0_0 = arith.constant 0 : index
    %0 = vector.load %arg2[%c0, %c0_0] : memref<8x128xbf16, #tpu.memory_space<vmem>>, vector<8x128xbf16>
    %c0_1 = arith.constant 0 : index
    %c0_2 = arith.constant 0 : index
    %1 = vector.load %arg3[%c0_1, %c0_2] : memref<128x256xbf16, #tpu.memory_space<vmem>>, vector<128x256xbf16>
    %cst = arith.constant dense<0.000000e+00> : vector<8x256xf32>
    %2 = tpu.matmul %0, %1, %cst {dimension_numbers = #tpu.dot_dimension_numbers<[1], [0], [0], [1], [0, 0, 1, 1], [], []>} : vector<8x128xbf16>, vector<128x256xbf16>, vector<8x256xf32> -> vector<8x256xf32>
    %c0_3 = arith.constant 0 : index
    %c0_4 = arith.constant 0 : index
    %3 = vector.load %arg4[%c0_3, %c0_4] : memref<1x256xf32, #tpu.memory_space<vmem>>, vector<1x256xf32>
    %4 = vector.broadcast %3 : vector<1x256xf32> to vector<8x256xf32>
    %5 = arith.addf %2, %4 : vector<8x256xf32>
    %c0_5 = arith.constant 0 : index
    %c0_6 = arith.constant 0 : index
    %6 = vector.load %arg5[%c0_5, %c0_6] : memref<8x256xf32, #tpu.memory_space<vmem>>, vector<8x256xf32>
    %7 = arith.addf %5, %6 : vector<8x256xf32>
    %cst_7 = arith.constant 0.000000e+00 : f32
    %8 = vector.broadcast %cst_7 : f32 to vector<8x256xf32>
    %9 = arith.maximumf %7, %8 : vector<8x256xf32>
    %c0_8 = arith.constant 0 : index
    %c0_9 = arith.constant 0 : index
    %10 = vector.load %arg6[%c0_8, %c0_9] : memref<8x256xf32, #tpu.memory_space<vmem>>, vector<8x256xf32>
    tpu.vector_store %arg6[%c0_8, %c0_9], %9 {strides = array<i32>} : memref<8x256xf32, #tpu.memory_space<vmem>>, vector<8x256xf32>,
    return
  }
  func.func @transform_0(%arg0: i32, %arg1: i32) -> (i32, i32) {
    %c0_i32 = arith.constant 0 : i32
    %c0_i32_0 = arith.constant 0 : i32
    return %arg0, %c0_i32 : i32, i32
  }
  func.func @transform_1(%arg0: i32, %arg1: i32) -> (i32, i32) {
    %c0_i32 = arith.constant 0 : i32
    %c0_i32_0 = arith.constant 0 : i32
    return %c0_i32, %arg1 : i32, i32
  }
  func.func @transform_2(%arg0: i32, %arg1: i32) -> (i32, i32) {
    %c0_i32 = arith.constant 0 : i32
    %c0_i32_0 = arith.constant 0 : i32
    return %c0_i32, %arg1 : i32, i32
  }
  func.func @transform_3(%arg0: i32, %arg1: i32) -> (i32, i32) {
    %c0_i32 = arith.constant 0 : i32
    return %arg0, %arg1 : i32, i32
  }
  func.func @transform_4(%arg0: i32, %arg1: i32) -> (i32, i32) {
    %c0_i32 = arith.constant 0 : i32
    return %arg0, %arg1 : i32, i32
  }
}

</mosaic_0001>

<bundles_post_ra>
// kernel: _lambda_.18
= control target key start
LH: loop header
LB: loop body
LE: loop exit
PB: predicated region body
PF: predicated region fallthrough
CT: control target
= control target key end

     0   :  { %s1577_s12 = smov 0   ;;  %s1579_s13 = smov 0   ;;  %s1898_s0 = inlined_call_operand.vmem [shape: bf16[2048,256], index: 0, kind: input, shape index: {}]   ;;  %s1899_s1 = inlined_call_operand.vmem [shape: bf16[256,128], index: 1, kind: input, shape index: {}]   ;;  %s1900_s2 = inlined_call_operand.vmem [shape: f32[1,128], index: 2, kind: input, shape index: {}]   ;;  %s1901_s3 = inlined_call_operand.vmem [shape: f32[2048,128], index: 3, kind: output, shape index: {}]  }
   0x1   :  { %s1581_s14 = smov 0  }
   0x2 LB: > { %s25_s15 = sadd.s32 1, %s1550_s13  ;;  %p1273_p0 = scmp.ge.s32.totalorder %s1554_s14, 1  ;;  %s1554_s14 = sphi %s1581_s14, %s13_s14   ;;  %s1550_s13 = sphi %s1579_s13, %s1903_s13   ;;  %s1546_s12 = sphi %s1577_s12, %s1902_s12  }
   0x3   : > { %p27_p1 = scmp.ge.s32.totalorder %s25_s15, 4  ;;  %p170_p2 = scmp.lt.s32.totalorder %s1554_s14, 5 }
   0x5   : > { %s1905_s15 = smov (%p27_p1, %s25_s15), 0  ;;  %p171_p3 = pnand %p1273_p0, %p170_p2 }
   0x6   : > { %s1274_s18 = sshll.u32 (!%p171_p3), %s1546_s12, 6 }
   0x7   : > { %174 = sbr.rel (%p171_p3) target bundleno = 399 (0x18f), region = 32  ;;  %p206_p4 = scmp.lt.s32.totalorder (!%p171_p3), %s1274_s18, 255 }
   0xc   : > { %v1420_v0 = vld [vmem:[%s1899_s1 + $0x38] sm:$0xff]   ;;  %v1556_v1 = vmov 0   ;;  %v1421_v2 = vld [vmem:[%s1899_s1 + $0x30] sm:$0xff]   ;;  %v1422_v3 = vld [vmem:[%s1899_s1 + $0x28] sm:$0xff]   ;;  %s1907_s18 = smov (!%p206_p4, %s1274_s18), 255 }
   0xd   : > { %748 = vmatprep.subr.bf16.mxu0 %v1556_v1  ;;  %1363 = vmatprep.subr.bf16.mxu1 %v1556_v1  ;;  %v1423_v4 = vld [vmem:[%s1899_s1 + $0x20] sm:$0xff]   ;;  %s1362_s25 = sshll.u32 %s1907_s18, 3  ;;  %v1424_v5 = vld [vmem:[%s1899_s1 + $0x18] sm:$0xff]   ;;  %v1425_v7 = vld [vmem:[%s1899_s1 + $0x10] sm:$0xff]  }
   0xe   : > { %749 = vmatpush1.bf16.msra.mxu0 %v1420_v0  ;;  %1379 = vmatpush1.bf16.msra.mxu1 %v1420_v0  ;;  %s1626_s30 = scalar_lea.vmem %s1898_s0, %s1362_s25  ;;  %v1426_v9 = vld [vmem:[%s1899_s1 + $0x8] sm:$0xff]   ;;  %v1427_v10 = vld [vmem:[%s1899_s1] sm:$0xff]   ;;  %v1428_v11 = vld [vmem:[%s1899_s1 + $0x78] sm:$0xff]   ;;  %s1761_s9 = scalar_lea.vmem %s1901_s3, %s1362_s25 }
   0xf   : > { %750 = vmatprep.subr.bf16.mxu0 %v1556_v1  ;;  %1364 = vmatprep.subr.bf16.mxu1 %v1556_v1  ;;  %v1438_v6 = vld [vmem:[%s1626_s30 + $0x4] ss:$8 sps:$4 sm:$0xff]   ;;  %v1429_v12 = vld [vmem:[%s1899_s1 + $0x70] sm:$0xff]   ;;  %v1432_v15 = vld [vmem:[%s1899_s1 + $0x58] sm:$0xff]  }
  0x10   : > { %v1441_v8 = vld [vmem:[%s1626_s30 + $0x104] ss:$8 sps:$4 sm:$0xff]   ;;  %780 = vmatprep.mubr.bf16.mxu0 %v1438_v6  ;;  %v1433_v16 = vld [vmem:[%s1899_s1 + $0x50] sm:$0xff]   ;;  %v1436_v19 = vld [vmem:[%s1626_s30] ss:$8 sps:$4 sm:$0xff]  }
  0x11   : > { %908 = vmatprep.mubr.bf16.mxu1 %v1441_v8  ;;  %v1430_v13 = vld [vmem:[%s1899_s1 + $0x68] sm:$0xff]   ;;  %v1431_v14 = vld [vmem:[%s1899_s1 + $0x60] sm:$0xff]   ;;  %v1442_v21 = vld [vmem:[%s1626_s30 + $0x14] ss:$8 sps:$4 sm:$0xff]  }
  0x12   : > { %751 = vmatpush1.bf16.msra.mxu0 %v1421_v2  ;;  %1380 = vmatpush1.bf16.msra.mxu1 %v1421_v2  ;;  %v1434_v17 = vld [vmem:[%s1899_s1 + $0x48] sm:$0xff]   ;;  %v1435_v18 = vld [vmem:[%s1899_s1 + $0x40] sm:$0xff]   ;;  %v1444_v22 = vld [vmem:[%s1626_s30 + $0x114] ss:$8 sps:$4 sm:$0xff]  }
  0x13   : > { %752 = vmatprep.subr.bf16.mxu0 %v1556_v1  ;;  %1365 = vmatprep.subr.bf16.mxu1 %v1556_v1  ;;  %v1439_v20 = vld [vmem:[%s1626_s30 + $0x100] ss:$8 sps:$4 sm:$0xff]   ;;  %v1446_v23 = vld [vmem:[%s1626_s30 + $0x10] ss:$8 sps:$4 sm:$0xff]   ;;  %v1448_v25 = vld [vmem:[%s1626_s30 + $0x24] ss:$8 sps:$4 sm:$0xff]  }
  0x14   : > { %v1447_v24 = vld [vmem:[%s1626_s30 + $0x110] ss:$8 sps:$4 sm:$0xff]   ;;  %v1450_v26 = vld [vmem:[%s1626_s30 + $0x124] ss:$8 sps:$4 sm:$0xff]   ;;  %v1452_v27 = vld [vmem:[%s1626_s30 + $0x20] ss:$8 sps:$4 sm:$0xff]  }
  0x15   : > { %v1453_v28 = vld [vmem:[%s1626_s30 + $0x120] ss:$8 sps:$4 sm:$0xff]   ;;  %v1454_v29 = vld [vmem:[%s1626_s30 + $0x34] ss:$8 sps:$4 sm:$0xff]   ;;  %v1458_v31 = vld [vmem:[%s1626_s30 + $0x30] ss:$8 sps:$4 sm:$0xff]  }
  0x16   : > { %753 = vmatpush1.bf16.msra.mxu0 %v1422_v3  ;;  %1381 = vmatpush1.bf16.msra.mxu1 %v1422_v3  ;;  %v1456_v30 = vld [vmem:[%s1626_s30 + $0x134] ss:$8 sps:$4 sm:$0xff]   ;;  %v1459_v32 = vld [vmem:[%s1626_s30 + $0x130] ss:$8 sps:$4 sm:$0xff]   ;;  %v1460_v33 = vld [vmem:[%s1626_s30 + $0x44] ss:$8 sps:$4 sm:$0xff]  }
  0x17   : > { %754 = vmatprep.subr.bf16.mxu0 %v1556_v1  ;;  %1366 = vmatprep.subr.bf16.mxu1 %v1556_v1  ;;  %v1462_v34 = vld [vmem:[%s1626_s30 + $0x144] ss:$8 sps:$4 sm:$0xff]   ;;  %v1464_v35 = vld [vmem:[%s1626_s30 + $0x40] ss:$8 sps:$4 sm:$0xff]   ;;  %v1466_v37 = vld [vmem:[%s1626_s30 + $0x54] ss:$8 sps:$4 sm:$0xff]  }
  0x18   : > { %v1465_v36 = vld [vmem:[%s1626_s30 + $0x140] ss:$8 sps:$4 sm:$0xff]   ;;  %v1468_v38 = vld [vmem:[%s1626_s30 + $0x154] ss:$8 sps:$4 sm:$0xff]   ;;  %v1470_v39 = vld [vmem:[%s1626_s30 + $0x50] ss:$8 sps:$4 sm:$0xff]  }
  0x19   : > { %v1471_v40 = vld [vmem:[%s1626_s30 + $0x150] ss:$8 sps:$4 sm:$0xff]   ;;  %v1472_v41 = vld [vmem:[%s1626_s30 + $0x64] ss:$8 sps:$4 sm:$0xff]   ;;  %v1476_v43 = vld [vmem:[%s1626_s30 + $0x60] ss:$8 sps:$4 sm:$0xff]  }
  0x1a   : > { %755 = vmatpush1.bf16.msra.mxu0 %v1423_v4  ;;  %1382 = vmatpush1.bf16.msra.mxu1 %v1423_v4  ;;  %v1474_v42 = vld [vmem:[%s1626_s30 + $0x164] ss:$8 sps:$4 sm:$0xff]   ;;  %v1477_v44 = vld [vmem:[%s1626_s30 + $0x160] ss:$8 sps:$4 sm:$0xff]   ;;  %v1478_v45 = vld [vmem:[%s1626_s30 + $0x74] ss:$8 sps:$4 sm:$0xff]  }
  0x1b   : > { %756 = vmatprep.subr.bf16.mxu0 %v1556_v1  ;;  %1367 = vmatprep.subr.bf16.mxu1 %v1556_v1  ;;  %v1480_v46 = vld [vmem:[%s1626_s30 + $0x174] ss:$8 sps:$4 sm:$0xff]   ;;  %v1482_v47 = vld [vmem:[%s1626_s30 + $0x70] ss:$8 sps:$4 sm:$0xff]   ;;  %v1484_v49 = vld [vmem:[%s1626_s30 + $0x84] ss:$8 sps:$4 sm:$0xff]  }
  0x1c   : > { %v1483_v48 = vld [vmem:[%s1626_s30 + $0x170] ss:$8 sps:$4 sm:$0xff]   ;;  %v1486_v50 = vld [vmem:[%s1626_s30 + $0x184] ss:$8 sps:$4 sm:$0xff]   ;;  %v1488_v51 = vld [vmem:[%s1626_s30 + $0x80] ss:$8 sps:$4 sm:$0xff]  }
  0x1d   : > { %v1489_v52 = vld [vmem:[%s1626_s30 + $0x180] ss:$8 sps:$4 sm:$0xff]   ;;  %v1490_v53 = vld [vmem:[%s1626_s30 + $0x94] ss:$8 sps:$4 sm:$0xff]   ;;  %v1494_v55 = vld [vmem:[%s1626_s30 + $0x90] ss:$8 sps:$4 sm:$0xff]  }
  0x1e   : > { %757 = vmatpush1.bf16.msra.mxu0 %v1424_v5  ;;  %1383 = vmatpush1.bf16.msra.mxu1 %v1424_v5  ;;  %v1492_v54 = vld [vmem:[%s1626_s30 + $0x194] ss:$8 sps:$4 sm:$0xff]   ;;  %v1495_v56 = vld [vmem:[%s1626_s30 + $0x190] ss:$8 sps:$4 sm:$0xff]   ;;  %v1496_v57 = vld [vmem:[%s1626_s30 + $0xa4] ss:$8 sps:$4 sm:$0xff]  }
  0x1f   : > { %758 = vmatprep.subr.bf16.mxu0 %v1556_v1  ;;  %1368 = vmatprep.subr.bf16.mxu1 %v1556_v1  ;;  %v1498_v58 = vld [vmem:[%s1626_s30 + $0x1a4] ss:$8 sps:$4 sm:$0xff]   ;;  %v1500_v59 = vld [vmem:[%s1626_s30 + $0xa0] ss:$8 sps:$4 sm:$0xff]   ;;  %v1502_v61 = vld [vmem:[%s1626_s30 + $0xb4] ss:$8 sps:$4 sm:$0xff]  }
  0x20   : > { %v1501_v60 = vld [vmem:[%s1626_s30 + $0x1a0] ss:$8 sps:$4 sm:$0xff]   ;;  %v1504_v62 = vld [vmem:[%s1626_s30 + $0x1b4] ss:$8 sps:$4 sm:$0xff]   ;;  %v1506_v63 = vld [vmem:[%s1626_s30 + $0xb0] ss:$8 sps:$4 sm:$0xff]  }
  0x21   : > { %v1507_v0 = vld [vmem:[%s1626_s30 + $0x1b0] ss:$8 sps:$4 sm:$0xff]   ;;  %v1510_v2 = vld [vmem:[%s1626_s30 + $0x1c4] ss:$8 sps:$4 sm:$0xff]   ;;  %v1512_v3 = vld [vmem:[%s1626_s30 + $0xc0] ss:$8 sps:$4 sm:$0xff]  }
  0x22   : > { %759 = vmatpush1.bf16.msra.mxu0 %v1425_v7  ;;  %1384 = vmatpush1.bf16.msra.mxu1 %v1425_v7  ;;  %v1513_v4 = vld [vmem:[%s1626_s30 + $0x1c0] ss:$8 sps:$4 sm:$0xff]   ;;  %v1514_v5 = vld [vmem:[%s1626_s30 + $0xd4] ss:$8 sps:$4 sm:$0xff]   ;;  %v1518_v7 = vld [vmem:[%s1626_s30 + $0xd0] ss:$8 sps:$4 sm:$0xff]  }
  0x23   : > { %760 = vmatprep.subr.bf16.mxu0 %v1556_v1  ;;  %1369 = vmatprep.subr.bf16.mxu1 %v1556_v1  ;;  %v1516_v6 = vld [vmem:[%s1626_s30 + $0x1d4] ss:$8 sps:$4 sm:$0xff]   ;;  %v1519_v8 = vld [vmem:[%s1626_s30 + $0x1d0] ss:$8 sps:$4 sm:$0xff]  }
  0x26   : > { %761 = vmatpush1.bf16.msra.mxu0 %v1426_v9  ;;  %1385 = vmatpush1.bf16.msra.mxu1 %v1426_v9  ;;  %v1520_v9 = vld [vmem:[%s1626_s30 + $0xe4] ss:$8 sps:$4 sm:$0xff]  }
  0x27   : > { %762 = vmatprep.subr.bf16.mxu0 %v1556_v1  ;;  %1370 = vmatprep.subr.bf16.mxu1 %v1556_v1 }
  0x2a   : > { %763 = vmatpush1.bf16.msra.mxu0 %v1427_v10  ;;  %1386 = vmatpush1.bf16.msra.mxu1 %v1427_v10  ;;  %v1522_v10 = vld [vmem:[%s1626_s30 + $0x1e4] ss:$8 sps:$4 sm:$0xff]  }
  0x2b   : > { %764 = vmatprep.subr.bf16.mxu0 %v1556_v1  ;;  %1371 = vmatprep.subr.bf16.mxu1 %v1556_v1 }
  0x2e   : > { %765 = vmatpush2.bf16.msra.mxu0 %v1428_v11  ;;  %1387 = vmatpush2.bf16.msra.mxu1 %v1428_v11  ;;  %v1524_v11 = vld [vmem:[%s1626_s30 + $0xe0] ss:$8 sps:$4 sm:$0xff]  }
  0x2f   : > { %766 = vmatprep.subr.bf16.mxu0 %v1556_v1  ;;  %1372 = vmatprep.subr.bf16.mxu1 %v1556_v1 }
  0x32   : > { %767 = vmatpush2.bf16.msra.mxu0 %v1429_v12  ;;  %1388 = vmatpush2.bf16.msra.mxu1 %v1429_v12  ;;  %v1525_v12 = vld [vmem:[%s1626_s30 + $0x1e0] ss:$8 sps:$4 sm:$0xff]  }
  0x33   : > { %768 = vmatprep.subr.bf16.mxu0 %v1556_v1  ;;  %1373 = vmatprep.subr.bf16.mxu1 %v1556_v1 }
  0x36   : > { %769 = vmatpush2.bf16.msra.mxu0 %v1430_v13  ;;  %1389 = vmatpush2.bf16.msra.mxu1 %v1430_v13  ;;  %v1526_v13 = vld [vmem:[%s1626_s30 + $0xf4] ss:$8 sps:$4 sm:$0xff]  }
  0x37   : > { %770 = vmatprep.subr.bf16.mxu0 %v1556_v1  ;;  %1374 = vmatprep.subr.bf16.mxu1 %v1556_v1 }
  0x3a   : > { %771 = vmatpush2.bf16.msra.mxu0 %v1431_v14  ;;  %1390 = vmatpush2.bf16.msra.mxu1 %v1431_v14  ;;  %v1528_v14 = vld [vmem:[%s1626_s30 + $0x1f4] ss:$8 sps:$4 sm:$0xff]  }
  0x3b   : > { %772 = vmatprep.subr.bf16.mxu0 %v1556_v1  ;;  %1375 = vmatprep.subr.bf16.mxu1 %v1556_v1 }
  0x3e   : > { %773 = vmatpush2.bf16.msra.mxu0 %v1432_v15  ;;  %1391 = vmatpush2.bf16.msra.mxu1 %v1432_v15  ;;  %v1530_v15 = vld [vmem:[%s1626_s30 + $0xf0] ss:$8 sps:$4 sm:$0xff]  }
  0x3f   : > { %774 = vmatprep.subr.bf16.mxu0 %v1556_v1  ;;  %1376 = vmatprep.subr.bf16.mxu1 %v1556_v1 }
  0x42   : > { %775 = vmatpush2.bf16.msra.mxu0 %v1433_v16  ;;  %1392 = vmatpush2.bf16.msra.mxu1 %v1433_v16  ;;  %v1531_v16 = vld [vmem:[%s1626_s30 + $0x1f0] ss:$8 sps:$4 sm:$0xff]  }
  0x43   : > { %776 = vmatprep.subr.bf16.mxu0 %v1556_v1  ;;  %1377 = vmatprep.subr.bf16.mxu1 %v1556_v1 }
  0x46   : > { %777 = vmatpush2.bf16.msra.mxu0 %v1434_v17  ;;  %1393 = vmatpush2.bf16.msra.mxu1 %v1434_v17  ;;  %v1752_v17 = vld [vmem:[%s1900_s2] ss:$0 sm:$0xff] }
  0x47   : > { %778 = vmatprep.subr.bf16.mxu0 %v1556_v1  ;;  %1378 = vmatprep.subr.bf16.mxu1 %v1556_v1  ;;  %v1508_v1 = vld [vmem:[%s1626_s30 + $0xc4] ss:$8 sps:$4 sm:$0xff]  }
  0x4a   : > { %779 = vmatpush2.bf16.msra.mxu0 %v1435_v18  ;;  %1394 = vmatpush2.bf16.msra.mxu1 %v1435_v18 }
  0x4d   : > { %781 = vmatmul.mubr.bf16.vlgmr.msra.gmra.mxu0 %v1436_v19  ;;  %909 = vmatmul.mubr.bf16.vlgmr.msra.gmra.mxu1 %v1439_v20 }
  0x4e   : > { %788 = vmatprep.mubr.bf16.mxu0 %v1442_v21  ;;  %916 = vmatprep.mubr.bf16.mxu1 %v1444_v22 }
  0x55   : > { %789 = vmatmul.mubr.bf16.gmra.mxu0 %v1446_v23  ;;  %917 = vmatmul.mubr.bf16.gmra.mxu1 %v1447_v24 }
  0x56   : > { %796 = vmatprep.mubr.bf16.mxu0 %v1448_v25  ;;  %924 = vmatprep.mubr.bf16.mxu1 %v1450_v26 }
  0x5d   : > { %797 = vmatmul.mubr.bf16.gmra.mxu0 %v1452_v27  ;;  %925 = vmatmul.mubr.bf16.gmra.mxu1 %v1453_v28 }
  0x5e   : > { %804 = vmatprep.mubr.bf16.mxu0 %v1454_v29  ;;  %932 = vmatprep.mubr.bf16.mxu1 %v1456_v30 }
  0x65   : > { %805 = vmatmul.mubr.bf16.gmra.mxu0 %v1458_v31  ;;  %933 = vmatmul.mubr.bf16.gmra.mxu1 %v1459_v32 }
  0x66   : > { %812 = vmatprep.mubr.bf16.mxu0 %v1460_v33  ;;  %940 = vmatprep.mubr.bf16.mxu1 %v1462_v34 }
  0x6d   : > { %813 = vmatmul.mubr.bf16.gmra.mxu0 %v1464_v35  ;;  %941 = vmatmul.mubr.bf16.gmra.mxu1 %v1465_v36 }
  0x6e   : > { %820 = vmatprep.mubr.bf16.mxu0 %v1466_v37  ;;  %948 = vmatprep.mubr.bf16.mxu1 %v1468_v38 }
  0x75   : > { %821 = vmatmul.mubr.bf16.gmra.mxu0 %v1470_v39  ;;  %949 = vmatmul.mubr.bf16.gmra.mxu1 %v1471_v40 }
  0x76   : > { %828 = vmatprep.mubr.bf16.mxu0 %v1472_v41  ;;  %956 = vmatprep.mubr.bf16.mxu1 %v1474_v42 }
  0x7d   : > { %829 = vmatmul.mubr.bf16.gmra.mxu0 %v1476_v43  ;;  %957 = vmatmul.mubr.bf16.gmra.mxu1 %v1477_v44 }
  0x7e   : > { %836 = vmatprep.mubr.bf16.mxu0 %v1478_v45  ;;  %964 = vmatprep.mubr.bf16.mxu1 %v1480_v46 }
  0x85   : > { %837 = vmatmul.mubr.bf16.gmra.mxu0 %v1482_v47  ;;  %965 = vmatmul.mubr.bf16.gmra.mxu1 %v1483_v48 }
  0x86   : > { %844 = vmatprep.mubr.bf16.mxu0 %v1484_v49  ;;  %972 = vmatprep.mubr.bf16.mxu1 %v1486_v50 }
  0x8d   : > { %845 = vmatmul.mubr.bf16.gmra.mxu0 %v1488_v51  ;;  %973 = vmatmul.mubr.bf16.gmra.mxu1 %v1489_v52 }
  0x8e   : > { %852 = vmatprep.mubr.bf16.mxu0 %v1490_v53  ;;  %980 = vmatprep.mubr.bf16.mxu1 %v1492_v54 }
  0x95   : > { %853 = vmatmul.mubr.bf16.gmra.mxu0 %v1494_v55  ;;  %981 = vmatmul.mubr.bf16.gmra.mxu1 %v1495_v56 }
  0x96   : > { %860 = vmatprep.mubr.bf16.mxu0 %v1496_v57  ;;  %988 = vmatprep.mubr.bf16.mxu1 %v1498_v58 }
  0x9d   : > { %861 = vmatmul.mubr.bf16.gmra.mxu0 %v1500_v59  ;;  %989 = vmatmul.mubr.bf16.gmra.mxu1 %v1501_v60 }
  0x9e   : > { %868 = vmatprep.mubr.bf16.mxu0 %v1502_v61  ;;  %996 = vmatprep.mubr.bf16.mxu1 %v1504_v62 }
  0xa5   : > { %869 = vmatmul.mubr.bf16.gmra.mxu0 %v1506_v63  ;;  %997 = vmatmul.mubr.bf16.gmra.mxu1 %v1507_v0 }
  0xa6   : > { %876 = vmatprep.mubr.bf16.mxu0 %v1508_v1  ;;  %1004 = vmatprep.mubr.bf16.mxu1 %v1510_v2 }
  0xad   : > { %877 = vmatmul.mubr.bf16.gmra.mxu0 %v1512_v3  ;;  %1005 = vmatmul.mubr.bf16.gmra.mxu1 %v1513_v4 }
  0xae   : > { %884 = vmatprep.mubr.bf16.mxu0 %v1514_v5  ;;  %1012 = vmatprep.mubr.bf16.mxu1 %v1516_v6 }
  0xb5   : > { %885 = vmatmul.mubr.bf16.gmra.mxu0 %v1518_v7  ;;  %1013 = vmatmul.mubr.bf16.gmra.mxu1 %v1519_v8 }
  0xb6   : > { %892 = vmatprep.mubr.bf16.mxu0 %v1520_v9  ;;  %1020 = vmatprep.mubr.bf16.mxu1 %v1522_v10 }
  0xbd   : > { %893 = vmatmul.mubr.bf16.gmra.mxu0 %v1524_v11  ;;  %1021 = vmatmul.mubr.bf16.gmra.mxu1 %v1525_v12 }
  0xbe   : > { %900 = vmatprep.mubr.bf16.mxu0 %v1526_v13  ;;  %1028 = vmatprep.mubr.bf16.mxu1 %v1528_v14 }
  0xc5   : > { %901 = vmatmul.mubr.bf16.gmra.mxu0 %v1530_v15  ;;  %1029 = vmatmul.mubr.bf16.gmra.mxu1 %v1531_v16 }
 0x10d   : > { %v782_v18 = vpop.f32.mrf.mxu0  ;;  %v910_v19 = vpop.f32.mrf.mxu1 }
 0x10e   : > { %v783_v20 = vadd.f32 %v1752_v17, %v782_v18  ;;  %v911_v21 = vadd.f32 %v1752_v17, %v910_v19 }
 0x10f   : > { %v784_v22 = vpop.f32.mrf.mxu0  ;;  %v912_v23 = vpop.f32.mrf.mxu1 }
 0x110   : > { %v1037_v24 = vmax.f32 %v783_v20, 0.0  ;;  %v1069_v25 = vmax.f32 %v911_v21, 0.0 }
 0x111   : > { %v785_v26 = vpop.f32.mrf.mxu0  ;;  %v913_v27 = vpop.f32.mrf.mxu1 }
 0x112   : > { %1101 = vst [vmem:[%s1761_s9] sm:$0xff] %v1037_v24  ;;  %1133 = vst [vmem:[%s1761_s9 + $0x100] sm:$0xff] %v1069_v25  ;;  %v786_v28 = vadd.f32 %v1752_v17, %v785_v26  ;;  %v914_v29 = vadd.f32 %v1752_v17, %v913_v27 }
 0x113   : > { %v787_v30 = vpop.f32.mrf.mxu0  ;;  %v915_v31 = vpop.f32.mrf.mxu1 }
 0x114   : > { %v1038_v32 = vmax.f32 %v786_v28, 0.0  ;;  %v1070_v33 = vmax.f32 %v914_v29, 0.0 }
 0x115   : > { %v790_v34 = vpop.f32.mrf.mxu0  ;;  %v918_v35 = vpop.f32.mrf.mxu1 }
 0x116   : > { %1102 = vst [vmem:[%s1761_s9 + $0x8] sm:$0xff] %v1038_v32  ;;  %1134 = vst [vmem:[%s1761_s9 + $0x108] sm:$0xff] %v1070_v33  ;;  %v791_v36 = vadd.f32 %v1752_v17, %v790_v34  ;;  %v919_v37 = vadd.f32 %v1752_v17, %v918_v35 }
 0x117   : > { %v792_v38 = vpop.f32.mrf.mxu0  ;;  %v920_v39 = vpop.f32.mrf.mxu1 }
 0x118   : > { %v1039_v40 = vmax.f32 %v791_v36, 0.0  ;;  %v1071_v41 = vmax.f32 %v919_v37, 0.0 }
 0x119   : > { %v793_v42 = vpop.f32.mrf.mxu0  ;;  %v921_v43 = vpop.f32.mrf.mxu1 }
 0x11a   : > { %1103 = vst [vmem:[%s1761_s9 + $0x10] sm:$0xff] %v1039_v40  ;;  %1135 = vst [vmem:[%s1761_s9 + $0x110] sm:$0xff] %v1071_v41  ;;  %v794_v44 = vadd.f32 %v1752_v17, %v793_v42  ;;  %v922_v45 = vadd.f32 %v1752_v17, %v921_v43 }
 0x11b   : > { %v795_v46 = vpop.f32.mrf.mxu0  ;;  %v923_v47 = vpop.f32.mrf.mxu1 }
 0x11c   : > { %v1040_v48 = vmax.f32 %v794_v44, 0.0  ;;  %v1072_v49 = vmax.f32 %v922_v45, 0.0 }
 0x11d   : > { %v798_v50 = vpop.f32.mrf.mxu0  ;;  %v926_v51 = vpop.f32.mrf.mxu1 }
 0x11e   : > { %1104 = vst [vmem:[%s1761_s9 + $0x18] sm:$0xff] %v1040_v48  ;;  %1136 = vst [vmem:[%s1761_s9 + $0x118] sm:$0xff] %v1072_v49  ;;  %v799_v52 = vadd.f32 %v1752_v17, %v798_v50  ;;  %v927_v53 = vadd.f32 %v1752_v17, %v926_v51 }
 0x11f   : > { %v800_v54 = vpop.f32.mrf.mxu0  ;;  %v928_v55 = vpop.f32.mrf.mxu1 }
 0x120   : > { %v1041_v56 = vmax.f32 %v799_v52, 0.0  ;;  %v1073_v57 = vmax.f32 %v927_v53, 0.0 }
 0x121   : > { %v801_v58 = vpop.f32.mrf.mxu0  ;;  %v929_v59 = vpop.f32.mrf.mxu1 }
 0x122   : > { %1105 = vst [vmem:[%s1761_s9 + $0x20] sm:$0xff] %v1041_v56  ;;  %1137 = vst [vmem:[%s1761_s9 + $0x120] sm:$0xff] %v1073_v57  ;;  %v802_v60 = vadd.f32 %v1752_v17, %v801_v58  ;;  %v930_v61 = vadd.f32 %v1752_v17, %v929_v59 }
 0x123   : > { %v803_v62 = vpop.f32.mrf.mxu0  ;;  %v931_v63 = vpop.f32.mrf.mxu1 }
 0x124   : > { %v1042_v0 = vmax.f32 %v802_v60, 0.0  ;;  %v1074_v1 = vmax.f32 %v930_v61, 0.0 }
 0x125   : > { %v806_v2 = vpop.f32.mrf.mxu0  ;;  %v934_v3 = vpop.f32.mrf.mxu1 }
 0x126   : > { %1106 = vst [vmem:[%s1761_s9 + $0x28] sm:$0xff] %v1042_v0  ;;  %1138 = vst [vmem:[%s1761_s9 + $0x128] sm:$0xff] %v1074_v1  ;;  %v807_v4 = vadd.f32 %v1752_v17, %v806_v2  ;;  %v935_v5 = vadd.f32 %v1752_v17, %v934_v3 }
 0x127   : > { %v808_v6 = vpop.f32.mrf.mxu0  ;;  %v936_v7 = vpop.f32.mrf.mxu1 }
 0x128   : > { %v1043_v8 = vmax.f32 %v807_v4, 0.0  ;;  %v1075_v9 = vmax.f32 %v935_v5, 0.0 }
 0x129   : > { %v809_v10 = vpop.f32.mrf.mxu0  ;;  %v937_v11 = vpop.f32.mrf.mxu1 }
 0x12a   : > { %1107 = vst [vmem:[%s1761_s9 + $0x30] sm:$0xff] %v1043_v8  ;;  %1139 = vst [vmem:[%s1761_s9 + $0x130] sm:$0xff] %v1075_v9  ;;  %v810_v12 = vadd.f32 %v1752_v17, %v809_v10  ;;  %v938_v13 = vadd.f32 %v1752_v17, %v937_v11 }
 0x12b   : > { %v811_v14 = vpop.f32.mrf.mxu0  ;;  %v939_v15 = vpop.f32.mrf.mxu1 }
 0x12c   : > { %v1044_v16 = vmax.f32 %v810_v12, 0.0  ;;  %v1076_v18 = vmax.f32 %v938_v13, 0.0 }
 0x12d   : > { %v814_v19 = vpop.f32.mrf.mxu0  ;;  %v942_v20 = vpop.f32.mrf.mxu1 }
 0x12e   : > { %1108 = vst [vmem:[%s1761_s9 + $0x38] sm:$0xff] %v1044_v16  ;;  %1140 = vst [vmem:[%s1761_s9 + $0x138] sm:$0xff] %v1076_v18  ;;  %v815_v21 = vadd.f32 %v1752_v17, %v814_v19  ;;  %v943_v22 = vadd.f32 %v1752_v17, %v942_v20 }
 0x12f   : > { %v816_v23 = vpop.f32.mrf.mxu0  ;;  %v944_v24 = vpop.f32.mrf.mxu1 }
 0x130   : > { %v1045_v25 = vmax.f32 %v815_v21, 0.0  ;;  %v1077_v26 = vmax.f32 %v943_v22, 0.0 }
 0x131   : > { %v817_v27 = vpop.f32.mrf.mxu0  ;;  %v945_v28 = vpop.f32.mrf.mxu1 }
 0x132   : > { %1109 = vst [vmem:[%s1761_s9 + $0x40] sm:$0xff] %v1045_v25  ;;  %1141 = vst [vmem:[%s1761_s9 + $0x140] sm:$0xff] %v1077_v26  ;;  %v818_v29 = vadd.f32 %v1752_v17, %v817_v27  ;;  %v946_v30 = vadd.f32 %v1752_v17, %v945_v28 }
 0x133   : > { %v819_v31 = vpop.f32.mrf.mxu0  ;;  %v947_v32 = vpop.f32.mrf.mxu1 }
 0x134   : > { %v1046_v33 = vmax.f32 %v818_v29, 0.0  ;;  %v1078_v34 = vmax.f32 %v946_v30, 0.0 }
 0x135   : > { %v822_v35 = vpop.f32.mrf.mxu0  ;;  %v950_v36 = vpop.f32.mrf.mxu1 }
 0x136   : > { %1110 = vst [vmem:[%s1761_s9 + $0x48] sm:$0xff] %v1046_v33  ;;  %1142 = vst [vmem:[%s1761_s9 + $0x148] sm:$0xff] %v1078_v34  ;;  %v823_v37 = vadd.f32 %v1752_v17, %v822_v35  ;;  %v951_v38 = vadd.f32 %v1752_v17, %v950_v36 }
 0x137   : > { %v824_v39 = vpop.f32.mrf.mxu0  ;;  %v952_v40 = vpop.f32.mrf.mxu1 }
 0x138   : > { %v1047_v41 = vmax.f32 %v823_v37, 0.0  ;;  %v1079_v42 = vmax.f32 %v951_v38, 0.0 }
 0x139   : > { %v825_v43 = vpop.f32.mrf.mxu0  ;;  %v953_v44 = vpop.f32.mrf.mxu1 }
 0x13a   : > { %1111 = vst [vmem:[%s1761_s9 + $0x50] sm:$0xff] %v1047_v41  ;;  %1143 = vst [vmem:[%s1761_s9 + $0x150] sm:$0xff] %v1079_v42  ;;  %v826_v45 = vadd.f32 %v1752_v17, %v825_v43  ;;  %v954_v46 = vadd.f32 %v1752_v17, %v953_v44 }
 0x13b   : > { %v827_v47 = vpop.f32.mrf.mxu0  ;;  %v955_v48 = vpop.f32.mrf.mxu1 }
 0x13c   : > { %v1048_v49 = vmax.f32 %v826_v45, 0.0  ;;  %v1080_v50 = vmax.f32 %v954_v46, 0.0 }
 0x13d   : > { %v830_v51 = vpop.f32.mrf.mxu0  ;;  %v958_v52 = vpop.f32.mrf.mxu1 }
 0x13e   : > { %1112 = vst [vmem:[%s1761_s9 + $0x58] sm:$0xff] %v1048_v49  ;;  %1144 = vst [vmem:[%s1761_s9 + $0x158] sm:$0xff] %v1080_v50  ;;  %v831_v53 = vadd.f32 %v1752_v17, %v830_v51  ;;  %v959_v54 = vadd.f32 %v1752_v17, %v958_v52 }
 0x13f   : > { %v832_v55 = vpop.f32.mrf.mxu0  ;;  %v960_v56 = vpop.f32.mrf.mxu1 }
 0x140   : > { %v1049_v57 = vmax.f32 %v831_v53, 0.0  ;;  %v1081_v58 = vmax.f32 %v959_v54, 0.0 }
 0x141   : > { %v833_v59 = vpop.f32.mrf.mxu0  ;;  %v961_v60 = vpop.f32.mrf.mxu1 }
 0x142   : > { %1113 = vst [vmem:[%s1761_s9 + $0x60] sm:$0xff] %v1049_v57  ;;  %1145 = vst [vmem:[%s1761_s9 + $0x160] sm:$0xff] %v1081_v58  ;;  %v834_v61 = vadd.f32 %v1752_v17, %v833_v59  ;;  %v962_v62 = vadd.f32 %v1752_v17, %v961_v60 }
 0x143   : > { %v835_v63 = vpop.f32.mrf.mxu0  ;;  %v963_v0 = vpop.f32.mrf.mxu1 }
 0x144   : > { %v1050_v1 = vmax.f32 %v834_v61, 0.0  ;;  %v1082_v2 = vmax.f32 %v962_v62, 0.0 }
 0x145   : > { %v838_v3 = vpop.f32.mrf.mxu0  ;;  %v966_v4 = vpop.f32.mrf.mxu1 }
 0x146   : > { %1114 = vst [vmem:[%s1761_s9 + $0x68] sm:$0xff] %v1050_v1  ;;  %1146 = vst [vmem:[%s1761_s9 + $0x168] sm:$0xff] %v1082_v2  ;;  %v839_v5 = vadd.f32 %v1752_v17, %v838_v3  ;;  %v967_v6 = vadd.f32 %v1752_v17, %v966_v4 }
 0x147   : > { %v840_v7 = vpop.f32.mrf.mxu0  ;;  %v968_v8 = vpop.f32.mrf.mxu1 }
 0x148   : > { %v1051_v9 = vmax.f32 %v839_v5, 0.0  ;;  %v1083_v10 = vmax.f32 %v967_v6, 0.0 }
 0x149   : > { %v841_v11 = vpop.f32.mrf.mxu0  ;;  %v969_v12 = vpop.f32.mrf.mxu1 }
 0x14a   : > { %1115 = vst [vmem:[%s1761_s9 + $0x70] sm:$0xff] %v1051_v9  ;;  %1147 = vst [vmem:[%s1761_s9 + $0x170] sm:$0xff] %v1083_v10  ;;  %v842_v13 = vadd.f32 %v1752_v17, %v841_v11  ;;  %v970_v14 = vadd.f32 %v1752_v17, %v969_v12 }
 0x14b   : > { %v843_v15 = vpop.f32.mrf.mxu0  ;;  %v971_v16 = vpop.f32.mrf.mxu1 }
 0x14c   : > { %v1052_v18 = vmax.f32 %v842_v13, 0.0  ;;  %v1084_v19 = vmax.f32 %v970_v14, 0.0 }
 0x14d   : > { %v846_v20 = vpop.f32.mrf.mxu0  ;;  %v974_v21 = vpop.f32.mrf.mxu1 }
 0x14e   : > { %1116 = vst [vmem:[%s1761_s9 + $0x78] sm:$0xff] %v1052_v18  ;;  %1148 = vst [vmem:[%s1761_s9 + $0x178] sm:$0xff] %v1084_v19  ;;  %v847_v22 = vadd.f32 %v1752_v17, %v846_v20  ;;  %v975_v23 = vadd.f32 %v1752_v17, %v974_v21 }
 0x14f   : > { %v848_v24 = vpop.f32.mrf.mxu0  ;;  %v976_v25 = vpop.f32.mrf.mxu1 }
 0x150   : > { %v1053_v26 = vmax.f32 %v847_v22, 0.0  ;;  %v1085_v27 = vmax.f32 %v975_v23, 0.0 }
 0x151   : > { %v849_v28 = vpop.f32.mrf.mxu0  ;;  %v977_v29 = vpop.f32.mrf.mxu1 }
 0x152   : > { %1117 = vst [vmem:[%s1761_s9 + $0x80] sm:$0xff] %v1053_v26  ;;  %1149 = vst [vmem:[%s1761_s9 + $0x180] sm:$0xff] %v1085_v27  ;;  %v850_v30 = vadd.f32 %v1752_v17, %v849_v28  ;;  %v978_v31 = vadd.f32 %v1752_v17, %v977_v29 }
 0x153   : > { %v851_v32 = vpop.f32.mrf.mxu0  ;;  %v979_v33 = vpop.f32.mrf.mxu1 }
 0x154   : > { %v1054_v34 = vmax.f32 %v850_v30, 0.0  ;;  %v1086_v35 = vmax.f32 %v978_v31, 0.0 }
 0x155   : > { %v854_v36 = vpop.f32.mrf.mxu0  ;;  %v982_v37 = vpop.f32.mrf.mxu1 }
 0x156   : > { %1118 = vst [vmem:[%s1761_s9 + $0x88] sm:$0xff] %v1054_v34  ;;  %1150 = vst [vmem:[%s1761_s9 + $0x188] sm:$0xff] %v1086_v35  ;;  %v855_v38 = vadd.f32 %v1752_v17, %v854_v36  ;;  %v983_v39 = vadd.f32 %v1752_v17, %v982_v37 }
 0x157   : > { %v856_v40 = vpop.f32.mrf.mxu0  ;;  %v984_v41 = vpop.f32.mrf.mxu1 }
 0x158   : > { %v1055_v42 = vmax.f32 %v855_v38, 0.0  ;;  %v1087_v43 = vmax.f32 %v983_v39, 0.0 }
 0x159   : > { %v857_v44 = vpop.f32.mrf.mxu0  ;;  %v985_v45 = vpop.f32.mrf.mxu1 }
 0x15a   : > { %1119 = vst [vmem:[%s1761_s9 + $0x90] sm:$0xff] %v1055_v42  ;;  %1151 = vst [vmem:[%s1761_s9 + $0x190] sm:$0xff] %v1087_v43  ;;  %v858_v46 = vadd.f32 %v1752_v17, %v857_v44  ;;  %v986_v47 = vadd.f32 %v1752_v17, %v985_v45 }
 0x15b   : > { %v859_v48 = vpop.f32.mrf.mxu0  ;;  %v987_v49 = vpop.f32.mrf.mxu1 }
 0x15c   : > { %v1056_v50 = vmax.f32 %v858_v46, 0.0  ;;  %v1088_v51 = vmax.f32 %v986_v47, 0.0 }
 0x15d   : > { %v862_v52 = vpop.f32.mrf.mxu0  ;;  %v990_v53 = vpop.f32.mrf.mxu1 }
 0x15e   : > { %1120 = vst [vmem:[%s1761_s9 + $0x98] sm:$0xff] %v1056_v50  ;;  %1152 = vst [vmem:[%s1761_s9 + $0x198] sm:$0xff] %v1088_v51  ;;  %v863_v54 = vadd.f32 %v1752_v17, %v862_v52  ;;  %v991_v55 = vadd.f32 %v1752_v17, %v990_v53 }
 0x15f   : > { %v864_v56 = vpop.f32.mrf.mxu0  ;;  %v992_v57 = vpop.f32.mrf.mxu1 }
 0x160   : > { %v1057_v58 = vmax.f32 %v863_v54, 0.0  ;;  %v1089_v59 = vmax.f32 %v991_v55, 0.0 }
 0x161   : > { %v865_v60 = vpop.f32.mrf.mxu0  ;;  %v993_v61 = vpop.f32.mrf.mxu1 }
 0x162   : > { %1121 = vst [vmem:[%s1761_s9 + $0xa0] sm:$0xff] %v1057_v58  ;;  %1153 = vst [vmem:[%s1761_s9 + $0x1a0] sm:$0xff] %v1089_v59  ;;  %v866_v62 = vadd.f32 %v1752_v17, %v865_v60  ;;  %v994_v63 = vadd.f32 %v1752_v17, %v993_v61 }
 0x163   : > { %v867_v0 = vpop.f32.mrf.mxu0  ;;  %v995_v1 = vpop.f32.mrf.mxu1 }
 0x164   : > { %v1058_v2 = vmax.f32 %v866_v62, 0.0  ;;  %v1090_v3 = vmax.f32 %v994_v63, 0.0 }
 0x165   : > { %v870_v4 = vpop.f32.mrf.mxu0  ;;  %v998_v5 = vpop.f32.mrf.mxu1 }
 0x166   : > { %1122 = vst [vmem:[%s1761_s9 + $0xa8] sm:$0xff] %v1058_v2  ;;  %1154 = vst [vmem:[%s1761_s9 + $0x1a8] sm:$0xff] %v1090_v3  ;;  %v871_v6 = vadd.f32 %v1752_v17, %v870_v4  ;;  %v999_v7 = vadd.f32 %v1752_v17, %v998_v5 }
 0x167   : > { %v872_v8 = vpop.f32.mrf.mxu0  ;;  %v1000_v9 = vpop.f32.mrf.mxu1 }
 0x168   : > { %v1059_v10 = vmax.f32 %v871_v6, 0.0  ;;  %v1091_v11 = vmax.f32 %v999_v7, 0.0 }
 0x169   : > { %v873_v12 = vpop.f32.mrf.mxu0  ;;  %v1001_v13 = vpop.f32.mrf.mxu1 }
 0x16a   : > { %1123 = vst [vmem:[%s1761_s9 + $0xb0] sm:$0xff] %v1059_v10  ;;  %1155 = vst [vmem:[%s1761_s9 + $0x1b0] sm:$0xff] %v1091_v11  ;;  %v874_v14 = vadd.f32 %v1752_v17, %v873_v12  ;;  %v1002_v15 = vadd.f32 %v1752_v17, %v1001_v13 }
 0x16b   : > { %v875_v16 = vpop.f32.mrf.mxu0  ;;  %v1003_v18 = vpop.f32.mrf.mxu1 }
 0x16c   : > { %v1060_v19 = vmax.f32 %v874_v14, 0.0  ;;  %v1092_v20 = vmax.f32 %v1002_v15, 0.0 }
 0x16d   : > { %v878_v21 = vpop.f32.mrf.mxu0  ;;  %v1006_v22 = vpop.f32.mrf.mxu1 }
 0x16e   : > { %1124 = vst [vmem:[%s1761_s9 + $0xb8] sm:$0xff] %v1060_v19  ;;  %1156 = vst [vmem:[%s1761_s9 + $0x1b8] sm:$0xff] %v1092_v20  ;;  %v879_v23 = vadd.f32 %v1752_v17, %v878_v21  ;;  %v1007_v24 = vadd.f32 %v1752_v17, %v1006_v22 }
 0x16f   : > { %v880_v25 = vpop.f32.mrf.mxu0  ;;  %v1008_v26 = vpop.f32.mrf.mxu1 }
 0x170   : > { %v1061_v27 = vmax.f32 %v879_v23, 0.0  ;;  %v1093_v28 = vmax.f32 %v1007_v24, 0.0 }
 0x171   : > { %v881_v29 = vpop.f32.mrf.mxu0  ;;  %v1009_v30 = vpop.f32.mrf.mxu1 }
 0x172   : > { %1125 = vst [vmem:[%s1761_s9 + $0xc0] sm:$0xff] %v1061_v27  ;;  %1157 = vst [vmem:[%s1761_s9 + $0x1c0] sm:$0xff] %v1093_v28  ;;  %v882_v31 = vadd.f32 %v1752_v17, %v881_v29  ;;  %v1010_v32 = vadd.f32 %v1752_v17, %v1009_v30 }
 0x173   : > { %v883_v33 = vpop.f32.mrf.mxu0  ;;  %v1011_v34 = vpop.f32.mrf.mxu1 }
 0x174   : > { %v1062_v35 = vmax.f32 %v882_v31, 0.0  ;;  %v1094_v36 = vmax.f32 %v1010_v32, 0.0 }
 0x175   : > { %v886_v37 = vpop.f32.mrf.mxu0  ;;  %v1014_v38 = vpop.f32.mrf.mxu1 }
 0x176   : > { %1126 = vst [vmem:[%s1761_s9 + $0xc8] sm:$0xff] %v1062_v35  ;;  %1158 = vst [vmem:[%s1761_s9 + $0x1c8] sm:$0xff] %v1094_v36  ;;  %v887_v39 = vadd.f32 %v1752_v17, %v886_v37  ;;  %v1015_v40 = vadd.f32 %v1752_v17, %v1014_v38 }
 0x177   : > { %v888_v41 = vpop.f32.mrf.mxu0  ;;  %v1016_v42 = vpop.f32.mrf.mxu1 }
 0x178   : > { %v1063_v43 = vmax.f32 %v887_v39, 0.0  ;;  %v1095_v44 = vmax.f32 %v1015_v40, 0.0 }
 0x179   : > { %v889_v45 = vpop.f32.mrf.mxu0  ;;  %v1017_v46 = vpop.f32.mrf.mxu1 }
 0x17a   : > { %1127 = vst [vmem:[%s1761_s9 + $0xd0] sm:$0xff] %v1063_v43  ;;  %1159 = vst [vmem:[%s1761_s9 + $0x1d0] sm:$0xff] %v1095_v44  ;;  %v890_v47 = vadd.f32 %v1752_v17, %v889_v45  ;;  %v1018_v48 = vadd.f32 %v1752_v17, %v1017_v46 }
 0x17b   : > { %v891_v49 = vpop.f32.mrf.mxu0  ;;  %v1019_v50 = vpop.f32.mrf.mxu1 }
 0x17c   : > { %v1064_v51 = vmax.f32 %v890_v47, 0.0  ;;  %v1096_v52 = vmax.f32 %v1018_v48, 0.0 }
 0x17d   : > { %v894_v53 = vpop.f32.mrf.mxu0  ;;  %v1022_v54 = vpop.f32.mrf.mxu1 }
 0x17e   : > { %1128 = vst [vmem:[%s1761_s9 + $0xd8] sm:$0xff] %v1064_v51  ;;  %1160 = vst [vmem:[%s1761_s9 + $0x1d8] sm:$0xff] %v1096_v52  ;;  %v895_v55 = vadd.f32 %v1752_v17, %v894_v53  ;;  %v1023_v56 = vadd.f32 %v1752_v17, %v1022_v54 }
 0x17f   : > { %v896_v57 = vpop.f32.mrf.mxu0  ;;  %v1024_v58 = vpop.f32.mrf.mxu1 }
 0x180   : > { %v1065_v59 = vmax.f32 %v895_v55, 0.0  ;;  %v1097_v60 = vmax.f32 %v1023_v56, 0.0 }
 0x181   : > { %v897_v61 = vpop.f32.mrf.mxu0  ;;  %v1025_v62 = vpop.f32.mrf.mxu1 }
 0x182   : > { %1129 = vst [vmem:[%s1761_s9 + $0xe0] sm:$0xff] %v1065_v59  ;;  %1161 = vst [vmem:[%s1761_s9 + $0x1e0] sm:$0xff] %v1097_v60  ;;  %v898_v63 = vadd.f32 %v1752_v17, %v897_v61  ;;  %v1026_v0 = vadd.f32 %v1752_v17, %v1025_v62 }
 0x183   : > { %v899_v1 = vpop.f32.mrf.mxu0  ;;  %v1027_v2 = vpop.f32.mrf.mxu1 }
 0x184   : > { %v1066_v3 = vmax.f32 %v898_v63, 0.0  ;;  %v1098_v4 = vmax.f32 %v1026_v0, 0.0 }
 0x185   : > { %v902_v5 = vpop.f32.mrf.mxu0  ;;  %v1030_v6 = vpop.f32.mrf.mxu1 }
 0x186   : > { %1130 = vst [vmem:[%s1761_s9 + $0xe8] sm:$0xff] %v1066_v3  ;;  %1162 = vst [vmem:[%s1761_s9 + $0x1e8] sm:$0xff] %v1098_v4  ;;  %v903_v7 = vadd.f32 %v1752_v17, %v902_v5  ;;  %v1031_v8 = vadd.f32 %v1752_v17, %v1030_v6 }
 0x187   : > { %v904_v9 = vpop.f32.mrf.mxu0  ;;  %v1032_v10 = vpop.f32.mrf.mxu1 }
 0x188   : > { %v1067_v11 = vmax.f32 %v903_v7, 0.0  ;;  %v1099_v12 = vmax.f32 %v1031_v8, 0.0 }
 0x189   : > { %v905_v13 = vpop.f32.mrf.mxu0  ;;  %v1033_v14 = vpop.f32.mrf.mxu1 }
 0x18a   : > { %1131 = vst [vmem:[%s1761_s9 + $0xf0] sm:$0xff] %v1067_v11  ;;  %1163 = vst [vmem:[%s1761_s9 + $0x1f0] sm:$0xff] %v1099_v12  ;;  %v906_v15 = vadd.f32 %v1752_v17, %v905_v13  ;;  %v1034_v16 = vadd.f32 %v1752_v17, %v1033_v14 }
 0x18b   : > { %v907_v18 = vpop.f32.mrf.mxu0  ;;  %v1035_v19 = vpop.f32.mrf.mxu1 }
 0x18c   : > { %v1068_v20 = vmax.f32 %v906_v15, 0.0  ;;  %v1100_v21 = vmax.f32 %v1034_v16, 0.0 }
 0x18e   : > { %1132 = vst [vmem:[%s1761_s9 + $0xf8] sm:$0xff] %v1068_v20  ;;  %1164 = vst [vmem:[%s1761_s9 + $0x1f8] sm:$0xff] %v1100_v21 }
 0x18f PF: > { %s13_s14 = sadd.s32 1, %s1554_s14   ;;  %s1902_s12 = smov %s1550_s13 }
 0x190   : > { %p10_p5 = scmp.ge.s32.totalorder %s13_s14, 6   ;;  %s1903_s13 = smov %s1905_s15 }
 0x192   :  { %12 = sbr.rel (!%p10_p5) target bundleno = 2 (0x2), region = 68 }

// kernel: _lambda_.19
= control target key start
LH: loop header
LB: loop body
LE: loop exit
PB: predicated region body
PF: predicated region fallthrough
CT: control target
= control target key end

     0   :  { %s1381_s1 = inlined_call_operand.vmem [shape: bf16[128,128], index: 1, kind: input, shape index: {}]   ;;  %s1382_s0 = inlined_call_operand.vmem [shape: bf16[512,128], index: 0, kind: input, shape index: {}]   ;;  %s1383_s2 = inlined_call_operand.vmem [shape: f32[1,128], index: 2, kind: input, shape index: {}]   ;;  %s1384_s3 = inlined_call_operand.vmem [shape: f32[512,128], index: 3, kind: output, shape index: {}]  }
   0x1   :  { %v940_v0 = vld [vmem:[%s1381_s1 + $0x38] sm:$0xff]   ;;  %v941_v1 = vld [vmem:[%s1381_s1 + $0x30] sm:$0xff]   ;;  %v942_v2 = vld [vmem:[%s1381_s1 + $0x28] sm:$0xff]  }
   0x2   :  { %844 = vmatprep.subr.bf16.mxu0 %v940_v0  ;;  %924 = vmatprep.subr.bf16.mxu1 %v940_v0  ;;  %v943_v3 = vld [vmem:[%s1381_s1 + $0x20] sm:$0xff]   ;;  %v944_v6 = vld [vmem:[%s1381_s1 + $0x18] sm:$0xff]   ;;  %v945_v7 = vld [vmem:[%s1381_s1 + $0x10] sm:$0xff]  }
   0x3   :  { %845 = vmatpush3.bf16.msra.mxu0 %v940_v0  ;;  %932 = vmatpush3.bf16.msra.mxu1 %v940_v0  ;;  %v948_v4 = vld [vmem:[%s1382_s0] sm:$0xff]   ;;  %v946_v8 = vld [vmem:[%s1381_s1 + $0x8] sm:$0xff]   ;;  %v952_v12 = vld [vmem:[%s1382_s0 + $0x10] sm:$0xff]  }
   0x4   :  { %846 = vmatprep.subr.bf16.mxu0 %v941_v1  ;;  %925 = vmatprep.subr.bf16.mxu1 %v941_v1  ;;  %v949_v5 = vld [vmem:[%s1382_s0 + $0x80] sm:$0xff]   ;;  %v950_v10 = vld [vmem:[%s1382_s0 + $0x8] sm:$0xff]   ;;  %v953_v13 = vld [vmem:[%s1382_s0 + $0x90] sm:$0xff]  }
   0x5   :  { %860 = vmatprep.mubr.bf16.mxu0 %v948_v4  ;;  %892 = vmatprep.mubr.bf16.mxu1 %v949_v5  ;;  %v947_v9 = vld [vmem:[%s1381_s1] sm:$0xff]   ;;  %v951_v11 = vld [vmem:[%s1382_s0 + $0x88] sm:$0xff]   ;;  %v954_v14 = vld [vmem:[%s1382_s0 + $0x18] sm:$0xff]  }
   0x6   :  { %v955_v15 = vld [vmem:[%s1382_s0 + $0x98] sm:$0xff]   ;;  %v956_v16 = vld [vmem:[%s1382_s0 + $0x20] sm:$0xff]   ;;  %v958_v18 = vld [vmem:[%s1382_s0 + $0x28] sm:$0xff]  }
   0x7   :  { %847 = vmatpush3.bf16.msra.mxu0 %v941_v1  ;;  %933 = vmatpush3.bf16.msra.mxu1 %v941_v1  ;;  %v957_v17 = vld [vmem:[%s1382_s0 + $0xa0] sm:$0xff]   ;;  %v959_v19 = vld [vmem:[%s1382_s0 + $0xa8] sm:$0xff]   ;;  %v960_v20 = vld [vmem:[%s1382_s0 + $0x30] sm:$0xff]  }
   0x8   :  { %848 = vmatprep.subr.bf16.mxu0 %v942_v2  ;;  %926 = vmatprep.subr.bf16.mxu1 %v942_v2  ;;  %v961_v21 = vld [vmem:[%s1382_s0 + $0xb0] sm:$0xff]   ;;  %v962_v22 = vld [vmem:[%s1382_s0 + $0x38] sm:$0xff]   ;;  %v964_v24 = vld [vmem:[%s1382_s0 + $0x40] sm:$0xff]  }
   0x9   :  { %v963_v23 = vld [vmem:[%s1382_s0 + $0xb8] sm:$0xff]   ;;  %v965_v25 = vld [vmem:[%s1382_s0 + $0xc0] sm:$0xff]   ;;  %v966_v26 = vld [vmem:[%s1382_s0 + $0x48] sm:$0xff]  }
   0xa   :  { %v967_v27 = vld [vmem:[%s1382_s0 + $0xc8] sm:$0xff]   ;;  %v968_v28 = vld [vmem:[%s1382_s0 + $0x50] sm:$0xff]   ;;  %v970_v30 = vld [vmem:[%s1382_s0 + $0x58] sm:$0xff]  }
   0xb   :  { %849 = vmatpush3.bf16.msra.mxu0 %v942_v2  ;;  %934 = vmatpush3.bf16.msra.mxu1 %v942_v2  ;;  %v969_v29 = vld [vmem:[%s1382_s0 + $0xd0] sm:$0xff]   ;;  %v971_v31 = vld [vmem:[%s1382_s0 + $0xd8] sm:$0xff]   ;;  %v972_v32 = vld [vmem:[%s1382_s0 + $0x60] sm:$0xff]  }
   0xc   :  { %850 = vmatprep.subr.bf16.mxu0 %v943_v3  ;;  %927 = vmatprep.subr.bf16.mxu1 %v943_v3  ;;  %v973_v33 = vld [vmem:[%s1382_s0 + $0xe0] sm:$0xff]   ;;  %v974_v34 = vld [vmem:[%s1382_s0 + $0x68] sm:$0xff]   ;;  %v976_v36 = vld [vmem:[%s1382_s0 + $0x70] sm:$0xff]  }
   0xd   :  { %v975_v35 = vld [vmem:[%s1382_s0 + $0xe8] sm:$0xff]   ;;  %v977_v37 = vld [vmem:[%s1382_s0 + $0xf0] sm:$0xff]   ;;  %v978_v38 = vld [vmem:[%s1382_s0 + $0x78] sm:$0xff]  }
   0xe   :  { %v979_v39 = vld [vmem:[%s1382_s0 + $0xf8] sm:$0xff]   ;;  %v1123_v40 = vld [vmem:[%s1383_s2] ss:$0 sm:$0xff] }
   0xf   :  { %851 = vmatpush3.bf16.msra.mxu0 %v943_v3  ;;  %935 = vmatpush3.bf16.msra.mxu1 %v943_v3 }
  0x10   :  { %852 = vmatprep.subr.bf16.mxu0 %v944_v6  ;;  %928 = vmatprep.subr.bf16.mxu1 %v944_v6 }
  0x13   :  { %853 = vmatpush3.bf16.msra.mxu0 %v944_v6  ;;  %936 = vmatpush3.bf16.msra.mxu1 %v944_v6 }
  0x14   :  { %854 = vmatprep.subr.bf16.mxu0 %v945_v7  ;;  %929 = vmatprep.subr.bf16.mxu1 %v945_v7 }
  0x17   :  { %855 = vmatpush3.bf16.msra.mxu0 %v945_v7  ;;  %937 = vmatpush3.bf16.msra.mxu1 %v945_v7 }
  0x18   :  { %856 = vmatprep.subr.bf16.mxu0 %v946_v8  ;;  %930 = vmatprep.subr.bf16.mxu1 %v946_v8 }
  0x1b   :  { %857 = vmatpush3.bf16.msra.mxu0 %v946_v8  ;;  %938 = vmatpush3.bf16.msra.mxu1 %v946_v8 }
  0x1c   :  { %858 = vmatprep.subr.bf16.mxu0 %v947_v9  ;;  %931 = vmatprep.subr.bf16.mxu1 %v947_v9 }
  0x1f   :  { %859 = vmatpush3.bf16.msra.mxu0 %v947_v9  ;;  %939 = vmatpush3.bf16.msra.mxu1 %v947_v9 }
  0x22   :  { %861 = vmatmul.mubr.bf16.vlgmr.msra.gmra.mxu0 %v950_v10  ;;  %893 = vmatmul.mubr.bf16.vlgmr.msra.gmra.mxu1 %v951_v11 }
  0x23   :  { %864 = vmatprep.mubr.bf16.mxu0 %v952_v12  ;;  %896 = vmatprep.mubr.bf16.mxu1 %v953_v13 }
  0x2a   :  { %865 = vmatmul.mubr.bf16.gmra.mxu0 %v954_v14  ;;  %897 = vmatmul.mubr.bf16.gmra.mxu1 %v955_v15 }
  0x2b   :  { %868 = vmatprep.mubr.bf16.mxu0 %v956_v16  ;;  %900 = vmatprep.mubr.bf16.mxu1 %v957_v17 }
  0x32   :  { %869 = vmatmul.mubr.bf16.gmra.mxu0 %v958_v18  ;;  %901 = vmatmul.mubr.bf16.gmra.mxu1 %v959_v19 }
  0x33   :  { %872 = vmatprep.mubr.bf16.mxu0 %v960_v20  ;;  %904 = vmatprep.mubr.bf16.mxu1 %v961_v21 }
  0x3a   :  { %873 = vmatmul.mubr.bf16.gmra.mxu0 %v962_v22  ;;  %905 = vmatmul.mubr.bf16.gmra.mxu1 %v963_v23 }
  0x3b   :  { %876 = vmatprep.mubr.bf16.mxu0 %v964_v24  ;;  %908 = vmatprep.mubr.bf16.mxu1 %v965_v25 }
  0x42   :  { %877 = vmatmul.mubr.bf16.gmra.mxu0 %v966_v26  ;;  %909 = vmatmul.mubr.bf16.gmra.mxu1 %v967_v27 }
  0x43   :  { %880 = vmatprep.mubr.bf16.mxu0 %v968_v28  ;;  %912 = vmatprep.mubr.bf16.mxu1 %v969_v29 }
  0x4a   :  { %881 = vmatmul.mubr.bf16.gmra.mxu0 %v970_v30  ;;  %913 = vmatmul.mubr.bf16.gmra.mxu1 %v971_v31 }
  0x4b   :  { %884 = vmatprep.mubr.bf16.mxu0 %v972_v32  ;;  %916 = vmatprep.mubr.bf16.mxu1 %v973_v33 }
  0x52   :  { %885 = vmatmul.mubr.bf16.gmra.mxu0 %v974_v34  ;;  %917 = vmatmul.mubr.bf16.gmra.mxu1 %v975_v35 }
  0x53   :  { %888 = vmatprep.mubr.bf16.mxu0 %v976_v36  ;;  %920 = vmatprep.mubr.bf16.mxu1 %v977_v37 }
  0x5a   :  { %889 = vmatmul.mubr.bf16.gmra.mxu0 %v978_v38  ;;  %921 = vmatmul.mubr.bf16.gmra.mxu1 %v979_v39 }
  0xe2   :  { %v862_v41 = vpop.f32.mrf.mxu0  ;;  %v894_v42 = vpop.f32.mrf.mxu1 }
  0xe3   :  { %v385_v43 = vadd.f32 %v862_v41, %v1123_v40  ;;  %v513_v44 = vadd.f32 %v894_v42, %v1123_v40 }
  0xe4   :  { %v376_v45 = vpop.f32.mrf.mxu0  ;;  %v504_v46 = vpop.f32.mrf.mxu1 }
  0xe5   :  { %v633_v47 = vmax.f32 %v385_v43, 0.0  ;;  %v665_v48 = vmax.f32 %v513_v44, 0.0  ;;  %v377_v49 = vadd.f32 %v1123_v40, %v376_v45  ;;  %v505_v50 = vadd.f32 %v1123_v40, %v504_v46 }
  0xe6   :  { %v863_v51 = vpop.f32.mrf.mxu0  ;;  %v895_v52 = vpop.f32.mrf.mxu1 }
  0xe7   :  { %697 = vst [vmem:[%s1384_s3 + $0x10] sm:$0xff] %v633_v47  ;;  %729 = vst [vmem:[%s1384_s3 + $0x110] sm:$0xff] %v665_v48  ;;  %v631_v53 = vmax.f32 %v377_v49, 0.0  ;;  %v663_v54 = vmax.f32 %v505_v50, 0.0  ;;  %v388_v55 = vadd.f32 %v863_v51, %v1123_v40  ;;  %v516_v56 = vadd.f32 %v895_v52, %v1123_v40 }
  0xe8   :  { %v379_v57 = vpop.f32.mrf.mxu0  ;;  %v507_v58 = vpop.f32.mrf.mxu1 }
  0xe9   :  { %695 = vst [vmem:[%s1384_s3] sm:$0xff] %v631_v53  ;;  %727 = vst [vmem:[%s1384_s3 + $0x100] sm:$0xff] %v663_v54  ;;  %v634_v59 = vmax.f32 %v388_v55, 0.0  ;;  %v666_v60 = vmax.f32 %v516_v56, 0.0  ;;  %v380_v61 = vadd.f32 %v1123_v40, %v379_v57  ;;  %v508_v62 = vadd.f32 %v1123_v40, %v507_v58 }
  0xea   :  { %v866_v63 = vpop.f32.mrf.mxu0  ;;  %v898_v0 = vpop.f32.mrf.mxu1 }
  0xeb   :  { %698 = vst [vmem:[%s1384_s3 + $0x18] sm:$0xff] %v634_v59  ;;  %730 = vst [vmem:[%s1384_s3 + $0x118] sm:$0xff] %v666_v60  ;;  %v632_v1 = vmax.f32 %v380_v61, 0.0  ;;  %v664_v2 = vmax.f32 %v508_v62, 0.0  ;;  %v401_v3 = vadd.f32 %v866_v63, %v1123_v40  ;;  %v529_v4 = vadd.f32 %v898_v0, %v1123_v40 }
  0xec   :  { %v392_v5 = vpop.f32.mrf.mxu0  ;;  %v520_v6 = vpop.f32.mrf.mxu1 }
  0xed   :  { %696 = vst [vmem:[%s1384_s3 + $0x8] sm:$0xff] %v632_v1  ;;  %728 = vst [vmem:[%s1384_s3 + $0x108] sm:$0xff] %v664_v2  ;;  %v637_v7 = vmax.f32 %v401_v3, 0.0  ;;  %v669_v8 = vmax.f32 %v529_v4, 0.0  ;;  %v393_v9 = vadd.f32 %v1123_v40, %v392_v5  ;;  %v521_v10 = vadd.f32 %v1123_v40, %v520_v6 }
  0xee   :  { %v867_v11 = vpop.f32.mrf.mxu0  ;;  %v899_v12 = vpop.f32.mrf.mxu1 }
  0xef   :  { %701 = vst [vmem:[%s1384_s3 + $0x30] sm:$0xff] %v637_v7  ;;  %733 = vst [vmem:[%s1384_s3 + $0x130] sm:$0xff] %v669_v8  ;;  %v635_v13 = vmax.f32 %v393_v9, 0.0  ;;  %v667_v14 = vmax.f32 %v521_v10, 0.0  ;;  %v404_v15 = vadd.f32 %v867_v11, %v1123_v40  ;;  %v532_v16 = vadd.f32 %v899_v12, %v1123_v40 }
  0xf0   :  { %v395_v17 = vpop.f32.mrf.mxu0  ;;  %v523_v18 = vpop.f32.mrf.mxu1 }
  0xf1   :  { %699 = vst [vmem:[%s1384_s3 + $0x20] sm:$0xff] %v635_v13  ;;  %731 = vst [vmem:[%s1384_s3 + $0x120] sm:$0xff] %v667_v14  ;;  %v638_v19 = vmax.f32 %v404_v15, 0.0  ;;  %v670_v20 = vmax.f32 %v532_v16, 0.0  ;;  %v396_v21 = vadd.f32 %v1123_v40, %v395_v17  ;;  %v524_v22 = vadd.f32 %v1123_v40, %v523_v18 }
  0xf2   :  { %v870_v23 = vpop.f32.mrf.mxu0  ;;  %v902_v24 = vpop.f32.mrf.mxu1 }
  0xf3   :  { %702 = vst [vmem:[%s1384_s3 + $0x38] sm:$0xff] %v638_v19  ;;  %734 = vst [vmem:[%s1384_s3 + $0x138] sm:$0xff] %v670_v20  ;;  %v636_v25 = vmax.f32 %v396_v21, 0.0  ;;  %v668_v26 = vmax.f32 %v524_v22, 0.0  ;;  %v417_v27 = vadd.f32 %v870_v23, %v1123_v40  ;;  %v545_v28 = vadd.f32 %v902_v24, %v1123_v40 }
  0xf4   :  { %v408_v29 = vpop.f32.mrf.mxu0  ;;  %v536_v30 = vpop.f32.mrf.mxu1 }
  0xf5   :  { %700 = vst [vmem:[%s1384_s3 + $0x28] sm:$0xff] %v636_v25  ;;  %732 = vst [vmem:[%s1384_s3 + $0x128] sm:$0xff] %v668_v26  ;;  %v641_v31 = vmax.f32 %v417_v27, 0.0  ;;  %v673_v32 = vmax.f32 %v545_v28, 0.0  ;;  %v409_v33 = vadd.f32 %v1123_v40, %v408_v29  ;;  %v537_v34 = vadd.f32 %v1123_v40, %v536_v30 }
  0xf6   :  { %v871_v35 = vpop.f32.mrf.mxu0  ;;  %v903_v36 = vpop.f32.mrf.mxu1 }
  0xf7   :  { %705 = vst [vmem:[%s1384_s3 + $0x50] sm:$0xff] %v641_v31  ;;  %737 = vst [vmem:[%s1384_s3 + $0x150] sm:$0xff] %v673_v32  ;;  %v639_v37 = vmax.f32 %v409_v33, 0.0  ;;  %v671_v38 = vmax.f32 %v537_v34, 0.0  ;;  %v420_v39 = vadd.f32 %v871_v35, %v1123_v40  ;;  %v548_v41 = vadd.f32 %v903_v36, %v1123_v40 }
  0xf8   :  { %v411_v42 = vpop.f32.mrf.mxu0  ;;  %v539_v43 = vpop.f32.mrf.mxu1 }
  0xf9   :  { %703 = vst [vmem:[%s1384_s3 + $0x40] sm:$0xff] %v639_v37  ;;  %735 = vst [vmem:[%s1384_s3 + $0x140] sm:$0xff] %v671_v38  ;;  %v642_v44 = vmax.f32 %v420_v39, 0.0  ;;  %v674_v45 = vmax.f32 %v548_v41, 0.0  ;;  %v412_v46 = vadd.f32 %v1123_v40, %v411_v42  ;;  %v540_v47 = vadd.f32 %v1123_v40, %v539_v43 }
  0xfa   :  { %v874_v48 = vpop.f32.mrf.mxu0  ;;  %v906_v49 = vpop.f32.mrf.mxu1 }
  0xfb   :  { %706 = vst [vmem:[%s1384_s3 + $0x58] sm:$0xff] %v642_v44  ;;  %738 = vst [vmem:[%s1384_s3 + $0x158] sm:$0xff] %v674_v45  ;;  %v640_v50 = vmax.f32 %v412_v46, 0.0  ;;  %v672_v51 = vmax.f32 %v540_v47, 0.0  ;;  %v433_v52 = vadd.f32 %v874_v48, %v1123_v40  ;;  %v561_v53 = vadd.f32 %v906_v49, %v1123_v40 }
  0xfc   :  { %v424_v54 = vpop.f32.mrf.mxu0  ;;  %v552_v55 = vpop.f32.mrf.mxu1 }
  0xfd   :  { %704 = vst [vmem:[%s1384_s3 + $0x48] sm:$0xff] %v640_v50  ;;  %736 = vst [vmem:[%s1384_s3 + $0x148] sm:$0xff] %v672_v51  ;;  %v645_v56 = vmax.f32 %v433_v52, 0.0  ;;  %v677_v57 = vmax.f32 %v561_v53, 0.0  ;;  %v425_v58 = vadd.f32 %v1123_v40, %v424_v54  ;;  %v553_v59 = vadd.f32 %v1123_v40, %v552_v55 }
  0xfe   :  { %v875_v60 = vpop.f32.mrf.mxu0  ;;  %v907_v61 = vpop.f32.mrf.mxu1 }
  0xff   :  { %709 = vst [vmem:[%s1384_s3 + $0x70] sm:$0xff] %v645_v56  ;;  %741 = vst [vmem:[%s1384_s3 + $0x170] sm:$0xff] %v677_v57  ;;  %v643_v62 = vmax.f32 %v425_v58, 0.0  ;;  %v675_v63 = vmax.f32 %v553_v59, 0.0  ;;  %v436_v0 = vadd.f32 %v875_v60, %v1123_v40  ;;  %v564_v1 = vadd.f32 %v907_v61, %v1123_v40 }
 0x100   :  { %v427_v2 = vpop.f32.mrf.mxu0  ;;  %v555_v3 = vpop.f32.mrf.mxu1 }
 0x101   :  { %707 = vst [vmem:[%s1384_s3 + $0x60] sm:$0xff] %v643_v62  ;;  %739 = vst [vmem:[%s1384_s3 + $0x160] sm:$0xff] %v675_v63  ;;  %v646_v4 = vmax.f32 %v436_v0, 0.0  ;;  %v678_v5 = vmax.f32 %v564_v1, 0.0  ;;  %v428_v6 = vadd.f32 %v1123_v40, %v427_v2  ;;  %v556_v7 = vadd.f32 %v1123_v40, %v555_v3 }
 0x102   :  { %v878_v8 = vpop.f32.mrf.mxu0  ;;  %v910_v9 = vpop.f32.mrf.mxu1 }
 0x103   :  { %710 = vst [vmem:[%s1384_s3 + $0x78] sm:$0xff] %v646_v4  ;;  %742 = vst [vmem:[%s1384_s3 + $0x178] sm:$0xff] %v678_v5  ;;  %v644_v10 = vmax.f32 %v428_v6, 0.0  ;;  %v676_v11 = vmax.f32 %v556_v7, 0.0  ;;  %v449_v12 = vadd.f32 %v878_v8, %v1123_v40  ;;  %v577_v13 = vadd.f32 %v910_v9, %v1123_v40 }
 0x104   :  { %v440_v14 = vpop.f32.mrf.mxu0  ;;  %v568_v15 = vpop.f32.mrf.mxu1 }
 0x105   :  { %708 = vst [vmem:[%s1384_s3 + $0x68] sm:$0xff] %v644_v10  ;;  %740 = vst [vmem:[%s1384_s3 + $0x168] sm:$0xff] %v676_v11  ;;  %v649_v16 = vmax.f32 %v449_v12, 0.0  ;;  %v681_v17 = vmax.f32 %v577_v13, 0.0  ;;  %v441_v18 = vadd.f32 %v1123_v40, %v440_v14  ;;  %v569_v19 = vadd.f32 %v1123_v40, %v568_v15 }
 0x106   :  { %v879_v20 = vpop.f32.mrf.mxu0  ;;  %v911_v21 = vpop.f32.mrf.mxu1 }
 0x107   :  { %713 = vst [vmem:[%s1384_s3 + $0x90] sm:$0xff] %v649_v16  ;;  %745 = vst [vmem:[%s1384_s3 + $0x190] sm:$0xff] %v681_v17  ;;  %v647_v22 = vmax.f32 %v441_v18, 0.0  ;;  %v679_v23 = vmax.f32 %v569_v19, 0.0  ;;  %v452_v24 = vadd.f32 %v879_v20, %v1123_v40  ;;  %v580_v25 = vadd.f32 %v911_v21, %v1123_v40 }
 0x108   :  { %v443_v26 = vpop.f32.mrf.mxu0  ;;  %v571_v27 = vpop.f32.mrf.mxu1 }
 0x109   :  { %711 = vst [vmem:[%s1384_s3 + $0x80] sm:$0xff] %v647_v22  ;;  %743 = vst [vmem:[%s1384_s3 + $0x180] sm:$0xff] %v679_v23  ;;  %v650_v28 = vmax.f32 %v452_v24, 0.0  ;;  %v682_v29 = vmax.f32 %v580_v25, 0.0  ;;  %v444_v30 = vadd.f32 %v1123_v40, %v443_v26  ;;  %v572_v31 = vadd.f32 %v1123_v40, %v571_v27 }
 0x10a   :  { %v882_v32 = vpop.f32.mrf.mxu0  ;;  %v914_v33 = vpop.f32.mrf.mxu1 }
 0x10b   :  { %714 = vst [vmem:[%s1384_s3 + $0x98] sm:$0xff] %v650_v28  ;;  %746 = vst [vmem:[%s1384_s3 + $0x198] sm:$0xff] %v682_v29  ;;  %v648_v34 = vmax.f32 %v444_v30, 0.0  ;;  %v680_v35 = vmax.f32 %v572_v31, 0.0  ;;  %v465_v36 = vadd.f32 %v882_v32, %v1123_v40  ;;  %v593_v37 = vadd.f32 %v914_v33, %v1123_v40 }
 0x10c   :  { %v456_v38 = vpop.f32.mrf.mxu0  ;;  %v584_v39 = vpop.f32.mrf.mxu1 }
 0x10d   :  { %712 = vst [vmem:[%s1384_s3 + $0x88] sm:$0xff] %v648_v34  ;;  %744 = vst [vmem:[%s1384_s3 + $0x188] sm:$0xff] %v680_v35  ;;  %v653_v41 = vmax.f32 %v465_v36, 0.0  ;;  %v685_v42 = vmax.f32 %v593_v37, 0.0  ;;  %v457_v43 = vadd.f32 %v1123_v40, %v456_v38  ;;  %v585_v44 = vadd.f32 %v1123_v40, %v584_v39 }
 0x10e   :  { %v883_v45 = vpop.f32.mrf.mxu0  ;;  %v915_v46 = vpop.f32.mrf.mxu1 }
 0x10f   :  { %717 = vst [vmem:[%s1384_s3 + $0xb0] sm:$0xff] %v653_v41  ;;  %749 = vst [vmem:[%s1384_s3 + $0x1b0] sm:$0xff] %v685_v42  ;;  %v651_v47 = vmax.f32 %v457_v43, 0.0  ;;  %v683_v48 = vmax.f32 %v585_v44, 0.0  ;;  %v468_v49 = vadd.f32 %v883_v45, %v1123_v40  ;;  %v596_v50 = vadd.f32 %v915_v46, %v1123_v40 }
 0x110   :  { %v459_v51 = vpop.f32.mrf.mxu0  ;;  %v587_v52 = vpop.f32.mrf.mxu1 }
 0x111   :  { %715 = vst [vmem:[%s1384_s3 + $0xa0] sm:$0xff] %v651_v47  ;;  %747 = vst [vmem:[%s1384_s3 + $0x1a0] sm:$0xff] %v683_v48  ;;  %v654_v53 = vmax.f32 %v468_v49, 0.0  ;;  %v686_v54 = vmax.f32 %v596_v50, 0.0  ;;  %v460_v55 = vadd.f32 %v1123_v40, %v459_v51  ;;  %v588_v56 = vadd.f32 %v1123_v40, %v587_v52 }
 0x112   :  { %v886_v57 = vpop.f32.mrf.mxu0  ;;  %v918_v58 = vpop.f32.mrf.mxu1 }
 0x113   :  { %718 = vst [vmem:[%s1384_s3 + $0xb8] sm:$0xff] %v654_v53  ;;  %750 = vst [vmem:[%s1384_s3 + $0x1b8] sm:$0xff] %v686_v54  ;;  %v652_v59 = vmax.f32 %v460_v55, 0.0  ;;  %v684_v60 = vmax.f32 %v588_v56, 0.0  ;;  %v481_v61 = vadd.f32 %v886_v57, %v1123_v40  ;;  %v609_v62 = vadd.f32 %v918_v58, %v1123_v40 }
 0x114   :  { %v472_v63 = vpop.f32.mrf.mxu0  ;;  %v600_v0 = vpop.f32.mrf.mxu1 }
 0x115   :  { %716 = vst [vmem:[%s1384_s3 + $0xa8] sm:$0xff] %v652_v59  ;;  %748 = vst [vmem:[%s1384_s3 + $0x1a8] sm:$0xff] %v684_v60  ;;  %v657_v1 = vmax.f32 %v481_v61, 0.0  ;;  %v689_v2 = vmax.f32 %v609_v62, 0.0  ;;  %v473_v3 = vadd.f32 %v1123_v40, %v472_v63  ;;  %v601_v4 = vadd.f32 %v1123_v40, %v600_v0 }
 0x116   :  { %v887_v5 = vpop.f32.mrf.mxu0  ;;  %v919_v6 = vpop.f32.mrf.mxu1 }
 0x117   :  { %721 = vst [vmem:[%s1384_s3 + $0xd0] sm:$0xff] %v657_v1  ;;  %753 = vst [vmem:[%s1384_s3 + $0x1d0] sm:$0xff] %v689_v2  ;;  %v655_v7 = vmax.f32 %v473_v3, 0.0  ;;  %v687_v8 = vmax.f32 %v601_v4, 0.0  ;;  %v484_v9 = vadd.f32 %v887_v5, %v1123_v40  ;;  %v612_v10 = vadd.f32 %v919_v6, %v1123_v40 }
 0x118   :  { %v475_v11 = vpop.f32.mrf.mxu0  ;;  %v603_v12 = vpop.f32.mrf.mxu1 }
 0x119   :  { %719 = vst [vmem:[%s1384_s3 + $0xc0] sm:$0xff] %v655_v7  ;;  %751 = vst [vmem:[%s1384_s3 + $0x1c0] sm:$0xff] %v687_v8  ;;  %v658_v13 = vmax.f32 %v484_v9, 0.0  ;;  %v690_v14 = vmax.f32 %v612_v10, 0.0  ;;  %v476_v15 = vadd.f32 %v1123_v40, %v475_v11  ;;  %v604_v16 = vadd.f32 %v1123_v40, %v603_v12 }
 0x11a   :  { %v890_v17 = vpop.f32.mrf.mxu0  ;;  %v922_v18 = vpop.f32.mrf.mxu1 }
 0x11b   :  { %722 = vst [vmem:[%s1384_s3 + $0xd8] sm:$0xff] %v658_v13  ;;  %754 = vst [vmem:[%s1384_s3 + $0x1d8] sm:$0xff] %v690_v14  ;;  %v656_v19 = vmax.f32 %v476_v15, 0.0  ;;  %v688_v20 = vmax.f32 %v604_v16, 0.0  ;;  %v497_v21 = vadd.f32 %v890_v17, %v1123_v40  ;;  %v625_v22 = vadd.f32 %v922_v18, %v1123_v40 }
 0x11c   :  { %v488_v23 = vpop.f32.mrf.mxu0  ;;  %v616_v24 = vpop.f32.mrf.mxu1 }
 0x11d   :  { %720 = vst [vmem:[%s1384_s3 + $0xc8] sm:$0xff] %v656_v19  ;;  %752 = vst [vmem:[%s1384_s3 + $0x1c8] sm:$0xff] %v688_v20  ;;  %v661_v25 = vmax.f32 %v497_v21, 0.0  ;;  %v693_v26 = vmax.f32 %v625_v22, 0.0  ;;  %v489_v27 = vadd.f32 %v1123_v40, %v488_v23  ;;  %v617_v28 = vadd.f32 %v1123_v40, %v616_v24 }
 0x11e   :  { %v891_v29 = vpop.f32.mrf.mxu0  ;;  %v923_v30 = vpop.f32.mrf.mxu1 }
 0x11f   :  { %725 = vst [vmem:[%s1384_s3 + $0xf0] sm:$0xff] %v661_v25  ;;  %757 = vst [vmem:[%s1384_s3 + $0x1f0] sm:$0xff] %v693_v26  ;;  %v659_v31 = vmax.f32 %v489_v27, 0.0  ;;  %v691_v32 = vmax.f32 %v617_v28, 0.0  ;;  %v500_v33 = vadd.f32 %v891_v29, %v1123_v40  ;;  %v628_v34 = vadd.f32 %v923_v30, %v1123_v40 }
 0x120   :  { %v491_v35 = vpop.f32.mrf.mxu0  ;;  %v619_v36 = vpop.f32.mrf.mxu1 }
 0x121   :  { %723 = vst [vmem:[%s1384_s3 + $0xe0] sm:$0xff] %v659_v31  ;;  %755 = vst [vmem:[%s1384_s3 + $0x1e0] sm:$0xff] %v691_v32  ;;  %v662_v37 = vmax.f32 %v500_v33, 0.0  ;;  %v694_v38 = vmax.f32 %v628_v34, 0.0  ;;  %v492_v39 = vadd.f32 %v1123_v40, %v491_v35  ;;  %v620_v41 = vadd.f32 %v1123_v40, %v619_v36 }
 0x123   :  { %726 = vst [vmem:[%s1384_s3 + $0xf8] sm:$0xff] %v662_v37  ;;  %758 = vst [vmem:[%s1384_s3 + $0x1f8] sm:$0xff] %v694_v38  ;;  %v660_v42 = vmax.f32 %v492_v39, 0.0  ;;  %v692_v43 = vmax.f32 %v620_v41, 0.0 }
 0x125   :  { %724 = vst [vmem:[%s1384_s3 + $0xe8] sm:$0xff] %v660_v42  ;;  %756 = vst [vmem:[%s1384_s3 + $0x1e8] sm:$0xff] %v692_v43 }

// kernel: _lambda_.21
= control target key start
LH: loop header
LB: loop body
LE: loop exit
PB: predicated region body
PF: predicated region fallthrough
CT: control target
= control target key end

     0   :  { %s1317_s1 = inlined_call_operand.vmem [shape: bf16[128,128], index: 1, kind: input, shape index: {}]   ;;  %s1318_s0 = inlined_call_operand.vmem [shape: bf16[512,128], index: 0, kind: input, shape index: {}]   ;;  %s1319_s2 = inlined_call_operand.vmem [shape: f32[1,128], index: 2, kind: input, shape index: {}]   ;;  %s1320_s3 = inlined_call_operand.vmem [shape: f32[512,128], index: 3, kind: output, shape index: {}]  }
   0x1   :  { %v876_v0 = vld [vmem:[%s1317_s1 + $0x38] sm:$0xff]   ;;  %v877_v1 = vld [vmem:[%s1317_s1 + $0x30] sm:$0xff]   ;;  %v878_v2 = vld [vmem:[%s1317_s1 + $0x28] sm:$0xff]  }
   0x2   :  { %780 = vmatprep.subr.bf16.mxu0 %v876_v0  ;;  %860 = vmatprep.subr.bf16.mxu1 %v876_v0  ;;  %v879_v3 = vld [vmem:[%s1317_s1 + $0x20] sm:$0xff]   ;;  %v880_v6 = vld [vmem:[%s1317_s1 + $0x18] sm:$0xff]   ;;  %v881_v7 = vld [vmem:[%s1317_s1 + $0x10] sm:$0xff]  }
   0x3   :  { %781 = vmatpush3.bf16.msra.mxu0 %v876_v0  ;;  %868 = vmatpush3.bf16.msra.mxu1 %v876_v0  ;;  %v884_v4 = vld [vmem:[%s1318_s0] sm:$0xff]   ;;  %v882_v8 = vld [vmem:[%s1317_s1 + $0x8] sm:$0xff]   ;;  %v888_v12 = vld [vmem:[%s1318_s0 + $0x10] sm:$0xff]  }
   0x4   :  { %782 = vmatprep.subr.bf16.mxu0 %v877_v1  ;;  %861 = vmatprep.subr.bf16.mxu1 %v877_v1  ;;  %v885_v5 = vld [vmem:[%s1318_s0 + $0x80] sm:$0xff]   ;;  %v886_v10 = vld [vmem:[%s1318_s0 + $0x8] sm:$0xff]   ;;  %v889_v13 = vld [vmem:[%s1318_s0 + $0x90] sm:$0xff]  }
   0x5   :  { %796 = vmatprep.mubr.bf16.mxu0 %v884_v4  ;;  %828 = vmatprep.mubr.bf16.mxu1 %v885_v5  ;;  %v883_v9 = vld [vmem:[%s1317_s1] sm:$0xff]   ;;  %v887_v11 = vld [vmem:[%s1318_s0 + $0x88] sm:$0xff]   ;;  %v890_v14 = vld [vmem:[%s1318_s0 + $0x18] sm:$0xff]  }
   0x6   :  { %v891_v15 = vld [vmem:[%s1318_s0 + $0x98] sm:$0xff]   ;;  %v892_v16 = vld [vmem:[%s1318_s0 + $0x20] sm:$0xff]   ;;  %v894_v18 = vld [vmem:[%s1318_s0 + $0x28] sm:$0xff]  }
   0x7   :  { %783 = vmatpush3.bf16.msra.mxu0 %v877_v1  ;;  %869 = vmatpush3.bf16.msra.mxu1 %v877_v1  ;;  %v893_v17 = vld [vmem:[%s1318_s0 + $0xa0] sm:$0xff]   ;;  %v895_v19 = vld [vmem:[%s1318_s0 + $0xa8] sm:$0xff]   ;;  %v896_v20 = vld [vmem:[%s1318_s0 + $0x30] sm:$0xff]  }
   0x8   :  { %784 = vmatprep.subr.bf16.mxu0 %v878_v2  ;;  %862 = vmatprep.subr.bf16.mxu1 %v878_v2  ;;  %v897_v21 = vld [vmem:[%s1318_s0 + $0xb0] sm:$0xff]   ;;  %v898_v22 = vld [vmem:[%s1318_s0 + $0x38] sm:$0xff]   ;;  %v900_v24 = vld [vmem:[%s1318_s0 + $0x40] sm:$0xff]  }
   0x9   :  { %v899_v23 = vld [vmem:[%s1318_s0 + $0xb8] sm:$0xff]   ;;  %v901_v25 = vld [vmem:[%s1318_s0 + $0xc0] sm:$0xff]   ;;  %v902_v26 = vld [vmem:[%s1318_s0 + $0x48] sm:$0xff]  }
   0xa   :  { %v903_v27 = vld [vmem:[%s1318_s0 + $0xc8] sm:$0xff]   ;;  %v904_v28 = vld [vmem:[%s1318_s0 + $0x50] sm:$0xff]   ;;  %v906_v30 = vld [vmem:[%s1318_s0 + $0x58] sm:$0xff]  }
   0xb   :  { %785 = vmatpush3.bf16.msra.mxu0 %v878_v2  ;;  %870 = vmatpush3.bf16.msra.mxu1 %v878_v2  ;;  %v905_v29 = vld [vmem:[%s1318_s0 + $0xd0] sm:$0xff]   ;;  %v907_v31 = vld [vmem:[%s1318_s0 + $0xd8] sm:$0xff]   ;;  %v908_v32 = vld [vmem:[%s1318_s0 + $0x60] sm:$0xff]  }
   0xc   :  { %786 = vmatprep.subr.bf16.mxu0 %v879_v3  ;;  %863 = vmatprep.subr.bf16.mxu1 %v879_v3  ;;  %v909_v33 = vld [vmem:[%s1318_s0 + $0xe0] sm:$0xff]   ;;  %v910_v34 = vld [vmem:[%s1318_s0 + $0x68] sm:$0xff]   ;;  %v912_v36 = vld [vmem:[%s1318_s0 + $0x70] sm:$0xff]  }
   0xd   :  { %v911_v35 = vld [vmem:[%s1318_s0 + $0xe8] sm:$0xff]   ;;  %v913_v37 = vld [vmem:[%s1318_s0 + $0xf0] sm:$0xff]   ;;  %v914_v38 = vld [vmem:[%s1318_s0 + $0x78] sm:$0xff]  }
   0xe   :  { %v915_v39 = vld [vmem:[%s1318_s0 + $0xf8] sm:$0xff]   ;;  %v1059_v40 = vld [vmem:[%s1319_s2] ss:$0 sm:$0xff] }
   0xf   :  { %787 = vmatpush3.bf16.msra.mxu0 %v879_v3  ;;  %871 = vmatpush3.bf16.msra.mxu1 %v879_v3 }
  0x10   :  { %788 = vmatprep.subr.bf16.mxu0 %v880_v6  ;;  %864 = vmatprep.subr.bf16.mxu1 %v880_v6 }
  0x13   :  { %789 = vmatpush3.bf16.msra.mxu0 %v880_v6  ;;  %872 = vmatpush3.bf16.msra.mxu1 %v880_v6 }
  0x14   :  { %790 = vmatprep.subr.bf16.mxu0 %v881_v7  ;;  %865 = vmatprep.subr.bf16.mxu1 %v881_v7 }
  0x17   :  { %791 = vmatpush3.bf16.msra.mxu0 %v881_v7  ;;  %873 = vmatpush3.bf16.msra.mxu1 %v881_v7 }
  0x18   :  { %792 = vmatprep.subr.bf16.mxu0 %v882_v8  ;;  %866 = vmatprep.subr.bf16.mxu1 %v882_v8 }
  0x1b   :  { %793 = vmatpush3.bf16.msra.mxu0 %v882_v8  ;;  %874 = vmatpush3.bf16.msra.mxu1 %v882_v8 }
  0x1c   :  { %794 = vmatprep.subr.bf16.mxu0 %v883_v9  ;;  %867 = vmatprep.subr.bf16.mxu1 %v883_v9 }
  0x1f   :  { %795 = vmatpush3.bf16.msra.mxu0 %v883_v9  ;;  %875 = vmatpush3.bf16.msra.mxu1 %v883_v9 }
  0x22   :  { %797 = vmatmul.mubr.bf16.vlgmr.msra.gmra.mxu0 %v886_v10  ;;  %829 = vmatmul.mubr.bf16.vlgmr.msra.gmra.mxu1 %v887_v11 }
  0x23   :  { %800 = vmatprep.mubr.bf16.mxu0 %v888_v12  ;;  %832 = vmatprep.mubr.bf16.mxu1 %v889_v13 }
  0x2a   :  { %801 = vmatmul.mubr.bf16.gmra.mxu0 %v890_v14  ;;  %833 = vmatmul.mubr.bf16.gmra.mxu1 %v891_v15 }
  0x2b   :  { %804 = vmatprep.mubr.bf16.mxu0 %v892_v16  ;;  %836 = vmatprep.mubr.bf16.mxu1 %v893_v17 }
  0x32   :  { %805 = vmatmul.mubr.bf16.gmra.mxu0 %v894_v18  ;;  %837 = vmatmul.mubr.bf16.gmra.mxu1 %v895_v19 }
  0x33   :  { %808 = vmatprep.mubr.bf16.mxu0 %v896_v20  ;;  %840 = vmatprep.mubr.bf16.mxu1 %v897_v21 }
  0x3a   :  { %809 = vmatmul.mubr.bf16.gmra.mxu0 %v898_v22  ;;  %841 = vmatmul.mubr.bf16.gmra.mxu1 %v899_v23 }
  0x3b   :  { %812 = vmatprep.mubr.bf16.mxu0 %v900_v24  ;;  %844 = vmatprep.mubr.bf16.mxu1 %v901_v25 }
  0x42   :  { %813 = vmatmul.mubr.bf16.gmra.mxu0 %v902_v26  ;;  %845 = vmatmul.mubr.bf16.gmra.mxu1 %v903_v27 }
  0x43   :  { %816 = vmatprep.mubr.bf16.mxu0 %v904_v28  ;;  %848 = vmatprep.mubr.bf16.mxu1 %v905_v29 }
  0x4a   :  { %817 = vmatmul.mubr.bf16.gmra.mxu0 %v906_v30  ;;  %849 = vmatmul.mubr.bf16.gmra.mxu1 %v907_v31 }
  0x4b   :  { %820 = vmatprep.mubr.bf16.mxu0 %v908_v32  ;;  %852 = vmatprep.mubr.bf16.mxu1 %v909_v33 }
  0x52   :  { %821 = vmatmul.mubr.bf16.gmra.mxu0 %v910_v34  ;;  %853 = vmatmul.mubr.bf16.gmra.mxu1 %v911_v35 }
  0x53   :  { %824 = vmatprep.mubr.bf16.mxu0 %v912_v36  ;;  %856 = vmatprep.mubr.bf16.mxu1 %v913_v37 }
  0x5a   :  { %825 = vmatmul.mubr.bf16.gmra.mxu0 %v914_v38  ;;  %857 = vmatmul.mubr.bf16.gmra.mxu1 %v915_v39 }
  0xe2   :  { %v798_v41 = vpop.f32.mrf.mxu0  ;;  %v830_v42 = vpop.f32.mrf.mxu1 }
  0xe3   :  { %v385_v43 = vadd.f32 %v798_v41, %v1059_v40  ;;  %v513_v44 = vadd.f32 %v830_v42, %v1059_v40 }
  0xe4   :  { %v376_v45 = vpop.f32.mrf.mxu0  ;;  %v504_v46 = vpop.f32.mrf.mxu1 }
  0xe5   :  { %633 = vst [vmem:[%s1320_s3 + $0x10] sm:$0xff] %v385_v43  ;;  %665 = vst [vmem:[%s1320_s3 + $0x110] sm:$0xff] %v513_v44  ;;  %v377_v47 = vadd.f32 %v1059_v40, %v376_v45  ;;  %v505_v48 = vadd.f32 %v1059_v40, %v504_v46 }
  0xe6   :  { %v799_v49 = vpop.f32.mrf.mxu0  ;;  %v831_v50 = vpop.f32.mrf.mxu1 }
  0xe7   :  { %631 = vst [vmem:[%s1320_s3] sm:$0xff] %v377_v47  ;;  %663 = vst [vmem:[%s1320_s3 + $0x100] sm:$0xff] %v505_v48  ;;  %v388_v51 = vadd.f32 %v799_v49, %v1059_v40  ;;  %v516_v52 = vadd.f32 %v831_v50, %v1059_v40 }
  0xe8   :  { %v379_v53 = vpop.f32.mrf.mxu0  ;;  %v507_v54 = vpop.f32.mrf.mxu1 }
  0xe9   :  { %634 = vst [vmem:[%s1320_s3 + $0x18] sm:$0xff] %v388_v51  ;;  %666 = vst [vmem:[%s1320_s3 + $0x118] sm:$0xff] %v516_v52  ;;  %v380_v55 = vadd.f32 %v1059_v40, %v379_v53  ;;  %v508_v56 = vadd.f32 %v1059_v40, %v507_v54 }
  0xea   :  { %v802_v57 = vpop.f32.mrf.mxu0  ;;  %v834_v58 = vpop.f32.mrf.mxu1 }
  0xeb   :  { %632 = vst [vmem:[%s1320_s3 + $0x8] sm:$0xff] %v380_v55  ;;  %664 = vst [vmem:[%s1320_s3 + $0x108] sm:$0xff] %v508_v56  ;;  %v401_v59 = vadd.f32 %v802_v57, %v1059_v40  ;;  %v529_v60 = vadd.f32 %v834_v58, %v1059_v40 }
  0xec   :  { %v392_v61 = vpop.f32.mrf.mxu0  ;;  %v520_v62 = vpop.f32.mrf.mxu1 }
  0xed   :  { %637 = vst [vmem:[%s1320_s3 + $0x30] sm:$0xff] %v401_v59  ;;  %669 = vst [vmem:[%s1320_s3 + $0x130] sm:$0xff] %v529_v60  ;;  %v393_v63 = vadd.f32 %v1059_v40, %v392_v61  ;;  %v521_v0 = vadd.f32 %v1059_v40, %v520_v62 }
  0xee   :  { %v803_v1 = vpop.f32.mrf.mxu0  ;;  %v835_v2 = vpop.f32.mrf.mxu1 }
  0xef   :  { %635 = vst [vmem:[%s1320_s3 + $0x20] sm:$0xff] %v393_v63  ;;  %667 = vst [vmem:[%s1320_s3 + $0x120] sm:$0xff] %v521_v0  ;;  %v404_v3 = vadd.f32 %v803_v1, %v1059_v40  ;;  %v532_v4 = vadd.f32 %v835_v2, %v1059_v40 }
  0xf0   :  { %v395_v5 = vpop.f32.mrf.mxu0  ;;  %v523_v6 = vpop.f32.mrf.mxu1 }
  0xf1   :  { %638 = vst [vmem:[%s1320_s3 + $0x38] sm:$0xff] %v404_v3  ;;  %670 = vst [vmem:[%s1320_s3 + $0x138] sm:$0xff] %v532_v4  ;;  %v396_v7 = vadd.f32 %v1059_v40, %v395_v5  ;;  %v524_v8 = vadd.f32 %v1059_v40, %v523_v6 }
  0xf2   :  { %v806_v9 = vpop.f32.mrf.mxu0  ;;  %v838_v10 = vpop.f32.mrf.mxu1 }
  0xf3   :  { %636 = vst [vmem:[%s1320_s3 + $0x28] sm:$0xff] %v396_v7  ;;  %668 = vst [vmem:[%s1320_s3 + $0x128] sm:$0xff] %v524_v8  ;;  %v417_v11 = vadd.f32 %v806_v9, %v1059_v40  ;;  %v545_v12 = vadd.f32 %v838_v10, %v1059_v40 }
  0xf4   :  { %v408_v13 = vpop.f32.mrf.mxu0  ;;  %v536_v14 = vpop.f32.mrf.mxu1 }
  0xf5   :  { %641 = vst [vmem:[%s1320_s3 + $0x50] sm:$0xff] %v417_v11  ;;  %673 = vst [vmem:[%s1320_s3 + $0x150] sm:$0xff] %v545_v12  ;;  %v409_v15 = vadd.f32 %v1059_v40, %v408_v13  ;;  %v537_v16 = vadd.f32 %v1059_v40, %v536_v14 }
  0xf6   :  { %v807_v17 = vpop.f32.mrf.mxu0  ;;  %v839_v18 = vpop.f32.mrf.mxu1 }
  0xf7   :  { %639 = vst [vmem:[%s1320_s3 + $0x40] sm:$0xff] %v409_v15  ;;  %671 = vst [vmem:[%s1320_s3 + $0x140] sm:$0xff] %v537_v16  ;;  %v420_v19 = vadd.f32 %v807_v17, %v1059_v40  ;;  %v548_v20 = vadd.f32 %v839_v18, %v1059_v40 }
  0xf8   :  { %v411_v21 = vpop.f32.mrf.mxu0  ;;  %v539_v22 = vpop.f32.mrf.mxu1 }
  0xf9   :  { %642 = vst [vmem:[%s1320_s3 + $0x58] sm:$0xff] %v420_v19  ;;  %674 = vst [vmem:[%s1320_s3 + $0x158] sm:$0xff] %v548_v20  ;;  %v412_v23 = vadd.f32 %v1059_v40, %v411_v21  ;;  %v540_v24 = vadd.f32 %v1059_v40, %v539_v22 }
  0xfa   :  { %v810_v25 = vpop.f32.mrf.mxu0  ;;  %v842_v26 = vpop.f32.mrf.mxu1 }
  0xfb   :  { %640 = vst [vmem:[%s1320_s3 + $0x48] sm:$0xff] %v412_v23  ;;  %672 = vst [vmem:[%s1320_s3 + $0x148] sm:$0xff] %v540_v24  ;;  %v433_v27 = vadd.f32 %v810_v25, %v1059_v40  ;;  %v561_v28 = vadd.f32 %v842_v26, %v1059_v40 }
  0xfc   :  { %v424_v29 = vpop.f32.mrf.mxu0  ;;  %v552_v30 = vpop.f32.mrf.mxu1 }
  0xfd   :  { %645 = vst [vmem:[%s1320_s3 + $0x70] sm:$0xff] %v433_v27  ;;  %677 = vst [vmem:[%s1320_s3 + $0x170] sm:$0xff] %v561_v28  ;;  %v425_v31 = vadd.f32 %v1059_v40, %v424_v29  ;;  %v553_v32 = vadd.f32 %v1059_v40, %v552_v30 }
  0xfe   :  { %v811_v33 = vpop.f32.mrf.mxu0  ;;  %v843_v34 = vpop.f32.mrf.mxu1 }
  0xff   :  { %643 = vst [vmem:[%s1320_s3 + $0x60] sm:$0xff] %v425_v31  ;;  %675 = vst [vmem:[%s1320_s3 + $0x160] sm:$0xff] %v553_v32  ;;  %v436_v35 = vadd.f32 %v811_v33, %v1059_v40  ;;  %v564_v36 = vadd.f32 %v843_v34, %v1059_v40 }
 0x100   :  { %v427_v37 = vpop.f32.mrf.mxu0  ;;  %v555_v38 = vpop.f32.mrf.mxu1 }
 0x101   :  { %646 = vst [vmem:[%s1320_s3 + $0x78] sm:$0xff] %v436_v35  ;;  %678 = vst [vmem:[%s1320_s3 + $0x178] sm:$0xff] %v564_v36  ;;  %v428_v39 = vadd.f32 %v1059_v40, %v427_v37  ;;  %v556_v41 = vadd.f32 %v1059_v40, %v555_v38 }
 0x102   :  { %v814_v42 = vpop.f32.mrf.mxu0  ;;  %v846_v43 = vpop.f32.mrf.mxu1 }
 0x103   :  { %644 = vst [vmem:[%s1320_s3 + $0x68] sm:$0xff] %v428_v39  ;;  %676 = vst [vmem:[%s1320_s3 + $0x168] sm:$0xff] %v556_v41  ;;  %v449_v44 = vadd.f32 %v814_v42, %v1059_v40  ;;  %v577_v45 = vadd.f32 %v846_v43, %v1059_v40 }
 0x104   :  { %v440_v46 = vpop.f32.mrf.mxu0  ;;  %v568_v47 = vpop.f32.mrf.mxu1 }
 0x105   :  { %649 = vst [vmem:[%s1320_s3 + $0x90] sm:$0xff] %v449_v44  ;;  %681 = vst [vmem:[%s1320_s3 + $0x190] sm:$0xff] %v577_v45  ;;  %v441_v48 = vadd.f32 %v1059_v40, %v440_v46  ;;  %v569_v49 = vadd.f32 %v1059_v40, %v568_v47 }
 0x106   :  { %v815_v50 = vpop.f32.mrf.mxu0  ;;  %v847_v51 = vpop.f32.mrf.mxu1 }
 0x107   :  { %647 = vst [vmem:[%s1320_s3 + $0x80] sm:$0xff] %v441_v48  ;;  %679 = vst [vmem:[%s1320_s3 + $0x180] sm:$0xff] %v569_v49  ;;  %v452_v52 = vadd.f32 %v815_v50, %v1059_v40  ;;  %v580_v53 = vadd.f32 %v847_v51, %v1059_v40 }
 0x108   :  { %v443_v54 = vpop.f32.mrf.mxu0  ;;  %v571_v55 = vpop.f32.mrf.mxu1 }
 0x109   :  { %650 = vst [vmem:[%s1320_s3 + $0x98] sm:$0xff] %v452_v52  ;;  %682 = vst [vmem:[%s1320_s3 + $0x198] sm:$0xff] %v580_v53  ;;  %v444_v56 = vadd.f32 %v1059_v40, %v443_v54  ;;  %v572_v57 = vadd.f32 %v1059_v40, %v571_v55 }
 0x10a   :  { %v818_v58 = vpop.f32.mrf.mxu0  ;;  %v850_v59 = vpop.f32.mrf.mxu1 }
 0x10b   :  { %648 = vst [vmem:[%s1320_s3 + $0x88] sm:$0xff] %v444_v56  ;;  %680 = vst [vmem:[%s1320_s3 + $0x188] sm:$0xff] %v572_v57  ;;  %v465_v60 = vadd.f32 %v818_v58, %v1059_v40  ;;  %v593_v61 = vadd.f32 %v850_v59, %v1059_v40 }
 0x10c   :  { %v456_v62 = vpop.f32.mrf.mxu0  ;;  %v584_v63 = vpop.f32.mrf.mxu1 }
 0x10d   :  { %653 = vst [vmem:[%s1320_s3 + $0xb0] sm:$0xff] %v465_v60  ;;  %685 = vst [vmem:[%s1320_s3 + $0x1b0] sm:$0xff] %v593_v61  ;;  %v457_v0 = vadd.f32 %v1059_v40, %v456_v62  ;;  %v585_v1 = vadd.f32 %v1059_v40, %v584_v63 }
 0x10e   :  { %v819_v2 = vpop.f32.mrf.mxu0  ;;  %v851_v3 = vpop.f32.mrf.mxu1 }
 0x10f   :  { %651 = vst [vmem:[%s1320_s3 + $0xa0] sm:$0xff] %v457_v0  ;;  %683 = vst [vmem:[%s1320_s3 + $0x1a0] sm:$0xff] %v585_v1  ;;  %v468_v4 = vadd.f32 %v819_v2, %v1059_v40  ;;  %v596_v5 = vadd.f32 %v851_v3, %v1059_v40 }
 0x110   :  { %v459_v6 = vpop.f32.mrf.mxu0  ;;  %v587_v7 = vpop.f32.mrf.mxu1 }
 0x111   :  { %654 = vst [vmem:[%s1320_s3 + $0xb8] sm:$0xff] %v468_v4  ;;  %686 = vst [vmem:[%s1320_s3 + $0x1b8] sm:$0xff] %v596_v5  ;;  %v460_v8 = vadd.f32 %v1059_v40, %v459_v6  ;;  %v588_v9 = vadd.f32 %v1059_v40, %v587_v7 }
 0x112   :  { %v822_v10 = vpop.f32.mrf.mxu0  ;;  %v854_v11 = vpop.f32.mrf.mxu1 }
 0x113   :  { %652 = vst [vmem:[%s1320_s3 + $0xa8] sm:$0xff] %v460_v8  ;;  %684 = vst [vmem:[%s1320_s3 + $0x1a8] sm:$0xff] %v588_v9  ;;  %v481_v12 = vadd.f32 %v822_v10, %v1059_v40  ;;  %v609_v13 = vadd.f32 %v854_v11, %v1059_v40 }
 0x114   :  { %v472_v14 = vpop.f32.mrf.mxu0  ;;  %v600_v15 = vpop.f32.mrf.mxu1 }
 0x115   :  { %657 = vst [vmem:[%s1320_s3 + $0xd0] sm:$0xff] %v481_v12  ;;  %689 = vst [vmem:[%s1320_s3 + $0x1d0] sm:$0xff] %v609_v13  ;;  %v473_v16 = vadd.f32 %v1059_v40, %v472_v14  ;;  %v601_v17 = vadd.f32 %v1059_v40, %v600_v15 }
 0x116   :  { %v823_v18 = vpop.f32.mrf.mxu0  ;;  %v855_v19 = vpop.f32.mrf.mxu1 }
 0x117   :  { %655 = vst [vmem:[%s1320_s3 + $0xc0] sm:$0xff] %v473_v16  ;;  %687 = vst [vmem:[%s1320_s3 + $0x1c0] sm:$0xff] %v601_v17  ;;  %v484_v20 = vadd.f32 %v823_v18, %v1059_v40  ;;  %v612_v21 = vadd.f32 %v855_v19, %v1059_v40 }
 0x118   :  { %v475_v22 = vpop.f32.mrf.mxu0  ;;  %v603_v23 = vpop.f32.mrf.mxu1 }
 0x119   :  { %658 = vst [vmem:[%s1320_s3 + $0xd8] sm:$0xff] %v484_v20  ;;  %690 = vst [vmem:[%s1320_s3 + $0x1d8] sm:$0xff] %v612_v21  ;;  %v476_v24 = vadd.f32 %v1059_v40, %v475_v22  ;;  %v604_v25 = vadd.f32 %v1059_v40, %v603_v23 }
 0x11a   :  { %v826_v26 = vpop.f32.mrf.mxu0  ;;  %v858_v27 = vpop.f32.mrf.mxu1 }
 0x11b   :  { %656 = vst [vmem:[%s1320_s3 + $0xc8] sm:$0xff] %v476_v24  ;;  %688 = vst [vmem:[%s1320_s3 + $0x1c8] sm:$0xff] %v604_v25  ;;  %v497_v28 = vadd.f32 %v826_v26, %v1059_v40  ;;  %v625_v29 = vadd.f32 %v858_v27, %v1059_v40 }
 0x11c   :  { %v488_v30 = vpop.f32.mrf.mxu0  ;;  %v616_v31 = vpop.f32.mrf.mxu1 }
 0x11d   :  { %661 = vst [vmem:[%s1320_s3 + $0xf0] sm:$0xff] %v497_v28  ;;  %693 = vst [vmem:[%s1320_s3 + $0x1f0] sm:$0xff] %v625_v29  ;;  %v489_v32 = vadd.f32 %v1059_v40, %v488_v30  ;;  %v617_v33 = vadd.f32 %v1059_v40, %v616_v31 }
 0x11e   :  { %v827_v34 = vpop.f32.mrf.mxu0  ;;  %v859_v35 = vpop.f32.mrf.mxu1 }
 0x11f   :  { %659 = vst [vmem:[%s1320_s3 + $0xe0] sm:$0xff] %v489_v32  ;;  %691 = vst [vmem:[%s1320_s3 + $0x1e0] sm:$0xff] %v617_v33  ;;  %v500_v36 = vadd.f32 %v827_v34, %v1059_v40  ;;  %v628_v37 = vadd.f32 %v859_v35, %v1059_v40 }
 0x120   :  { %v491_v38 = vpop.f32.mrf.mxu0  ;;  %v619_v39 = vpop.f32.mrf.mxu1 }
 0x121   :  { %662 = vst [vmem:[%s1320_s3 + $0xf8] sm:$0xff] %v500_v36  ;;  %694 = vst [vmem:[%s1320_s3 + $0x1f8] sm:$0xff] %v628_v37  ;;  %v492_v41 = vadd.f32 %v1059_v40, %v491_v38  ;;  %v620_v42 = vadd.f32 %v1059_v40, %v619_v39 }
 0x123   :  { %660 = vst [vmem:[%s1320_s3 + $0xe8] sm:$0xff] %v492_v41  ;;  %692 = vst [vmem:[%s1320_s3 + $0x1e8] sm:$0xff] %v620_v42 }

// kernel: _lambda_.25
= control target key start
LH: loop header
LB: loop body
LE: loop exit
PB: predicated region body
PF: predicated region fallthrough
CT: control target
= control target key end

     0   :  { %s483_s1 = inlined_call_operand.vmem [shape: bf16[128,128], index: 1, kind: input, shape index: {}]   ;;  %s484_s0 = inlined_call_operand.vmem [shape: bf16[128,128], index: 0, kind: input, shape index: {}]   ;;  %s485_s2 = inlined_call_operand.vmem [shape: f32[1,128], index: 2, kind: input, shape index: {}]   ;;  %s486_s3 = inlined_call_operand.vmem [shape: f32[128,128], index: 3, kind: output, shape index: {}]  }
   0x1   :  { %v348_v0 = vld [vmem:[%s483_s1 + $0x38] sm:$0xff]   ;;  %v349_v1 = vld [vmem:[%s483_s1 + $0x30] sm:$0xff]   ;;  %v350_v2 = vld [vmem:[%s483_s1 + $0x28] sm:$0xff]  }
   0x2   :  { %300 = vmatprep.subr.bf16.mxu0 %v348_v0  ;;  %332 = vmatprep.subr.bf16.mxu1 %v348_v0  ;;  %v351_v3 = vld [vmem:[%s483_s1 + $0x20] sm:$0xff]   ;;  %v352_v6 = vld [vmem:[%s483_s1 + $0x18] sm:$0xff]   ;;  %v353_v7 = vld [vmem:[%s483_s1 + $0x10] sm:$0xff]  }
   0x3   :  { %301 = vmatpush3.bf16.msra.mxu0 %v348_v0  ;;  %340 = vmatpush3.bf16.msra.mxu1 %v348_v0  ;;  %v356_v4 = vld [vmem:[%s484_s0] sm:$0xff]   ;;  %v354_v8 = vld [vmem:[%s483_s1 + $0x8] sm:$0xff]   ;;  %v360_v12 = vld [vmem:[%s484_s0 + $0x10] sm:$0xff]  }
   0x4   :  { %302 = vmatprep.subr.bf16.mxu0 %v349_v1  ;;  %333 = vmatprep.subr.bf16.mxu1 %v349_v1  ;;  %v357_v5 = vld [vmem:[%s484_s0 + $0x20] sm:$0xff]   ;;  %v358_v10 = vld [vmem:[%s484_s0 + $0x8] sm:$0xff]   ;;  %v361_v13 = vld [vmem:[%s484_s0 + $0x30] sm:$0xff]  }
   0x5   :  { %316 = vmatprep.mubr.bf16.mxu0 %v356_v4  ;;  %324 = vmatprep.mubr.bf16.mxu1 %v357_v5  ;;  %v355_v9 = vld [vmem:[%s483_s1] sm:$0xff]   ;;  %v359_v11 = vld [vmem:[%s484_s0 + $0x28] sm:$0xff]   ;;  %v362_v14 = vld [vmem:[%s484_s0 + $0x18] sm:$0xff]  }
   0x6   :  { %v363_v15 = vld [vmem:[%s484_s0 + $0x38] sm:$0xff]   ;;  %v267_v16 = vld [vmem:[%s485_s2] ss:$0 sm:$0xff] }
   0x7   :  { %303 = vmatpush3.bf16.msra.mxu0 %v349_v1  ;;  %341 = vmatpush3.bf16.msra.mxu1 %v349_v1 }
   0x8   :  { %304 = vmatprep.subr.bf16.mxu0 %v350_v2  ;;  %334 = vmatprep.subr.bf16.mxu1 %v350_v2 }
   0xb   :  { %305 = vmatpush3.bf16.msra.mxu0 %v350_v2  ;;  %342 = vmatpush3.bf16.msra.mxu1 %v350_v2 }
   0xc   :  { %306 = vmatprep.subr.bf16.mxu0 %v351_v3  ;;  %335 = vmatprep.subr.bf16.mxu1 %v351_v3 }
   0xf   :  { %307 = vmatpush3.bf16.msra.mxu0 %v351_v3  ;;  %343 = vmatpush3.bf16.msra.mxu1 %v351_v3 }
  0x10   :  { %308 = vmatprep.subr.bf16.mxu0 %v352_v6  ;;  %336 = vmatprep.subr.bf16.mxu1 %v352_v6 }
  0x13   :  { %309 = vmatpush3.bf16.msra.mxu0 %v352_v6  ;;  %344 = vmatpush3.bf16.msra.mxu1 %v352_v6 }
  0x14   :  { %310 = vmatprep.subr.bf16.mxu0 %v353_v7  ;;  %337 = vmatprep.subr.bf16.mxu1 %v353_v7 }
  0x17   :  { %311 = vmatpush3.bf16.msra.mxu0 %v353_v7  ;;  %345 = vmatpush3.bf16.msra.mxu1 %v353_v7 }
  0x18   :  { %312 = vmatprep.subr.bf16.mxu0 %v354_v8  ;;  %338 = vmatprep.subr.bf16.mxu1 %v354_v8 }
  0x1b   :  { %313 = vmatpush3.bf16.msra.mxu0 %v354_v8  ;;  %346 = vmatpush3.bf16.msra.mxu1 %v354_v8 }
  0x1c   :  { %314 = vmatprep.subr.bf16.mxu0 %v355_v9  ;;  %339 = vmatprep.subr.bf16.mxu1 %v355_v9 }
  0x1f   :  { %315 = vmatpush3.bf16.msra.mxu0 %v355_v9  ;;  %347 = vmatpush3.bf16.msra.mxu1 %v355_v9 }
  0x22   :  { %317 = vmatmul.mubr.bf16.vlgmr.msra.gmra.mxu0 %v358_v10  ;;  %325 = vmatmul.mubr.bf16.vlgmr.msra.gmra.mxu1 %v359_v11 }
  0x23   :  { %320 = vmatprep.mubr.bf16.mxu0 %v360_v12  ;;  %328 = vmatprep.mubr.bf16.mxu1 %v361_v13 }
  0x2a   :  { %321 = vmatmul.mubr.bf16.gmra.mxu0 %v362_v14  ;;  %329 = vmatmul.mubr.bf16.gmra.mxu1 %v363_v15 }
  0xe2   :  { %v318_v17 = vpop.f32.mrf.mxu0  ;;  %v326_v18 = vpop.f32.mrf.mxu1 }
  0xe3   :  { %v193_v19 = vadd.f32 %v318_v17, %v267_v16  ;;  %v225_v20 = vadd.f32 %v326_v18, %v267_v16 }
  0xe4   :  { %v184_v21 = vpop.f32.mrf.mxu0  ;;  %v216_v22 = vpop.f32.mrf.mxu1 }
  0xe5   :  { %249 = vst [vmem:[%s486_s3 + $0x10] sm:$0xff] %v193_v19  ;;  %257 = vst [vmem:[%s486_s3 + $0x50] sm:$0xff] %v225_v20  ;;  %v185_v23 = vadd.f32 %v267_v16, %v184_v21  ;;  %v217_v24 = vadd.f32 %v267_v16, %v216_v22 }
  0xe6   :  { %v319_v25 = vpop.f32.mrf.mxu0  ;;  %v327_v26 = vpop.f32.mrf.mxu1 }
  0xe7   :  { %247 = vst [vmem:[%s486_s3] sm:$0xff] %v185_v23  ;;  %255 = vst [vmem:[%s486_s3 + $0x40] sm:$0xff] %v217_v24  ;;  %v196_v27 = vadd.f32 %v319_v25, %v267_v16  ;;  %v228_v28 = vadd.f32 %v327_v26, %v267_v16 }
  0xe8   :  { %v187_v29 = vpop.f32.mrf.mxu0  ;;  %v219_v30 = vpop.f32.mrf.mxu1 }
  0xe9   :  { %250 = vst [vmem:[%s486_s3 + $0x18] sm:$0xff] %v196_v27  ;;  %258 = vst [vmem:[%s486_s3 + $0x58] sm:$0xff] %v228_v28  ;;  %v188_v31 = vadd.f32 %v267_v16, %v187_v29  ;;  %v220_v32 = vadd.f32 %v267_v16, %v219_v30 }
  0xea   :  { %v322_v33 = vpop.f32.mrf.mxu0  ;;  %v330_v34 = vpop.f32.mrf.mxu1 }
  0xeb   :  { %248 = vst [vmem:[%s486_s3 + $0x8] sm:$0xff] %v188_v31  ;;  %256 = vst [vmem:[%s486_s3 + $0x48] sm:$0xff] %v220_v32  ;;  %v209_v35 = vadd.f32 %v322_v33, %v267_v16  ;;  %v241_v36 = vadd.f32 %v330_v34, %v267_v16 }
  0xec   :  { %v200_v37 = vpop.f32.mrf.mxu0  ;;  %v232_v38 = vpop.f32.mrf.mxu1 }
  0xed   :  { %253 = vst [vmem:[%s486_s3 + $0x30] sm:$0xff] %v209_v35  ;;  %261 = vst [vmem:[%s486_s3 + $0x70] sm:$0xff] %v241_v36  ;;  %v201_v39 = vadd.f32 %v267_v16, %v200_v37  ;;  %v233_v40 = vadd.f32 %v267_v16, %v232_v38 }
  0xee   :  { %v323_v41 = vpop.f32.mrf.mxu0  ;;  %v331_v42 = vpop.f32.mrf.mxu1 }
  0xef   :  { %251 = vst [vmem:[%s486_s3 + $0x20] sm:$0xff] %v201_v39  ;;  %259 = vst [vmem:[%s486_s3 + $0x60] sm:$0xff] %v233_v40  ;;  %v212_v43 = vadd.f32 %v323_v41, %v267_v16  ;;  %v244_v44 = vadd.f32 %v331_v42, %v267_v16 }
  0xf0   :  { %v203_v45 = vpop.f32.mrf.mxu0  ;;  %v235_v46 = vpop.f32.mrf.mxu1 }
  0xf1   :  { %254 = vst [vmem:[%s486_s3 + $0x38] sm:$0xff] %v212_v43  ;;  %262 = vst [vmem:[%s486_s3 + $0x78] sm:$0xff] %v244_v44  ;;  %v204_v47 = vadd.f32 %v267_v16, %v203_v45  ;;  %v236_v48 = vadd.f32 %v267_v16, %v235_v46 }
  0xf3   :  { %252 = vst [vmem:[%s486_s3 + $0x28] sm:$0xff] %v204_v47  ;;  %260 = vst [vmem:[%s486_s3 + $0x68] sm:$0xff] %v236_v48 }

// kernel: _lambda_.22
= control target key start
LH: loop header
LB: loop body
LE: loop exit
PB: predicated region body
PF: predicated region fallthrough
CT: control target
= control target key end

     0   :  { %s1709_s1 = inlined_call_operand.vmem [shape: bf16[128,128], index: 1, kind: input, shape index: {}]   ;;  %s1710_s0 = inlined_call_operand.vmem [shape: bf16[512,128], index: 0, kind: input, shape index: {}]   ;;  %s1711_s2 = inlined_call_operand.vmem [shape: f32[1,128], index: 2, kind: input, shape index: {}]   ;;  %s1712_s3 = inlined_call_operand.vmem [shape: f32[512,128], index: 3, kind: input, shape index: {}]   ;;  %s1713_s4 = inlined_call_operand.vmem [shape: f32[512,128], index: 4, kind: output, shape index: {}]  }
   0x1   :  { %v1071_v0 = vld [vmem:[%s1709_s1 + $0x38] sm:$0xff]   ;;  %v1072_v1 = vld [vmem:[%s1709_s1 + $0x30] sm:$0xff]   ;;  %v1073_v2 = vld [vmem:[%s1709_s1 + $0x28] sm:$0xff]  }
   0x2   :  { %975 = vmatprep.subr.bf16.mxu0 %v1071_v0  ;;  %1055 = vmatprep.subr.bf16.mxu1 %v1071_v0  ;;  %v1074_v3 = vld [vmem:[%s1709_s1 + $0x20] sm:$0xff]   ;;  %v1075_v6 = vld [vmem:[%s1709_s1 + $0x18] sm:$0xff]   ;;  %v1076_v7 = vld [vmem:[%s1709_s1 + $0x10] sm:$0xff]  }
   0x3   :  { %976 = vmatpush3.bf16.msra.mxu0 %v1071_v0  ;;  %1063 = vmatpush3.bf16.msra.mxu1 %v1071_v0  ;;  %v1079_v4 = vld [vmem:[%s1710_s0] sm:$0xff]   ;;  %v1077_v8 = vld [vmem:[%s1709_s1 + $0x8] sm:$0xff]   ;;  %v1083_v12 = vld [vmem:[%s1710_s0 + $0x10] sm:$0xff]  }
   0x4   :  { %977 = vmatprep.subr.bf16.mxu0 %v1072_v1  ;;  %1056 = vmatprep.subr.bf16.mxu1 %v1072_v1  ;;  %v1080_v5 = vld [vmem:[%s1710_s0 + $0x80] sm:$0xff]   ;;  %v1081_v10 = vld [vmem:[%s1710_s0 + $0x8] sm:$0xff]   ;;  %v1084_v13 = vld [vmem:[%s1710_s0 + $0x90] sm:$0xff]  }
   0x5   :  { %991 = vmatprep.mubr.bf16.mxu0 %v1079_v4  ;;  %1023 = vmatprep.mubr.bf16.mxu1 %v1080_v5  ;;  %v1078_v9 = vld [vmem:[%s1709_s1] sm:$0xff]   ;;  %v1082_v11 = vld [vmem:[%s1710_s0 + $0x88] sm:$0xff]   ;;  %v1085_v14 = vld [vmem:[%s1710_s0 + $0x18] sm:$0xff]  }
   0x6   :  { %v1086_v15 = vld [vmem:[%s1710_s0 + $0x98] sm:$0xff]   ;;  %v1087_v16 = vld [vmem:[%s1710_s0 + $0x20] sm:$0xff]   ;;  %v1089_v18 = vld [vmem:[%s1710_s0 + $0x28] sm:$0xff]  }
   0x7   :  { %978 = vmatpush3.bf16.msra.mxu0 %v1072_v1  ;;  %1064 = vmatpush3.bf16.msra.mxu1 %v1072_v1  ;;  %v1088_v17 = vld [vmem:[%s1710_s0 + $0xa0] sm:$0xff]   ;;  %v1090_v19 = vld [vmem:[%s1710_s0 + $0xa8] sm:$0xff]   ;;  %v1091_v20 = vld [vmem:[%s1710_s0 + $0x30] sm:$0xff]  }
   0x8   :  { %979 = vmatprep.subr.bf16.mxu0 %v1073_v2  ;;  %1057 = vmatprep.subr.bf16.mxu1 %v1073_v2  ;;  %v1092_v21 = vld [vmem:[%s1710_s0 + $0xb0] sm:$0xff]   ;;  %v1093_v22 = vld [vmem:[%s1710_s0 + $0x38] sm:$0xff]   ;;  %v1095_v24 = vld [vmem:[%s1710_s0 + $0x40] sm:$0xff]  }
   0x9   :  { %v1094_v23 = vld [vmem:[%s1710_s0 + $0xb8] sm:$0xff]   ;;  %v1096_v25 = vld [vmem:[%s1710_s0 + $0xc0] sm:$0xff]   ;;  %v1097_v26 = vld [vmem:[%s1710_s0 + $0x48] sm:$0xff]  }
   0xa   :  { %v1098_v27 = vld [vmem:[%s1710_s0 + $0xc8] sm:$0xff]   ;;  %v1099_v28 = vld [vmem:[%s1710_s0 + $0x50] sm:$0xff]   ;;  %v1101_v30 = vld [vmem:[%s1710_s0 + $0x58] sm:$0xff]  }
   0xb   :  { %980 = vmatpush3.bf16.msra.mxu0 %v1073_v2  ;;  %1065 = vmatpush3.bf16.msra.mxu1 %v1073_v2  ;;  %v1100_v29 = vld [vmem:[%s1710_s0 + $0xd0] sm:$0xff]   ;;  %v1102_v31 = vld [vmem:[%s1710_s0 + $0xd8] sm:$0xff]   ;;  %v1103_v32 = vld [vmem:[%s1710_s0 + $0x60] sm:$0xff]  }
   0xc   :  { %981 = vmatprep.subr.bf16.mxu0 %v1074_v3  ;;  %1058 = vmatprep.subr.bf16.mxu1 %v1074_v3  ;;  %v1104_v33 = vld [vmem:[%s1710_s0 + $0xe0] sm:$0xff]   ;;  %v1105_v34 = vld [vmem:[%s1710_s0 + $0x68] sm:$0xff]   ;;  %v1107_v36 = vld [vmem:[%s1710_s0 + $0x70] sm:$0xff]  }
   0xd   :  { %v1106_v35 = vld [vmem:[%s1710_s0 + $0xe8] sm:$0xff]   ;;  %v1108_v37 = vld [vmem:[%s1710_s0 + $0xf0] sm:$0xff]   ;;  %v1109_v38 = vld [vmem:[%s1710_s0 + $0x78] sm:$0xff]  }
   0xe   :  { %v1110_v39 = vld [vmem:[%s1710_s0 + $0xf8] sm:$0xff]   ;;  %v1259_v40 = vld [vmem:[%s1711_s2] ss:$0 sm:$0xff]  ;;  %v636_v42 = vld [vmem:[%s1712_s3 + $0x10] sm:$0xff] }
   0xf   :  { %982 = vmatpush3.bf16.msra.mxu0 %v1074_v3  ;;  %1066 = vmatpush3.bf16.msra.mxu1 %v1074_v3  ;;  %v668_v44 = vld [vmem:[%s1712_s3 + $0x110] sm:$0xff]  ;;  %v634_v48 = vld [vmem:[%s1712_s3] sm:$0xff]  ;;  %v637_v61 = vld [vmem:[%s1712_s3 + $0x18] sm:$0xff] }
  0x10   :  { %983 = vmatprep.subr.bf16.mxu0 %v1075_v6  ;;  %1059 = vmatprep.subr.bf16.mxu1 %v1075_v6  ;;  %v666_v50 = vld [vmem:[%s1712_s3 + $0x100] sm:$0xff]  ;;  %v669_v62 = vld [vmem:[%s1712_s3 + $0x118] sm:$0xff]  ;;  %v635_v2 = vld [vmem:[%s1712_s3 + $0x8] sm:$0xff] }
  0x11   :  { %v667_v4 = vld [vmem:[%s1712_s3 + $0x108] sm:$0xff] }
  0x13   :  { %984 = vmatpush3.bf16.msra.mxu0 %v1075_v6  ;;  %1067 = vmatpush3.bf16.msra.mxu1 %v1075_v6 }
  0x14   :  { %985 = vmatprep.subr.bf16.mxu0 %v1076_v7  ;;  %1060 = vmatprep.subr.bf16.mxu1 %v1076_v7 }
  0x17   :  { %986 = vmatpush3.bf16.msra.mxu0 %v1076_v7  ;;  %1068 = vmatpush3.bf16.msra.mxu1 %v1076_v7 }
  0x18   :  { %987 = vmatprep.subr.bf16.mxu0 %v1077_v8  ;;  %1061 = vmatprep.subr.bf16.mxu1 %v1077_v8 }
  0x1b   :  { %988 = vmatpush3.bf16.msra.mxu0 %v1077_v8  ;;  %1069 = vmatpush3.bf16.msra.mxu1 %v1077_v8 }
  0x1c   :  { %989 = vmatprep.subr.bf16.mxu0 %v1078_v9  ;;  %1062 = vmatprep.subr.bf16.mxu1 %v1078_v9 }
  0x1f   :  { %990 = vmatpush3.bf16.msra.mxu0 %v1078_v9  ;;  %1070 = vmatpush3.bf16.msra.mxu1 %v1078_v9 }
  0x22   :  { %992 = vmatmul.mubr.bf16.vlgmr.msra.gmra.mxu0 %v1081_v10  ;;  %1024 = vmatmul.mubr.bf16.vlgmr.msra.gmra.mxu1 %v1082_v11 }
  0x23   :  { %995 = vmatprep.mubr.bf16.mxu0 %v1083_v12  ;;  %1027 = vmatprep.mubr.bf16.mxu1 %v1084_v13  ;;  %v640_v12 = vld [vmem:[%s1712_s3 + $0x30] sm:$0xff] }
  0x2a   :  { %996 = vmatmul.mubr.bf16.gmra.mxu0 %v1085_v14  ;;  %1028 = vmatmul.mubr.bf16.gmra.mxu1 %v1086_v15  ;;  %v672_v14 = vld [vmem:[%s1712_s3 + $0x130] sm:$0xff] }
  0x2b   :  { %999 = vmatprep.mubr.bf16.mxu0 %v1087_v16  ;;  %1031 = vmatprep.mubr.bf16.mxu1 %v1088_v17 }
  0x32   :  { %1000 = vmatmul.mubr.bf16.gmra.mxu0 %v1089_v18  ;;  %1032 = vmatmul.mubr.bf16.gmra.mxu1 %v1090_v19 }
  0x33   :  { %1003 = vmatprep.mubr.bf16.mxu0 %v1091_v20  ;;  %1035 = vmatprep.mubr.bf16.mxu1 %v1092_v21 }
  0x3a   :  { %1004 = vmatmul.mubr.bf16.gmra.mxu0 %v1093_v22  ;;  %1036 = vmatmul.mubr.bf16.gmra.mxu1 %v1094_v23 }
  0x3b   :  { %1007 = vmatprep.mubr.bf16.mxu0 %v1095_v24  ;;  %1039 = vmatprep.mubr.bf16.mxu1 %v1096_v25 }
  0x42   :  { %1008 = vmatmul.mubr.bf16.gmra.mxu0 %v1097_v26  ;;  %1040 = vmatmul.mubr.bf16.gmra.mxu1 %v1098_v27  ;;  %v638_v27 = vld [vmem:[%s1712_s3 + $0x20] sm:$0xff] }
  0x43   :  { %1011 = vmatprep.mubr.bf16.mxu0 %v1099_v28  ;;  %1043 = vmatprep.mubr.bf16.mxu1 %v1100_v29  ;;  %v670_v28 = vld [vmem:[%s1712_s3 + $0x120] sm:$0xff] }
  0x4a   :  { %1012 = vmatmul.mubr.bf16.gmra.mxu0 %v1101_v30  ;;  %1044 = vmatmul.mubr.bf16.gmra.mxu1 %v1102_v31 }
  0x4b   :  { %1015 = vmatprep.mubr.bf16.mxu0 %v1103_v32  ;;  %1047 = vmatprep.mubr.bf16.mxu1 %v1104_v33  ;;  %v641_v32 = vld [vmem:[%s1712_s3 + $0x38] sm:$0xff] }
  0x52   :  { %1016 = vmatmul.mubr.bf16.gmra.mxu0 %v1105_v34  ;;  %1048 = vmatmul.mubr.bf16.gmra.mxu1 %v1106_v35  ;;  %v673_v34 = vld [vmem:[%s1712_s3 + $0x138] sm:$0xff] }
  0x53   :  { %1019 = vmatprep.mubr.bf16.mxu0 %v1107_v36  ;;  %1051 = vmatprep.mubr.bf16.mxu1 %v1108_v37 }
  0x5a   :  { %1020 = vmatmul.mubr.bf16.gmra.mxu0 %v1109_v38  ;;  %1052 = vmatmul.mubr.bf16.gmra.mxu1 %v1110_v39 }
  0xe2   :  { %v993_v41 = vpop.f32.mrf.mxu0  ;;  %v1025_v43 = vpop.f32.mrf.mxu1 }
  0xe3   :  { %v388_v45 = vadd.f32 %v993_v41, %v1259_v40  ;;  %v516_v46 = vadd.f32 %v1025_v43, %v1259_v40  ;;  %v639_v43 = vld [vmem:[%s1712_s3 + $0x28] sm:$0xff] }
  0xe4   :  { %v379_v47 = vpop.f32.mrf.mxu0  ;;  %v507_v49 = vpop.f32.mrf.mxu1 }
  0xe5   :  { %v700_v51 = vadd.f32 %v636_v42, %v388_v45  ;;  %v732_v52 = vadd.f32 %v668_v44, %v516_v46  ;;  %v380_v53 = vadd.f32 %v1259_v40, %v379_v47  ;;  %v508_v54 = vadd.f32 %v1259_v40, %v507_v49  ;;  %v671_v45 = vld [vmem:[%s1712_s3 + $0x128] sm:$0xff] }
  0xe6   :  { %v994_v55 = vpop.f32.mrf.mxu0  ;;  %v1026_v56 = vpop.f32.mrf.mxu1 }
  0xe7   :  { %v764_v57 = vmax.f32 %v700_v51, 0.0  ;;  %v796_v58 = vmax.f32 %v732_v52, 0.0  ;;  %v698_v59 = vadd.f32 %v634_v48, %v380_v53  ;;  %v730_v60 = vadd.f32 %v666_v50, %v508_v54 }
  0xe8   :  { %v391_v63 = vadd.f32 %v994_v55, %v1259_v40  ;;  %v519_v0 = vadd.f32 %v1026_v56, %v1259_v40  ;;  %v382_v1 = vpop.f32.mrf.mxu0  ;;  %v510_v3 = vpop.f32.mrf.mxu1 }
  0xe9   :  { %828 = vst [vmem:[%s1713_s4 + $0x10] sm:$0xff] %v764_v57  ;;  %860 = vst [vmem:[%s1713_s4 + $0x110] sm:$0xff] %v796_v58  ;;  %v762_v5 = vmax.f32 %v698_v59, 0.0  ;;  %v794_v6 = vmax.f32 %v730_v60, 0.0  ;;  %v383_v7 = vadd.f32 %v1259_v40, %v382_v1  ;;  %v511_v8 = vadd.f32 %v1259_v40, %v510_v3  ;;  %v644_v58 = vld [vmem:[%s1712_s3 + $0x50] sm:$0xff]  ;;  %v674_v1 = vld [vmem:[%s1712_s3 + $0x140] sm:$0xff] }
  0xea   :  { %v701_v9 = vadd.f32 %v637_v61, %v391_v63  ;;  %v733_v10 = vadd.f32 %v669_v62, %v519_v0  ;;  %v997_v11 = vpop.f32.mrf.mxu0  ;;  %v1029_v13 = vpop.f32.mrf.mxu1  ;;  %v676_v59 = vld [vmem:[%s1712_s3 + $0x150] sm:$0xff]  ;;  %v642_v63 = vld [vmem:[%s1712_s3 + $0x40] sm:$0xff] }
  0xeb   :  { %826 = vst [vmem:[%s1713_s4] sm:$0xff] %v762_v5  ;;  %858 = vst [vmem:[%s1713_s4 + $0x100] sm:$0xff] %v794_v6  ;;  %v699_v15 = vadd.f32 %v635_v2, %v383_v7  ;;  %v731_v16 = vadd.f32 %v667_v4, %v511_v8  ;;  %v404_v17 = vadd.f32 %v997_v11, %v1259_v40  ;;  %v677_v11 = vld [vmem:[%s1712_s3 + $0x158] sm:$0xff] }
  0xec   :  { %v532_v18 = vadd.f32 %v1029_v13, %v1259_v40  ;;  %v765_v19 = vmax.f32 %v701_v9, 0.0  ;;  %v797_v20 = vmax.f32 %v733_v10, 0.0  ;;  %v395_v21 = vpop.f32.mrf.mxu0  ;;  %v523_v22 = vpop.f32.mrf.mxu1  ;;  %v645_v9 = vld [vmem:[%s1712_s3 + $0x58] sm:$0xff] }
  0xed   :  { %v763_v23 = vmax.f32 %v699_v15, 0.0  ;;  %v795_v24 = vmax.f32 %v731_v16, 0.0  ;;  %v704_v25 = vadd.f32 %v640_v12, %v404_v17  ;;  %v396_v29 = vadd.f32 %v1259_v40, %v395_v21 }
  0xee   :  { %v736_v26 = vadd.f32 %v672_v14, %v532_v18  ;;  %829 = vst [vmem:[%s1713_s4 + $0x18] sm:$0xff] %v765_v19  ;;  %861 = vst [vmem:[%s1713_s4 + $0x118] sm:$0xff] %v797_v20  ;;  %v524_v30 = vadd.f32 %v1259_v40, %v523_v22  ;;  %v998_v31 = vpop.f32.mrf.mxu0  ;;  %v1030_v33 = vpop.f32.mrf.mxu1 }
  0xef   :  { %827 = vst [vmem:[%s1713_s4 + $0x8] sm:$0xff] %v763_v23  ;;  %859 = vst [vmem:[%s1713_s4 + $0x108] sm:$0xff] %v795_v24  ;;  %v768_v35 = vmax.f32 %v704_v25, 0.0  ;;  %v407_v37 = vadd.f32 %v998_v31, %v1259_v40  ;;  %v535_v38 = vadd.f32 %v1030_v33, %v1259_v40  ;;  %v702_v39 = vadd.f32 %v638_v27, %v396_v29  ;;  %v643_v24 = vld [vmem:[%s1712_s3 + $0x48] sm:$0xff]  ;;  %v648_v29 = vld [vmem:[%s1712_s3 + $0x70] sm:$0xff] }
  0xf0   :  { %v800_v36 = vmax.f32 %v736_v26, 0.0  ;;  %v734_v41 = vadd.f32 %v670_v28, %v524_v30  ;;  %v398_v42 = vpop.f32.mrf.mxu0  ;;  %v526_v44 = vpop.f32.mrf.mxu1  ;;  %v675_v25 = vld [vmem:[%s1712_s3 + $0x148] sm:$0xff]  ;;  %v680_v31 = vld [vmem:[%s1712_s3 + $0x170] sm:$0xff] }
  0xf1   :  { %832 = vst [vmem:[%s1713_s4 + $0x30] sm:$0xff] %v768_v35  ;;  %v705_v46 = vadd.f32 %v641_v32, %v407_v37  ;;  %v737_v47 = vadd.f32 %v673_v34, %v535_v38  ;;  %v399_v48 = vadd.f32 %v1259_v40, %v398_v42  ;;  %v527_v49 = vadd.f32 %v1259_v40, %v526_v44  ;;  %v678_v42 = vld [vmem:[%s1712_s3 + $0x160] sm:$0xff] }
  0xf2   :  { %864 = vst [vmem:[%s1713_s4 + $0x130] sm:$0xff] %v800_v36  ;;  %v766_v50 = vmax.f32 %v702_v39, 0.0  ;;  %v798_v51 = vmax.f32 %v734_v41, 0.0  ;;  %v1001_v52 = vpop.f32.mrf.mxu0  ;;  %v1033_v53 = vpop.f32.mrf.mxu1  ;;  %v646_v39 = vld [vmem:[%s1712_s3 + $0x60] sm:$0xff] }
  0xf3   :  { %v769_v54 = vmax.f32 %v705_v46, 0.0  ;;  %v801_v55 = vmax.f32 %v737_v47, 0.0  ;;  %v703_v56 = vadd.f32 %v639_v43, %v399_v48  ;;  %v735_v57 = vadd.f32 %v671_v45, %v527_v49 }
  0xf4   :  { %830 = vst [vmem:[%s1713_s4 + $0x20] sm:$0xff] %v766_v50  ;;  %862 = vst [vmem:[%s1713_s4 + $0x120] sm:$0xff] %v798_v51  ;;  %v420_v60 = vadd.f32 %v1001_v52, %v1259_v40  ;;  %v548_v61 = vadd.f32 %v1033_v53, %v1259_v40  ;;  %v411_v62 = vpop.f32.mrf.mxu0  ;;  %v539_v0 = vpop.f32.mrf.mxu1 }
  0xf5   :  { %833 = vst [vmem:[%s1713_s4 + $0x38] sm:$0xff] %v769_v54  ;;  %865 = vst [vmem:[%s1713_s4 + $0x138] sm:$0xff] %v801_v55  ;;  %v767_v2 = vmax.f32 %v703_v56, 0.0  ;;  %v799_v3 = vmax.f32 %v735_v57, 0.0  ;;  %v412_v4 = vadd.f32 %v1259_v40, %v411_v62  ;;  %v540_v5 = vadd.f32 %v1259_v40, %v539_v0  ;;  %v649_v55 = vld [vmem:[%s1712_s3 + $0x78] sm:$0xff]  ;;  %v679_v62 = vld [vmem:[%s1712_s3 + $0x168] sm:$0xff] }
  0xf6   :  { %v708_v6 = vadd.f32 %v644_v58, %v420_v60  ;;  %v740_v7 = vadd.f32 %v676_v59, %v548_v61  ;;  %v1002_v8 = vpop.f32.mrf.mxu0  ;;  %v1034_v10 = vpop.f32.mrf.mxu1  ;;  %v681_v56 = vld [vmem:[%s1712_s3 + $0x178] sm:$0xff]  ;;  %v647_v60 = vld [vmem:[%s1712_s3 + $0x68] sm:$0xff] }
  0xf7   :  { %831 = vst [vmem:[%s1713_s4 + $0x28] sm:$0xff] %v767_v2  ;;  %863 = vst [vmem:[%s1713_s4 + $0x128] sm:$0xff] %v799_v3  ;;  %v706_v12 = vadd.f32 %v642_v63, %v412_v4  ;;  %v738_v13 = vadd.f32 %v674_v1, %v540_v5  ;;  %v423_v14 = vadd.f32 %v1002_v8, %v1259_v40  ;;  %v684_v8 = vld [vmem:[%s1712_s3 + $0x190] sm:$0xff] }
  0xf8   :  { %v551_v15 = vadd.f32 %v1034_v10, %v1259_v40  ;;  %v772_v16 = vmax.f32 %v708_v6, 0.0  ;;  %v804_v17 = vmax.f32 %v740_v7, 0.0  ;;  %v414_v18 = vpop.f32.mrf.mxu0  ;;  %v542_v19 = vpop.f32.mrf.mxu1  ;;  %v652_v6 = vld [vmem:[%s1712_s3 + $0x90] sm:$0xff] }
  0xf9   :  { %v770_v20 = vmax.f32 %v706_v12, 0.0  ;;  %v802_v21 = vmax.f32 %v738_v13, 0.0  ;;  %v709_v22 = vadd.f32 %v645_v9, %v423_v14  ;;  %v415_v26 = vadd.f32 %v1259_v40, %v414_v18 }
  0xfa   :  { %v741_v23 = vadd.f32 %v677_v11, %v551_v15  ;;  %836 = vst [vmem:[%s1713_s4 + $0x50] sm:$0xff] %v772_v16  ;;  %868 = vst [vmem:[%s1713_s4 + $0x150] sm:$0xff] %v804_v17  ;;  %v543_v27 = vadd.f32 %v1259_v40, %v542_v19  ;;  %v1005_v28 = vpop.f32.mrf.mxu0  ;;  %v1037_v30 = vpop.f32.mrf.mxu1 }
  0xfb   :  { %834 = vst [vmem:[%s1713_s4 + $0x40] sm:$0xff] %v770_v20  ;;  %866 = vst [vmem:[%s1713_s4 + $0x140] sm:$0xff] %v802_v21  ;;  %v773_v32 = vmax.f32 %v709_v22, 0.0  ;;  %v436_v34 = vadd.f32 %v1005_v28, %v1259_v40  ;;  %v564_v35 = vadd.f32 %v1037_v30, %v1259_v40  ;;  %v707_v36 = vadd.f32 %v643_v24, %v415_v26  ;;  %v650_v21 = vld [vmem:[%s1712_s3 + $0x80] sm:$0xff]  ;;  %v653_v26 = vld [vmem:[%s1712_s3 + $0x98] sm:$0xff] }
  0xfc   :  { %v805_v33 = vmax.f32 %v741_v23, 0.0  ;;  %v739_v37 = vadd.f32 %v675_v25, %v543_v27  ;;  %v427_v38 = vpop.f32.mrf.mxu0  ;;  %v555_v41 = vpop.f32.mrf.mxu1  ;;  %v682_v22 = vld [vmem:[%s1712_s3 + $0x180] sm:$0xff]  ;;  %v685_v28 = vld [vmem:[%s1712_s3 + $0x198] sm:$0xff] }
  0xfd   :  { %837 = vst [vmem:[%s1713_s4 + $0x58] sm:$0xff] %v773_v32  ;;  %v712_v43 = vadd.f32 %v648_v29, %v436_v34  ;;  %v744_v44 = vadd.f32 %v680_v31, %v564_v35  ;;  %v428_v45 = vadd.f32 %v1259_v40, %v427_v38  ;;  %v556_v46 = vadd.f32 %v1259_v40, %v555_v41  ;;  %v683_v38 = vld [vmem:[%s1712_s3 + $0x188] sm:$0xff] }
  0xfe   :  { %869 = vst [vmem:[%s1713_s4 + $0x158] sm:$0xff] %v805_v33  ;;  %v771_v47 = vmax.f32 %v707_v36, 0.0  ;;  %v803_v48 = vmax.f32 %v739_v37, 0.0  ;;  %v1006_v49 = vpop.f32.mrf.mxu0  ;;  %v1038_v50 = vpop.f32.mrf.mxu1  ;;  %v651_v36 = vld [vmem:[%s1712_s3 + $0x88] sm:$0xff] }
  0xff   :  { %v776_v51 = vmax.f32 %v712_v43, 0.0  ;;  %v808_v52 = vmax.f32 %v744_v44, 0.0  ;;  %v710_v53 = vadd.f32 %v646_v39, %v428_v45  ;;  %v742_v54 = vadd.f32 %v678_v42, %v556_v46 }
 0x100   :  { %835 = vst [vmem:[%s1713_s4 + $0x48] sm:$0xff] %v771_v47  ;;  %867 = vst [vmem:[%s1713_s4 + $0x148] sm:$0xff] %v803_v48  ;;  %v439_v57 = vadd.f32 %v1006_v49, %v1259_v40  ;;  %v567_v58 = vadd.f32 %v1038_v50, %v1259_v40  ;;  %v430_v59 = vpop.f32.mrf.mxu0  ;;  %v558_v61 = vpop.f32.mrf.mxu1 }
 0x101   :  { %840 = vst [vmem:[%s1713_s4 + $0x70] sm:$0xff] %v776_v51  ;;  %872 = vst [vmem:[%s1713_s4 + $0x170] sm:$0xff] %v808_v52  ;;  %v774_v63 = vmax.f32 %v710_v53, 0.0  ;;  %v806_v0 = vmax.f32 %v742_v54, 0.0  ;;  %v431_v1 = vadd.f32 %v1259_v40, %v430_v59  ;;  %v559_v2 = vadd.f32 %v1259_v40, %v558_v61  ;;  %v656_v52 = vld [vmem:[%s1712_s3 + $0xb0] sm:$0xff]  ;;  %v686_v59 = vld [vmem:[%s1712_s3 + $0x1a0] sm:$0xff] }
 0x102   :  { %v713_v3 = vadd.f32 %v649_v55, %v439_v57  ;;  %v745_v4 = vadd.f32 %v681_v56, %v567_v58  ;;  %v1009_v5 = vpop.f32.mrf.mxu0  ;;  %v1041_v7 = vpop.f32.mrf.mxu1  ;;  %v688_v53 = vld [vmem:[%s1712_s3 + $0x1b0] sm:$0xff]  ;;  %v654_v57 = vld [vmem:[%s1712_s3 + $0xa0] sm:$0xff] }
 0x103   :  { %838 = vst [vmem:[%s1713_s4 + $0x60] sm:$0xff] %v774_v63  ;;  %870 = vst [vmem:[%s1713_s4 + $0x160] sm:$0xff] %v806_v0  ;;  %v711_v9 = vadd.f32 %v647_v60, %v431_v1  ;;  %v743_v10 = vadd.f32 %v679_v62, %v559_v2  ;;  %v452_v11 = vadd.f32 %v1009_v5, %v1259_v40  ;;  %v689_v5 = vld [vmem:[%s1712_s3 + $0x1b8] sm:$0xff] }
 0x104   :  { %v580_v12 = vadd.f32 %v1041_v7, %v1259_v40  ;;  %v777_v13 = vmax.f32 %v713_v3, 0.0  ;;  %v809_v14 = vmax.f32 %v745_v4, 0.0  ;;  %v443_v15 = vpop.f32.mrf.mxu0  ;;  %v571_v16 = vpop.f32.mrf.mxu1  ;;  %v657_v3 = vld [vmem:[%s1712_s3 + $0xb8] sm:$0xff] }
 0x105   :  { %v775_v17 = vmax.f32 %v711_v9, 0.0  ;;  %v807_v18 = vmax.f32 %v743_v10, 0.0  ;;  %v716_v19 = vadd.f32 %v652_v6, %v452_v11  ;;  %v444_v23 = vadd.f32 %v1259_v40, %v443_v15 }
 0x106   :  { %v748_v20 = vadd.f32 %v684_v8, %v580_v12  ;;  %841 = vst [vmem:[%s1713_s4 + $0x78] sm:$0xff] %v777_v13  ;;  %873 = vst [vmem:[%s1713_s4 + $0x178] sm:$0xff] %v809_v14  ;;  %v572_v24 = vadd.f32 %v1259_v40, %v571_v16  ;;  %v1010_v25 = vpop.f32.mrf.mxu0  ;;  %v1042_v27 = vpop.f32.mrf.mxu1 }
 0x107   :  { %839 = vst [vmem:[%s1713_s4 + $0x68] sm:$0xff] %v775_v17  ;;  %871 = vst [vmem:[%s1713_s4 + $0x168] sm:$0xff] %v807_v18  ;;  %v780_v29 = vmax.f32 %v716_v19, 0.0  ;;  %v455_v31 = vadd.f32 %v1010_v25, %v1259_v40  ;;  %v583_v32 = vadd.f32 %v1042_v27, %v1259_v40  ;;  %v714_v33 = vadd.f32 %v650_v21, %v444_v23  ;;  %v655_v18 = vld [vmem:[%s1712_s3 + $0xa8] sm:$0xff]  ;;  %v660_v23 = vld [vmem:[%s1712_s3 + $0xd0] sm:$0xff] }
 0x108   :  { %v812_v30 = vmax.f32 %v748_v20, 0.0  ;;  %v746_v34 = vadd.f32 %v682_v22, %v572_v24  ;;  %v446_v35 = vpop.f32.mrf.mxu0  ;;  %v574_v37 = vpop.f32.mrf.mxu1  ;;  %v687_v19 = vld [vmem:[%s1712_s3 + $0x1a8] sm:$0xff]  ;;  %v692_v25 = vld [vmem:[%s1712_s3 + $0x1d0] sm:$0xff] }
 0x109   :  { %844 = vst [vmem:[%s1713_s4 + $0x90] sm:$0xff] %v780_v29  ;;  %v717_v39 = vadd.f32 %v653_v26, %v455_v31  ;;  %v749_v41 = vadd.f32 %v685_v28, %v583_v32  ;;  %v447_v42 = vadd.f32 %v1259_v40, %v446_v35  ;;  %v575_v43 = vadd.f32 %v1259_v40, %v574_v37  ;;  %v690_v35 = vld [vmem:[%s1712_s3 + $0x1c0] sm:$0xff] }
 0x10a   :  { %876 = vst [vmem:[%s1713_s4 + $0x190] sm:$0xff] %v812_v30  ;;  %v778_v44 = vmax.f32 %v714_v33, 0.0  ;;  %v810_v45 = vmax.f32 %v746_v34, 0.0  ;;  %v1013_v46 = vpop.f32.mrf.mxu0  ;;  %v1045_v47 = vpop.f32.mrf.mxu1  ;;  %v658_v33 = vld [vmem:[%s1712_s3 + $0xc0] sm:$0xff] }
 0x10b   :  { %v781_v48 = vmax.f32 %v717_v39, 0.0  ;;  %v813_v49 = vmax.f32 %v749_v41, 0.0  ;;  %v715_v50 = vadd.f32 %v651_v36, %v447_v42  ;;  %v747_v51 = vadd.f32 %v683_v38, %v575_v43 }
 0x10c   :  { %842 = vst [vmem:[%s1713_s4 + $0x80] sm:$0xff] %v778_v44  ;;  %874 = vst [vmem:[%s1713_s4 + $0x180] sm:$0xff] %v810_v45  ;;  %v468_v54 = vadd.f32 %v1013_v46, %v1259_v40  ;;  %v596_v55 = vadd.f32 %v1045_v47, %v1259_v40  ;;  %v459_v56 = vpop.f32.mrf.mxu0  ;;  %v587_v58 = vpop.f32.mrf.mxu1 }
 0x10d   :  { %845 = vst [vmem:[%s1713_s4 + $0x98] sm:$0xff] %v781_v48  ;;  %877 = vst [vmem:[%s1713_s4 + $0x198] sm:$0xff] %v813_v49  ;;  %v779_v60 = vmax.f32 %v715_v50, 0.0  ;;  %v811_v61 = vmax.f32 %v747_v51, 0.0  ;;  %v460_v62 = vadd.f32 %v1259_v40, %v459_v56  ;;  %v588_v63 = vadd.f32 %v1259_v40, %v587_v58  ;;  %v661_v49 = vld [vmem:[%s1712_s3 + $0xd8] sm:$0xff]  ;;  %v691_v56 = vld [vmem:[%s1712_s3 + $0x1c8] sm:$0xff] }
 0x10e   :  { %v720_v0 = vadd.f32 %v656_v52, %v468_v54  ;;  %v752_v1 = vadd.f32 %v688_v53, %v596_v55  ;;  %v1014_v2 = vpop.f32.mrf.mxu0  ;;  %v1046_v4 = vpop.f32.mrf.mxu1  ;;  %v693_v50 = vld [vmem:[%s1712_s3 + $0x1d8] sm:$0xff]  ;;  %v659_v54 = vld [vmem:[%s1712_s3 + $0xc8] sm:$0xff] }
 0x10f   :  { %843 = vst [vmem:[%s1713_s4 + $0x88] sm:$0xff] %v779_v60  ;;  %875 = vst [vmem:[%s1713_s4 + $0x188] sm:$0xff] %v811_v61  ;;  %v718_v6 = vadd.f32 %v654_v57, %v460_v62  ;;  %v750_v7 = vadd.f32 %v686_v59, %v588_v63  ;;  %v471_v8 = vadd.f32 %v1014_v2, %v1259_v40  ;;  %v696_v2 = vld [vmem:[%s1712_s3 + $0x1f0] sm:$0xff] }
 0x110   :  { %v599_v9 = vadd.f32 %v1046_v4, %v1259_v40  ;;  %v784_v10 = vmax.f32 %v720_v0, 0.0  ;;  %v816_v11 = vmax.f32 %v752_v1, 0.0  ;;  %v462_v12 = vpop.f32.mrf.mxu0  ;;  %v590_v13 = vpop.f32.mrf.mxu1  ;;  %v664_v0 = vld [vmem:[%s1712_s3 + $0xf0] sm:$0xff] }
 0x111   :  { %v782_v14 = vmax.f32 %v718_v6, 0.0  ;;  %v814_v15 = vmax.f32 %v750_v7, 0.0  ;;  %v721_v16 = vadd.f32 %v657_v3, %v471_v8  ;;  %v463_v20 = vadd.f32 %v1259_v40, %v462_v12 }
 0x112   :  { %v753_v17 = vadd.f32 %v689_v5, %v599_v9  ;;  %848 = vst [vmem:[%s1713_s4 + $0xb0] sm:$0xff] %v784_v10  ;;  %880 = vst [vmem:[%s1713_s4 + $0x1b0] sm:$0xff] %v816_v11  ;;  %v591_v21 = vadd.f32 %v1259_v40, %v590_v13  ;;  %v1017_v22 = vpop.f32.mrf.mxu0  ;;  %v1049_v24 = vpop.f32.mrf.mxu1 }
 0x113   :  { %846 = vst [vmem:[%s1713_s4 + $0xa0] sm:$0xff] %v782_v14  ;;  %878 = vst [vmem:[%s1713_s4 + $0x1a0] sm:$0xff] %v814_v15  ;;  %v785_v26 = vmax.f32 %v721_v16, 0.0  ;;  %v484_v28 = vadd.f32 %v1017_v22, %v1259_v40  ;;  %v612_v29 = vadd.f32 %v1049_v24, %v1259_v40  ;;  %v719_v30 = vadd.f32 %v655_v18, %v463_v20  ;;  %v662_v15 = vld [vmem:[%s1712_s3 + $0xe0] sm:$0xff]  ;;  %v665_v20 = vld [vmem:[%s1712_s3 + $0xf8] sm:$0xff] }
 0x114   :  { %v817_v27 = vmax.f32 %v753_v17, 0.0  ;;  %v751_v31 = vadd.f32 %v687_v19, %v591_v21  ;;  %v475_v32 = vpop.f32.mrf.mxu0  ;;  %v603_v34 = vpop.f32.mrf.mxu1  ;;  %v694_v16 = vld [vmem:[%s1712_s3 + $0x1e0] sm:$0xff]  ;;  %v697_v22 = vld [vmem:[%s1712_s3 + $0x1f8] sm:$0xff] }
 0x115   :  { %849 = vst [vmem:[%s1713_s4 + $0xb8] sm:$0xff] %v785_v26  ;;  %v724_v36 = vadd.f32 %v660_v23, %v484_v28  ;;  %v756_v37 = vadd.f32 %v692_v25, %v612_v29  ;;  %v476_v38 = vadd.f32 %v1259_v40, %v475_v32  ;;  %v604_v39 = vadd.f32 %v1259_v40, %v603_v34  ;;  %v695_v32 = vld [vmem:[%s1712_s3 + $0x1e8] sm:$0xff] }
 0x116   :  { %881 = vst [vmem:[%s1713_s4 + $0x1b8] sm:$0xff] %v817_v27  ;;  %v783_v41 = vmax.f32 %v719_v30, 0.0  ;;  %v815_v42 = vmax.f32 %v751_v31, 0.0  ;;  %v1018_v43 = vpop.f32.mrf.mxu0  ;;  %v1050_v44 = vpop.f32.mrf.mxu1  ;;  %v663_v30 = vld [vmem:[%s1712_s3 + $0xe8] sm:$0xff] }
 0x117   :  { %v788_v45 = vmax.f32 %v724_v36, 0.0  ;;  %v820_v46 = vmax.f32 %v756_v37, 0.0  ;;  %v722_v47 = vadd.f32 %v658_v33, %v476_v38  ;;  %v754_v48 = vadd.f32 %v690_v35, %v604_v39 }
 0x118   :  { %847 = vst [vmem:[%s1713_s4 + $0xa8] sm:$0xff] %v783_v41  ;;  %879 = vst [vmem:[%s1713_s4 + $0x1a8] sm:$0xff] %v815_v42  ;;  %v487_v51 = vadd.f32 %v1018_v43, %v1259_v40  ;;  %v615_v52 = vadd.f32 %v1050_v44, %v1259_v40  ;;  %v478_v53 = vpop.f32.mrf.mxu0  ;;  %v606_v55 = vpop.f32.mrf.mxu1 }
 0x119   :  { %852 = vst [vmem:[%s1713_s4 + $0xd0] sm:$0xff] %v788_v45  ;;  %884 = vst [vmem:[%s1713_s4 + $0x1d0] sm:$0xff] %v820_v46  ;;  %v786_v57 = vmax.f32 %v722_v47, 0.0  ;;  %v818_v58 = vmax.f32 %v754_v48, 0.0  ;;  %v479_v59 = vadd.f32 %v1259_v40, %v478_v53  ;;  %v607_v60 = vadd.f32 %v1259_v40, %v606_v55 }
 0x11a   :  { %v725_v61 = vadd.f32 %v661_v49, %v487_v51  ;;  %v757_v62 = vadd.f32 %v693_v50, %v615_v52  ;;  %v1021_v63 = vpop.f32.mrf.mxu0  ;;  %v1053_v1 = vpop.f32.mrf.mxu1 }
 0x11b   :  { %850 = vst [vmem:[%s1713_s4 + $0xc0] sm:$0xff] %v786_v57  ;;  %882 = vst [vmem:[%s1713_s4 + $0x1c0] sm:$0xff] %v818_v58  ;;  %v723_v3 = vadd.f32 %v659_v54, %v479_v59  ;;  %v755_v4 = vadd.f32 %v691_v56, %v607_v60  ;;  %v500_v5 = vadd.f32 %v1021_v63, %v1259_v40 }
 0x11c   :  { %v628_v6 = vadd.f32 %v1053_v1, %v1259_v40  ;;  %v789_v7 = vmax.f32 %v725_v61, 0.0  ;;  %v821_v8 = vmax.f32 %v757_v62, 0.0  ;;  %v491_v9 = vpop.f32.mrf.mxu0  ;;  %v619_v10 = vpop.f32.mrf.mxu1 }
 0x11d   :  { %v787_v11 = vmax.f32 %v723_v3, 0.0  ;;  %v819_v12 = vmax.f32 %v755_v4, 0.0  ;;  %v728_v13 = vadd.f32 %v664_v0, %v500_v5  ;;  %v492_v17 = vadd.f32 %v1259_v40, %v491_v9 }
 0x11e   :  { %v760_v14 = vadd.f32 %v696_v2, %v628_v6  ;;  %853 = vst [vmem:[%s1713_s4 + $0xd8] sm:$0xff] %v789_v7  ;;  %885 = vst [vmem:[%s1713_s4 + $0x1d8] sm:$0xff] %v821_v8  ;;  %v620_v18 = vadd.f32 %v1259_v40, %v619_v10  ;;  %v1022_v19 = vpop.f32.mrf.mxu0  ;;  %v1054_v21 = vpop.f32.mrf.mxu1 }
 0x11f   :  { %851 = vst [vmem:[%s1713_s4 + $0xc8] sm:$0xff] %v787_v11  ;;  %883 = vst [vmem:[%s1713_s4 + $0x1c8] sm:$0xff] %v819_v12  ;;  %v792_v23 = vmax.f32 %v728_v13, 0.0  ;;  %v503_v25 = vadd.f32 %v1022_v19, %v1259_v40  ;;  %v631_v26 = vadd.f32 %v1054_v21, %v1259_v40  ;;  %v726_v27 = vadd.f32 %v662_v15, %v492_v17 }
 0x120   :  { %v824_v24 = vmax.f32 %v760_v14, 0.0  ;;  %v758_v28 = vadd.f32 %v694_v16, %v620_v18  ;;  %v494_v29 = vpop.f32.mrf.mxu0  ;;  %v622_v31 = vpop.f32.mrf.mxu1 }
 0x121   :  { %856 = vst [vmem:[%s1713_s4 + $0xf0] sm:$0xff] %v792_v23  ;;  %v729_v33 = vadd.f32 %v665_v20, %v503_v25  ;;  %v761_v34 = vadd.f32 %v697_v22, %v631_v26  ;;  %v495_v35 = vadd.f32 %v1259_v40, %v494_v29  ;;  %v623_v36 = vadd.f32 %v1259_v40, %v622_v31 }
 0x122   :  { %888 = vst [vmem:[%s1713_s4 + $0x1f0] sm:$0xff] %v824_v24  ;;  %v790_v37 = vmax.f32 %v726_v27, 0.0  ;;  %v822_v38 = vmax.f32 %v758_v28, 0.0 }
 0x123   :  { %v793_v39 = vmax.f32 %v729_v33, 0.0  ;;  %v825_v41 = vmax.f32 %v761_v34, 0.0  ;;  %v727_v42 = vadd.f32 %v663_v30, %v495_v35  ;;  %v759_v43 = vadd.f32 %v695_v32, %v623_v36 }
 0x124   :  { %854 = vst [vmem:[%s1713_s4 + $0xe0] sm:$0xff] %v790_v37  ;;  %886 = vst [vmem:[%s1713_s4 + $0x1e0] sm:$0xff] %v822_v38 }
 0x125   :  { %857 = vst [vmem:[%s1713_s4 + $0xf8] sm:$0xff] %v793_v39  ;;  %889 = vst [vmem:[%s1713_s4 + $0x1f8] sm:$0xff] %v825_v41  ;;  %v791_v40 = vmax.f32 %v727_v42, 0.0  ;;  %v823_v44 = vmax.f32 %v759_v43, 0.0 }
 0x127   :  { %855 = vst [vmem:[%s1713_s4 + $0xe8] sm:$0xff] %v791_v40  ;;  %887 = vst [vmem:[%s1713_s4 + $0x1e8] sm:$0xff] %v823_v44 }

// kernel: _lambda_.26
= control target key start
LH: loop header
LB: loop body
LE: loop exit
PB: predicated region body
PF: predicated region fallthrough
CT: control target
= control target key end

     0   :  { %s605_s1 = inlined_call_operand.vmem [shape: bf16[128,128], index: 1, kind: input, shape index: {}]   ;;  %s606_s0 = inlined_call_operand.vmem [shape: bf16[128,128], index: 0, kind: input, shape index: {}]   ;;  %s607_s2 = inlined_call_operand.vmem [shape: f32[1,128], index: 2, kind: input, shape index: {}]   ;;  %s608_s3 = inlined_call_operand.vmem [shape: f32[128,128], index: 3, kind: input, shape index: {}]   ;;  %s609_s4 = inlined_call_operand.vmem [shape: f32[128,128], index: 4, kind: output, shape index: {}]  }
   0x1   :  { %v399_v0 = vld [vmem:[%s605_s1 + $0x38] sm:$0xff]   ;;  %v400_v1 = vld [vmem:[%s605_s1 + $0x30] sm:$0xff]   ;;  %v401_v2 = vld [vmem:[%s605_s1 + $0x28] sm:$0xff]  }
   0x2   :  { %351 = vmatprep.subr.bf16.mxu0 %v399_v0  ;;  %383 = vmatprep.subr.bf16.mxu1 %v399_v0  ;;  %v402_v3 = vld [vmem:[%s605_s1 + $0x20] sm:$0xff]   ;;  %v403_v6 = vld [vmem:[%s605_s1 + $0x18] sm:$0xff]   ;;  %v404_v7 = vld [vmem:[%s605_s1 + $0x10] sm:$0xff]  }
   0x3   :  { %352 = vmatpush3.bf16.msra.mxu0 %v399_v0  ;;  %391 = vmatpush3.bf16.msra.mxu1 %v399_v0  ;;  %v407_v4 = vld [vmem:[%s606_s0] sm:$0xff]   ;;  %v405_v8 = vld [vmem:[%s605_s1 + $0x8] sm:$0xff]   ;;  %v411_v12 = vld [vmem:[%s606_s0 + $0x10] sm:$0xff]  }
   0x4   :  { %353 = vmatprep.subr.bf16.mxu0 %v400_v1  ;;  %384 = vmatprep.subr.bf16.mxu1 %v400_v1  ;;  %v408_v5 = vld [vmem:[%s606_s0 + $0x20] sm:$0xff]   ;;  %v409_v10 = vld [vmem:[%s606_s0 + $0x8] sm:$0xff]   ;;  %v412_v13 = vld [vmem:[%s606_s0 + $0x30] sm:$0xff]  }
   0x5   :  { %367 = vmatprep.mubr.bf16.mxu0 %v407_v4  ;;  %375 = vmatprep.mubr.bf16.mxu1 %v408_v5  ;;  %v406_v9 = vld [vmem:[%s605_s1] sm:$0xff]   ;;  %v410_v11 = vld [vmem:[%s606_s0 + $0x28] sm:$0xff]   ;;  %v413_v14 = vld [vmem:[%s606_s0 + $0x18] sm:$0xff]  }
   0x6   :  { %v414_v15 = vld [vmem:[%s606_s0 + $0x38] sm:$0xff]   ;;  %v491_v16 = vld [vmem:[%s607_s2] ss:$0 sm:$0xff]  ;;  %v252_v18 = vld [vmem:[%s608_s3 + $0x10] sm:$0xff] }
   0x7   :  { %354 = vmatpush3.bf16.msra.mxu0 %v400_v1  ;;  %392 = vmatpush3.bf16.msra.mxu1 %v400_v1  ;;  %v260_v20 = vld [vmem:[%s608_s3 + $0x50] sm:$0xff]  ;;  %v250_v24 = vld [vmem:[%s608_s3] sm:$0xff]  ;;  %v253_v37 = vld [vmem:[%s608_s3 + $0x18] sm:$0xff] }
   0x8   :  { %355 = vmatprep.subr.bf16.mxu0 %v401_v2  ;;  %385 = vmatprep.subr.bf16.mxu1 %v401_v2  ;;  %v258_v26 = vld [vmem:[%s608_s3 + $0x40] sm:$0xff]  ;;  %v261_v38 = vld [vmem:[%s608_s3 + $0x58] sm:$0xff]  ;;  %v251_v42 = vld [vmem:[%s608_s3 + $0x8] sm:$0xff] }
   0x9   :  { %v259_v44 = vld [vmem:[%s608_s3 + $0x48] sm:$0xff]  ;;  %v256_v52 = vld [vmem:[%s608_s3 + $0x30] sm:$0xff]  ;;  %v262_v4 = vld [vmem:[%s608_s3 + $0x60] sm:$0xff] }
   0xa   :  { %v264_v54 = vld [vmem:[%s608_s3 + $0x70] sm:$0xff] }
   0xb   :  { %356 = vmatpush3.bf16.msra.mxu0 %v401_v2  ;;  %393 = vmatpush3.bf16.msra.mxu1 %v401_v2 }
   0xc   :  { %357 = vmatprep.subr.bf16.mxu0 %v402_v3  ;;  %386 = vmatprep.subr.bf16.mxu1 %v402_v3 }
   0xf   :  { %358 = vmatpush3.bf16.msra.mxu0 %v402_v3  ;;  %394 = vmatpush3.bf16.msra.mxu1 %v402_v3  ;;  %v254_v3 = vld [vmem:[%s608_s3 + $0x20] sm:$0xff] }
  0x10   :  { %359 = vmatprep.subr.bf16.mxu0 %v403_v6  ;;  %387 = vmatprep.subr.bf16.mxu1 %v403_v6 }
  0x13   :  { %360 = vmatpush3.bf16.msra.mxu0 %v403_v6  ;;  %395 = vmatpush3.bf16.msra.mxu1 %v403_v6 }
  0x14   :  { %361 = vmatprep.subr.bf16.mxu0 %v404_v7  ;;  %388 = vmatprep.subr.bf16.mxu1 %v404_v7 }
  0x17   :  { %362 = vmatpush3.bf16.msra.mxu0 %v404_v7  ;;  %396 = vmatpush3.bf16.msra.mxu1 %v404_v7 }
  0x18   :  { %363 = vmatprep.subr.bf16.mxu0 %v405_v8  ;;  %389 = vmatprep.subr.bf16.mxu1 %v405_v8 }
  0x1b   :  { %364 = vmatpush3.bf16.msra.mxu0 %v405_v8  ;;  %397 = vmatpush3.bf16.msra.mxu1 %v405_v8  ;;  %v257_v8 = vld [vmem:[%s608_s3 + $0x38] sm:$0xff] }
  0x1c   :  { %365 = vmatprep.subr.bf16.mxu0 %v406_v9  ;;  %390 = vmatprep.subr.bf16.mxu1 %v406_v9 }
  0x1f   :  { %366 = vmatpush3.bf16.msra.mxu0 %v406_v9  ;;  %398 = vmatpush3.bf16.msra.mxu1 %v406_v9 }
  0x22   :  { %368 = vmatmul.mubr.bf16.vlgmr.msra.gmra.mxu0 %v409_v10  ;;  %376 = vmatmul.mubr.bf16.vlgmr.msra.gmra.mxu1 %v410_v11  ;;  %v265_v10 = vld [vmem:[%s608_s3 + $0x78] sm:$0xff] }
  0x23   :  { %371 = vmatprep.mubr.bf16.mxu0 %v411_v12  ;;  %379 = vmatprep.mubr.bf16.mxu1 %v412_v13 }
  0x2a   :  { %372 = vmatmul.mubr.bf16.gmra.mxu0 %v413_v14  ;;  %380 = vmatmul.mubr.bf16.gmra.mxu1 %v414_v15 }
  0xe2   :  { %v369_v17 = vpop.f32.mrf.mxu0  ;;  %v377_v19 = vpop.f32.mrf.mxu1 }
  0xe3   :  { %v196_v21 = vadd.f32 %v369_v17, %v491_v16  ;;  %v228_v22 = vadd.f32 %v377_v19, %v491_v16  ;;  %v255_v19 = vld [vmem:[%s608_s3 + $0x28] sm:$0xff] }
  0xe4   :  { %v187_v23 = vpop.f32.mrf.mxu0  ;;  %v219_v25 = vpop.f32.mrf.mxu1 }
  0xe5   :  { %v268_v27 = vadd.f32 %v252_v18, %v196_v21  ;;  %v276_v28 = vadd.f32 %v260_v20, %v228_v22  ;;  %v188_v29 = vadd.f32 %v491_v16, %v187_v23  ;;  %v220_v30 = vadd.f32 %v491_v16, %v219_v25  ;;  %v263_v21 = vld [vmem:[%s608_s3 + $0x68] sm:$0xff] }
  0xe6   :  { %v370_v31 = vpop.f32.mrf.mxu0  ;;  %v378_v32 = vpop.f32.mrf.mxu1 }
  0xe7   :  { %v284_v33 = vmax.f32 %v268_v27, 0.0  ;;  %v292_v34 = vmax.f32 %v276_v28, 0.0  ;;  %v266_v35 = vadd.f32 %v250_v24, %v188_v29  ;;  %v274_v36 = vadd.f32 %v258_v26, %v220_v30 }
  0xe8   :  { %v199_v39 = vadd.f32 %v370_v31, %v491_v16  ;;  %v231_v40 = vadd.f32 %v378_v32, %v491_v16  ;;  %v190_v41 = vpop.f32.mrf.mxu0  ;;  %v222_v43 = vpop.f32.mrf.mxu1 }
  0xe9   :  { %300 = vst [vmem:[%s609_s4 + $0x10] sm:$0xff] %v284_v33  ;;  %308 = vst [vmem:[%s609_s4 + $0x50] sm:$0xff] %v292_v34  ;;  %v282_v45 = vmax.f32 %v266_v35, 0.0  ;;  %v290_v46 = vmax.f32 %v274_v36, 0.0  ;;  %v191_v47 = vadd.f32 %v491_v16, %v190_v41  ;;  %v223_v48 = vadd.f32 %v491_v16, %v222_v43 }
  0xea   :  { %v269_v49 = vadd.f32 %v253_v37, %v199_v39  ;;  %v277_v50 = vadd.f32 %v261_v38, %v231_v40  ;;  %v373_v51 = vpop.f32.mrf.mxu0  ;;  %v381_v53 = vpop.f32.mrf.mxu1 }
  0xeb   :  { %298 = vst [vmem:[%s609_s4] sm:$0xff] %v282_v45  ;;  %306 = vst [vmem:[%s609_s4 + $0x40] sm:$0xff] %v290_v46  ;;  %v267_v55 = vadd.f32 %v251_v42, %v191_v47  ;;  %v275_v56 = vadd.f32 %v259_v44, %v223_v48  ;;  %v212_v57 = vadd.f32 %v373_v51, %v491_v16 }
  0xec   :  { %v244_v58 = vadd.f32 %v381_v53, %v491_v16  ;;  %v285_v59 = vmax.f32 %v269_v49, 0.0  ;;  %v293_v60 = vmax.f32 %v277_v50, 0.0  ;;  %v203_v61 = vpop.f32.mrf.mxu0  ;;  %v235_v62 = vpop.f32.mrf.mxu1 }
  0xed   :  { %v283_v63 = vmax.f32 %v267_v55, 0.0  ;;  %v291_v0 = vmax.f32 %v275_v56, 0.0  ;;  %v272_v1 = vadd.f32 %v256_v52, %v212_v57  ;;  %v204_v5 = vadd.f32 %v491_v16, %v203_v61 }
  0xee   :  { %v280_v2 = vadd.f32 %v264_v54, %v244_v58  ;;  %301 = vst [vmem:[%s609_s4 + $0x18] sm:$0xff] %v285_v59  ;;  %309 = vst [vmem:[%s609_s4 + $0x58] sm:$0xff] %v293_v60  ;;  %v236_v6 = vadd.f32 %v491_v16, %v235_v62  ;;  %v374_v7 = vpop.f32.mrf.mxu0  ;;  %v382_v9 = vpop.f32.mrf.mxu1 }
  0xef   :  { %299 = vst [vmem:[%s609_s4 + $0x8] sm:$0xff] %v283_v63  ;;  %307 = vst [vmem:[%s609_s4 + $0x48] sm:$0xff] %v291_v0  ;;  %v288_v11 = vmax.f32 %v272_v1, 0.0  ;;  %v215_v13 = vadd.f32 %v374_v7, %v491_v16  ;;  %v247_v14 = vadd.f32 %v382_v9, %v491_v16  ;;  %v270_v15 = vadd.f32 %v254_v3, %v204_v5 }
  0xf0   :  { %v296_v12 = vmax.f32 %v280_v2, 0.0  ;;  %v278_v17 = vadd.f32 %v262_v4, %v236_v6  ;;  %v206_v18 = vpop.f32.mrf.mxu0  ;;  %v238_v20 = vpop.f32.mrf.mxu1 }
  0xf1   :  { %304 = vst [vmem:[%s609_s4 + $0x30] sm:$0xff] %v288_v11  ;;  %v273_v22 = vadd.f32 %v257_v8, %v215_v13  ;;  %v281_v23 = vadd.f32 %v265_v10, %v247_v14  ;;  %v207_v24 = vadd.f32 %v491_v16, %v206_v18  ;;  %v239_v25 = vadd.f32 %v491_v16, %v238_v20 }
  0xf2   :  { %312 = vst [vmem:[%s609_s4 + $0x70] sm:$0xff] %v296_v12  ;;  %v286_v26 = vmax.f32 %v270_v15, 0.0  ;;  %v294_v27 = vmax.f32 %v278_v17, 0.0 }
  0xf3   :  { %v289_v28 = vmax.f32 %v273_v22, 0.0  ;;  %v297_v29 = vmax.f32 %v281_v23, 0.0  ;;  %v271_v30 = vadd.f32 %v255_v19, %v207_v24  ;;  %v279_v31 = vadd.f32 %v263_v21, %v239_v25 }
  0xf4   :  { %302 = vst [vmem:[%s609_s4 + $0x20] sm:$0xff] %v286_v26  ;;  %310 = vst [vmem:[%s609_s4 + $0x60] sm:$0xff] %v294_v27 }
  0xf5   :  { %305 = vst [vmem:[%s609_s4 + $0x38] sm:$0xff] %v289_v28  ;;  %313 = vst [vmem:[%s609_s4 + $0x78] sm:$0xff] %v297_v29  ;;  %v287_v16 = vmax.f32 %v271_v30, 0.0  ;;  %v295_v32 = vmax.f32 %v279_v31, 0.0 }
  0xf7   :  { %303 = vst [vmem:[%s609_s4 + $0x28] sm:$0xff] %v287_v16  ;;  %311 = vst [vmem:[%s609_s4 + $0x68] sm:$0xff] %v295_v32 }

// kernel: _lambda_.29
= control target key start
LH: loop header
LB: loop body
LE: loop exit
PB: predicated region body
PF: predicated region fallthrough
CT: control target
= control target key end

     0   :  { %v265_v1 = vmov 0   ;;  %v37_v19 = vlaneseq  ;;  %s367_s1 = inlined_call_operand.vmem [shape: bf16[128,256], index: 1, kind: input, shape index: {}]   ;;  %s368_s0 = inlined_call_operand.vmem [shape: bf16[32,128], index: 0, kind: input, shape index: {}]   ;;  %s369_s2 = inlined_call_operand.vmem [shape: f32[1,256], index: 2, kind: input, shape index: {}]   ;;  %s370_s3 = inlined_call_operand.vmem [shape: f32[32,256], index: 3, kind: output, shape index: {}]  }
   0x1   :  { %v239_v0 = vld [vmem:[%s367_s1 + $0x74] ss:$8 sps:$4 sm:$0xff]   ;;  %171 = vmatprep.mubr.bf16.mxu0 %v265_v1  ;;  %181 = vmatprep.mubr.bf16.mxu1 %v265_v1  ;;  %v241_v2 = vld [vmem:[%s367_s1 + $0x70] ss:$8 sps:$4 sm:$0xff]   ;;  %v242_v3 = vld [vmem:[%s367_s1 + $0x64] ss:$8 sps:$4 sm:$0xff]  }
   0x2   :  { %139 = vmatprep.subr.bf16.mxu0 %v239_v0  ;;  %222 = vmatprep.subr.bf16.mxu1 %v239_v0  ;;  %v244_v4 = vld [vmem:[%s367_s1 + $0x60] ss:$8 sps:$4 sm:$0xff]   ;;  %v245_v5 = vld [vmem:[%s367_s1 + $0x54] ss:$8 sps:$4 sm:$0xff]   ;;  %v247_v6 = vld [vmem:[%s367_s1 + $0x50] ss:$8 sps:$4 sm:$0xff]  }
   0x3   :  { %140 = vmatpush1.bf16.msra.mxu0 %v241_v2  ;;  %230 = vmatpush1.bf16.msra.mxu1 %v241_v2  ;;  %v248_v7 = vld [vmem:[%s367_s1 + $0x44] ss:$8 sps:$4 sm:$0xff]   ;;  %v250_v8 = vld [vmem:[%s367_s1 + $0x40] ss:$8 sps:$4 sm:$0xff]   ;;  %v251_v9 = vld [vmem:[%s367_s1 + $0x34] ss:$8 sps:$4 sm:$0xff]  }
   0x4   :  { %141 = vmatprep.subr.bf16.mxu0 %v242_v3  ;;  %223 = vmatprep.subr.bf16.mxu1 %v242_v3  ;;  %v253_v10 = vld [vmem:[%s367_s1 + $0x30] ss:$8 sps:$4 sm:$0xff]   ;;  %v254_v11 = vld [vmem:[%s367_s1 + $0x24] ss:$8 sps:$4 sm:$0xff]   ;;  %v256_v12 = vld [vmem:[%s367_s1 + $0x20] ss:$8 sps:$4 sm:$0xff]  }
   0x5   :  { %v257_v13 = vld [vmem:[%s367_s1 + $0x14] ss:$8 sps:$4 sm:$0xff]   ;;  %v259_v14 = vld [vmem:[%s367_s1 + $0x10] ss:$8 sps:$4 sm:$0xff]   ;;  %v260_v15 = vld [vmem:[%s367_s1 + $0x4] ss:$8 sps:$4 sm:$0xff]  }
   0x6   :  { %v262_v16 = vld [vmem:[%s367_s1] ss:$8 sps:$4 sm:$0xff]   ;;  %v38_v20 = vshrl.u32 %v37_v19, 7 }
   0x7   :  { %142 = vmatpush1.bf16.msra.mxu0 %v244_v4  ;;  %231 = vmatpush1.bf16.msra.mxu1 %v244_v4  ;;  %v263_v17 = vld [vmem:[%s368_s0] sm:$0xff]   ;;  %v264_v18 = vld [vmem:[%s368_s0 + $0x8] sm:$0xff]  }
   0x8   :  { %143 = vmatprep.subr.bf16.mxu0 %v245_v5  ;;  %224 = vmatprep.subr.bf16.mxu1 %v245_v5  ;;  %v39_v21 = vsub.s32 0, %v38_v20  ;;  %v35_v22 = vld [vmem:[%s369_s2] sm:$0x3]  ;;  %v43_v23 = vsub.s32 1, %v38_v20 }
   0xa   :  { %v40_v24 = vrot.slane %v35_v22, %v39_v21  ;;  %v44_v25 = vrot.slane %v35_v22, %v43_v23 }
   0xb   :  { %144 = vmatpush1.bf16.msra.mxu0 %v247_v6  ;;  %232 = vmatpush1.bf16.msra.mxu1 %v247_v6 }
   0xc   :  { %145 = vmatprep.subr.bf16.mxu0 %v248_v7  ;;  %225 = vmatprep.subr.bf16.mxu1 %v248_v7 }
   0xf   :  { %146 = vmatpush1.bf16.msra.mxu0 %v250_v8  ;;  %233 = vmatpush1.bf16.msra.mxu1 %v250_v8 }
  0x10   :  { %147 = vmatprep.subr.bf16.mxu0 %v251_v9  ;;  %226 = vmatprep.subr.bf16.mxu1 %v251_v9 }
  0x13   :  { %148 = vmatpush1.bf16.msra.mxu0 %v253_v10  ;;  %234 = vmatpush1.bf16.msra.mxu1 %v253_v10 }
  0x14   :  { %149 = vmatprep.subr.bf16.mxu0 %v254_v11  ;;  %227 = vmatprep.subr.bf16.mxu1 %v254_v11 }
  0x17   :  { %150 = vmatpush1.bf16.msra.mxu0 %v256_v12  ;;  %235 = vmatpush1.bf16.msra.mxu1 %v256_v12 }
  0x18   :  { %151 = vmatprep.subr.bf16.mxu0 %v257_v13  ;;  %228 = vmatprep.subr.bf16.mxu1 %v257_v13 }
  0x1b   :  { %152 = vmatpush1.bf16.msra.mxu0 %v259_v14  ;;  %236 = vmatpush1.bf16.msra.mxu1 %v259_v14 }
  0x1c   :  { %153 = vmatprep.subr.bf16.mxu0 %v260_v15  ;;  %229 = vmatprep.subr.bf16.mxu1 %v260_v15 }
  0x1f   :  { %154 = vmatpush1.bf16.msra.mxu0 %v262_v16  ;;  %237 = vmatpush1.bf16.msra.mxu1 %v262_v16 }
  0x22   :  { %172 = vmatmul.mubr.bf16.vlgmr.msra.gmra.mxu0 %v263_v17  ;;  %182 = vmatmul.mubr.bf16.vlgmr.msra.gmra.mxu1 %v264_v18 }
  0xe2   :  { %v173_v26 = vpop.f32.mrf.mxu0  ;;  %v183_v27 = vpop.f32.mrf.mxu1 }
  0xe3   :  { %v174_v28 = vadd.f32 %v173_v26, %v40_v24  ;;  %v184_v29 = vadd.f32 %v183_v27, %v40_v24 }
  0xe4   :  { %v175_v30 = vpop.f32.mrf.mxu0  ;;  %v185_v31 = vpop.f32.mrf.mxu1 }
  0xe5   :  { %192 = vst [vmem:[%s370_s3] sm:$0xff] %v174_v28  ;;  %196 = vst [vmem:[%s370_s3 + $0x20] sm:$0xff] %v184_v29  ;;  %v176_v32 = vadd.f32 %v175_v30, %v44_v25  ;;  %v186_v33 = vadd.f32 %v185_v31, %v44_v25 }
  0xe6   :  { %v177_v34 = vpop.f32.mrf.mxu0  ;;  %v187_v35 = vpop.f32.mrf.mxu1 }
  0xe7   :  { %193 = vst [vmem:[%s370_s3 + $0x8] sm:$0xff] %v176_v32  ;;  %197 = vst [vmem:[%s370_s3 + $0x28] sm:$0xff] %v186_v33  ;;  %v178_v36 = vadd.f32 %v177_v34, %v40_v24  ;;  %v188_v37 = vadd.f32 %v187_v35, %v40_v24 }
  0xe8   :  { %v179_v38 = vpop.f32.mrf.mxu0  ;;  %v189_v39 = vpop.f32.mrf.mxu1 }
  0xe9   :  { %194 = vst [vmem:[%s370_s3 + $0x10] sm:$0xff] %v178_v36  ;;  %198 = vst [vmem:[%s370_s3 + $0x30] sm:$0xff] %v188_v37  ;;  %v180_v40 = vadd.f32 %v179_v38, %v44_v25  ;;  %v190_v41 = vadd.f32 %v189_v39, %v44_v25 }
  0xeb   :  { %195 = vst [vmem:[%s370_s3 + $0x18] sm:$0xff] %v180_v40  ;;  %199 = vst [vmem:[%s370_s3 + $0x38] sm:$0xff] %v190_v41 }

// kernel: _lambda_.20
= control target key start
LH: loop header
LB: loop body
LE: loop exit
PB: predicated region body
PF: predicated region fallthrough
CT: control target
= control target key end

     0   :  { %v4970_v0 = vmov 0   ;;  %s7159_s1 = inlined_call_operand.vmem [shape: bf16[1152,128], index: 1, kind: input, shape index: {}]   ;;  %s7160_s0 = inlined_call_operand.vmem [shape: bf16[512,1152], index: 0, kind: input, shape index: {}]   ;;  %s7161_s2 = inlined_call_operand.vmem [shape: f32[1,128], index: 2, kind: input, shape index: {}]   ;;  %s7162_s3 = inlined_call_operand.vmem [shape: f32[512,128], index: 3, kind: output, shape index: {}]  }
   0x1   :  { %2390 = vmatprep.subr.bf16.mxu0 %v4970_v0  ;;  %4448 = vmatprep.subr.bf16.mxu1 %v4970_v0  ;;  %v4481_v1 = vld [vmem:[%s7159_s1 + $0x38] sm:$0xff]   ;;  %v4482_v2 = vld [vmem:[%s7159_s1 + $0x30] sm:$0xff]   ;;  %v4483_v3 = vld [vmem:[%s7159_s1 + $0x28] sm:$0xff]  }
   0x2   :  { %2391 = vmatpush1.bf16.msra.mxu0 %v4481_v1  ;;  %4464 = vmatpush1.bf16.msra.mxu1 %v4481_v1  ;;  %v4484_v4 = vld [vmem:[%s7159_s1 + $0x20] sm:$0xff]   ;;  %v4485_v5 = vld [vmem:[%s7159_s1 + $0x18] sm:$0xff]   ;;  %v4486_v7 = vld [vmem:[%s7159_s1 + $0x10] sm:$0xff]  }
   0x3   :  { %2392 = vmatprep.subr.bf16.mxu0 %v4970_v0  ;;  %4449 = vmatprep.subr.bf16.mxu1 %v4970_v0  ;;  %v4499_v6 = vld [vmem:[%s7160_s0 + $0x4] ss:$36 sps:$4 sm:$0xff]   ;;  %v4489_v11 = vld [vmem:[%s7159_s1 + $0x78] sm:$0xff]   ;;  %v4490_v12 = vld [vmem:[%s7159_s1 + $0x70] sm:$0xff]  }
   0x4   :  { %v4502_v8 = vld [vmem:[%s7160_s0 + $0x6c4] ss:$36 sps:$4 sm:$0xff]   ;;  %2422 = vmatprep.mubr.bf16.mxu0 %v4499_v6  ;;  %v4493_v15 = vld [vmem:[%s7159_s1 + $0x58] sm:$0xff]   ;;  %v4494_v16 = vld [vmem:[%s7159_s1 + $0x50] sm:$0xff]  }
   0x5   :  { %2614 = vmatprep.mubr.bf16.mxu1 %v4502_v8  ;;  %v4487_v9 = vld [vmem:[%s7159_s1 + $0x8] sm:$0xff]   ;;  %v4488_v10 = vld [vmem:[%s7159_s1] sm:$0xff]   ;;  %v4503_v21 = vld [vmem:[%s7159_s1 + $0xb8] sm:$0xff]  }
   0x6   :  { %2393 = vmatpush1.bf16.msra.mxu0 %v4482_v2  ;;  %4465 = vmatpush1.bf16.msra.mxu1 %v4482_v2  ;;  %v4491_v13 = vld [vmem:[%s7159_s1 + $0x68] sm:$0xff]   ;;  %v4492_v14 = vld [vmem:[%s7159_s1 + $0x60] sm:$0xff]   ;;  %v4504_v22 = vld [vmem:[%s7159_s1 + $0x138] sm:$0xff]  }
   0x7   :  { %2394 = vmatprep.subr.bf16.mxu0 %v4970_v0  ;;  %4450 = vmatprep.subr.bf16.mxu1 %v4970_v0  ;;  %v4495_v17 = vld [vmem:[%s7159_s1 + $0x48] sm:$0xff]   ;;  %v4496_v18 = vld [vmem:[%s7159_s1 + $0x40] sm:$0xff]   ;;  %v4505_v25 = vld [vmem:[%s7159_s1 + $0xb0] sm:$0xff]  }
   0x8   :  { %v4497_v19 = vld [vmem:[%s7160_s0] ss:$36 sps:$4 sm:$0xff]   ;;  %v4506_v23 = vld [vmem:[%s7160_s0 + $0x4c] ss:$36 sps:$4 sm:$0xff]   ;;  %v4515_v30 = vld [vmem:[%s7160_s0 + $0x94] ss:$36 sps:$4 sm:$0xff]  }
   0x9   :  { %v4500_v20 = vld [vmem:[%s7160_s0 + $0x6c0] ss:$36 sps:$4 sm:$0xff]   ;;  %v4508_v24 = vld [vmem:[%s7160_s0 + $0x70c] ss:$36 sps:$4 sm:$0xff]   ;;  %v4517_v31 = vld [vmem:[%s7160_s0 + $0x754] ss:$36 sps:$4 sm:$0xff]  }
   0xa   :  { %2395 = vmatpush1.bf16.msra.mxu0 %v4483_v3  ;;  %4466 = vmatpush1.bf16.msra.mxu1 %v4483_v3  ;;  %v4514_v26 = vld [vmem:[%s7159_s1 + $0x130] sm:$0xff]   ;;  %v4510_v27 = vld [vmem:[%s7160_s0 + $0x48] ss:$36 sps:$4 sm:$0xff]   ;;  %v4513_v33 = vld [vmem:[%s7159_s1 + $0xa0] sm:$0xff]  }
   0xb   :  { %2396 = vmatprep.subr.bf16.mxu0 %v4970_v0  ;;  %4451 = vmatprep.subr.bf16.mxu1 %v4970_v0  ;;  %v4511_v28 = vld [vmem:[%s7160_s0 + $0x708] ss:$36 sps:$4 sm:$0xff]   ;;  %v4519_v34 = vld [vmem:[%s7160_s0 + $0x90] ss:$36 sps:$4 sm:$0xff]   ;;  %v4540_v36 = vld [vmem:[%s7159_s1 + $0x120] sm:$0xff]  }
   0xc   :  { %v4512_v29 = vld [vmem:[%s7159_s1 + $0xa8] sm:$0xff]   ;;  %v4520_v35 = vld [vmem:[%s7160_s0 + $0x750] ss:$36 sps:$4 sm:$0xff]   ;;  %v4521_v37 = vld [vmem:[%s7159_s1 + $0x98] sm:$0xff]  }
   0xd   :  { %v4530_v32 = vld [vmem:[%s7159_s1 + $0x128] sm:$0xff]   ;;  %v4523_v38 = vld [vmem:[%s7160_s0 + $0xdc] ss:$36 sps:$4 sm:$0xff]   ;;  %v4522_v41 = vld [vmem:[%s7159_s1 + $0x90] sm:$0xff]  }
   0xe   :  { %2397 = vmatpush1.bf16.msra.mxu0 %v4484_v4  ;;  %4467 = vmatpush1.bf16.msra.mxu1 %v4484_v4  ;;  %v4525_v39 = vld [vmem:[%s7160_s0 + $0x79c] ss:$36 sps:$4 sm:$0xff]   ;;  %v4529_v44 = vld [vmem:[%s7159_s1 + $0x88] sm:$0xff]   ;;  %v4566_v47 = vld [vmem:[%s7159_s1 + $0x110] sm:$0xff]  }
   0xf   :  { %2398 = vmatprep.subr.bf16.mxu0 %v4970_v0  ;;  %4452 = vmatprep.subr.bf16.mxu1 %v4970_v0  ;;  %v4556_v40 = vld [vmem:[%s7159_s1 + $0x118] sm:$0xff]   ;;  %v4532_v45 = vld [vmem:[%s7160_s0 + $0x124] ss:$36 sps:$4 sm:$0xff]   ;;  %v4541_v53 = vld [vmem:[%s7160_s0 + $0x16c] ss:$36 sps:$4 sm:$0xff]  }
  0x10   :  { %v4527_v42 = vld [vmem:[%s7160_s0 + $0xd8] ss:$36 sps:$4 sm:$0xff]   ;;  %v4534_v46 = vld [vmem:[%s7160_s0 + $0x7e4] ss:$36 sps:$4 sm:$0xff]   ;;  %v4543_v54 = vld [vmem:[%s7160_s0 + $0x82c] ss:$36 sps:$4 sm:$0xff]  }
  0x11   :  { %v4528_v43 = vld [vmem:[%s7160_s0 + $0x798] ss:$36 sps:$4 sm:$0xff]   ;;  %v4531_v48 = vld [vmem:[%s7159_s1 + $0x80] sm:$0xff]   ;;  %v4580_v51 = vld [vmem:[%s7159_s1 + $0x108] sm:$0xff]  }
  0x12   :  { %2399 = vmatpush1.bf16.msra.mxu0 %v4485_v5  ;;  %4468 = vmatpush1.bf16.msra.mxu1 %v4485_v5  ;;  %v4536_v49 = vld [vmem:[%s7160_s0 + $0x120] ss:$36 sps:$4 sm:$0xff]   ;;  %v4538_v52 = vld [vmem:[%s7159_s1 + $0xf8] sm:$0xff]   ;;  %v4539_v56 = vld [vmem:[%s7159_s1 + $0xf0] sm:$0xff]  }
  0x13   :  { %2400 = vmatprep.subr.bf16.mxu0 %v4970_v0  ;;  %4453 = vmatprep.subr.bf16.mxu1 %v4970_v0  ;;  %v4537_v50 = vld [vmem:[%s7160_s0 + $0x7e0] ss:$36 sps:$4 sm:$0xff]   ;;  %v4545_v57 = vld [vmem:[%s7160_s0 + $0x168] ss:$36 sps:$4 sm:$0xff]   ;;  %v4549_v60 = vld [vmem:[%s7160_s0 + $0x1b4] ss:$36 sps:$4 sm:$0xff]  }
  0x14   :  { %v4588_v55 = vld [vmem:[%s7159_s1 + $0x100] sm:$0xff]   ;;  %v4546_v58 = vld [vmem:[%s7160_s0 + $0x828] ss:$36 sps:$4 sm:$0xff]   ;;  %v4551_v61 = vld [vmem:[%s7160_s0 + $0x874] ss:$36 sps:$4 sm:$0xff]  }
  0x15   :  { %v4547_v59 = vld [vmem:[%s7159_s1 + $0xe8] sm:$0xff]   ;;  %v4601_v62 = vld [vmem:[%s7159_s1 + $0x178] sm:$0xff]   ;;  %v4548_v63 = vld [vmem:[%s7159_s1 + $0xe0] sm:$0xff]  }
  0x16   :  { %2401 = vmatpush1.bf16.msra.mxu0 %v4486_v7  ;;  %4469 = vmatpush1.bf16.msra.mxu1 %v4486_v7  ;;  %v4553_v1 = vld [vmem:[%s7160_s0 + $0x1b0] ss:$36 sps:$4 sm:$0xff]   ;;  %v4555_v4 = vld [vmem:[%s7159_s1 + $0xd8] sm:$0xff]   ;;  %v4623_v7 = vld [vmem:[%s7159_s1 + $0x168] sm:$0xff]  }
  0x17   :  { %2402 = vmatprep.subr.bf16.mxu0 %v4970_v0  ;;  %4454 = vmatprep.subr.bf16.mxu1 %v4970_v0  ;;  %v4554_v2 = vld [vmem:[%s7160_s0 + $0x870] ss:$36 sps:$4 sm:$0xff]   ;;  %v4558_v5 = vld [vmem:[%s7160_s0 + $0x1fc] ss:$36 sps:$4 sm:$0xff]  }
  0x18   :  { %v4609_v3 = vld [vmem:[%s7159_s1 + $0x170] sm:$0xff]   ;;  %v4560_v6 = vld [vmem:[%s7160_s0 + $0x8bc] ss:$36 sps:$4 sm:$0xff]  }
  0x19   :  { %v4557_v8 = vld [vmem:[%s7159_s1 + $0xd0] sm:$0xff]  }
  0x1a   :  { %2403 = vmatpush1.bf16.msra.mxu0 %v4487_v9  ;;  %4470 = vmatpush1.bf16.msra.mxu1 %v4487_v9  ;;  %v4562_v9 = vld [vmem:[%s7160_s0 + $0x1f8] ss:$36 sps:$4 sm:$0xff]  }
  0x1b   :  { %2404 = vmatprep.subr.bf16.mxu0 %v4970_v0  ;;  %4455 = vmatprep.subr.bf16.mxu1 %v4970_v0 }
  0x1e   :  { %2405 = vmatpush1.bf16.msra.mxu0 %v4488_v10  ;;  %4471 = vmatpush1.bf16.msra.mxu1 %v4488_v10  ;;  %v4563_v10 = vld [vmem:[%s7160_s0 + $0x8b8] ss:$36 sps:$4 sm:$0xff]  }
  0x1f   :  { %2406 = vmatprep.subr.bf16.mxu0 %v4970_v0  ;;  %4456 = vmatprep.subr.bf16.mxu1 %v4970_v0 }
  0x22   :  { %2407 = vmatpush2.bf16.msra.mxu0 %v4489_v11  ;;  %4472 = vmatpush2.bf16.msra.mxu1 %v4489_v11  ;;  %v4564_v11 = vld [vmem:[%s7159_s1 + $0xc8] sm:$0xff]  }
  0x23   :  { %2408 = vmatprep.subr.bf16.mxu0 %v4970_v0  ;;  %4457 = vmatprep.subr.bf16.mxu1 %v4970_v0 }
  0x26   :  { %2409 = vmatpush2.bf16.msra.mxu0 %v4490_v12  ;;  %4473 = vmatpush2.bf16.msra.mxu1 %v4490_v12  ;;  %v4567_v12 = vld [vmem:[%s7160_s0 + $0x244] ss:$36 sps:$4 sm:$0xff]  }
  0x27   :  { %2410 = vmatprep.subr.bf16.mxu0 %v4970_v0  ;;  %4458 = vmatprep.subr.bf16.mxu1 %v4970_v0 }
  0x2a   :  { %2411 = vmatpush2.bf16.msra.mxu0 %v4491_v13  ;;  %4474 = vmatpush2.bf16.msra.mxu1 %v4491_v13  ;;  %v4571_v13 = vld [vmem:[%s7160_s0 + $0xc] ss:$36 sps:$4 sm:$0xff]  }
  0x2b   :  { %2412 = vmatprep.subr.bf16.mxu0 %v4970_v0  ;;  %4459 = vmatprep.subr.bf16.mxu1 %v4970_v0 }
  0x2e   :  { %2413 = vmatpush2.bf16.msra.mxu0 %v4492_v14  ;;  %4475 = vmatpush2.bf16.msra.mxu1 %v4492_v14  ;;  %v4631_v14 = vld [vmem:[%s7159_s1 + $0x160] sm:$0xff]  }
  0x2f   :  { %2414 = vmatprep.subr.bf16.mxu0 %v4970_v0  ;;  %4460 = vmatprep.subr.bf16.mxu1 %v4970_v0 }
  0x32   :  { %2415 = vmatpush2.bf16.msra.mxu0 %v4493_v15  ;;  %4476 = vmatpush2.bf16.msra.mxu1 %v4493_v15  ;;  %v4565_v15 = vld [vmem:[%s7159_s1 + $0xc0] sm:$0xff]  }
  0x33   :  { %2416 = vmatprep.subr.bf16.mxu0 %v4970_v0  ;;  %4461 = vmatprep.subr.bf16.mxu1 %v4970_v0 }
  0x36   :  { %2417 = vmatpush2.bf16.msra.mxu0 %v4494_v16  ;;  %4477 = vmatpush2.bf16.msra.mxu1 %v4494_v16  ;;  %v4569_v16 = vld [vmem:[%s7160_s0 + $0x8] ss:$36 sps:$4 sm:$0xff]  }
  0x37   :  { %2418 = vmatprep.subr.bf16.mxu0 %v4970_v0  ;;  %4462 = vmatprep.subr.bf16.mxu1 %v4970_v0 }
  0x3a   :  { %2419 = vmatpush2.bf16.msra.mxu0 %v4495_v17  ;;  %4478 = vmatpush2.bf16.msra.mxu1 %v4495_v17  ;;  %v4572_v17 = vld [vmem:[%s7160_s0 + $0x240] ss:$36 sps:$4 sm:$0xff]  }
  0x3b   :  { %2420 = vmatprep.subr.bf16.mxu0 %v4970_v0  ;;  %4463 = vmatprep.subr.bf16.mxu1 %v4970_v0 }
  0x3e   :  { %2421 = vmatpush2.bf16.msra.mxu0 %v4496_v18  ;;  %4479 = vmatpush2.bf16.msra.mxu1 %v4496_v18  ;;  %v4644_v18 = vld [vmem:[%s7159_s1 + $0x158] sm:$0xff]  }
  0x3f   :  { %2679 = vmatprep.subr.bf16.mxu1 %v4970_v0  ;;  %2968 = vmatprep.subr.bf16.mxu0 %v4970_v0 }
  0x41   :  { %2423 = vmatmul.mubr.bf16.vlgmr.msra.gmra.mxu0 %v4497_v19  ;;  %2615 = vmatmul.mubr.bf16.vlgmr.msra.gmra.mxu1 %v4500_v20  ;;  %v4573_v19 = vld [vmem:[%s7159_s1 + $0x1b8] sm:$0xff]   ;;  %v4574_v20 = vld [vmem:[%s7160_s0 + $0x28c] ss:$36 sps:$4 sm:$0xff]  }
  0x42   :  { %2680 = vmatpush1.bf16.msra.mxu1 %v4503_v21  ;;  %2969 = vmatpush1.bf16.msra.mxu0 %v4504_v22  ;;  %v4576_v21 = vld [vmem:[%s7160_s0 + $0x54] ss:$36 sps:$4 sm:$0xff]  }
  0x43   :  { %2681 = vmatprep.subr.bf16.mxu1 %v4970_v0  ;;  %2430 = vmatprep.mubr.bf16.mxu0 %v4506_v23  ;;  %v4652_v22 = vld [vmem:[%s7159_s1 + $0x150] sm:$0xff]  }
  0x44   :  { %2622 = vmatprep.mubr.bf16.mxu1 %v4508_v24  ;;  %2970 = vmatprep.subr.bf16.mxu0 %v4970_v0  ;;  %v4587_v23 = vld [vmem:[%s7159_s1 + $0x1b0] sm:$0xff]   ;;  %v4578_v24 = vld [vmem:[%s7160_s0 + $0x288] ss:$36 sps:$4 sm:$0xff]  }
  0x46   :  { %2682 = vmatpush1.bf16.msra.mxu1 %v4505_v25  ;;  %2971 = vmatpush1.bf16.msra.mxu0 %v4514_v26  ;;  %v4579_v25 = vld [vmem:[%s7160_s0 + $0x50] ss:$36 sps:$4 sm:$0xff]  }
  0x47   :  { %2683 = vmatprep.subr.bf16.mxu1 %v4970_v0  ;;  %2972 = vmatprep.subr.bf16.mxu0 %v4970_v0  ;;  %v4581_v26 = vld [vmem:[%s7160_s0 + $0x2d4] ss:$36 sps:$4 sm:$0xff]  }
  0x49   :  { %2431 = vmatmul.mubr.bf16.gmra.mxu0 %v4510_v27  ;;  %2623 = vmatmul.mubr.bf16.gmra.mxu1 %v4511_v28  ;;  %v4583_v27 = vld [vmem:[%s7160_s0 + $0x9c] ss:$36 sps:$4 sm:$0xff]   ;;  %v4602_v28 = vld [vmem:[%s7159_s1 + $0x1a8] sm:$0xff]  }
  0x4a   :  { %2684 = vmatpush1.bf16.msra.mxu1 %v4512_v29  ;;  %2438 = vmatprep.mubr.bf16.mxu0 %v4515_v30  ;;  %v4666_v29 = vld [vmem:[%s7159_s1 + $0x148] sm:$0xff]   ;;  %v4616_v30 = vld [vmem:[%s7159_s1 + $0x1a0] sm:$0xff]  }
  0x4b   :  { %2685 = vmatprep.subr.bf16.mxu1 %v4970_v0  ;;  %2630 = vmatprep.mubr.bf16.mxu1 %v4517_v31  ;;  %v4674_v31 = vld [vmem:[%s7159_s1 + $0x140] sm:$0xff]  }
  0x4c   :  { %2973 = vmatpush1.bf16.msra.mxu0 %v4530_v32  ;;  %v5342_v32 = vld [vmem:[%s7159_s1 + $0x238] sm:$0xff]  }
  0x4d   :  { %2974 = vmatprep.subr.bf16.mxu0 %v4970_v0 }
  0x4e   :  { %2686 = vmatpush1.bf16.msra.mxu1 %v4513_v33  ;;  %v4585_v33 = vld [vmem:[%s7160_s0 + $0x2d0] ss:$36 sps:$4 sm:$0xff]  }
  0x4f   :  { %2687 = vmatprep.subr.bf16.mxu1 %v4970_v0 }
  0x50   :  { %2975 = vmatpush1.bf16.msra.mxu0 %v4540_v36  ;;  %v4591_v36 = vld [vmem:[%s7160_s0 + $0xe4] ss:$36 sps:$4 sm:$0xff]  }
  0x51   :  { %2439 = vmatmul.mubr.bf16.gmra.mxu0 %v4519_v34  ;;  %2631 = vmatmul.mubr.bf16.gmra.mxu1 %v4520_v35  ;;  %v4586_v34 = vld [vmem:[%s7160_s0 + $0x98] ss:$36 sps:$4 sm:$0xff]  }
  0x52   :  { %2688 = vmatpush1.bf16.msra.mxu1 %v4521_v37  ;;  %2446 = vmatprep.mubr.bf16.mxu0 %v4523_v38  ;;  %v4589_v35 = vld [vmem:[%s7160_s0 + $0x31c] ss:$36 sps:$4 sm:$0xff]   ;;  %v4645_v38 = vld [vmem:[%s7159_s1 + $0x190] sm:$0xff]  }
  0x53   :  { %2689 = vmatprep.subr.bf16.mxu1 %v4970_v0  ;;  %2638 = vmatprep.mubr.bf16.mxu1 %v4525_v39  ;;  %v4630_v37 = vld [vmem:[%s7159_s1 + $0x198] sm:$0xff]  }
  0x54   :  { %2976 = vmatprep.subr.bf16.mxu0 %v4970_v0  ;;  %v4593_v39 = vld [vmem:[%s7160_s0 + $0x318] ss:$36 sps:$4 sm:$0xff]  }
  0x55   :  { %2977 = vmatpush1.bf16.msra.mxu0 %v4556_v40  ;;  %v4594_v40 = vld [vmem:[%s7160_s0 + $0xe0] ss:$36 sps:$4 sm:$0xff]  }
  0x56   :  { %2690 = vmatpush1.bf16.msra.mxu1 %v4522_v41  ;;  %2978 = vmatprep.subr.bf16.mxu0 %v4970_v0  ;;  %v4595_v41 = vld [vmem:[%s7160_s0 + $0x364] ss:$36 sps:$4 sm:$0xff]  }
  0x57   :  { %2691 = vmatprep.subr.bf16.mxu1 %v4970_v0 }
  0x59   :  { %2447 = vmatmul.mubr.bf16.gmra.mxu0 %v4527_v42  ;;  %2639 = vmatmul.mubr.bf16.gmra.mxu1 %v4528_v43  ;;  %v4597_v42 = vld [vmem:[%s7160_s0 + $0x12c] ss:$36 sps:$4 sm:$0xff]  }
  0x5a   :  { %2692 = vmatpush1.bf16.msra.mxu1 %v4529_v44  ;;  %2454 = vmatprep.mubr.bf16.mxu0 %v4532_v45  ;;  %v4659_v43 = vld [vmem:[%s7159_s1 + $0x188] sm:$0xff]   ;;  %v4673_v44 = vld [vmem:[%s7159_s1 + $0x180] sm:$0xff]  }
  0x5b   :  { %2693 = vmatprep.subr.bf16.mxu1 %v4970_v0  ;;  %2646 = vmatprep.mubr.bf16.mxu1 %v4534_v46  ;;  %v4599_v45 = vld [vmem:[%s7160_s0 + $0x360] ss:$36 sps:$4 sm:$0xff]   ;;  %v4600_v46 = vld [vmem:[%s7160_s0 + $0x128] ss:$36 sps:$4 sm:$0xff]  }
  0x5c   :  { %2979 = vmatpush1.bf16.msra.mxu0 %v4566_v47  ;;  %v4603_v47 = vld [vmem:[%s7160_s0 + $0x3ac] ss:$36 sps:$4 sm:$0xff]  }
  0x5d   :  { %2980 = vmatprep.subr.bf16.mxu0 %v4970_v0 }
  0x5e   :  { %2694 = vmatpush1.bf16.msra.mxu1 %v4531_v48  ;;  %v4605_v48 = vld [vmem:[%s7160_s0 + $0x174] ss:$36 sps:$4 sm:$0xff]  }
  0x5f   :  { %2695 = vmatprep.subr.bf16.mxu1 %v4970_v0 }
  0x60   :  { %2981 = vmatpush1.bf16.msra.mxu0 %v4580_v51  ;;  %v4607_v51 = vld [vmem:[%s7160_s0 + $0x3a8] ss:$36 sps:$4 sm:$0xff]  }
  0x61   :  { %2455 = vmatmul.mubr.bf16.gmra.mxu0 %v4536_v49  ;;  %2647 = vmatmul.mubr.bf16.gmra.mxu1 %v4537_v50  ;;  %v4688_v49 = vld [vmem:[%s7159_s1 + $0x1f8] sm:$0xff]   ;;  %v4701_v50 = vld [vmem:[%s7159_s1 + $0x1f0] sm:$0xff]  }
  0x62   :  { %2696 = vmatpush2.bf16.msra.mxu1 %v4538_v52  ;;  %2462 = vmatprep.mubr.bf16.mxu0 %v4541_v53  ;;  %v4608_v52 = vld [vmem:[%s7160_s0 + $0x170] ss:$36 sps:$4 sm:$0xff]  }
  0x63   :  { %2697 = vmatprep.subr.bf16.mxu1 %v4970_v0  ;;  %2654 = vmatprep.mubr.bf16.mxu1 %v4543_v54  ;;  %v4610_v53 = vld [vmem:[%s7160_s0 + $0x3f4] ss:$36 sps:$4 sm:$0xff]   ;;  %v4612_v54 = vld [vmem:[%s7160_s0 + $0x1bc] ss:$36 sps:$4 sm:$0xff]  }
  0x64   :  { %2982 = vmatprep.subr.bf16.mxu0 %v4970_v0 }
  0x65   :  { %2983 = vmatpush1.bf16.msra.mxu0 %v4588_v55  ;;  %v4715_v55 = vld [vmem:[%s7159_s1 + $0x1e8] sm:$0xff]  }
  0x66   :  { %2698 = vmatpush2.bf16.msra.mxu1 %v4539_v56  ;;  %2984 = vmatprep.subr.bf16.mxu0 %v4970_v0  ;;  %v4614_v56 = vld [vmem:[%s7160_s0 + $0x3f0] ss:$36 sps:$4 sm:$0xff]  }
  0x67   :  { %2699 = vmatprep.subr.bf16.mxu1 %v4970_v0 }
  0x69   :  { %2463 = vmatmul.mubr.bf16.gmra.mxu0 %v4545_v57  ;;  %2655 = vmatmul.mubr.bf16.gmra.mxu1 %v4546_v58  ;;  %v4615_v57 = vld [vmem:[%s7160_s0 + $0x1b8] ss:$36 sps:$4 sm:$0xff]  }
  0x6a   :  { %2700 = vmatpush2.bf16.msra.mxu1 %v4547_v59  ;;  %2470 = vmatprep.mubr.bf16.mxu0 %v4549_v60  ;;  %v4617_v58 = vld [vmem:[%s7160_s0 + $0x43c] ss:$36 sps:$4 sm:$0xff]   ;;  %v4619_v59 = vld [vmem:[%s7160_s0 + $0x204] ss:$36 sps:$4 sm:$0xff]  }
  0x6b   :  { %2701 = vmatprep.subr.bf16.mxu1 %v4970_v0  ;;  %2662 = vmatprep.mubr.bf16.mxu1 %v4551_v61  ;;  %v4728_v60 = vld [vmem:[%s7159_s1 + $0x1e0] sm:$0xff]   ;;  %v4621_v61 = vld [vmem:[%s7160_s0 + $0x438] ss:$36 sps:$4 sm:$0xff]  }
  0x6c   :  { %2985 = vmatpush2.bf16.msra.mxu0 %v4601_v62  ;;  %v4622_v62 = vld [vmem:[%s7160_s0 + $0x200] ss:$36 sps:$4 sm:$0xff]  }
  0x6d   :  { %2986 = vmatprep.subr.bf16.mxu0 %v4970_v0 }
  0x6e   :  { %2702 = vmatpush2.bf16.msra.mxu1 %v4548_v63  ;;  %v4624_v63 = vld [vmem:[%s7160_s0 + $0x484] ss:$36 sps:$4 sm:$0xff]  }
  0x6f   :  { %2703 = vmatprep.subr.bf16.mxu1 %v4970_v0 }
  0x70   :  { %2987 = vmatpush2.bf16.msra.mxu0 %v4609_v3  ;;  %v4629_v3 = vld [vmem:[%s7160_s0 + $0x248] ss:$36 sps:$4 sm:$0xff]  }
  0x71   :  { %2471 = vmatmul.mubr.bf16.gmra.mxu0 %v4553_v1  ;;  %2663 = vmatmul.mubr.bf16.gmra.mxu1 %v4554_v2  ;;  %v4626_v1 = vld [vmem:[%s7160_s0 + $0x24c] ss:$36 sps:$4 sm:$0xff]   ;;  %v4628_v2 = vld [vmem:[%s7160_s0 + $0x480] ss:$36 sps:$4 sm:$0xff]  }
  0x72   :  { %2704 = vmatpush2.bf16.msra.mxu1 %v4555_v4  ;;  %2478 = vmatprep.mubr.bf16.mxu0 %v4558_v5  ;;  %v4632_v4 = vld [vmem:[%s7160_s0 + $0x4cc] ss:$36 sps:$4 sm:$0xff]   ;;  %v4634_v5 = vld [vmem:[%s7160_s0 + $0x294] ss:$36 sps:$4 sm:$0xff]  }
  0x73   :  { %2705 = vmatprep.subr.bf16.mxu1 %v4970_v0  ;;  %2670 = vmatprep.mubr.bf16.mxu1 %v4560_v6  ;;  %v4742_v6 = vld [vmem:[%s7159_s1 + $0x1d8] sm:$0xff]  }
  0x74   :  { %2988 = vmatprep.subr.bf16.mxu0 %v4970_v0 }
  0x75   :  { %2989 = vmatpush2.bf16.msra.mxu0 %v4623_v7  ;;  %v4636_v7 = vld [vmem:[%s7160_s0 + $0x4c8] ss:$36 sps:$4 sm:$0xff]  }
  0x76   :  { %2706 = vmatpush2.bf16.msra.mxu1 %v4557_v8  ;;  %2990 = vmatprep.subr.bf16.mxu0 %v4970_v0  ;;  %v4637_v8 = vld [vmem:[%s7160_s0 + $0x290] ss:$36 sps:$4 sm:$0xff]  }
  0x77   :  { %2707 = vmatprep.subr.bf16.mxu1 %v4970_v0 }
  0x79   :  { %2479 = vmatmul.mubr.bf16.gmra.mxu0 %v4562_v9  ;;  %2671 = vmatmul.mubr.bf16.gmra.mxu1 %v4563_v10  ;;  %v4638_v9 = vld [vmem:[%s7160_s0 + $0x514] ss:$36 sps:$4 sm:$0xff]   ;;  %v4640_v10 = vld [vmem:[%s7160_s0 + $0x2dc] ss:$36 sps:$4 sm:$0xff]  }
  0x7a   :  { %2708 = vmatpush2.bf16.msra.mxu1 %v4564_v11  ;;  %2486 = vmatprep.mubr.bf16.mxu0 %v4567_v12  ;;  %v4642_v11 = vld [vmem:[%s7160_s0 + $0x510] ss:$36 sps:$4 sm:$0xff]   ;;  %v4643_v12 = vld [vmem:[%s7160_s0 + $0x2d8] ss:$36 sps:$4 sm:$0xff]  }
  0x7b   :  { %2709 = vmatprep.subr.bf16.mxu1 %v4970_v0  ;;  %2711 = vmatprep.mubr.bf16.mxu1 %v4571_v13  ;;  %v4646_v13 = vld [vmem:[%s7160_s0 + $0x55c] ss:$36 sps:$4 sm:$0xff]  }
  0x7c   :  { %2991 = vmatpush2.bf16.msra.mxu0 %v4631_v14  ;;  %v4648_v14 = vld [vmem:[%s7160_s0 + $0x324] ss:$36 sps:$4 sm:$0xff]  }
  0x7d   :  { %2992 = vmatprep.subr.bf16.mxu0 %v4970_v0 }
  0x7e   :  { %2710 = vmatpush2.bf16.msra.mxu1 %v4565_v15  ;;  %v4755_v15 = vld [vmem:[%s7159_s1 + $0x1d0] sm:$0xff]  }
  0x7f   :  { %3257 = vmatprep.subr.bf16.mxu1 %v4970_v0 }
  0x80   :  { %2993 = vmatpush2.bf16.msra.mxu0 %v4644_v18  ;;  %v4653_v18 = vld [vmem:[%s7160_s0 + $0x5a4] ss:$36 sps:$4 sm:$0xff]  }
  0x81   :  { %2487 = vmatmul.mubr.bf16.gmra.mxu0 %v4572_v17  ;;  %2712 = vmatmul.mubr.bf16.vlgmr.msra.gmra.mxu1 %v4569_v16  ;;  %v4650_v16 = vld [vmem:[%s7160_s0 + $0x558] ss:$36 sps:$4 sm:$0xff]   ;;  %v4651_v17 = vld [vmem:[%s7160_s0 + $0x320] ss:$36 sps:$4 sm:$0xff]  }
  0x82   :  { %3258 = vmatpush1.bf16.msra.mxu1 %v4573_v19  ;;  %2494 = vmatprep.mubr.bf16.mxu0 %v4574_v20  ;;  %v4655_v19 = vld [vmem:[%s7160_s0 + $0x36c] ss:$36 sps:$4 sm:$0xff]   ;;  %v4657_v20 = vld [vmem:[%s7160_s0 + $0x5a0] ss:$36 sps:$4 sm:$0xff]  }
  0x83   :  { %2719 = vmatprep.mubr.bf16.mxu1 %v4576_v21  ;;  %3259 = vmatprep.subr.bf16.mxu1 %v4970_v0  ;;  %v4658_v21 = vld [vmem:[%s7160_s0 + $0x368] ss:$36 sps:$4 sm:$0xff]  }
  0x84   :  { %2994 = vmatprep.subr.bf16.mxu0 %v4970_v0 }
  0x85   :  { %2995 = vmatpush2.bf16.msra.mxu0 %v4652_v22  ;;  %v4660_v22 = vld [vmem:[%s7160_s0 + $0x5ec] ss:$36 sps:$4 sm:$0xff]  }
  0x86   :  { %3260 = vmatpush1.bf16.msra.mxu1 %v4587_v23  ;;  %2996 = vmatprep.subr.bf16.mxu0 %v4970_v0  ;;  %v4662_v23 = vld [vmem:[%s7160_s0 + $0x3b4] ss:$36 sps:$4 sm:$0xff]  }
  0x87   :  { %3261 = vmatprep.subr.bf16.mxu1 %v4970_v0 }
  0x89   :  { %2495 = vmatmul.mubr.bf16.gmra.mxu0 %v4578_v24  ;;  %2720 = vmatmul.mubr.bf16.gmra.mxu1 %v4579_v25  ;;  %v4769_v24 = vld [vmem:[%s7159_s1 + $0x1c8] sm:$0xff]  }
  0x8a   :  { %2502 = vmatprep.mubr.bf16.mxu0 %v4581_v26  ;;  %2727 = vmatprep.mubr.bf16.mxu1 %v4583_v27  ;;  %v4664_v25 = vld [vmem:[%s7160_s0 + $0x5e8] ss:$36 sps:$4 sm:$0xff]   ;;  %v4665_v26 = vld [vmem:[%s7160_s0 + $0x3b0] ss:$36 sps:$4 sm:$0xff]  }
  0x8b   :  { %3262 = vmatpush1.bf16.msra.mxu1 %v4602_v28  ;;  %2997 = vmatpush2.bf16.msra.mxu0 %v4666_v29  ;;  %v4667_v27 = vld [vmem:[%s7160_s0 + $0x634] ss:$36 sps:$4 sm:$0xff]   ;;  %v4669_v28 = vld [vmem:[%s7160_s0 + $0x3fc] ss:$36 sps:$4 sm:$0xff]  }
  0x8c   :  { %3263 = vmatprep.subr.bf16.mxu1 %v4970_v0  ;;  %2998 = vmatprep.subr.bf16.mxu0 %v4970_v0  ;;  %v4671_v29 = vld [vmem:[%s7160_s0 + $0x630] ss:$36 sps:$4 sm:$0xff]  }
  0x8f   :  { %3264 = vmatpush1.bf16.msra.mxu1 %v4616_v30  ;;  %2999 = vmatpush2.bf16.msra.mxu0 %v4674_v31  ;;  %v4675_v30 = vld [vmem:[%s7160_s0 + $0x67c] ss:$36 sps:$4 sm:$0xff]   ;;  %v4677_v31 = vld [vmem:[%s7160_s0 + $0x444] ss:$36 sps:$4 sm:$0xff]  }
  0x90   :  { %3265 = vmatprep.subr.bf16.mxu1 %v4970_v0  ;;  %4368 = vmatprep.subr.bf16.mxu0 %v5342_v32 }
  0x91   :  { %2503 = vmatmul.mubr.bf16.gmra.mxu0 %v4585_v33  ;;  %2728 = vmatmul.mubr.bf16.gmra.mxu1 %v4586_v34  ;;  %v4782_v33 = vld [vmem:[%s7159_s1 + $0x1c0] sm:$0xff]   ;;  %v4679_v34 = vld [vmem:[%s7160_s0 + $0x678] ss:$36 sps:$4 sm:$0xff]  }
  0x92   :  { %2510 = vmatprep.mubr.bf16.mxu0 %v4589_v35  ;;  %2735 = vmatprep.mubr.bf16.mxu1 %v4591_v36  ;;  %v4680_v35 = vld [vmem:[%s7160_s0 + $0x440] ss:$36 sps:$4 sm:$0xff]   ;;  %v4681_v36 = vld [vmem:[%s7160_s0 + $0x48c] ss:$36 sps:$4 sm:$0xff]  }
  0x93   :  { %3266 = vmatpush1.bf16.msra.mxu1 %v4630_v37  ;;  %v4685_v37 = vld [vmem:[%s7160_s0 + $0x14] ss:$36 sps:$4 sm:$0xff]  }
  0x94   :  { %3267 = vmatprep.subr.bf16.mxu1 %v4970_v0 }
  0x97   :  { %3268 = vmatpush1.bf16.msra.mxu1 %v4645_v38  ;;  %v4683_v38 = vld [vmem:[%s7160_s0 + $0x10] ss:$36 sps:$4 sm:$0xff]  }
  0x98   :  { %3269 = vmatprep.subr.bf16.mxu1 %v4970_v0 }
  0x99   :  { %2511 = vmatmul.mubr.bf16.gmra.mxu0 %v4593_v39  ;;  %2736 = vmatmul.mubr.bf16.gmra.mxu1 %v4594_v40  ;;  %v4686_v39 = vld [vmem:[%s7160_s0 + $0x488] ss:$36 sps:$4 sm:$0xff]   ;;  %v4689_v40 = vld [vmem:[%s7160_s0 + $0x4d4] ss:$36 sps:$4 sm:$0xff]  }
  0x9a   :  { %2518 = vmatprep.mubr.bf16.mxu0 %v4595_v41  ;;  %2743 = vmatprep.mubr.bf16.mxu1 %v4597_v42  ;;  %v4691_v41 = vld [vmem:[%s7160_s0 + $0x5c] ss:$36 sps:$4 sm:$0xff]   ;;  %v4714_v42 = vld [vmem:[%s7159_s1 + $0x230] sm:$0xff]  }
  0x9b   :  { %3270 = vmatpush1.bf16.msra.mxu1 %v4659_v43 }
  0x9c   :  { %3271 = vmatprep.subr.bf16.mxu1 %v4970_v0 }
  0x9f   :  { %3272 = vmatpush1.bf16.msra.mxu1 %v4673_v44 }
  0xa0   :  { %3273 = vmatprep.subr.bf16.mxu1 %v4970_v0 }
  0xa1   :  { %2519 = vmatmul.mubr.bf16.gmra.mxu0 %v4599_v45  ;;  %2744 = vmatmul.mubr.bf16.gmra.mxu1 %v4600_v46 }
  0xa2   :  { %2526 = vmatprep.mubr.bf16.mxu0 %v4603_v47  ;;  %2751 = vmatprep.mubr.bf16.mxu1 %v4605_v48  ;;  %v4741_v47 = vld [vmem:[%s7159_s1 + $0x228] sm:$0xff]  }
  0xa3   :  { %3274 = vmatpush2.bf16.msra.mxu1 %v4688_v49 }
  0xa4   :  { %3275 = vmatprep.subr.bf16.mxu1 %v4970_v0 }
  0xa7   :  { %3276 = vmatpush2.bf16.msra.mxu1 %v4701_v50  ;;  %v4693_v50 = vld [vmem:[%s7160_s0 + $0x4d0] ss:$36 sps:$4 sm:$0xff]  }
  0xa8   :  { %3277 = vmatprep.subr.bf16.mxu1 %v4970_v0 }
  0xa9   :  { %2527 = vmatmul.mubr.bf16.gmra.mxu0 %v4607_v51  ;;  %2752 = vmatmul.mubr.bf16.gmra.mxu1 %v4608_v52  ;;  %v4695_v51 = vld [vmem:[%s7160_s0 + $0x51c] ss:$36 sps:$4 sm:$0xff]   ;;  %v4697_v52 = vld [vmem:[%s7160_s0 + $0xa4] ss:$36 sps:$4 sm:$0xff]  }
  0xaa   :  { %2534 = vmatprep.mubr.bf16.mxu0 %v4610_v53  ;;  %2759 = vmatprep.mubr.bf16.mxu1 %v4612_v54 }
  0xab   :  { %3278 = vmatpush2.bf16.msra.mxu1 %v4715_v55  ;;  %v4768_v55 = vld [vmem:[%s7159_s1 + $0x220] sm:$0xff]  }
  0xac   :  { %3279 = vmatprep.subr.bf16.mxu1 %v4970_v0 }
  0xaf   :  { %3280 = vmatpush2.bf16.msra.mxu1 %v4728_v60  ;;  %v4795_v60 = vld [vmem:[%s7159_s1 + $0x218] sm:$0xff]  }
  0xb0   :  { %3281 = vmatprep.subr.bf16.mxu1 %v4970_v0 }
  0xb1   :  { %2535 = vmatmul.mubr.bf16.gmra.mxu0 %v4614_v56  ;;  %2760 = vmatmul.mubr.bf16.gmra.mxu1 %v4615_v57 }
  0xb2   :  { %2542 = vmatprep.mubr.bf16.mxu0 %v4617_v58  ;;  %2767 = vmatprep.mubr.bf16.mxu1 %v4619_v59 }
  0xb3   :  { %3282 = vmatpush2.bf16.msra.mxu1 %v4742_v6 }
  0xb4   :  { %3283 = vmatprep.subr.bf16.mxu1 %v4970_v0 }
  0xb7   :  { %3284 = vmatpush2.bf16.msra.mxu1 %v4755_v15  ;;  %v4713_v15 = vld [vmem:[%s7160_s0 + $0x134] ss:$36 sps:$4 sm:$0xff]  }
  0xb8   :  { %3285 = vmatprep.subr.bf16.mxu1 %v4970_v0 }
  0xb9   :  { %2543 = vmatmul.mubr.bf16.gmra.mxu0 %v4621_v61  ;;  %2768 = vmatmul.mubr.bf16.gmra.mxu1 %v4622_v62 }
  0xba   :  { %2550 = vmatprep.mubr.bf16.mxu0 %v4624_v63  ;;  %2775 = vmatprep.mubr.bf16.mxu1 %v4626_v1  ;;  %v4699_v63 = vld [vmem:[%s7160_s0 + $0x518] ss:$36 sps:$4 sm:$0xff]   ;;  %v4700_v1 = vld [vmem:[%s7160_s0 + $0xa0] ss:$36 sps:$4 sm:$0xff]  }
  0xbb   :  { %3286 = vmatpush2.bf16.msra.mxu1 %v4769_v24  ;;  %v4708_v24 = vld [vmem:[%s7160_s0 + $0x5a8] ss:$36 sps:$4 sm:$0xff]  }
  0xbc   :  { %3287 = vmatprep.subr.bf16.mxu1 %v4970_v0  ;;  %v4672_v0 = vld [vmem:[%s7160_s0 + $0x3f8] ss:$36 sps:$4 sm:$0xff]  }
  0xbf   :  { %3288 = vmatpush2.bf16.msra.mxu1 %v4782_v33 }
  0xc1   :  { %2551 = vmatmul.mubr.bf16.gmra.mxu0 %v4628_v2  ;;  %2776 = vmatmul.mubr.bf16.gmra.mxu1 %v4629_v3  ;;  %v4702_v2 = vld [vmem:[%s7160_s0 + $0x564] ss:$36 sps:$4 sm:$0xff]   ;;  %v4704_v3 = vld [vmem:[%s7160_s0 + $0xec] ss:$36 sps:$4 sm:$0xff]  }
  0xc2   :  { %2558 = vmatprep.mubr.bf16.mxu0 %v4632_v4  ;;  %2783 = vmatprep.mubr.bf16.mxu1 %v4634_v5 }
  0xc9   :  { %2559 = vmatmul.mubr.bf16.gmra.mxu0 %v4636_v7  ;;  %2784 = vmatmul.mubr.bf16.gmra.mxu1 %v4637_v8 }
  0xca   :  { %2566 = vmatprep.mubr.bf16.mxu0 %v4638_v9  ;;  %2791 = vmatprep.mubr.bf16.mxu1 %v4640_v10 }
  0xd1   :  { %2567 = vmatmul.mubr.bf16.gmra.mxu0 %v4642_v11  ;;  %2792 = vmatmul.mubr.bf16.gmra.mxu1 %v4643_v12  ;;  %v4706_v12 = vld [vmem:[%s7160_s0 + $0x560] ss:$36 sps:$4 sm:$0xff]  }
  0xd2   :  { %2574 = vmatprep.mubr.bf16.mxu0 %v4646_v13  ;;  %2799 = vmatprep.mubr.bf16.mxu1 %v4648_v14  ;;  %v4707_v13 = vld [vmem:[%s7160_s0 + $0xe8] ss:$36 sps:$4 sm:$0xff]  }
  0xd3   :  { %v4710_v14 = vld [vmem:[%s7160_s0 + $0x5ac] ss:$36 sps:$4 sm:$0xff]  }
  0xd9   :  { %2575 = vmatmul.mubr.bf16.gmra.mxu0 %v4650_v16  ;;  %2800 = vmatmul.mubr.bf16.gmra.mxu1 %v4651_v17 }
  0xda   :  { %2582 = vmatprep.mubr.bf16.mxu0 %v4653_v18  ;;  %2807 = vmatprep.mubr.bf16.mxu1 %v4655_v19 }
  0xe1   :  { %2583 = vmatmul.mubr.bf16.gmra.mxu0 %v4657_v20  ;;  %2808 = vmatmul.mubr.bf16.gmra.mxu1 %v4658_v21 }
  0xe2   :  { %2590 = vmatprep.mubr.bf16.mxu0 %v4660_v22  ;;  %2815 = vmatprep.mubr.bf16.mxu1 %v4662_v23 }
  0xe9   :  { %2591 = vmatmul.mubr.bf16.gmra.mxu0 %v4664_v25  ;;  %2816 = vmatmul.mubr.bf16.gmra.mxu1 %v4665_v26  ;;  %v4711_v25 = vld [vmem:[%s7160_s0 + $0x130] ss:$36 sps:$4 sm:$0xff]  }
  0xea   :  { %2598 = vmatprep.mubr.bf16.mxu0 %v4667_v27  ;;  %2823 = vmatprep.mubr.bf16.mxu1 %v4669_v28  ;;  %v4718_v26 = vld [vmem:[%s7160_s0 + $0x5f4] ss:$36 sps:$4 sm:$0xff]   ;;  %v4721_v27 = vld [vmem:[%s7160_s0 + $0x17c] ss:$36 sps:$4 sm:$0xff]  }
  0xf1   :  { %2599 = vmatmul.mubr.bf16.gmra.mxu0 %v4671_v29  ;;  %2824 = vmatmul.mubr.bf16.gmra.mxu1 %v4672_v0 }
  0xf2   :  { %2606 = vmatprep.mubr.bf16.mxu0 %v4675_v30  ;;  %2831 = vmatprep.mubr.bf16.mxu1 %v4677_v31  ;;  %v4820_v31 = vld [vmem:[%s7159_s1 + $0x210] sm:$0xff]  }
  0xf9   :  { %2607 = vmatmul.mubr.bf16.gmra.mxu0 %v4679_v34  ;;  %2832 = vmatmul.mubr.bf16.gmra.mxu1 %v4680_v35 }
  0xfa   :  { %2839 = vmatprep.mubr.bf16.mxu1 %v4681_v36  ;;  %3000 = vmatprep.mubr.bf16.mxu0 %v4685_v37  ;;  %v4716_v37 = vld [vmem:[%s7160_s0 + $0x5f0] ss:$36 sps:$4 sm:$0xff]  }
 0x101   :  { %v5578_v43 = vpop.f32.mrf.mxu0  ;;  %v5580_v44 = vpop.f32.mrf.mxu1  ;;  %2840 = vmatmul.mubr.bf16.gmra.mxu1 %v4686_v39  ;;  %3001 = vmatmul.mubr.bf16.vlgmr.msra.gmra.mxu0 %v4683_v38  ;;  %v4719_v38 = vld [vmem:[%s7160_s0 + $0x178] ss:$36 sps:$4 sm:$0xff]  }
 0x102   :  { %4369 = vmatpush3.bf16.msra.mxu0 %v5342_v32  ;;  %2847 = vmatprep.mubr.bf16.mxu1 %v4689_v40  ;;  %v4694_v32 = vld [vmem:[%s7160_s0 + $0x58] ss:$36 sps:$4 sm:$0xff]   ;;  %v4727_v40 = vld [vmem:[%s7160_s0 + $0x1c4] ss:$36 sps:$4 sm:$0xff]  }
 0x103   :  { %v2426_v45 = vpop.f32.mrf.mxu0  ;;  %v2618_v46 = vpop.f32.mrf.mxu1  ;;  %3008 = vmatprep.mubr.bf16.mxu0 %v4691_v41  ;;  %4370 = vmatprep.subr.bf16.mxu0 %v4714_v42  ;;  %v4724_v39 = vld [vmem:[%s7160_s0 + $0x63c] ss:$36 sps:$4 sm:$0xff]  }
 0x105   :  { %v5586_v48 = vpop.f32.mrf.mxu0  ;;  %v5588_v49 = vpop.f32.mrf.mxu1 }
 0x106   :  { %4371 = vmatpush3.bf16.msra.mxu0 %v4714_v42 }
 0x107   :  { %v2429_v53 = vpop.f32.mrf.mxu0  ;;  %v2621_v54 = vpop.f32.mrf.mxu1  ;;  %4372 = vmatprep.subr.bf16.mxu0 %v4741_v47 }
 0x108   :  { %v4725_v53 = vld [vmem:[%s7160_s0 + $0x1c0] ss:$36 sps:$4 sm:$0xff]  }
 0x109   :  { %v5605_v56 = vpop.f32.mrf.mxu0  ;;  %v5607_v57 = vpop.f32.mrf.mxu1  ;;  %2848 = vmatmul.mubr.bf16.gmra.mxu1 %v4693_v50  ;;  %3009 = vmatmul.mubr.bf16.gmra.mxu0 %v4694_v32  ;;  %v4731_v54 = vld [vmem:[%s7160_s0 + $0x684] ss:$36 sps:$4 sm:$0xff]  }
 0x10a   :  { %2855 = vmatprep.mubr.bf16.mxu1 %v4695_v51  ;;  %3016 = vmatprep.mubr.bf16.mxu0 %v4697_v52  ;;  %v4722_v52 = vld [vmem:[%s7160_s0 + $0x638] ss:$36 sps:$4 sm:$0xff]  }
 0x10b   :  { %v2434_v58 = vpop.f32.mrf.mxu0  ;;  %v2626_v59 = vpop.f32.mrf.mxu1  ;;  %4373 = vmatpush3.bf16.msra.mxu0 %v4741_v47 }
 0x10c   :  { %4374 = vmatprep.subr.bf16.mxu0 %v4768_v55 }
 0x10d   :  { %v5612_v61 = vpop.f32.mrf.mxu0  ;;  %v5614_v62 = vpop.f32.mrf.mxu1 }
 0x10f   :  { %v2437_v4 = vpop.f32.mrf.mxu0  ;;  %v2629_v5 = vpop.f32.mrf.mxu1  ;;  %4375 = vmatpush3.bf16.msra.mxu0 %v4768_v55  ;;  %v4734_v55 = vld [vmem:[%s7160_s0 + $0x20c] ss:$36 sps:$4 sm:$0xff]  }
 0x110   :  { %4376 = vmatprep.subr.bf16.mxu0 %v4795_v60  ;;  %v4729_v5 = vld [vmem:[%s7160_s0 + $0x680] ss:$36 sps:$4 sm:$0xff]  }
 0x111   :  { %v5628_v6 = vpop.f32.mrf.mxu0  ;;  %v5630_v7 = vpop.f32.mrf.mxu1  ;;  %2856 = vmatmul.mubr.bf16.gmra.mxu1 %v4699_v63  ;;  %3017 = vmatmul.mubr.bf16.gmra.mxu0 %v4700_v1 }
 0x112   :  { %2863 = vmatprep.mubr.bf16.mxu1 %v4702_v2  ;;  %3024 = vmatprep.mubr.bf16.mxu0 %v4704_v3 }
 0x113   :  { %v2442_v8 = vpop.f32.mrf.mxu0  ;;  %v2634_v9 = vpop.f32.mrf.mxu1  ;;  %4377 = vmatpush3.bf16.msra.mxu0 %v4795_v60 }
 0x114   :  { %4378 = vmatprep.subr.bf16.mxu0 %v4820_v31  ;;  %v4732_v8 = vld [vmem:[%s7160_s0 + $0x208] ss:$36 sps:$4 sm:$0xff]  }
 0x115   :  { %v5632_v10 = vpop.f32.mrf.mxu0  ;;  %v5634_v11 = vpop.f32.mrf.mxu1  ;;  %v4737_v9 = vld [vmem:[%s7160_s0 + $0x6cc] ss:$36 sps:$4 sm:$0xff]  }
 0x117   :  { %v2445_v16 = vpop.f32.mrf.mxu0  ;;  %v2637_v17 = vpop.f32.mrf.mxu1  ;;  %4379 = vmatpush3.bf16.msra.mxu0 %v4820_v31 }
 0x119   :  { %v5648_v18 = vpop.f32.mrf.mxu0  ;;  %v5650_v19 = vpop.f32.mrf.mxu1  ;;  %2864 = vmatmul.mubr.bf16.gmra.mxu1 %v4706_v12  ;;  %3025 = vmatmul.mubr.bf16.gmra.mxu0 %v4707_v13  ;;  %v4740_v12 = vld [vmem:[%s7160_s0 + $0x254] ss:$36 sps:$4 sm:$0xff]  }
 0x11a   :  { %2871 = vmatprep.mubr.bf16.mxu1 %v4710_v14  ;;  %3032 = vmatprep.mubr.bf16.mxu0 %v4713_v15 }
 0x11b   :  { %v2450_v20 = vpop.f32.mrf.mxu0  ;;  %v2642_v21 = vpop.f32.mrf.mxu1 }
 0x11c   :  { %v5738_v21 = vld [vmem:[%s7161_s2] ss:$0 sm:$0xff] }
 0x11d   :  { %v5652_v22 = vpop.f32.mrf.mxu0  ;;  %v5654_v23 = vpop.f32.mrf.mxu1 }
 0x11f   :  { %v2453_v28 = vpop.f32.mrf.mxu0  ;;  %v2645_v29 = vpop.f32.mrf.mxu1 }
 0x120   :  { %v4745_v28 = vld [vmem:[%s7160_s0 + $0x714] ss:$36 sps:$4 sm:$0xff]   ;;  %v4748_v29 = vld [vmem:[%s7160_s0 + $0x29c] ss:$36 sps:$4 sm:$0xff]  }
 0x121   :  { %v5668_v0 = vpop.f32.mrf.mxu0  ;;  %v5670_v30 = vpop.f32.mrf.mxu1  ;;  %2872 = vmatmul.mubr.bf16.gmra.mxu1 %v4708_v24  ;;  %3033 = vmatmul.mubr.bf16.gmra.mxu0 %v4711_v25 }
 0x122   :  { %2879 = vmatprep.mubr.bf16.mxu1 %v4718_v26  ;;  %3040 = vmatprep.mubr.bf16.mxu0 %v4721_v27  ;;  %v4735_v26 = vld [vmem:[%s7160_s0 + $0x6c8] ss:$36 sps:$4 sm:$0xff]   ;;  %v4738_v27 = vld [vmem:[%s7160_s0 + $0x250] ss:$36 sps:$4 sm:$0xff]  }
 0x123   :  { %v2458_v33 = vpop.f32.mrf.mxu0  ;;  %v2650_v34 = vpop.f32.mrf.mxu1 }
 0x124   :  { %v2425_v34 = vadd.f32 %v5738_v21, %v5578_v43 }
 0x125   :  { %v5675_v35 = vpop.f32.mrf.mxu0  ;;  %v5677_v36 = vpop.f32.mrf.mxu1 }
 0x126   :  { %7163 = vst [vmem:[#allocation2_spill] sm:$0xff] %v5677_v36 }
 0x127   :  { %v2461_v41 = vpop.f32.mrf.mxu0  ;;  %v2653_v42 = vpop.f32.mrf.mxu1 }
 0x129   :  { %v5691_v45 = vpop.f32.mrf.mxu0  ;;  %v5693_v46 = vpop.f32.mrf.mxu1  ;;  %2880 = vmatmul.mubr.bf16.gmra.mxu1 %v4716_v37  ;;  %3041 = vmatmul.mubr.bf16.gmra.mxu0 %v4719_v38 }
 0x12a   :  { %7164 = vst [vmem:[#allocation3_spill] sm:$0xff] %v5693_v46  ;;  %2887 = vmatprep.mubr.bf16.mxu1 %v4724_v39  ;;  %3048 = vmatprep.mubr.bf16.mxu0 %v4727_v40  ;;  %v4845_v40 = vld [vmem:[%s7159_s1 + $0x208] sm:$0xff]  }
 0x12b   :  { %v2466_v47 = vpop.f32.mrf.mxu0  ;;  %v2658_v50 = vpop.f32.mrf.mxu1  ;;  %4380 = vmatprep.subr.bf16.mxu0 %v4845_v40 }
 0x12c   :  { %v2428_v47 = vadd.f32 %v5738_v21, %v5586_v48  ;;  %4381 = vmatpush3.bf16.msra.mxu0 %v4845_v40  ;;  %v4754_v48 = vld [vmem:[%s7160_s0 + $0x2e4] ss:$36 sps:$4 sm:$0xff]  }
 0x12d   :  { %v5695_v32 = vpop.f32.mrf.mxu0  ;;  %v5697_v51 = vpop.f32.mrf.mxu1 }
 0x12e   :  { %7165 = vst [vmem:[#allocation4_spill] sm:$0xff] %v5697_v51 }
 0x12f   :  { %v2469_v58 = vpop.f32.mrf.mxu0  ;;  %v2661_v59 = vpop.f32.mrf.mxu1 }
 0x131   :  { %v5711_v60 = vpop.f32.mrf.mxu0  ;;  %v5713_v63 = vpop.f32.mrf.mxu1  ;;  %2888 = vmatmul.mubr.bf16.gmra.mxu1 %v4722_v52  ;;  %3049 = vmatmul.mubr.bf16.gmra.mxu0 %v4725_v53  ;;  %v4743_v52 = vld [vmem:[%s7160_s0 + $0x710] ss:$36 sps:$4 sm:$0xff]   ;;  %v4746_v53 = vld [vmem:[%s7160_s0 + $0x298] ss:$36 sps:$4 sm:$0xff]  }
 0x132   :  { %7166 = vst [vmem:[#allocation5_spill] sm:$0xff] %v5713_v63  ;;  %2895 = vmatprep.mubr.bf16.mxu1 %v4731_v54  ;;  %3056 = vmatprep.mubr.bf16.mxu0 %v4734_v55  ;;  %v4751_v55 = vld [vmem:[%s7160_s0 + $0x75c] ss:$36 sps:$4 sm:$0xff]  }
 0x133   :  { %v2474_v1 = vpop.f32.mrf.mxu0  ;;  %v2666_v2 = vpop.f32.mrf.mxu1 }
 0x134   :  { %v2433_v1 = vadd.f32 %v5738_v21, %v5605_v56  ;;  %v4749_v56 = vld [vmem:[%s7160_s0 + $0x758] ss:$36 sps:$4 sm:$0xff]  }
 0x135   :  { %v5715_v3 = vpop.f32.mrf.mxu0  ;;  %v5717_v4 = vpop.f32.mrf.mxu1 }
 0x136   :  { %7167 = vst [vmem:[#allocation6_spill] sm:$0xff] %v5717_v4 }
 0x137   :  { %v2477_v13 = vpop.f32.mrf.mxu0  ;;  %v2669_v14 = vpop.f32.mrf.mxu1 }
 0x138   :  { %v2436_v13 = vadd.f32 %v5738_v21, %v5612_v61  ;;  %v4761_v61 = vld [vmem:[%s7160_s0 + $0x32c] ss:$36 sps:$4 sm:$0xff]  }
 0x139   :  { %v5731_v15 = vpop.f32.mrf.mxu0  ;;  %v5733_v16 = vpop.f32.mrf.mxu1  ;;  %2896 = vmatmul.mubr.bf16.gmra.mxu1 %v4729_v5  ;;  %3057 = vmatmul.mubr.bf16.gmra.mxu0 %v4732_v8 }
 0x13a   :  { %7168 = vst [vmem:[#allocation7_spill] sm:$0xff] %v5733_v16  ;;  %2903 = vmatprep.mubr.bf16.mxu1 %v4737_v9  ;;  %3064 = vmatprep.mubr.bf16.mxu0 %v4740_v12 }
 0x13b   :  { %v2482_v17 = vpop.f32.mrf.mxu0  ;;  %v2674_v20 = vpop.f32.mrf.mxu1 }
 0x13c   :  { %v4752_v20 = vld [vmem:[%s7160_s0 + $0x2e0] ss:$36 sps:$4 sm:$0xff]  }
 0x13d   :  { %v5740_v24 = vpop.f32.mrf.mxu0  ;;  %v5742_v25 = vpop.f32.mrf.mxu1 }
 0x13e   :  { %7169 = vst [vmem:[#allocation8_spill] sm:$0xff] %v5742_v25 }
 0x13f   :  { %v2485_v31 = vpop.f32.mrf.mxu0  ;;  %v2677_v33 = vpop.f32.mrf.mxu1 }
 0x140   :  { %v2441_v31 = vadd.f32 %v5738_v21, %v5628_v6  ;;  %v4756_v6 = vld [vmem:[%s7160_s0 + $0x7a0] ss:$36 sps:$4 sm:$0xff]  }
 0x141   :  { %v5758_v37 = vpop.f32.mrf.mxu0  ;;  %v2713_v38 = vpop.f32.mrf.mxu1  ;;  %2904 = vmatmul.mubr.bf16.gmra.mxu1 %v4735_v26  ;;  %3065 = vmatmul.mubr.bf16.gmra.mxu0 %v4738_v27  ;;  %v4758_v27 = vld [vmem:[%s7160_s0 + $0x7a4] ss:$36 sps:$4 sm:$0xff]  }
 0x142   :  { %v5760_v39 = vadd.f32 %v2713_v38, %v2425_v34  ;;  %2911 = vmatprep.mubr.bf16.mxu1 %v4745_v28  ;;  %3072 = vmatprep.mubr.bf16.mxu0 %v4748_v29 }
 0x143   :  { %v2490_v41 = vpop.f32.mrf.mxu0  ;;  %v2715_v42 = vpop.f32.mrf.mxu1 }
 0x144   :  { %v2444_v42 = vadd.f32 %v5738_v21, %v5632_v10  ;;  %v4767_v10 = vld [vmem:[%s7160_s0 + $0x374] ss:$36 sps:$4 sm:$0xff]  }
 0x145   :  { %v5767_v43 = vpop.f32.mrf.mxu0  ;;  %v2716_v50 = vpop.f32.mrf.mxu1 }
 0x146   :  { %v5775_v54 = vadd.f32 %v2716_v50, %v2428_v47 }
 0x147   :  { %v2493_v58 = vpop.f32.mrf.mxu0  ;;  %v2718_v59 = vpop.f32.mrf.mxu1 }
 0x148   :  { %v2449_v59 = vadd.f32 %v5738_v21, %v5648_v18  ;;  %v4762_v18 = vld [vmem:[%s7160_s0 + $0x7e8] ss:$36 sps:$4 sm:$0xff]  }
 0x149   :  { %v5785_v2 = vpop.f32.mrf.mxu0  ;;  %v2721_v5 = vpop.f32.mrf.mxu1  ;;  %2912 = vmatmul.mubr.bf16.gmra.mxu1 %v4743_v52  ;;  %3073 = vmatmul.mubr.bf16.gmra.mxu0 %v4746_v53  ;;  %v4759_v52 = vld [vmem:[%s7160_s0 + $0x328] ss:$36 sps:$4 sm:$0xff]  }
 0x14a   :  { %v5787_v8 = vadd.f32 %v2721_v5, %v2433_v1  ;;  %2919 = vmatprep.mubr.bf16.mxu1 %v4751_v55  ;;  %3080 = vmatprep.mubr.bf16.mxu0 %v4754_v48  ;;  %v4764_v55 = vld [vmem:[%s7160_s0 + $0x7ec] ss:$36 sps:$4 sm:$0xff]  }
 0x14b   :  { %v2498_v9 = vpop.f32.mrf.mxu0  ;;  %v2723_v12 = vpop.f32.mrf.mxu1 }
 0x14d   :  { %v5791_v14 = vpop.f32.mrf.mxu0  ;;  %v2724_v17 = vpop.f32.mrf.mxu1 }
 0x14e   :  { %v5799_v26 = vadd.f32 %v2724_v17, %v2436_v13  ;;  %v2452_v17 = vadd.f32 %v5738_v21, %v5652_v22  ;;  %v4775_v22 = vld [vmem:[%s7160_s0 + $0x3bc] ss:$36 sps:$4 sm:$0xff]  }
 0x14f   :  { %v2501_v28 = vpop.f32.mrf.mxu0  ;;  %v2726_v29 = vpop.f32.mrf.mxu1 }
 0x150   :  { %v4772_v28 = vld [vmem:[%s7160_s0 + $0x834] ss:$36 sps:$4 sm:$0xff]  }
 0x151   :  { %v5809_v33 = vpop.f32.mrf.mxu0  ;;  %v2729_v34 = vpop.f32.mrf.mxu1  ;;  %2920 = vmatmul.mubr.bf16.gmra.mxu1 %v4749_v56  ;;  %3081 = vmatmul.mubr.bf16.gmra.mxu0 %v4752_v20 }
 0x152   :  { %v5811_v38 = vadd.f32 %v2729_v34, %v2441_v31  ;;  %2927 = vmatprep.mubr.bf16.mxu1 %v4758_v27  ;;  %3088 = vmatprep.mubr.bf16.mxu0 %v4761_v61  ;;  %v4765_v27 = vld [vmem:[%s7160_s0 + $0x370] ss:$36 sps:$4 sm:$0xff]   ;;  %v2457_v34 = vadd.f32 %v5738_v21, %v5668_v0 }
 0x153   :  { %v2506_v40 = vpop.f32.mrf.mxu0  ;;  %v2731_v41 = vpop.f32.mrf.mxu1 }
 0x155   :  { %v5815_v47 = vpop.f32.mrf.mxu0  ;;  %v2732_v50 = vpop.f32.mrf.mxu1 }
 0x156   :  { %v5823_v53 = vadd.f32 %v2732_v50, %v2444_v42  ;;  %v4870_v50 = vld [vmem:[%s7159_s1 + $0x200] sm:$0xff]   ;;  %v2508_v16 = vadd.f32 %v5738_v21, %v5815_v47 }
 0x157   :  { %v2509_v48 = vpop.f32.mrf.mxu0  ;;  %v2734_v58 = vpop.f32.mrf.mxu1  ;;  %4382 = vmatprep.subr.bf16.mxu0 %v4870_v50  ;;  %v4819_v47 = vld [vmem:[%s7160_s0 + $0x13c] ss:$36 sps:$4 sm:$0xff]  }
 0x158   :  { %v4770_v48 = vld [vmem:[%s7160_s0 + $0x830] ss:$36 sps:$4 sm:$0xff]   ;;  %v4773_v58 = vld [vmem:[%s7160_s0 + $0x3b8] ss:$36 sps:$4 sm:$0xff]   ;;  %4383 = vmatpush3.bf16.msra.mxu0 %v4870_v50 }
 0x159   :  { %v5833_v1 = vpop.f32.mrf.mxu0  ;;  %v2737_v5 = vpop.f32.mrf.mxu1  ;;  %2928 = vmatmul.mubr.bf16.gmra.mxu1 %v4756_v6  ;;  %3089 = vmatmul.mubr.bf16.gmra.mxu0 %v4759_v52 }
 0x15a   :  { %v5835_v9 = vadd.f32 %v2737_v5, %v2449_v59  ;;  %2935 = vmatprep.mubr.bf16.mxu1 %v4764_v55  ;;  %3096 = vmatprep.mubr.bf16.mxu0 %v4767_v10  ;;  %v2460_v55 = vadd.f32 %v5738_v21, %v5675_v35  ;;  %v4778_v5 = vld [vmem:[%s7160_s0 + $0x87c] ss:$36 sps:$4 sm:$0xff]   ;;  %v4781_v35 = vld [vmem:[%s7160_s0 + $0x404] ss:$36 sps:$4 sm:$0xff]  }
 0x15b   :  { %v2514_v12 = vpop.f32.mrf.mxu0  ;;  %v2739_v13 = vpop.f32.mrf.mxu1 }
 0x15d   :  { %v5839_v56 = vpop.f32.mrf.mxu0  ;;  %v2740_v20 = vpop.f32.mrf.mxu1 }
 0x15e   :  { %v5847_v61 = vadd.f32 %v2740_v20, %v2452_v17  ;;  %v2465_v17 = vadd.f32 %v5738_v21, %v5691_v45  ;;  %v4776_v45 = vld [vmem:[%s7160_s0 + $0x878] ss:$36 sps:$4 sm:$0xff]   ;;  %v2516_v63 = vadd.f32 %v5738_v21, %v5839_v56  ;;  %v4826_v56 = vld [vmem:[%s7160_s0 + $0x184] ss:$36 sps:$4 sm:$0xff]  }
 0x15f   :  { %v2517_v29 = vpop.f32.mrf.mxu0  ;;  %v2742_v31 = vpop.f32.mrf.mxu1 }
 0x160   :  { %v2468_v29 = vadd.f32 %v5738_v21, %v5695_v32  ;;  %v4788_v32 = vld [vmem:[%s7160_s0 + $0x44c] ss:$36 sps:$4 sm:$0xff]  }
 0x161   :  { %v5857_v40 = vpop.f32.mrf.mxu0  ;;  %v2745_v41 = vpop.f32.mrf.mxu1  ;;  %2936 = vmatmul.mubr.bf16.gmra.mxu1 %v4762_v18  ;;  %3097 = vmatmul.mubr.bf16.gmra.mxu0 %v4765_v27 }
 0x162   :  { %v5859_v42 = vadd.f32 %v2745_v41, %v2457_v34  ;;  %2943 = vmatprep.mubr.bf16.mxu1 %v4772_v28  ;;  %3104 = vmatprep.mubr.bf16.mxu0 %v4775_v22  ;;  %v4779_v41 = vld [vmem:[%s7160_s0 + $0x400] ss:$36 sps:$4 sm:$0xff]  }
 0x163   :  { %v2522_v6 = vpop.f32.mrf.mxu0  ;;  %v2747_v52 = vpop.f32.mrf.mxu1 }
 0x164   :  { %v4785_v6 = vld [vmem:[%s7160_s0 + $0x8c4] ss:$36 sps:$4 sm:$0xff]  }
 0x165   :  { %v5866_v0 = vpop.f32.mrf.mxu0  ;;  %v2748_v10 = vpop.f32.mrf.mxu1 }
 0x166   :  { %v5874_v59 = vadd.f32 %v2748_v10, %v2460_v55  ;;  %v2473_v10 = vadd.f32 %v5738_v21, %v5711_v60  ;;  %v4783_v60 = vld [vmem:[%s7160_s0 + $0x8c0] ss:$36 sps:$4 sm:$0xff]   ;;  %v2524_v46 = vadd.f32 %v5738_v21, %v5866_v0  ;;  %v4832_v0 = vld [vmem:[%s7160_s0 + $0x1cc] ss:$36 sps:$4 sm:$0xff]  }
 0x167   :  { %v2525_v12 = vpop.f32.mrf.mxu0  ;;  %v2750_v13 = vpop.f32.mrf.mxu1 }
 0x168   :  { %v2476_v13 = vadd.f32 %v5738_v21, %v5715_v3  ;;  %v4794_v3 = vld [vmem:[%s7160_s0 + $0x1c] ss:$36 sps:$4 sm:$0xff]  }
 0x169   :  { %v5884_v20 = vpop.f32.mrf.mxu0  ;;  %v2753_v18 = vpop.f32.mrf.mxu1  ;;  %2944 = vmatmul.mubr.bf16.gmra.mxu1 %v4770_v48  ;;  %3105 = vmatmul.mubr.bf16.gmra.mxu0 %v4773_v58 }
 0x16a   :  { %v5886_v27 = vadd.f32 %v2753_v18, %v2465_v17  ;;  %2951 = vmatprep.mubr.bf16.mxu1 %v4778_v5  ;;  %3112 = vmatprep.mubr.bf16.mxu0 %v4781_v35 }
 0x16b   :  { %v2530_v28 = vpop.f32.mrf.mxu0  ;;  %v2755_v22 = vpop.f32.mrf.mxu1 }
 0x16c   :  { %v4786_v28 = vld [vmem:[%s7160_s0 + $0x448] ss:$36 sps:$4 sm:$0xff]  }
 0x16d   :  { %v5890_v31 = vpop.f32.mrf.mxu0  ;;  %v2756_v34 = vpop.f32.mrf.mxu1 }
 0x16e   :  { %v5898_v50 = vadd.f32 %v2756_v34, %v2468_v29  ;;  %v4791_v29 = vld [vmem:[%s7160_s0 + $0x494] ss:$36 sps:$4 sm:$0xff]  }
 0x16f   :  { %v2533_v52 = vpop.f32.mrf.mxu0  ;;  %v2758_v55 = vpop.f32.mrf.mxu1 }
 0x171   :  { %v5908_v48 = vpop.f32.mrf.mxu0  ;;  %v2761_v58 = vpop.f32.mrf.mxu1  ;;  %2952 = vmatmul.mubr.bf16.gmra.mxu1 %v4776_v45  ;;  %3113 = vmatmul.mubr.bf16.gmra.mxu0 %v4779_v41  ;;  %v2481_v41 = vadd.f32 %v5738_v21, %v5731_v15  ;;  %v4789_v15 = vld [vmem:[%s7160_s0 + $0x490] ss:$36 sps:$4 sm:$0xff]  }
 0x172   :  { %v5910_v5 = vadd.f32 %v2761_v58, %v2473_v10  ;;  %2959 = vmatprep.mubr.bf16.mxu1 %v4785_v6  ;;  %3120 = vmatprep.mubr.bf16.mxu0 %v4788_v32  ;;  %v2484_v58 = vadd.f32 %v5738_v21, %v5740_v24  ;;  %v4801_v24 = vld [vmem:[%s7160_s0 + $0x64] ss:$36 sps:$4 sm:$0xff]  }
 0x173   :  { %v2538_v35 = vpop.f32.mrf.mxu0  ;;  %v2763_v12 = vpop.f32.mrf.mxu1 }
 0x175   :  { %v5914_v17 = vpop.f32.mrf.mxu0  ;;  %v2764_v18 = vpop.f32.mrf.mxu1 }
 0x176   :  { %v5922_v22 = vadd.f32 %v2764_v18, %v2476_v13  ;;  %v4792_v13 = vld [vmem:[%s7160_s0 + $0x18] ss:$36 sps:$4 sm:$0xff]  }
 0x177   :  { %v2541_v34 = vpop.f32.mrf.mxu0  ;;  %v2766_v45 = vpop.f32.mrf.mxu1 }
 0x179   :  { %v5932_v6 = vpop.f32.mrf.mxu0  ;;  %v2769_v32 = vpop.f32.mrf.mxu1  ;;  %2960 = vmatmul.mubr.bf16.gmra.mxu1 %v4783_v60  ;;  %3121 = vmatmul.mubr.bf16.gmra.mxu0 %v4786_v28  ;;  %v4798_v60 = vld [vmem:[%s7160_s0 + $0x4dc] ss:$36 sps:$4 sm:$0xff]  }
 0x17a   :  { %v5934_v52 = vadd.f32 %v2769_v32, %v2481_v41  ;;  %3128 = vmatprep.mubr.bf16.mxu0 %v4791_v29  ;;  %3289 = vmatprep.mubr.bf16.mxu1 %v4794_v3  ;;  %v2489_v3 = vadd.f32 %v5738_v21, %v5758_v37  ;;  %v4796_v37 = vld [vmem:[%s7160_s0 + $0x4d8] ss:$36 sps:$4 sm:$0xff]  }
 0x17b   :  { %v2546_v55 = vpop.f32.mrf.mxu0  ;;  %v2771_v10 = vpop.f32.mrf.mxu1 }
 0x17c   :  { %v2492_v10 = vadd.f32 %v5738_v21, %v5767_v43  ;;  %v4807_v43 = vld [vmem:[%s7160_s0 + $0xac] ss:$36 sps:$4 sm:$0xff]  }
 0x17d   :  { %v5938_v35 = vpop.f32.mrf.mxu0  ;;  %v2772_v12 = vpop.f32.mrf.mxu1 }
 0x17e   :  { %v5946_v18 = vadd.f32 %v2772_v12, %v2484_v58 }
 0x17f   :  { %v2549_v28 = vpop.f32.mrf.mxu0  ;;  %v2774_v29 = vpop.f32.mrf.mxu1 }
 0x180   :  { %v2497_v29 = vadd.f32 %v5738_v21, %v5785_v2  ;;  %v4802_v2 = vld [vmem:[%s7160_s0 + $0x520] ss:$36 sps:$4 sm:$0xff]  }
 0x181   :  { %v5956_v34 = vpop.f32.mrf.mxu0  ;;  %v2777_v45 = vpop.f32.mrf.mxu1  ;;  %3129 = vmatmul.mubr.bf16.gmra.mxu0 %v4789_v15  ;;  %3290 = vmatmul.mubr.bf16.vlgmr.msra.gmra.mxu1 %v4792_v13  ;;  %v4799_v15 = vld [vmem:[%s7160_s0 + $0x60] ss:$36 sps:$4 sm:$0xff]  }
 0x182   :  { %v5958_v41 = vadd.f32 %v2777_v45, %v2489_v3  ;;  %3136 = vmatprep.mubr.bf16.mxu0 %v4798_v60  ;;  %3297 = vmatprep.mubr.bf16.mxu1 %v4801_v24  ;;  %v4804_v60 = vld [vmem:[%s7160_s0 + $0x524] ss:$36 sps:$4 sm:$0xff]  }
 0x183   :  { %v2554_v32 = vpop.f32.mrf.mxu0  ;;  %v2779_v55 = vpop.f32.mrf.mxu1 }
 0x185   :  { %v5962_v58 = vpop.f32.mrf.mxu0  ;;  %v2780_v12 = vpop.f32.mrf.mxu1 }
 0x186   :  { %v5970_v13 = vadd.f32 %v2780_v12, %v2492_v10  ;;  %v2500_v12 = vadd.f32 %v5738_v21, %v5791_v14  ;;  %v4813_v14 = vld [vmem:[%s7160_s0 + $0xf4] ss:$36 sps:$4 sm:$0xff]  }
 0x187   :  { %v2557_v24 = vpop.f32.mrf.mxu0  ;;  %v2782_v28 = vpop.f32.mrf.mxu1 }
 0x189   :  { %v5980_v3 = vpop.f32.mrf.mxu0  ;;  %v2785_v45 = vpop.f32.mrf.mxu1  ;;  %3137 = vmatmul.mubr.bf16.gmra.mxu0 %v4796_v37  ;;  %3298 = vmatmul.mubr.bf16.gmra.mxu1 %v4799_v15  ;;  %v4805_v37 = vld [vmem:[%s7160_s0 + $0xa8] ss:$36 sps:$4 sm:$0xff]  }
 0x18a   :  { %v5982_v32 = vadd.f32 %v2785_v45, %v2497_v29  ;;  %3144 = vmatprep.mubr.bf16.mxu0 %v4804_v60  ;;  %3305 = vmatprep.mubr.bf16.mxu1 %v4807_v43  ;;  %v4810_v60 = vld [vmem:[%s7160_s0 + $0x56c] ss:$36 sps:$4 sm:$0xff]   ;;  %v2505_v29 = vadd.f32 %v5738_v21, %v5809_v33 }
 0x18b   :  { %v2562_v55 = vpop.f32.mrf.mxu0  ;;  %v2787_v10 = vpop.f32.mrf.mxu1  ;;  %v4808_v33 = vld [vmem:[%s7160_s0 + $0x568] ss:$36 sps:$4 sm:$0xff]  }
 0x18d   :  { %v5986_v25 = vpop.f32.mrf.mxu0  ;;  %v2788_v24 = vpop.f32.mrf.mxu1 }
 0x18e   :  { %v5994_v15 = vadd.f32 %v2788_v24, %v2500_v12 }
 0x18f   :  { %v2565_v43 = vpop.f32.mrf.mxu0  ;;  %v2790_v28 = vpop.f32.mrf.mxu1 }
 0x191   :  { %v6004_v45 = vpop.f32.mrf.mxu0  ;;  %v2793_v55 = vpop.f32.mrf.mxu1  ;;  %3145 = vmatmul.mubr.bf16.gmra.mxu0 %v4802_v2  ;;  %3306 = vmatmul.mubr.bf16.gmra.mxu1 %v4805_v37  ;;  %v4811_v2 = vld [vmem:[%s7160_s0 + $0xf0] ss:$36 sps:$4 sm:$0xff]  }
 0x192   :  { %v6006_v10 = vadd.f32 %v2793_v55, %v2505_v29  ;;  %3152 = vmatprep.mubr.bf16.mxu0 %v4810_v60  ;;  %3313 = vmatprep.mubr.bf16.mxu1 %v4813_v14  ;;  %v4816_v60 = vld [vmem:[%s7160_s0 + $0x5b4] ss:$36 sps:$4 sm:$0xff]   ;;  %v2513_v29 = vadd.f32 %v5738_v21, %v5833_v1 }
 0x193   :  { %v2570_v12 = vpop.f32.mrf.mxu0  ;;  %v2795_v24 = vpop.f32.mrf.mxu1  ;;  %v4814_v1 = vld [vmem:[%s7160_s0 + $0x5b0] ss:$36 sps:$4 sm:$0xff]  }
 0x195   :  { %v6010_v4 = vpop.f32.mrf.mxu0  ;;  %v2796_v43 = vpop.f32.mrf.mxu1 }
 0x196   :  { %v6018_v37 = vadd.f32 %v2796_v43, %v2508_v16 }
 0x197   :  { %v2573_v14 = vpop.f32.mrf.mxu0  ;;  %v2798_v28 = vpop.f32.mrf.mxu1 }
 0x199   :  { %v6028_v55 = vpop.f32.mrf.mxu0  ;;  %v2801_v12 = vpop.f32.mrf.mxu1  ;;  %3153 = vmatmul.mubr.bf16.gmra.mxu0 %v4808_v33  ;;  %3314 = vmatmul.mubr.bf16.gmra.mxu1 %v4811_v2  ;;  %v4817_v33 = vld [vmem:[%s7160_s0 + $0x138] ss:$36 sps:$4 sm:$0xff]  }
 0x19a   :  { %v6030_v16 = vadd.f32 %v2801_v12, %v2513_v29  ;;  %3160 = vmatprep.mubr.bf16.mxu0 %v4816_v60  ;;  %3321 = vmatprep.mubr.bf16.mxu1 %v4819_v47  ;;  %v4823_v60 = vld [vmem:[%s7160_s0 + $0x5fc] ss:$36 sps:$4 sm:$0xff]   ;;  %v2521_v29 = vadd.f32 %v5738_v21, %v5857_v40 }
 0x19b   :  { %v2578_v24 = vpop.f32.mrf.mxu0  ;;  %v2803_v43 = vpop.f32.mrf.mxu1  ;;  %v4821_v40 = vld [vmem:[%s7160_s0 + $0x5f8] ss:$36 sps:$4 sm:$0xff]  }
 0x19d   :  { %v6034_v51 = vpop.f32.mrf.mxu0  ;;  %v2804_v14 = vpop.f32.mrf.mxu1 }
 0x19e   :  { %v6042_v2 = vadd.f32 %v2804_v14, %v2516_v63 }
 0x19f   :  { %v2581_v47 = vpop.f32.mrf.mxu0  ;;  %v2806_v28 = vpop.f32.mrf.mxu1 }
 0x1a1   :  { %v6052_v12 = vpop.f32.mrf.mxu0  ;;  %v2809_v24 = vpop.f32.mrf.mxu1  ;;  %3161 = vmatmul.mubr.bf16.gmra.mxu0 %v4814_v1  ;;  %3322 = vmatmul.mubr.bf16.gmra.mxu1 %v4817_v33  ;;  %v4824_v1 = vld [vmem:[%s7160_s0 + $0x180] ss:$36 sps:$4 sm:$0xff]  }
 0x1a2   :  { %v6054_v63 = vadd.f32 %v2809_v24, %v2521_v29  ;;  %3168 = vmatprep.mubr.bf16.mxu0 %v4823_v60  ;;  %3329 = vmatprep.mubr.bf16.mxu1 %v4826_v56  ;;  %v4829_v60 = vld [vmem:[%s7160_s0 + $0x644] ss:$36 sps:$4 sm:$0xff]   ;;  %v2529_v29 = vadd.f32 %v5738_v21, %v5884_v20 }
 0x1a3   :  { %v2586_v43 = vpop.f32.mrf.mxu0  ;;  %v2811_v14 = vpop.f32.mrf.mxu1  ;;  %v4827_v20 = vld [vmem:[%s7160_s0 + $0x640] ss:$36 sps:$4 sm:$0xff]  }
 0x1a4   :  { %7170 = vst [vmem:[#allocation9_spill] sm:$0xff] %v6054_v63 }
 0x1a5   :  { %v6058_v36 = vpop.f32.mrf.mxu0  ;;  %v2812_v47 = vpop.f32.mrf.mxu1 }
 0x1a6   :  { %v6066_v33 = vadd.f32 %v2812_v47, %v2524_v46 }
 0x1a7   :  { %v2589_v56 = vpop.f32.mrf.mxu0  ;;  %v2814_v28 = vpop.f32.mrf.mxu1 }
 0x1a8   :  { %7171 = vst [vmem:[#allocation10_spill] sm:$0xff] %v6066_v33  ;;  %v2532_v33 = vadd.f32 %v5738_v21, %v5890_v31  ;;  %v4838_v31 = vld [vmem:[%s7160_s0 + $0x214] ss:$36 sps:$4 sm:$0xff]  }
 0x1a9   :  { %v6076_v24 = vpop.f32.mrf.mxu0  ;;  %v2817_v43 = vpop.f32.mrf.mxu1  ;;  %3169 = vmatmul.mubr.bf16.gmra.mxu0 %v4821_v40  ;;  %3330 = vmatmul.mubr.bf16.gmra.mxu1 %v4824_v1  ;;  %v4830_v40 = vld [vmem:[%s7160_s0 + $0x1c8] ss:$36 sps:$4 sm:$0xff]  }
 0x1aa   :  { %v6078_v46 = vadd.f32 %v2817_v43, %v2529_v29  ;;  %3176 = vmatprep.mubr.bf16.mxu0 %v4829_v60  ;;  %3337 = vmatprep.mubr.bf16.mxu1 %v4832_v0  ;;  %v4835_v60 = vld [vmem:[%s7160_s0 + $0x68c] ss:$36 sps:$4 sm:$0xff]   ;;  %v2537_v29 = vadd.f32 %v5738_v21, %v5908_v48 }
 0x1ab   :  { %v2594_v14 = vpop.f32.mrf.mxu0  ;;  %v2819_v47 = vpop.f32.mrf.mxu1  ;;  %v4833_v48 = vld [vmem:[%s7160_s0 + $0x688] ss:$36 sps:$4 sm:$0xff]  }
 0x1ac   :  { %7172 = vst [vmem:[#allocation11_spill] sm:$0xff] %v6078_v46 }
 0x1ad   :  { %v6082_v63 = vpop.f32.mrf.mxu0  ;;  %v2820_v56 = vpop.f32.mrf.mxu1 }
 0x1ae   :  { %v6090_v1 = vadd.f32 %v2820_v56, %v2532_v33 }
 0x1af   :  { %v2597_v0 = vpop.f32.mrf.mxu0  ;;  %v2822_v28 = vpop.f32.mrf.mxu1 }
 0x1b0   :  { %7173 = vst [vmem:[#allocation12_spill] sm:$0xff] %v6090_v1  ;;  %v2540_v1 = vadd.f32 %v5738_v21, %v5914_v17  ;;  %v4844_v17 = vld [vmem:[%s7160_s0 + $0x25c] ss:$36 sps:$4 sm:$0xff]  }
 0x1b1   :  { %v6100_v43 = vpop.f32.mrf.mxu0  ;;  %v2825_v14 = vpop.f32.mrf.mxu1  ;;  %3177 = vmatmul.mubr.bf16.gmra.mxu0 %v4827_v20  ;;  %3338 = vmatmul.mubr.bf16.gmra.mxu1 %v4830_v40  ;;  %v4836_v20 = vld [vmem:[%s7160_s0 + $0x210] ss:$36 sps:$4 sm:$0xff]  }
 0x1b2   :  { %v6102_v33 = vadd.f32 %v2825_v14, %v2537_v29  ;;  %3184 = vmatprep.mubr.bf16.mxu0 %v4835_v60  ;;  %3345 = vmatprep.mubr.bf16.mxu1 %v4838_v31  ;;  %v4841_v60 = vld [vmem:[%s7160_s0 + $0x6d4] ss:$36 sps:$4 sm:$0xff]   ;;  %v2545_v29 = vadd.f32 %v5738_v21, %v5932_v6 }
 0x1b3   :  { %v2602_v47 = vpop.f32.mrf.mxu0  ;;  %v2827_v56 = vpop.f32.mrf.mxu1  ;;  %v4839_v6 = vld [vmem:[%s7160_s0 + $0x6d0] ss:$36 sps:$4 sm:$0xff]  }
 0x1b4   :  { %7174 = vst [vmem:[#allocation13_spill] sm:$0xff] %v6102_v33 }
 0x1b5   :  { %v6106_v46 = vpop.f32.mrf.mxu0  ;;  %v2828_v0 = vpop.f32.mrf.mxu1 }
 0x1b6   :  { %v6114_v40 = vadd.f32 %v2828_v0, %v2540_v1 }
 0x1b7   :  { %v2605_v31 = vpop.f32.mrf.mxu0  ;;  %v2830_v28 = vpop.f32.mrf.mxu1 }
 0x1b8   :  { %7175 = vst [vmem:[#allocation14_spill] sm:$0xff] %v6114_v40  ;;  %v2548_v40 = vadd.f32 %v5738_v21, %v5938_v35  ;;  %v4851_v35 = vld [vmem:[%s7160_s0 + $0x2a4] ss:$36 sps:$4 sm:$0xff]  }
 0x1b9   :  { %v6124_v14 = vpop.f32.mrf.mxu0  ;;  %v2833_v47 = vpop.f32.mrf.mxu1  ;;  %3185 = vmatmul.mubr.bf16.gmra.mxu0 %v4833_v48  ;;  %3346 = vmatmul.mubr.bf16.gmra.mxu1 %v4836_v20  ;;  %v4842_v48 = vld [vmem:[%s7160_s0 + $0x258] ss:$36 sps:$4 sm:$0xff]  }
 0x1ba   :  { %v6126_v1 = vadd.f32 %v2833_v47, %v2545_v29  ;;  %3192 = vmatprep.mubr.bf16.mxu0 %v4841_v60  ;;  %3353 = vmatprep.mubr.bf16.mxu1 %v4844_v17  ;;  %v4848_v60 = vld [vmem:[%s7160_s0 + $0x71c] ss:$36 sps:$4 sm:$0xff]   ;;  %v2553_v29 = vadd.f32 %v5738_v21, %v5956_v34 }
 0x1bb   :  { %v2610_v56 = vpop.f32.mrf.mxu0  ;;  %v2835_v0 = vpop.f32.mrf.mxu1  ;;  %v4846_v34 = vld [vmem:[%s7160_s0 + $0x718] ss:$36 sps:$4 sm:$0xff]  }
 0x1bc   :  { %7176 = vst [vmem:[#allocation15_spill] sm:$0xff] %v6126_v1 }
 0x1bd   :  { %v6130_v33 = vpop.f32.mrf.mxu0  ;;  %v2836_v31 = vpop.f32.mrf.mxu1 }
 0x1be   :  { %v6138_v20 = vadd.f32 %v2836_v31, %v2548_v40 }
 0x1bf   :  { %v2613_v17 = vpop.f32.mrf.mxu0  ;;  %v2838_v28 = vpop.f32.mrf.mxu1 }
 0x1c0   :  { %7177 = vst [vmem:[#allocation16_spill] sm:$0xff] %v6138_v20  ;;  %v2556_v17 = vadd.f32 %v5738_v21, %v5962_v58  ;;  %v4857_v58 = vld [vmem:[%s7160_s0 + $0x2ec] ss:$36 sps:$4 sm:$0xff]  }
 0x1c1   :  { %v2841_v47 = vpop.f32.mrf.mxu1  ;;  %v3002_v56 = vpop.f32.mrf.mxu0  ;;  %3193 = vmatmul.mubr.bf16.gmra.mxu0 %v4839_v6  ;;  %3354 = vmatmul.mubr.bf16.gmra.mxu1 %v4842_v48  ;;  %v4849_v6 = vld [vmem:[%s7160_s0 + $0x2a0] ss:$36 sps:$4 sm:$0xff]  }
 0x1c2   :  { %v6148_v0 = vadd.f32 %v2841_v47, %v2553_v29  ;;  %v6151_v40 = vadd.f32 %v3002_v56, %v5760_v39  ;;  %3200 = vmatprep.mubr.bf16.mxu0 %v4848_v60  ;;  %3361 = vmatprep.mubr.bf16.mxu1 %v4851_v35  ;;  %v2561_v29 = vadd.f32 %v5738_v21, %v5980_v3  ;;  %v4852_v3 = vld [vmem:[%s7160_s0 + $0x760] ss:$36 sps:$4 sm:$0xff]  }
 0x1c3   :  { %v2843_v31 = vpop.f32.mrf.mxu1  ;;  %v3004_v20 = vpop.f32.mrf.mxu0 }
 0x1c4   :  { %v4854_v20 = vld [vmem:[%s7160_s0 + $0x764] ss:$36 sps:$4 sm:$0xff]  }
 0x1c5   :  { %v2844_v28 = vpop.f32.mrf.mxu1  ;;  %v3005_v1 = vpop.f32.mrf.mxu0 }
 0x1c6   :  { %v6161_v48 = vadd.f32 %v2844_v28, %v2556_v17  ;;  %v6164_v39 = vadd.f32 %v3005_v1, %v5775_v54  ;;  %v2564_v28 = vadd.f32 %v5738_v21, %v5986_v25  ;;  %v4863_v25 = vld [vmem:[%s7160_s0 + $0x334] ss:$36 sps:$4 sm:$0xff]  }
 0x1c7   :  { %v2846_v60 = vpop.f32.mrf.mxu1  ;;  %v3007_v35 = vpop.f32.mrf.mxu0 }
 0x1c9   :  { %v2849_v47 = vpop.f32.mrf.mxu1  ;;  %v3010_v56 = vpop.f32.mrf.mxu0  ;;  %3201 = vmatmul.mubr.bf16.gmra.mxu0 %v4846_v34  ;;  %3362 = vmatmul.mubr.bf16.gmra.mxu1 %v4849_v6  ;;  %v4855_v34 = vld [vmem:[%s7160_s0 + $0x2e8] ss:$36 sps:$4 sm:$0xff]  }
 0x1ca   :  { %v6174_v31 = vadd.f32 %v2849_v47, %v2561_v29  ;;  %v6177_v54 = vadd.f32 %v3010_v56, %v5787_v8  ;;  %3208 = vmatprep.mubr.bf16.mxu0 %v4854_v20  ;;  %3369 = vmatprep.mubr.bf16.mxu1 %v4857_v58  ;;  %v4860_v20 = vld [vmem:[%s7160_s0 + $0x7ac] ss:$36 sps:$4 sm:$0xff]   ;;  %v2569_v47 = vadd.f32 %v5738_v21, %v6004_v45 }
 0x1cb   :  { %v2851_v1 = vpop.f32.mrf.mxu1  ;;  %v3012_v17 = vpop.f32.mrf.mxu0  ;;  %v4858_v45 = vld [vmem:[%s7160_s0 + $0x7a8] ss:$36 sps:$4 sm:$0xff]  }
 0x1cd   :  { %v2852_v60 = vpop.f32.mrf.mxu1  ;;  %v3013_v35 = vpop.f32.mrf.mxu0 }
 0x1ce   :  { %v6187_v6 = vadd.f32 %v2852_v60, %v2564_v28  ;;  %v6190_v8 = vadd.f32 %v3013_v35, %v5799_v26  ;;  %v2572_v35 = vadd.f32 %v5738_v21, %v6010_v4  ;;  %v4869_v4 = vld [vmem:[%s7160_s0 + $0x37c] ss:$36 sps:$4 sm:$0xff]  }
 0x1cf   :  { %v2854_v58 = vpop.f32.mrf.mxu1  ;;  %v3015_v29 = vpop.f32.mrf.mxu0 }
 0x1d1   :  { %v2857_v56 = vpop.f32.mrf.mxu1  ;;  %v3018_v1 = vpop.f32.mrf.mxu0  ;;  %3209 = vmatmul.mubr.bf16.gmra.mxu0 %v4852_v3  ;;  %3370 = vmatmul.mubr.bf16.gmra.mxu1 %v4855_v34  ;;  %v4861_v3 = vld [vmem:[%s7160_s0 + $0x330] ss:$36 sps:$4 sm:$0xff]  }
 0x1d2   :  { %v6200_v17 = vadd.f32 %v2857_v56, %v2569_v47  ;;  %v6203_v26 = vadd.f32 %v3018_v1, %v5811_v38  ;;  %3216 = vmatprep.mubr.bf16.mxu0 %v4860_v20  ;;  %3377 = vmatprep.mubr.bf16.mxu1 %v4863_v25  ;;  %v4866_v20 = vld [vmem:[%s7160_s0 + $0x7f4] ss:$36 sps:$4 sm:$0xff]   ;;  %v2577_v56 = vadd.f32 %v5738_v21, %v6028_v55 }
 0x1d3   :  { %v2859_v28 = vpop.f32.mrf.mxu1  ;;  %v3020_v60 = vpop.f32.mrf.mxu0  ;;  %v4864_v55 = vld [vmem:[%s7160_s0 + $0x7f0] ss:$36 sps:$4 sm:$0xff]  }
 0x1d5   :  { %v2860_v58 = vpop.f32.mrf.mxu1  ;;  %v3021_v29 = vpop.f32.mrf.mxu0 }
 0x1d6   :  { %v6213_v34 = vadd.f32 %v2860_v58, %v2572_v35  ;;  %v6216_v38 = vadd.f32 %v3021_v29, %v5823_v53  ;;  %v2580_v29 = vadd.f32 %v5738_v21, %v6034_v51  ;;  %v4876_v51 = vld [vmem:[%s7160_s0 + $0x3c4] ss:$36 sps:$4 sm:$0xff]  }
 0x1d7   :  { %v2862_v25 = vpop.f32.mrf.mxu1  ;;  %v3023_v47 = vpop.f32.mrf.mxu0 }
 0x1d9   :  { %v2865_v1 = vpop.f32.mrf.mxu1  ;;  %v3026_v28 = vpop.f32.mrf.mxu0  ;;  %3217 = vmatmul.mubr.bf16.gmra.mxu0 %v4858_v45  ;;  %3378 = vmatmul.mubr.bf16.gmra.mxu1 %v4861_v3  ;;  %v4867_v45 = vld [vmem:[%s7160_s0 + $0x378] ss:$36 sps:$4 sm:$0xff]  }
 0x1da   :  { %v6226_v60 = vadd.f32 %v2865_v1, %v2577_v56  ;;  %v6229_v53 = vadd.f32 %v3026_v28, %v5835_v9  ;;  %3224 = vmatprep.mubr.bf16.mxu0 %v4866_v20  ;;  %3385 = vmatprep.mubr.bf16.mxu1 %v4869_v4  ;;  %v4873_v20 = vld [vmem:[%s7160_s0 + $0x83c] ss:$36 sps:$4 sm:$0xff]   ;;  %v2585_v1 = vadd.f32 %v5738_v21, %v6052_v12 }
 0x1db   :  { %v2867_v35 = vpop.f32.mrf.mxu1  ;;  %v3028_v58 = vpop.f32.mrf.mxu0  ;;  %v4871_v12 = vld [vmem:[%s7160_s0 + $0x838] ss:$36 sps:$4 sm:$0xff]  }
 0x1dd   :  { %v2868_v25 = vpop.f32.mrf.mxu1  ;;  %v3029_v47 = vpop.f32.mrf.mxu0 }
 0x1de   :  { %v6239_v3 = vadd.f32 %v2868_v25, %v2580_v29  ;;  %v6242_v9 = vadd.f32 %v3029_v47, %v5847_v61  ;;  %v2588_v47 = vadd.f32 %v5738_v21, %v6058_v36  ;;  %v4882_v36 = vld [vmem:[%s7160_s0 + $0x40c] ss:$36 sps:$4 sm:$0xff]  }
 0x1df   :  { %v2870_v4 = vpop.f32.mrf.mxu1  ;;  %v3031_v56 = vpop.f32.mrf.mxu0 }
 0x1e1   :  { %v2873_v28 = vpop.f32.mrf.mxu1  ;;  %v3034_v35 = vpop.f32.mrf.mxu0  ;;  %3225 = vmatmul.mubr.bf16.gmra.mxu0 %v4864_v55  ;;  %3386 = vmatmul.mubr.bf16.gmra.mxu1 %v4867_v45  ;;  %v4874_v55 = vld [vmem:[%s7160_s0 + $0x3c0] ss:$36 sps:$4 sm:$0xff]  }
 0x1e2   :  { %v6252_v58 = vadd.f32 %v2873_v28, %v2585_v1  ;;  %v6255_v61 = vadd.f32 %v3034_v35, %v5859_v42  ;;  %3232 = vmatprep.mubr.bf16.mxu0 %v4873_v20  ;;  %3393 = vmatprep.mubr.bf16.mxu1 %v4876_v51  ;;  %v4879_v20 = vld [vmem:[%s7160_s0 + $0x884] ss:$36 sps:$4 sm:$0xff]   ;;  %v2593_v28 = vadd.f32 %v5738_v21, %v6076_v24 }
 0x1e3   :  { %v2875_v29 = vpop.f32.mrf.mxu1  ;;  %v3036_v25 = vpop.f32.mrf.mxu0  ;;  %v4877_v24 = vld [vmem:[%s7160_s0 + $0x880] ss:$36 sps:$4 sm:$0xff]  }
 0x1e5   :  { %v2876_v4 = vpop.f32.mrf.mxu1  ;;  %v3037_v56 = vpop.f32.mrf.mxu0 }
 0x1e6   :  { %v6265_v45 = vadd.f32 %v2876_v4, %v2588_v47  ;;  %v6268_v42 = vadd.f32 %v3037_v56, %v5874_v59  ;;  %v2596_v56 = vadd.f32 %v5738_v21, %v6082_v63  ;;  %v4888_v63 = vld [vmem:[%s7160_s0 + $0x454] ss:$36 sps:$4 sm:$0xff]  }
 0x1e7   :  { %v2878_v51 = vpop.f32.mrf.mxu1  ;;  %v3039_v1 = vpop.f32.mrf.mxu0 }
 0x1e9   :  { %v2881_v35 = vpop.f32.mrf.mxu1  ;;  %v3042_v29 = vpop.f32.mrf.mxu0  ;;  %3233 = vmatmul.mubr.bf16.gmra.mxu0 %v4871_v12  ;;  %3394 = vmatmul.mubr.bf16.gmra.mxu1 %v4874_v55  ;;  %v4880_v12 = vld [vmem:[%s7160_s0 + $0x408] ss:$36 sps:$4 sm:$0xff]  }
 0x1ea   :  { %v6278_v25 = vadd.f32 %v2881_v35, %v2593_v28  ;;  %v6281_v59 = vadd.f32 %v3042_v29, %v5886_v27  ;;  %3240 = vmatprep.mubr.bf16.mxu0 %v4879_v20  ;;  %3401 = vmatprep.mubr.bf16.mxu1 %v4882_v36  ;;  %v4885_v20 = vld [vmem:[%s7160_s0 + $0x8cc] ss:$36 sps:$4 sm:$0xff]   ;;  %v2601_v35 = vadd.f32 %v5738_v21, %v6100_v43 }
 0x1eb   :  { %v2883_v47 = vpop.f32.mrf.mxu1  ;;  %v3044_v4 = vpop.f32.mrf.mxu0  ;;  %v4883_v43 = vld [vmem:[%s7160_s0 + $0x8c8] ss:$36 sps:$4 sm:$0xff]  }
 0x1ed   :  { %v2884_v51 = vpop.f32.mrf.mxu1  ;;  %v3045_v1 = vpop.f32.mrf.mxu0 }
 0x1ee   :  { %v6291_v55 = vadd.f32 %v2884_v51, %v2596_v56  ;;  %v6294_v27 = vadd.f32 %v3045_v1, %v5898_v50  ;;  %v2604_v1 = vadd.f32 %v5738_v21, %v6106_v46  ;;  %v4892_v46 = vld [vmem:[%s7160_s0 + $0x20] ss:$36 sps:$4 sm:$0xff]  }
 0x1ef   :  { %v2886_v36 = vpop.f32.mrf.mxu1  ;;  %v3047_v28 = vpop.f32.mrf.mxu0 }
 0x1f1   :  { %v2889_v29 = vpop.f32.mrf.mxu1  ;;  %v3050_v47 = vpop.f32.mrf.mxu0  ;;  %3241 = vmatmul.mubr.bf16.gmra.mxu0 %v4877_v24  ;;  %3402 = vmatmul.mubr.bf16.gmra.mxu1 %v4880_v12  ;;  %v4886_v24 = vld [vmem:[%s7160_s0 + $0x450] ss:$36 sps:$4 sm:$0xff]  }
 0x1f2   :  { %v6304_v4 = vadd.f32 %v2889_v29, %v2601_v35  ;;  %v6307_v50 = vadd.f32 %v3050_v47, %v5910_v5  ;;  %3248 = vmatprep.mubr.bf16.mxu0 %v4885_v20  ;;  %3409 = vmatprep.mubr.bf16.mxu1 %v4888_v63  ;;  %v4891_v20 = vld [vmem:[%s7160_s0 + $0x49c] ss:$36 sps:$4 sm:$0xff]   ;;  %v2609_v29 = vadd.f32 %v5738_v21, %v6124_v14 }
 0x1f3   :  { %v2891_v56 = vpop.f32.mrf.mxu1  ;;  %v3052_v51 = vpop.f32.mrf.mxu0  ;;  %v4889_v14 = vld [vmem:[%s7160_s0 + $0x498] ss:$36 sps:$4 sm:$0xff]  }
 0x1f5   :  { %v2892_v36 = vpop.f32.mrf.mxu1  ;;  %v3053_v28 = vpop.f32.mrf.mxu0 }
 0x1f6   :  { %v6317_v12 = vadd.f32 %v2892_v36, %v2604_v1  ;;  %v6320_v5 = vadd.f32 %v3053_v28, %v5922_v22  ;;  %v2612_v28 = vadd.f32 %v5738_v21, %v6130_v33  ;;  %v4897_v33 = vld [vmem:[%s7160_s0 + $0xb0] ss:$36 sps:$4 sm:$0xff]  }
 0x1f7   :  { %v2894_v63 = vpop.f32.mrf.mxu1  ;;  %v3055_v35 = vpop.f32.mrf.mxu0 }
 0x1f9   :  { %v2897_v47 = vpop.f32.mrf.mxu1  ;;  %v3058_v56 = vpop.f32.mrf.mxu0  ;;  %3249 = vmatmul.mubr.bf16.gmra.mxu0 %v4883_v43  ;;  %3410 = vmatmul.mubr.bf16.gmra.mxu1 %v4886_v24  ;;  %v4893_v43 = vld [vmem:[%s7160_s0 + $0x68] ss:$36 sps:$4 sm:$0xff]  }
 0x1fa   :  { %v6330_v51 = vadd.f32 %v2897_v47, %v2609_v29  ;;  %v6333_v22 = vadd.f32 %v3058_v56, %v5934_v52  ;;  %3417 = vmatprep.mubr.bf16.mxu1 %v4891_v20  ;;  %4384 = vmatprep.mubr.bf16.mxu0 %v4892_v46  ;;  %v4896_v20 = vld [vmem:[%s7160_s0 + $0x4e4] ss:$36 sps:$4 sm:$0xff]   ;;  %v2617_v47 = vadd.f32 %v5738_v21, %v5580_v44 }
 0x1fb   :  { %v2899_v1 = vpop.f32.mrf.mxu1  ;;  %v3060_v36 = vpop.f32.mrf.mxu0 }
 0x1fd   :  { %v2900_v63 = vpop.f32.mrf.mxu1  ;;  %v3061_v35 = vpop.f32.mrf.mxu0 }
 0x1fe   :  { %v6343_v24 = vadd.f32 %v2900_v63, %v2612_v28  ;;  %v6346_v52 = vadd.f32 %v3061_v35, %v5946_v18  ;;  %v6364_v35 = vld [vmem:[%s7161_s2] ss:$0 sm:$0xff] }
 0x1ff   :  { %v2902_v46 = vpop.f32.mrf.mxu1  ;;  %v3063_v29 = vpop.f32.mrf.mxu0  ;;  %v2620_v44 = vadd.f32 %v6364_v35, %v5588_v49  ;;  %v4902_v49 = vld [vmem:[%s7160_s0 + $0x140] ss:$36 sps:$4 sm:$0xff]  }
 0x200   :  { %v4901_v46 = vld [vmem:[%s7160_s0 + $0x52c] ss:$36 sps:$4 sm:$0xff]  }
 0x201   :  { %v2905_v56 = vpop.f32.mrf.mxu1  ;;  %v3066_v1 = vpop.f32.mrf.mxu0  ;;  %3418 = vmatmul.mubr.bf16.gmra.mxu1 %v4889_v14  ;;  %4385 = vmatmul.mubr.bf16.vlgmr.msra.gmra.mxu0 %v4893_v43  ;;  %v4894_v43 = vld [vmem:[%s7160_s0 + $0x4e0] ss:$36 sps:$4 sm:$0xff]  }
 0x202   :  { %v6356_v36 = vadd.f32 %v2905_v56, %v2617_v47  ;;  %v6359_v18 = vadd.f32 %v3066_v1, %v5958_v41  ;;  %3425 = vmatprep.mubr.bf16.mxu1 %v4896_v20  ;;  %4388 = vmatprep.mubr.bf16.mxu0 %v4897_v33  ;;  %v4898_v41 = vld [vmem:[%s7160_s0 + $0xf8] ss:$36 sps:$4 sm:$0xff]   ;;  %v2625_v56 = vadd.f32 %v6364_v35, %v5607_v57  ;;  %v4899_v57 = vld [vmem:[%s7160_s0 + $0x528] ss:$36 sps:$4 sm:$0xff]  }
 0x203   :  { %v2907_v28 = vpop.f32.mrf.mxu1  ;;  %v3068_v63 = vpop.f32.mrf.mxu0 }
 0x205   :  { %v2908_v21 = vpop.f32.mrf.mxu1  ;;  %v3069_v14 = vpop.f32.mrf.mxu0 }
 0x206   :  { %v6374_v20 = vadd.f32 %v2908_v21, %v2620_v44  ;;  %v6377_v33 = vadd.f32 %v3069_v14, %v5970_v13  ;;  %v2628_v14 = vadd.f32 %v6364_v35, %v5614_v62  ;;  %v4907_v62 = vld [vmem:[%s7160_s0 + $0x1d0] ss:$36 sps:$4 sm:$0xff]  }
 0x207   :  { %v2910_v29 = vpop.f32.mrf.mxu1  ;;  %v3071_v47 = vpop.f32.mrf.mxu0 }
 0x209   :  { %v2913_v1 = vpop.f32.mrf.mxu1  ;;  %v3074_v28 = vpop.f32.mrf.mxu0  ;;  %3426 = vmatmul.mubr.bf16.gmra.mxu1 %v4894_v43  ;;  %4389 = vmatmul.mubr.bf16.gmra.mxu0 %v4898_v41  ;;  %v4903_v43 = vld [vmem:[%s7160_s0 + $0x188] ss:$36 sps:$4 sm:$0xff]  }
 0x20a   :  { %v6387_v63 = vadd.f32 %v2913_v1, %v2625_v56  ;;  %v6390_v13 = vadd.f32 %v3074_v28, %v5982_v32  ;;  %3433 = vmatprep.mubr.bf16.mxu1 %v4901_v46  ;;  %4392 = vmatprep.mubr.bf16.mxu0 %v4902_v49  ;;  %v4906_v46 = vld [vmem:[%s7160_s0 + $0x574] ss:$36 sps:$4 sm:$0xff]   ;;  %v2633_v1 = vadd.f32 %v6364_v35, %v5630_v7 }
 0x20b   :  { %v2915_v44 = vpop.f32.mrf.mxu1  ;;  %v3076_v21 = vpop.f32.mrf.mxu0  ;;  %v4904_v7 = vld [vmem:[%s7160_s0 + $0x570] ss:$36 sps:$4 sm:$0xff]  }
 0x20d   :  { %v2916_v29 = vpop.f32.mrf.mxu1  ;;  %v3077_v47 = vpop.f32.mrf.mxu0 }
 0x20e   :  { %v6400_v41 = vadd.f32 %v2916_v29, %v2628_v14  ;;  %v6403_v32 = vadd.f32 %v3077_v47, %v5994_v15  ;;  %v2636_v47 = vadd.f32 %v6364_v35, %v5634_v11  ;;  %v4912_v11 = vld [vmem:[%s7160_s0 + $0x260] ss:$36 sps:$4 sm:$0xff]  }
 0x20f   :  { %v2918_v49 = vpop.f32.mrf.mxu1  ;;  %v3079_v56 = vpop.f32.mrf.mxu0 }
 0x211   :  { %v2921_v28 = vpop.f32.mrf.mxu1  ;;  %v3082_v44 = vpop.f32.mrf.mxu0  ;;  %3434 = vmatmul.mubr.bf16.gmra.mxu1 %v4899_v57  ;;  %4393 = vmatmul.mubr.bf16.gmra.mxu0 %v4903_v43  ;;  %v4908_v57 = vld [vmem:[%s7160_s0 + $0x218] ss:$36 sps:$4 sm:$0xff]  }
 0x212   :  { %v6413_v21 = vadd.f32 %v2921_v28, %v2633_v1  ;;  %v6416_v15 = vadd.f32 %v3082_v44, %v6006_v10  ;;  %3441 = vmatprep.mubr.bf16.mxu1 %v4906_v46  ;;  %4396 = vmatprep.mubr.bf16.mxu0 %v4907_v62  ;;  %v4911_v46 = vld [vmem:[%s7160_s0 + $0x5bc] ss:$36 sps:$4 sm:$0xff]   ;;  %v2641_v28 = vadd.f32 %v6364_v35, %v5650_v19 }
 0x213   :  { %v2923_v14 = vpop.f32.mrf.mxu1  ;;  %v3084_v29 = vpop.f32.mrf.mxu0  ;;  %v4909_v19 = vld [vmem:[%s7160_s0 + $0x5b8] ss:$36 sps:$4 sm:$0xff]  }
 0x215   :  { %v2924_v49 = vpop.f32.mrf.mxu1  ;;  %v3085_v56 = vpop.f32.mrf.mxu0 }
 0x216   :  { %v6426_v43 = vadd.f32 %v2924_v49, %v2636_v47  ;;  %v6429_v10 = vadd.f32 %v3085_v56, %v6018_v37  ;;  %v2644_v56 = vadd.f32 %v6364_v35, %v5654_v23  ;;  %v4917_v23 = vld [vmem:[%s7160_s0 + $0x2f0] ss:$36 sps:$4 sm:$0xff]  }
 0x217   :  { %v2926_v62 = vpop.f32.mrf.mxu1  ;;  %v3087_v1 = vpop.f32.mrf.mxu0 }
 0x219   :  { %v2929_v44 = vpop.f32.mrf.mxu1  ;;  %v3090_v14 = vpop.f32.mrf.mxu0  ;;  %3442 = vmatmul.mubr.bf16.gmra.mxu1 %v4904_v7  ;;  %4397 = vmatmul.mubr.bf16.gmra.mxu0 %v4908_v57  ;;  %v4913_v7 = vld [vmem:[%s7160_s0 + $0x2a8] ss:$36 sps:$4 sm:$0xff]  }
 0x21a   :  { %v6439_v29 = vadd.f32 %v2929_v44, %v2641_v28  ;;  %v6442_v37 = vadd.f32 %v3090_v14, %v6030_v16  ;;  %3449 = vmatprep.mubr.bf16.mxu1 %v4911_v46  ;;  %4400 = vmatprep.mubr.bf16.mxu0 %v4912_v11  ;;  %v4916_v46 = vld [vmem:[%s7160_s0 + $0x604] ss:$36 sps:$4 sm:$0xff]   ;;  %v2649_v44 = vadd.f32 %v6364_v35, %v5670_v30 }
 0x21b   :  { %v2931_v47 = vpop.f32.mrf.mxu1  ;;  %v3092_v49 = vpop.f32.mrf.mxu0  ;;  %v4914_v30 = vld [vmem:[%s7160_s0 + $0x600] ss:$36 sps:$4 sm:$0xff]  }
 0x21d   :  { %v2932_v62 = vpop.f32.mrf.mxu1  ;;  %v3093_v1 = vpop.f32.mrf.mxu0 }
 0x21e   :  { %v6452_v57 = vadd.f32 %v2932_v62, %v2644_v56  ;;  %v6455_v16 = vadd.f32 %v3093_v1, %v6042_v2  ;;  %v7181_v2 = vld [vmem:[#allocation9_spill] sm:$0xff] }
 0x21f   :  { %v2934_v11 = vpop.f32.mrf.mxu1  ;;  %v3095_v28 = vpop.f32.mrf.mxu0 }
 0x220   :  { %7178 = vst [vmem:[#allocation17_spill] sm:$0xff] %v6452_v57  ;;  %7179 = vst [vmem:[#allocation18_spill] sm:$0xff] %v6455_v16  ;;  %v7183_v16 = vld [vmem:[#allocation2_spill] sm:$0xff] }
 0x221   :  { %v2937_v14 = vpop.f32.mrf.mxu1  ;;  %v3098_v47 = vpop.f32.mrf.mxu0  ;;  %3450 = vmatmul.mubr.bf16.gmra.mxu1 %v4909_v19  ;;  %4401 = vmatmul.mubr.bf16.gmra.mxu0 %v4913_v7  ;;  %v2652_v11 = vadd.f32 %v6364_v35, %v7183_v16  ;;  %v4918_v19 = vld [vmem:[%s7160_s0 + $0x338] ss:$36 sps:$4 sm:$0xff]   ;;  %v4922_v16 = vld [vmem:[%s7160_s0 + $0x380] ss:$36 sps:$4 sm:$0xff]  }
 0x222   :  { %v6465_v49 = vadd.f32 %v2937_v14, %v2649_v44  ;;  %v6468_v56 = vadd.f32 %v3098_v47, %v7181_v2  ;;  %3457 = vmatprep.mubr.bf16.mxu1 %v4916_v46  ;;  %4404 = vmatprep.mubr.bf16.mxu0 %v4917_v23  ;;  %v7185_v44 = vld [vmem:[#allocation10_spill] sm:$0xff]  ;;  %v4921_v23 = vld [vmem:[%s7160_s0 + $0x64c] ss:$36 sps:$4 sm:$0xff]  }
 0x223   :  { %v2939_v62 = vpop.f32.mrf.mxu1  ;;  %v3100_v1 = vpop.f32.mrf.mxu0  ;;  %v7187_v2 = vld [vmem:[#allocation3_spill] sm:$0xff] }
 0x224   :  { %7180 = vst [vmem:[#allocation19_spill] sm:$0xff] %v6465_v49  ;;  %7182 = vst [vmem:[#allocation9_spill] sm:$0xff] %v6468_v56  ;;  %v2657_v62 = vadd.f32 %v6364_v35, %v7187_v2  ;;  %v4919_v2 = vld [vmem:[%s7160_s0 + $0x648] ss:$36 sps:$4 sm:$0xff]  }
 0x225   :  { %v2940_v28 = vpop.f32.mrf.mxu1  ;;  %v3101_v57 = vpop.f32.mrf.mxu0 }
 0x226   :  { %v6478_v7 = vadd.f32 %v2940_v28, %v2652_v11  ;;  %v6481_v46 = vadd.f32 %v3101_v57, %v7185_v44  ;;  %v7189_v57 = vld [vmem:[#allocation11_spill] sm:$0xff] }
 0x227   :  { %v2942_v14 = vpop.f32.mrf.mxu1  ;;  %v3103_v47 = vpop.f32.mrf.mxu0 }
 0x228   :  { %7184 = vst [vmem:[#allocation2_spill] sm:$0xff] %v6478_v7  ;;  %7186 = vst [vmem:[#allocation10_spill] sm:$0xff] %v6481_v46  ;;  %v7191_v7 = vld [vmem:[#allocation4_spill] sm:$0xff] }
 0x229   :  { %v2945_v1 = vpop.f32.mrf.mxu1  ;;  %v3106_v56 = vpop.f32.mrf.mxu0  ;;  %3458 = vmatmul.mubr.bf16.gmra.mxu1 %v4914_v30  ;;  %4405 = vmatmul.mubr.bf16.gmra.mxu0 %v4918_v19  ;;  %v2660_v14 = vadd.f32 %v6364_v35, %v7191_v7  ;;  %v4923_v30 = vld [vmem:[%s7160_s0 + $0x3c8] ss:$36 sps:$4 sm:$0xff]   ;;  %v4927_v7 = vld [vmem:[%s7160_s0 + $0x410] ss:$36 sps:$4 sm:$0xff]  }
 0x22a   :  { %v6491_v11 = vadd.f32 %v2945_v1, %v2657_v62  ;;  %v6494_v28 = vadd.f32 %v3106_v56, %v7189_v57  ;;  %3465 = vmatprep.mubr.bf16.mxu1 %v4921_v23  ;;  %4408 = vmatprep.mubr.bf16.mxu0 %v4922_v16  ;;  %v7193_v56 = vld [vmem:[#allocation12_spill] sm:$0xff]  ;;  %v7195_v1 = vld [vmem:[#allocation5_spill] sm:$0xff] }
 0x22b   :  { %v2947_v44 = vpop.f32.mrf.mxu1  ;;  %v3108_v46 = vpop.f32.mrf.mxu0  ;;  %v2665_v57 = vadd.f32 %v6364_v35, %v7195_v1  ;;  %v4924_v1 = vld [vmem:[%s7160_s0 + $0x690] ss:$36 sps:$4 sm:$0xff]  }
 0x22c   :  { %7188 = vst [vmem:[#allocation3_spill] sm:$0xff] %v6491_v11  ;;  %7190 = vst [vmem:[#allocation11_spill] sm:$0xff] %v6494_v28  ;;  %v4926_v46 = vld [vmem:[%s7160_s0 + $0x694] ss:$36 sps:$4 sm:$0xff]  }
 0x22d   :  { %v2948_v47 = vpop.f32.mrf.mxu1  ;;  %v3109_v49 = vpop.f32.mrf.mxu0 }
 0x22e   :  { %v6504_v19 = vadd.f32 %v2948_v47, %v2660_v14  ;;  %v6507_v23 = vadd.f32 %v3109_v49, %v7193_v56  ;;  %v7197_v49 = vld [vmem:[#allocation13_spill] sm:$0xff] }
 0x22f   :  { %v2950_v16 = vpop.f32.mrf.mxu1  ;;  %v3111_v62 = vpop.f32.mrf.mxu0 }
 0x230   :  { %7192 = vst [vmem:[#allocation4_spill] sm:$0xff] %v6504_v19  ;;  %7194 = vst [vmem:[#allocation12_spill] sm:$0xff] %v6507_v23  ;;  %v7199_v19 = vld [vmem:[#allocation6_spill] sm:$0xff] }
 0x231   :  { %v2953_v44 = vpop.f32.mrf.mxu1  ;;  %v3114_v28 = vpop.f32.mrf.mxu0  ;;  %3466 = vmatmul.mubr.bf16.gmra.mxu1 %v4919_v2  ;;  %4409 = vmatmul.mubr.bf16.gmra.mxu0 %v4923_v30  ;;  %v2668_v16 = vadd.f32 %v6364_v35, %v7199_v19  ;;  %v4928_v2 = vld [vmem:[%s7160_s0 + $0x458] ss:$36 sps:$4 sm:$0xff]   ;;  %v4932_v19 = vld [vmem:[%s7160_s0 + $0x4a0] ss:$36 sps:$4 sm:$0xff]  }
 0x232   :  { %v6517_v14 = vadd.f32 %v2953_v44, %v2665_v57  ;;  %v6520_v47 = vadd.f32 %v3114_v28, %v7197_v49  ;;  %3473 = vmatprep.mubr.bf16.mxu1 %v4926_v46  ;;  %4412 = vmatprep.mubr.bf16.mxu0 %v4927_v7  ;;  %v7201_v28 = vld [vmem:[#allocation14_spill] sm:$0xff]  ;;  %v7203_v44 = vld [vmem:[#allocation7_spill] sm:$0xff] }
 0x233   :  { %v2955_v56 = vpop.f32.mrf.mxu1  ;;  %v3116_v23 = vpop.f32.mrf.mxu0  ;;  %v2673_v49 = vadd.f32 %v6364_v35, %v7203_v44  ;;  %v4929_v44 = vld [vmem:[%s7160_s0 + $0x6d8] ss:$36 sps:$4 sm:$0xff]  }
 0x234   :  { %7196 = vst [vmem:[#allocation5_spill] sm:$0xff] %v6517_v14  ;;  %7198 = vst [vmem:[#allocation13_spill] sm:$0xff] %v6520_v47  ;;  %v4931_v23 = vld [vmem:[%s7160_s0 + $0x6dc] ss:$36 sps:$4 sm:$0xff]  }
 0x235   :  { %v2956_v62 = vpop.f32.mrf.mxu1  ;;  %v3117_v11 = vpop.f32.mrf.mxu0 }
 0x236   :  { %v6530_v30 = vadd.f32 %v2956_v62, %v2668_v16  ;;  %v6533_v46 = vadd.f32 %v3117_v11, %v7201_v28  ;;  %v7204_v11 = vld [vmem:[#allocation15_spill] sm:$0xff] }
 0x237   :  { %v2958_v7 = vpop.f32.mrf.mxu1  ;;  %v3119_v57 = vpop.f32.mrf.mxu0 }
 0x238   :  { %7200 = vst [vmem:[#allocation6_spill] sm:$0xff] %v6530_v30  ;;  %7202 = vst [vmem:[#allocation14_spill] sm:$0xff] %v6533_v46  ;;  %v7205_v30 = vld [vmem:[#allocation8_spill] sm:$0xff] }
 0x239   :  { %v2961_v56 = vpop.f32.mrf.mxu1  ;;  %v3122_v47 = vpop.f32.mrf.mxu0  ;;  %3474 = vmatmul.mubr.bf16.gmra.mxu1 %v4924_v1  ;;  %4413 = vmatmul.mubr.bf16.gmra.mxu0 %v4928_v2  ;;  %v2676_v7 = vadd.f32 %v6364_v35, %v7205_v30  ;;  %v4933_v1 = vld [vmem:[%s7160_s0 + $0x4e8] ss:$36 sps:$4 sm:$0xff]   ;;  %v4937_v35 = vld [vmem:[%s7160_s0 + $0x530] ss:$36 sps:$4 sm:$0xff]  }
 0x23a   :  { %v6543_v16 = vadd.f32 %v2961_v56, %v2673_v49  ;;  %v6546_v62 = vadd.f32 %v3122_v47, %v7204_v11  ;;  %3481 = vmatprep.mubr.bf16.mxu1 %v4931_v23  ;;  %4416 = vmatprep.mubr.bf16.mxu0 %v4932_v19  ;;  %v7206_v47 = vld [vmem:[#allocation16_spill] sm:$0xff] }
 0x23b   :  { %v2963_v28 = vpop.f32.mrf.mxu1  ;;  %v3124_v46 = vpop.f32.mrf.mxu0 }
 0x23c   :  { %v4936_v46 = vld [vmem:[%s7160_s0 + $0x724] ss:$36 sps:$4 sm:$0xff]  }
 0x23d   :  { %v2964_v57 = vpop.f32.mrf.mxu1  ;;  %v3125_v14 = vpop.f32.mrf.mxu0 }
 0x23e   :  { %v6556_v2 = vadd.f32 %v2964_v57, %v2676_v7  ;;  %v6559_v23 = vadd.f32 %v3125_v14, %v7206_v47 }
 0x23f   :  { %v2966_v30 = vpop.f32.mrf.mxu1  ;;  %v3127_v19 = vpop.f32.mrf.mxu0 }
 0x240   :  { %v4934_v30 = vld [vmem:[%s7160_s0 + $0x720] ss:$36 sps:$4 sm:$0xff]  }
 0x241   :  { %v3130_v49 = vpop.f32.mrf.mxu0  ;;  %v3291_v56 = vpop.f32.mrf.mxu1  ;;  %3482 = vmatmul.mubr.bf16.gmra.mxu1 %v4929_v44  ;;  %4417 = vmatmul.mubr.bf16.gmra.mxu0 %v4933_v1  ;;  %v4938_v44 = vld [vmem:[%s7160_s0 + $0x578] ss:$36 sps:$4 sm:$0xff]   ;;  %v4941_v1 = vld [vmem:[%s7160_s0 + $0x76c] ss:$36 sps:$4 sm:$0xff]  }
 0x242   :  { %v6568_v11 = vadd.f32 %v3130_v49, %v6148_v0  ;;  %v6571_v14 = vadd.f32 %v3291_v56, %v6151_v40  ;;  %3489 = vmatprep.mubr.bf16.mxu1 %v4936_v46  ;;  %4420 = vmatprep.mubr.bf16.mxu0 %v4937_v35  ;;  %v4942_v46 = vld [vmem:[%s7160_s0 + $0x5c0] ss:$36 sps:$4 sm:$0xff]  }
 0x243   :  { %v3132_v28 = vpop.f32.mrf.mxu0  ;;  %v3293_v7 = vpop.f32.mrf.mxu1 }
 0x245   :  { %v3133_v57 = vpop.f32.mrf.mxu0  ;;  %v3294_v47 = vpop.f32.mrf.mxu1 }
 0x246   :  { %v6580_v0 = vadd.f32 %v3133_v57, %v6161_v48  ;;  %v6583_v40 = vadd.f32 %v3294_v47, %v6164_v39 }
 0x247   :  { %v3135_v35 = vpop.f32.mrf.mxu0  ;;  %v3296_v19 = vpop.f32.mrf.mxu1 }
 0x248   :  { %v4939_v35 = vld [vmem:[%s7160_s0 + $0x768] ss:$36 sps:$4 sm:$0xff]  }
 0x249   :  { %v3138_v49 = vpop.f32.mrf.mxu0  ;;  %v3299_v56 = vpop.f32.mrf.mxu1  ;;  %3490 = vmatmul.mubr.bf16.gmra.mxu1 %v4934_v30  ;;  %4421 = vmatmul.mubr.bf16.gmra.mxu0 %v4938_v44  ;;  %v4943_v30 = vld [vmem:[%s7160_s0 + $0x608] ss:$36 sps:$4 sm:$0xff]   ;;  %v4946_v44 = vld [vmem:[%s7160_s0 + $0x7b4] ss:$36 sps:$4 sm:$0xff]  }
 0x24a   :  { %v6592_v48 = vadd.f32 %v3138_v49, %v6174_v31  ;;  %v6595_v39 = vadd.f32 %v3299_v56, %v6177_v54  ;;  %3497 = vmatprep.mubr.bf16.mxu1 %v4941_v1  ;;  %4424 = vmatprep.mubr.bf16.mxu0 %v4942_v46  ;;  %v4947_v1 = vld [vmem:[%s7160_s0 + $0x650] ss:$36 sps:$4 sm:$0xff]  }
 0x24b   :  { %v3140_v28 = vpop.f32.mrf.mxu0  ;;  %v3301_v7 = vpop.f32.mrf.mxu1 }
 0x24d   :  { %v3141_v57 = vpop.f32.mrf.mxu0  ;;  %v3302_v47 = vpop.f32.mrf.mxu1 }
 0x24e   :  { %v6604_v31 = vadd.f32 %v3141_v57, %v6187_v6  ;;  %v6607_v54 = vadd.f32 %v3302_v47, %v6190_v8 }
 0x24f   :  { %v3143_v46 = vpop.f32.mrf.mxu0  ;;  %v3304_v19 = vpop.f32.mrf.mxu1 }
 0x250   :  { %v4944_v46 = vld [vmem:[%s7160_s0 + $0x7b0] ss:$36 sps:$4 sm:$0xff]  }
 0x251   :  { %v3146_v49 = vpop.f32.mrf.mxu0  ;;  %v3307_v56 = vpop.f32.mrf.mxu1  ;;  %3498 = vmatmul.mubr.bf16.gmra.mxu1 %v4939_v35  ;;  %4425 = vmatmul.mubr.bf16.gmra.mxu0 %v4943_v30  ;;  %v4948_v35 = vld [vmem:[%s7160_s0 + $0x698] ss:$36 sps:$4 sm:$0xff]  }
 0x252   :  { %v6616_v6 = vadd.f32 %v3146_v49, %v6200_v17  ;;  %v6619_v8 = vadd.f32 %v3307_v56, %v6203_v26  ;;  %3505 = vmatprep.mubr.bf16.mxu1 %v4946_v44  ;;  %4428 = vmatprep.mubr.bf16.mxu0 %v4947_v1  ;;  %v4951_v30 = vld [vmem:[%s7160_s0 + $0x7fc] ss:$36 sps:$4 sm:$0xff]  }
 0x253   :  { %v3148_v28 = vpop.f32.mrf.mxu0  ;;  %v3309_v7 = vpop.f32.mrf.mxu1  ;;  %v4952_v44 = vld [vmem:[%s7160_s0 + $0x6e0] ss:$36 sps:$4 sm:$0xff]  }
 0x255   :  { %v3149_v57 = vpop.f32.mrf.mxu0  ;;  %v3310_v47 = vpop.f32.mrf.mxu1 }
 0x256   :  { %v6628_v17 = vadd.f32 %v3149_v57, %v6213_v34  ;;  %v6631_v26 = vadd.f32 %v3310_v47, %v6216_v38 }
 0x257   :  { %v3151_v1 = vpop.f32.mrf.mxu0  ;;  %v3312_v19 = vpop.f32.mrf.mxu1 }
 0x258   :  { %v4949_v1 = vld [vmem:[%s7160_s0 + $0x7f8] ss:$36 sps:$4 sm:$0xff]  }
 0x259   :  { %v3154_v49 = vpop.f32.mrf.mxu0  ;;  %v3315_v56 = vpop.f32.mrf.mxu1  ;;  %3506 = vmatmul.mubr.bf16.gmra.mxu1 %v4944_v46  ;;  %4429 = vmatmul.mubr.bf16.gmra.mxu0 %v4948_v35  ;;  %v4953_v46 = vld [vmem:[%s7160_s0 + $0x728] ss:$36 sps:$4 sm:$0xff]  }
 0x25a   :  { %v6640_v34 = vadd.f32 %v3154_v49, %v6226_v60  ;;  %v6643_v38 = vadd.f32 %v3315_v56, %v6229_v53  ;;  %3513 = vmatprep.mubr.bf16.mxu1 %v4951_v30  ;;  %4432 = vmatprep.mubr.bf16.mxu0 %v4952_v44  ;;  %v4956_v35 = vld [vmem:[%s7160_s0 + $0x844] ss:$36 sps:$4 sm:$0xff]   ;;  %v4957_v30 = vld [vmem:[%s7160_s0 + $0x770] ss:$36 sps:$4 sm:$0xff]  }
 0x25b   :  { %v3156_v28 = vpop.f32.mrf.mxu0  ;;  %v3317_v7 = vpop.f32.mrf.mxu1 }
 0x25d   :  { %v3157_v57 = vpop.f32.mrf.mxu0  ;;  %v3318_v47 = vpop.f32.mrf.mxu1 }
 0x25e   :  { %v6652_v60 = vadd.f32 %v3157_v57, %v6239_v3  ;;  %v6655_v53 = vadd.f32 %v3318_v47, %v6242_v9 }
 0x25f   :  { %v3159_v44 = vpop.f32.mrf.mxu0  ;;  %v3320_v19 = vpop.f32.mrf.mxu1 }
 0x260   :  { %v4954_v44 = vld [vmem:[%s7160_s0 + $0x840] ss:$36 sps:$4 sm:$0xff]  }
 0x261   :  { %v3162_v49 = vpop.f32.mrf.mxu0  ;;  %v3323_v56 = vpop.f32.mrf.mxu1  ;;  %3514 = vmatmul.mubr.bf16.gmra.mxu1 %v4949_v1  ;;  %4433 = vmatmul.mubr.bf16.gmra.mxu0 %v4953_v46  ;;  %v4958_v1 = vld [vmem:[%s7160_s0 + $0x7b8] ss:$36 sps:$4 sm:$0xff]   ;;  %v4961_v46 = vld [vmem:[%s7160_s0 + $0x88c] ss:$36 sps:$4 sm:$0xff]  }
 0x262   :  { %v6664_v3 = vadd.f32 %v3162_v49, %v6252_v58  ;;  %v6667_v9 = vadd.f32 %v3323_v56, %v6255_v61  ;;  %3521 = vmatprep.mubr.bf16.mxu1 %v4956_v35  ;;  %4436 = vmatprep.mubr.bf16.mxu0 %v4957_v30  ;;  %v4962_v35 = vld [vmem:[%s7160_s0 + $0x800] ss:$36 sps:$4 sm:$0xff]  }
 0x263   :  { %v3164_v28 = vpop.f32.mrf.mxu0  ;;  %v3325_v7 = vpop.f32.mrf.mxu1 }
 0x265   :  { %v3165_v57 = vpop.f32.mrf.mxu0  ;;  %v3326_v47 = vpop.f32.mrf.mxu1 }
 0x266   :  { %v6676_v58 = vadd.f32 %v3165_v57, %v6265_v45  ;;  %v6679_v61 = vadd.f32 %v3326_v47, %v6268_v42 }
 0x267   :  { %v3167_v30 = vpop.f32.mrf.mxu0  ;;  %v3328_v19 = vpop.f32.mrf.mxu1 }
 0x268   :  { %v4959_v30 = vld [vmem:[%s7160_s0 + $0x888] ss:$36 sps:$4 sm:$0xff]  }
 0x269   :  { %v3170_v49 = vpop.f32.mrf.mxu0  ;;  %v3331_v56 = vpop.f32.mrf.mxu1  ;;  %3522 = vmatmul.mubr.bf16.gmra.mxu1 %v4954_v44  ;;  %4437 = vmatmul.mubr.bf16.gmra.mxu0 %v4958_v1  ;;  %v4963_v44 = vld [vmem:[%s7160_s0 + $0x848] ss:$36 sps:$4 sm:$0xff]   ;;  %v4966_v1 = vld [vmem:[%s7160_s0 + $0x8d4] ss:$36 sps:$4 sm:$0xff]  }
 0x26a   :  { %v6688_v45 = vadd.f32 %v3170_v49, %v6278_v25  ;;  %v6691_v42 = vadd.f32 %v3331_v56, %v6281_v59  ;;  %3529 = vmatprep.mubr.bf16.mxu1 %v4961_v46  ;;  %4440 = vmatprep.mubr.bf16.mxu0 %v4962_v35  ;;  %v4967_v46 = vld [vmem:[%s7160_s0 + $0x890] ss:$36 sps:$4 sm:$0xff]  }
 0x26b   :  { %v3172_v28 = vpop.f32.mrf.mxu0  ;;  %v3333_v7 = vpop.f32.mrf.mxu1 }
 0x26d   :  { %v3173_v57 = vpop.f32.mrf.mxu0  ;;  %v3334_v47 = vpop.f32.mrf.mxu1 }
 0x26e   :  { %v6700_v25 = vadd.f32 %v3173_v57, %v6291_v55  ;;  %v6703_v59 = vadd.f32 %v3334_v47, %v6294_v27 }
 0x26f   :  { %v3175_v35 = vpop.f32.mrf.mxu0  ;;  %v3336_v19 = vpop.f32.mrf.mxu1 }
 0x270   :  { %v4964_v35 = vld [vmem:[%s7160_s0 + $0x8d0] ss:$36 sps:$4 sm:$0xff]  }
 0x271   :  { %v3178_v49 = vpop.f32.mrf.mxu0  ;;  %v3339_v56 = vpop.f32.mrf.mxu1  ;;  %3530 = vmatmul.mubr.bf16.gmra.mxu1 %v4959_v30  ;;  %4441 = vmatmul.mubr.bf16.gmra.mxu0 %v4963_v44  ;;  %v4968_v30 = vld [vmem:[%s7160_s0 + $0x8d8] ss:$36 sps:$4 sm:$0xff]  }
 0x272   :  { %v6712_v55 = vadd.f32 %v3178_v49, %v6304_v4  ;;  %v6715_v27 = vadd.f32 %v3339_v56, %v6307_v50  ;;  %3537 = vmatprep.mubr.bf16.mxu1 %v4966_v1  ;;  %4444 = vmatprep.mubr.bf16.mxu0 %v4967_v46 }
 0x273   :  { %v3180_v28 = vpop.f32.mrf.mxu0  ;;  %v3341_v7 = vpop.f32.mrf.mxu1 }
 0x274   :  { %7207 = vst [vmem:[#allocation7_spill] sm:$0xff] %v6712_v55 }
 0x275   :  { %v3181_v57 = vpop.f32.mrf.mxu0  ;;  %v3342_v47 = vpop.f32.mrf.mxu1 }
 0x276   :  { %v6724_v4 = vadd.f32 %v3181_v57, %v6317_v12  ;;  %v6727_v50 = vadd.f32 %v3342_v47, %v6320_v5 }
 0x277   :  { %v3183_v44 = vpop.f32.mrf.mxu0  ;;  %v3344_v1 = vpop.f32.mrf.mxu1 }
 0x278   :  { %7208 = vst [vmem:[#allocation15_spill] sm:$0xff] %v6724_v4  ;;  %v7233_v4 = vld [vmem:[#allocation6_spill] sm:$0xff] }
 0x279   :  { %v3186_v46 = vpop.f32.mrf.mxu0  ;;  %v3347_v19 = vpop.f32.mrf.mxu1  ;;  %3538 = vmatmul.mubr.bf16.gmra.mxu1 %v4964_v35  ;;  %4445 = vmatmul.mubr.bf16.gmra.mxu0 %v4968_v30 }
 0x27a   :  { %v6730_v49 = vadd.f32 %v3186_v46, %v6330_v51  ;;  %v6733_v56 = vadd.f32 %v3347_v19, %v6333_v22 }
 0x27b   :  { %v3188_v28 = vpop.f32.mrf.mxu0  ;;  %v3349_v7 = vpop.f32.mrf.mxu1 }
 0x27d   :  { %v3189_v55 = vpop.f32.mrf.mxu0  ;;  %v3350_v12 = vpop.f32.mrf.mxu1 }
 0x27e   :  { %v6736_v57 = vadd.f32 %v3189_v55, %v6343_v24  ;;  %v6739_v5 = vadd.f32 %v3350_v12, %v6346_v52 }
 0x27f   :  { %v3191_v47 = vpop.f32.mrf.mxu0  ;;  %v3352_v44 = vpop.f32.mrf.mxu1 }
 0x281   :  { %v3194_v35 = vpop.f32.mrf.mxu0  ;;  %v3355_v30 = vpop.f32.mrf.mxu1 }
 0x282   :  { %v6742_v51 = vadd.f32 %v3194_v35, %v6356_v36  ;;  %v6745_v22 = vadd.f32 %v3355_v30, %v6359_v18 }
 0x283   :  { %v3196_v1 = vpop.f32.mrf.mxu0  ;;  %v3357_v46 = vpop.f32.mrf.mxu1 }
 0x284   :  { %7209 = vst [vmem:[#allocation8_spill] sm:$0xff] %v6742_v51  ;;  %v7228_v51 = vld [vmem:[#allocation4_spill] sm:$0xff] }
 0x285   :  { %v3197_v19 = vpop.f32.mrf.mxu0  ;;  %v3358_v28 = vpop.f32.mrf.mxu1 }
 0x286   :  { %v6748_v24 = vadd.f32 %v3197_v19, %v6374_v20  ;;  %v6751_v52 = vadd.f32 %v3358_v28, %v6377_v33 }
 0x287   :  { %v3199_v55 = vpop.f32.mrf.mxu0  ;;  %v3360_v7 = vpop.f32.mrf.mxu1 }
 0x288   :  { %7210 = vst [vmem:[#allocation16_spill] sm:$0xff] %v6748_v24  ;;  %v7222_v24 = vld [vmem:[#allocation2_spill] sm:$0xff] }
 0x289   :  { %v3202_v12 = vpop.f32.mrf.mxu0  ;;  %v3363_v47 = vpop.f32.mrf.mxu1 }
 0x28a   :  { %v6754_v36 = vadd.f32 %v3202_v12, %v6387_v63  ;;  %v6757_v18 = vadd.f32 %v3363_v47, %v6390_v13 }
 0x28b   :  { %v3204_v44 = vpop.f32.mrf.mxu0  ;;  %v3365_v35 = vpop.f32.mrf.mxu1 }
 0x28c   :  { %7211 = vst [vmem:[#allocation20_spill] sm:$0xff] %v6754_v36  ;;  %v7231_v36 = vld [vmem:[#allocation5_spill] sm:$0xff] }
 0x28d   :  { %v3205_v30 = vpop.f32.mrf.mxu0  ;;  %v3366_v1 = vpop.f32.mrf.mxu1 }
 0x28e   :  { %v6760_v20 = vadd.f32 %v3205_v30, %v6400_v41  ;;  %v6763_v33 = vadd.f32 %v3366_v1, %v6403_v32 }
 0x28f   :  { %v3207_v46 = vpop.f32.mrf.mxu0  ;;  %v3368_v19 = vpop.f32.mrf.mxu1 }
 0x290   :  { %7212 = vst [vmem:[#allocation21_spill] sm:$0xff] %v6760_v20  ;;  %v7225_v20 = vld [vmem:[#allocation3_spill] sm:$0xff] }
 0x291   :  { %v3210_v28 = vpop.f32.mrf.mxu0  ;;  %v3371_v55 = vpop.f32.mrf.mxu1 }
 0x292   :  { %v6766_v63 = vadd.f32 %v3210_v28, %v6413_v21  ;;  %v6769_v13 = vadd.f32 %v3371_v55, %v6416_v15 }
 0x293   :  { %v3212_v7 = vpop.f32.mrf.mxu0  ;;  %v3373_v12 = vpop.f32.mrf.mxu1 }
 0x294   :  { %7213 = vst [vmem:[#allocation22_spill] sm:$0xff] %v6766_v63  ;;  %v7216_v12 = vld [vmem:[#allocation17_spill] sm:$0xff]  ;;  %v7219_v63 = vld [vmem:[#allocation19_spill] sm:$0xff] }
 0x295   :  { %v3213_v47 = vpop.f32.mrf.mxu0  ;;  %v3374_v44 = vpop.f32.mrf.mxu1 }
 0x296   :  { %v6772_v41 = vadd.f32 %v3213_v47, %v6426_v43  ;;  %v6775_v32 = vadd.f32 %v3374_v44, %v6429_v10  ;;  %v7218_v47 = vld [vmem:[#allocation18_spill] sm:$0xff] }
 0x297   :  { %v3215_v35 = vpop.f32.mrf.mxu0  ;;  %v3376_v30 = vpop.f32.mrf.mxu1 }
 0x298   :  { %7214 = vst [vmem:[#allocation23_spill] sm:$0xff] %v6772_v41 }
 0x299   :  { %v3218_v1 = vpop.f32.mrf.mxu0  ;;  %v3379_v46 = vpop.f32.mrf.mxu1 }
 0x29a   :  { %v6778_v21 = vadd.f32 %v3218_v1, %v6439_v29  ;;  %v6781_v15 = vadd.f32 %v3379_v46, %v6442_v37  ;;  %v7221_v1 = vld [vmem:[#allocation9_spill] sm:$0xff] }
 0x29b   :  { %v3220_v19 = vpop.f32.mrf.mxu0  ;;  %v3381_v28 = vpop.f32.mrf.mxu1 }
 0x29c   :  { %7215 = vst [vmem:[#allocation24_spill] sm:$0xff] %v6778_v21 }
 0x29d   :  { %v3221_v55 = vpop.f32.mrf.mxu0  ;;  %v3382_v7 = vpop.f32.mrf.mxu1 }
 0x29e   :  { %v6784_v43 = vadd.f32 %v3221_v55, %v7216_v12  ;;  %v6787_v10 = vadd.f32 %v3382_v7, %v7218_v47  ;;  %v7224_v12 = vld [vmem:[#allocation10_spill] sm:$0xff] }
 0x29f   :  { %v3223_v44 = vpop.f32.mrf.mxu0  ;;  %v3384_v35 = vpop.f32.mrf.mxu1 }
 0x2a0   :  { %7217 = vst [vmem:[#allocation17_spill] sm:$0xff] %v6784_v43 }
 0x2a1   :  { %v3226_v30 = vpop.f32.mrf.mxu0  ;;  %v3387_v41 = vpop.f32.mrf.mxu1 }
 0x2a2   :  { %v6790_v29 = vadd.f32 %v3226_v30, %v7219_v63  ;;  %v6793_v37 = vadd.f32 %v3387_v41, %v7221_v1  ;;  %v7227_v30 = vld [vmem:[#allocation11_spill] sm:$0xff] }
 0x2a3   :  { %v3228_v46 = vpop.f32.mrf.mxu0  ;;  %v3389_v19 = vpop.f32.mrf.mxu1 }
 0x2a4   :  { %7220 = vst [vmem:[#allocation18_spill] sm:$0xff] %v6790_v29 }
 0x2a5   :  { %v3229_v28 = vpop.f32.mrf.mxu0  ;;  %v3390_v21 = vpop.f32.mrf.mxu1 }
 0x2a6   :  { %v6796_v55 = vadd.f32 %v3229_v28, %v7222_v24  ;;  %v6799_v7 = vadd.f32 %v3390_v21, %v7224_v12  ;;  %v7230_v28 = vld [vmem:[#allocation12_spill] sm:$0xff] }
 0x2a7   :  { %v3231_v47 = vpop.f32.mrf.mxu0  ;;  %v3392_v44 = vpop.f32.mrf.mxu1 }
 0x2a8   :  { %7223 = vst [vmem:[#allocation19_spill] sm:$0xff] %v6796_v55 }
 0x2a9   :  { %v3234_v35 = vpop.f32.mrf.mxu0  ;;  %v3395_v43 = vpop.f32.mrf.mxu1 }
 0x2aa   :  { %v6802_v63 = vadd.f32 %v3234_v35, %v7225_v20  ;;  %v6805_v41 = vadd.f32 %v3395_v43, %v7227_v30  ;;  %v7232_v35 = vld [vmem:[#allocation13_spill] sm:$0xff] }
 0x2ab   :  { %v3236_v1 = vpop.f32.mrf.mxu0  ;;  %v3397_v46 = vpop.f32.mrf.mxu1 }
 0x2ac   :  { %7226 = vst [vmem:[#allocation9_spill] sm:$0xff] %v6802_v63 }
 0x2ad   :  { %v3237_v19 = vpop.f32.mrf.mxu0  ;;  %v3398_v29 = vpop.f32.mrf.mxu1 }
 0x2ae   :  { %v6808_v24 = vadd.f32 %v3237_v19, %v7228_v51  ;;  %v6811_v21 = vadd.f32 %v3398_v29, %v7230_v28  ;;  %v7235_v19 = vld [vmem:[#allocation14_spill] sm:$0xff] }
 0x2af   :  { %v3239_v12 = vpop.f32.mrf.mxu0  ;;  %v3400_v47 = vpop.f32.mrf.mxu1 }
 0x2b0   :  { %7229 = vst [vmem:[#allocation2_spill] sm:$0xff] %v6808_v24 }
 0x2b1   :  { %v3242_v44 = vpop.f32.mrf.mxu0  ;;  %v3403_v55 = vpop.f32.mrf.mxu1 }
 0x2b2   :  { %v6814_v20 = vadd.f32 %v3242_v44, %v7231_v36  ;;  %v6817_v43 = vadd.f32 %v3403_v55, %v7232_v35 }
 0x2b3   :  { %v3244_v30 = vpop.f32.mrf.mxu0  ;;  %v3405_v1 = vpop.f32.mrf.mxu1 }
 0x2b5   :  { %v3245_v46 = vpop.f32.mrf.mxu0  ;;  %v3406_v63 = vpop.f32.mrf.mxu1 }
 0x2b6   :  { %v6820_v51 = vadd.f32 %v3245_v46, %v7233_v4  ;;  %v6823_v29 = vadd.f32 %v3406_v63, %v7235_v19 }
 0x2b7   :  { %v3247_v28 = vpop.f32.mrf.mxu0  ;;  %v3408_v12 = vpop.f32.mrf.mxu1 }
 0x2b8   :  { %7234 = vst [vmem:[#allocation10_spill] sm:$0xff] %v6820_v51 }
 0x2b9   :  { %v3250_v47 = vpop.f32.mrf.mxu0  ;;  %v6825_v24 = vpop.f32.mrf.mxu1 }
 0x2ba   :  { %v6828_v36 = vadd.f32 %v3250_v47, %v6543_v16 }
 0x2bb   :  { %v3252_v55 = vpop.f32.mrf.mxu0  ;;  %v3413_v44 = vpop.f32.mrf.mxu1 }
 0x2bc   :  { %7236 = vst [vmem:[#allocation3_spill] sm:$0xff] %v6828_v36 }
 0x2bd   :  { %v3253_v35 = vpop.f32.mrf.mxu0  ;;  %v6830_v30 = vpop.f32.mrf.mxu1 }
 0x2be   :  { %v6833_v1 = vadd.f32 %v3253_v35, %v6556_v2 }
 0x2bf   :  { %v3255_v4 = vpop.f32.mrf.mxu0  ;;  %v3416_v46 = vpop.f32.mrf.mxu1 }
 0x2c1   :  { %v3419_v63 = vpop.f32.mrf.mxu1  ;;  %v4386_v19 = vpop.f32.mrf.mxu0 }
 0x2c2   :  { %v6836_v28 = vadd.f32 %v3419_v63, %v6568_v11  ;;  %v3589_v12 = vadd.f32 %v4386_v19, %v6595_v39 }
 0x2c3   :  { %v3421_v51 = vpop.f32.mrf.mxu1  ;;  %v3580_v16 = vpop.f32.mrf.mxu0 }
 0x2c4   :  { %v3837_v47 = vmax.f32 %v3589_v12, 0.0  ;;  %v3581_v55 = vadd.f32 %v3580_v16, %v6571_v14 }
 0x2c5   :  { %v3422_v44 = vpop.f32.mrf.mxu1  ;;  %v4387_v36 = vpop.f32.mrf.mxu0 }
 0x2c6   :  { %3901 = vst [vmem:[%s7162_s3 + $0x10] sm:$0xff] %v3837_v47  ;;  %v3835_v2 = vmax.f32 %v3581_v55, 0.0  ;;  %v6844_v35 = vadd.f32 %v3422_v44, %v6580_v0  ;;  %v3592_v11 = vadd.f32 %v4387_v36, %v6607_v54 }
 0x2c7   :  { %v3424_v4 = vpop.f32.mrf.mxu1  ;;  %v3583_v46 = vpop.f32.mrf.mxu0 }
 0x2c8   :  { %3899 = vst [vmem:[%s7162_s3] sm:$0xff] %v3835_v2  ;;  %v3838_v39 = vmax.f32 %v3592_v11, 0.0  ;;  %v3584_v14 = vadd.f32 %v3583_v46, %v6583_v40 }
 0x2c9   :  { %v6851_v51 = vpop.f32.mrf.mxu1  ;;  %v4390_v63 = vpop.f32.mrf.mxu0 }
 0x2ca   :  { %3902 = vst [vmem:[%s7162_s3 + $0x18] sm:$0xff] %v3838_v39  ;;  %v3836_v0 = vmax.f32 %v3584_v14, 0.0  ;;  %v3605_v19 = vadd.f32 %v4390_v63, %v6643_v38 }
 0x2cb   :  { %v3429_v54 = vpop.f32.mrf.mxu1  ;;  %v3596_v36 = vpop.f32.mrf.mxu0 }
 0x2cc   :  { %3900 = vst [vmem:[%s7162_s3 + $0x8] sm:$0xff] %v3836_v0  ;;  %v3841_v12 = vmax.f32 %v3605_v19, 0.0  ;;  %v3597_v16 = vadd.f32 %v3596_v36, %v6619_v8 }
 0x2cd   :  { %v6861_v40 = vpop.f32.mrf.mxu1  ;;  %v4391_v47 = vpop.f32.mrf.mxu0 }
 0x2ce   :  { %3905 = vst [vmem:[%s7162_s3 + $0x30] sm:$0xff] %v3841_v12  ;;  %v3839_v55 = vmax.f32 %v3597_v16, 0.0  ;;  %v3608_v44 = vadd.f32 %v4391_v47, %v6655_v53 }
 0x2cf   :  { %v3432_v38 = vpop.f32.mrf.mxu1  ;;  %v3599_v2 = vpop.f32.mrf.mxu0 }
 0x2d0   :  { %3903 = vst [vmem:[%s7162_s3 + $0x20] sm:$0xff] %v3839_v55  ;;  %v3842_v11 = vmax.f32 %v3608_v44, 0.0  ;;  %v3600_v4 = vadd.f32 %v3599_v2, %v6631_v26 }
 0x2d1   :  { %v6871_v8 = vpop.f32.mrf.mxu1  ;;  %v4394_v46 = vpop.f32.mrf.mxu0 }
 0x2d2   :  { %3906 = vst [vmem:[%s7162_s3 + $0x38] sm:$0xff] %v3842_v11  ;;  %v3840_v39 = vmax.f32 %v3600_v4, 0.0  ;;  %v3621_v14 = vadd.f32 %v4394_v46, %v6691_v42 }
 0x2d3   :  { %v3437_v53 = vpop.f32.mrf.mxu1  ;;  %v3612_v63 = vpop.f32.mrf.mxu0 }
 0x2d4   :  { %3904 = vst [vmem:[%s7162_s3 + $0x28] sm:$0xff] %v3840_v39  ;;  %v3845_v0 = vmax.f32 %v3621_v14, 0.0  ;;  %v3613_v19 = vadd.f32 %v3612_v63, %v6667_v9 }
 0x2d5   :  { %v6881_v26 = vpop.f32.mrf.mxu1  ;;  %v4395_v54 = vpop.f32.mrf.mxu0 }
 0x2d6   :  { %3909 = vst [vmem:[%s7162_s3 + $0x50] sm:$0xff] %v3845_v0  ;;  %v3843_v36 = vmax.f32 %v3613_v19, 0.0  ;;  %v3624_v12 = vadd.f32 %v4395_v54, %v6703_v59 }
 0x2d7   :  { %v3440_v42 = vpop.f32.mrf.mxu1  ;;  %v3615_v16 = vpop.f32.mrf.mxu0 }
 0x2d8   :  { %3907 = vst [vmem:[%s7162_s3 + $0x40] sm:$0xff] %v3843_v36  ;;  %v3846_v47 = vmax.f32 %v3624_v12, 0.0  ;;  %v3616_v55 = vadd.f32 %v3615_v16, %v6679_v61 }
 0x2d9   :  { %v6891_v9 = vpop.f32.mrf.mxu1  ;;  %v4398_v44 = vpop.f32.mrf.mxu0 }
 0x2da   :  { %3910 = vst [vmem:[%s7162_s3 + $0x58] sm:$0xff] %v3846_v47  ;;  %v3844_v38 = vmax.f32 %v3616_v55, 0.0  ;;  %v3637_v2 = vadd.f32 %v4398_v44, %v6733_v56 }
 0x2db   :  { %v3445_v59 = vpop.f32.mrf.mxu1  ;;  %v3628_v11 = vpop.f32.mrf.mxu0 }
 0x2dc   :  { %3908 = vst [vmem:[%s7162_s3 + $0x48] sm:$0xff] %v3844_v38  ;;  %v3849_v4 = vmax.f32 %v3637_v2, 0.0  ;;  %v3629_v46 = vadd.f32 %v3628_v11, %v6715_v27 }
 0x2dd   :  { %v6901_v61 = vpop.f32.mrf.mxu1  ;;  %v4399_v39 = vpop.f32.mrf.mxu0 }
 0x2de   :  { %3913 = vst [vmem:[%s7162_s3 + $0x70] sm:$0xff] %v3849_v4  ;;  %v3847_v14 = vmax.f32 %v3629_v46, 0.0  ;;  %v3640_v53 = vadd.f32 %v4399_v39, %v6739_v5 }
 0x2df   :  { %v3448_v56 = vpop.f32.mrf.mxu1  ;;  %v3631_v63 = vpop.f32.mrf.mxu0 }
 0x2e0   :  { %3911 = vst [vmem:[%s7162_s3 + $0x60] sm:$0xff] %v3847_v14  ;;  %v3850_v0 = vmax.f32 %v3640_v53, 0.0  ;;  %v3632_v19 = vadd.f32 %v3631_v63, %v6727_v50 }
 0x2e1   :  { %v6911_v27 = vpop.f32.mrf.mxu1  ;;  %v4402_v54 = vpop.f32.mrf.mxu0 }
 0x2e2   :  { %3914 = vst [vmem:[%s7162_s3 + $0x78] sm:$0xff] %v3850_v0  ;;  %v3848_v36 = vmax.f32 %v3632_v19, 0.0  ;;  %v3653_v12 = vadd.f32 %v4402_v54, %v6757_v18 }
 0x2e3   :  { %v3453_v5 = vpop.f32.mrf.mxu1  ;;  %v3644_v42 = vpop.f32.mrf.mxu0 }
 0x2e4   :  { %3912 = vst [vmem:[%s7162_s3 + $0x68] sm:$0xff] %v3848_v36  ;;  %v3853_v16 = vmax.f32 %v3653_v12, 0.0  ;;  %v3645_v47 = vadd.f32 %v3644_v42, %v6745_v22 }
 0x2e5   :  { %v6921_v50 = vpop.f32.mrf.mxu1  ;;  %v4403_v55 = vpop.f32.mrf.mxu0 }
 0x2e6   :  { %3917 = vst [vmem:[%s7162_s3 + $0x90] sm:$0xff] %v3853_v16  ;;  %v3851_v44 = vmax.f32 %v3645_v47, 0.0  ;;  %v3656_v38 = vadd.f32 %v4403_v55, %v6763_v33 }
 0x2e7   :  { %v3456_v18 = vpop.f32.mrf.mxu1  ;;  %v3647_v2 = vpop.f32.mrf.mxu0 }
 0x2e8   :  { %3915 = vst [vmem:[%s7162_s3 + $0x80] sm:$0xff] %v3851_v44  ;;  %v3854_v59 = vmax.f32 %v3656_v38, 0.0  ;;  %v3648_v11 = vadd.f32 %v3647_v2, %v6751_v52 }
 0x2e9   :  { %v6931_v22 = vpop.f32.mrf.mxu1  ;;  %v4406_v4 = vpop.f32.mrf.mxu0 }
 0x2ea   :  { %3918 = vst [vmem:[%s7162_s3 + $0x98] sm:$0xff] %v3854_v59  ;;  %v3852_v46 = vmax.f32 %v3648_v11, 0.0  ;;  %v3669_v39 = vadd.f32 %v4406_v4, %v6781_v15  ;;  %v3412_v11 = vadd.f32 %v6825_v24, %v6546_v62  ;;  %v3415_v62 = vadd.f32 %v6830_v30, %v6559_v23 }
 0x2eb   :  { %v3461_v33 = vpop.f32.mrf.mxu1  ;;  %v3660_v14 = vpop.f32.mrf.mxu0  ;;  %v3428_v23 = vadd.f32 %v6851_v51, %v6592_v48  ;;  %v3431_v48 = vadd.f32 %v6861_v40, %v6604_v31  ;;  %v3444_v31 = vadd.f32 %v6891_v9, %v6640_v34 }
 0x2ec   :  { %3916 = vst [vmem:[%s7162_s3 + $0x88] sm:$0xff] %v3852_v46  ;;  %v3857_v53 = vmax.f32 %v3669_v39, 0.0  ;;  %v3661_v56 = vadd.f32 %v3660_v14, %v6769_v13 }
 0x2ed   :  { %v6941_v52 = vpop.f32.mrf.mxu1  ;;  %v4407_v63 = vpop.f32.mrf.mxu0 }
 0x2ee   :  { %3921 = vst [vmem:[%s7162_s3 + $0xb0] sm:$0xff] %v3857_v53  ;;  %v3855_v0 = vmax.f32 %v3661_v56, 0.0  ;;  %v3672_v19 = vadd.f32 %v4407_v63, %v6787_v10 }
 0x2ef   :  { %v3464_v15 = vpop.f32.mrf.mxu1  ;;  %v3663_v54 = vpop.f32.mrf.mxu0 }
 0x2f0   :  { %3919 = vst [vmem:[%s7162_s3 + $0xa0] sm:$0xff] %v3855_v0  ;;  %v3858_v36 = vmax.f32 %v3672_v19, 0.0  ;;  %v3664_v12 = vadd.f32 %v3663_v54, %v6775_v32 }
 0x2f1   :  { %v6951_v13 = vpop.f32.mrf.mxu1  ;;  %v4410_v5 = vpop.f32.mrf.mxu0 }
 0x2f2   :  { %3922 = vst [vmem:[%s7162_s3 + $0xb8] sm:$0xff] %v3858_v36  ;;  %v3856_v42 = vmax.f32 %v3664_v12, 0.0  ;;  %v3685_v16 = vadd.f32 %v4410_v5, %v6805_v41 }
 0x2f3   :  { %v3469_v10 = vpop.f32.mrf.mxu1  ;;  %v3676_v47 = vpop.f32.mrf.mxu0 }
 0x2f4   :  { %3920 = vst [vmem:[%s7162_s3 + $0xa8] sm:$0xff] %v3856_v42  ;;  %v3861_v55 = vmax.f32 %v3685_v16, 0.0  ;;  %v3677_v44 = vadd.f32 %v3676_v47, %v6793_v37 }
 0x2f5   :  { %v6961_v32 = vpop.f32.mrf.mxu1  ;;  %v4411_v38 = vpop.f32.mrf.mxu0 }
 0x2f6   :  { %3925 = vst [vmem:[%s7162_s3 + $0xd0] sm:$0xff] %v3861_v55  ;;  %v3859_v18 = vmax.f32 %v3677_v44, 0.0  ;;  %v3688_v2 = vadd.f32 %v4411_v38, %v6811_v21 }
 0x2f7   :  { %v3472_v41 = vpop.f32.mrf.mxu1  ;;  %v3679_v59 = vpop.f32.mrf.mxu0 }
 0x2f8   :  { %3923 = vst [vmem:[%s7162_s3 + $0xc0] sm:$0xff] %v3859_v18  ;;  %v3862_v37 = vmax.f32 %v3688_v2, 0.0  ;;  %v3680_v4 = vadd.f32 %v3679_v59, %v6799_v7 }
 0x2f9   :  { %v6973_v46 = vpop.f32.mrf.mxu1  ;;  %v4414_v39 = vpop.f32.mrf.mxu0 }
 0x2fa   :  { %3926 = vst [vmem:[%s7162_s3 + $0xd8] sm:$0xff] %v3862_v37  ;;  %v3860_v21 = vmax.f32 %v3680_v4, 0.0  ;;  %v3701_v33 = vadd.f32 %v4414_v39, %v3412_v11  ;;  %v3436_v11 = vadd.f32 %v6871_v8, %v6616_v6  ;;  %v3447_v39 = vadd.f32 %v6901_v61, %v6652_v60 }
 0x2fb   :  { %v3477_v14 = vpop.f32.mrf.mxu1  ;;  %v3692_v53 = vpop.f32.mrf.mxu0  ;;  %v3439_v8 = vadd.f32 %v6881_v26, %v6628_v17  ;;  %v3460_v61 = vadd.f32 %v6931_v22, %v6688_v45  ;;  %v3452_v26 = vadd.f32 %v6911_v27, %v6664_v3  ;;  %v3463_v22 = vadd.f32 %v6941_v52, %v6700_v25 }
 0x2fc   :  { %3924 = vst [vmem:[%s7162_s3 + $0xc8] sm:$0xff] %v3860_v21  ;;  %v3865_v24 = vmax.f32 %v3701_v33, 0.0  ;;  %v3693_v7 = vadd.f32 %v3692_v53, %v6817_v43  ;;  %v3455_v27 = vadd.f32 %v6921_v50, %v6676_v58  ;;  %v3476_v52 = vadd.f32 %v6973_v46, %v6730_v49  ;;  %v7237_v58 = vld [vmem:[#allocation7_spill] sm:$0xff] }
 0x2fd   :  { %v6984_v56 = vpop.f32.mrf.mxu1  ;;  %v4415_v63 = vpop.f32.mrf.mxu0  ;;  %v3468_v50 = vadd.f32 %v6951_v13, %v7237_v58  ;;  %v7238_v13 = vld [vmem:[#allocation15_spill] sm:$0xff] }
 0x2fe   :  { %3929 = vst [vmem:[%s7162_s3 + $0xf0] sm:$0xff] %v3865_v24  ;;  %v3863_v0 = vmax.f32 %v3693_v7, 0.0  ;;  %v3704_v19 = vadd.f32 %v4415_v63, %v3415_v62  ;;  %v3479_v49 = vadd.f32 %v6984_v56, %v6736_v57  ;;  %v7239_v57 = vld [vmem:[#allocation20_spill] sm:$0xff] }
 0x2ff   :  { %v3480_v15 = vpop.f32.mrf.mxu1  ;;  %v3695_v54 = vpop.f32.mrf.mxu0 }
 0x300   :  { %3927 = vst [vmem:[%s7162_s3 + $0xe0] sm:$0xff] %v3863_v0  ;;  %v3866_v30 = vmax.f32 %v3704_v19, 0.0  ;;  %v3696_v43 = vadd.f32 %v3695_v54, %v6823_v29 }
 0x301   :  { %v6995_v36 = vpop.f32.mrf.mxu1  ;;  %v4418_v12 = vpop.f32.mrf.mxu0 }
 0x302   :  { %3930 = vst [vmem:[%s7162_s3 + $0xf8] sm:$0xff] %v3866_v30  ;;  %v3864_v5 = vmax.f32 %v3696_v43, 0.0  ;;  %v3717_v42 = vadd.f32 %v4418_v12, %v3428_v23 }
 0x303   :  { %v3485_v16 = vpop.f32.mrf.mxu1  ;;  %v3708_v10 = vpop.f32.mrf.mxu0 }
 0x304   :  { %3928 = vst [vmem:[%s7162_s3 + $0xe8] sm:$0xff] %v3864_v5  ;;  %v3869_v51 = vmax.f32 %v3717_v42, 0.0  ;;  %v3709_v29 = vadd.f32 %v3708_v10, %v6836_v28 }
 0x305   :  { %v7006_v47 = vpop.f32.mrf.mxu1  ;;  %v4419_v55 = vpop.f32.mrf.mxu0 }
 0x306   :  { %3933 = vst [vmem:[%s7162_s3 + $0x110] sm:$0xff] %v3869_v51  ;;  %v3867_v44 = vmax.f32 %v3709_v29, 0.0  ;;  %v3720_v38 = vadd.f32 %v4419_v55, %v3431_v48 }
 0x307   :  { %v3488_v18 = vpop.f32.mrf.mxu1  ;;  %v3711_v2 = vpop.f32.mrf.mxu0 }
 0x308   :  { %3931 = vst [vmem:[%s7162_s3 + $0x100] sm:$0xff] %v3867_v44  ;;  %v3870_v40 = vmax.f32 %v3720_v38, 0.0  ;;  %v3712_v28 = vadd.f32 %v3711_v2, %v6844_v35 }
 0x309   :  { %v7017_v41 = vpop.f32.mrf.mxu1  ;;  %v4422_v59 = vpop.f32.mrf.mxu0 }
 0x30a   :  { %3934 = vst [vmem:[%s7162_s3 + $0x118] sm:$0xff] %v3870_v40  ;;  %v3868_v37 = vmax.f32 %v3712_v28, 0.0  ;;  %v3733_v4 = vadd.f32 %v4422_v59, %v3444_v31  ;;  %v3471_v31 = vadd.f32 %v6961_v32, %v7238_v13  ;;  %v3492_v56 = vadd.f32 %v7017_v41, %v7239_v57  ;;  %v7240_v32 = vld [vmem:[#allocation8_spill] sm:$0xff]  ;;  %v7241_v41 = vld [vmem:[#allocation21_spill] sm:$0xff] }
 0x30b   :  { %v3493_v34 = vpop.f32.mrf.mxu1  ;;  %v3724_v9 = vpop.f32.mrf.mxu0 }
 0x30c   :  { %3932 = vst [vmem:[%s7162_s3 + $0x108] sm:$0xff] %v3868_v37  ;;  %v3873_v35 = vmax.f32 %v3733_v4, 0.0  ;;  %v3725_v21 = vadd.f32 %v3724_v9, %v3436_v11 }
 0x30d   :  { %v7029_v33 = vpop.f32.mrf.mxu1  ;;  %v4423_v6 = vpop.f32.mrf.mxu0 }
 0x30e   :  { %3937 = vst [vmem:[%s7162_s3 + $0x130] sm:$0xff] %v3873_v35  ;;  %v3871_v14 = vmax.f32 %v3725_v21, 0.0  ;;  %v3736_v53 = vadd.f32 %v4423_v6, %v3447_v39  ;;  %v3484_v39 = vadd.f32 %v6995_v36, %v7240_v32  ;;  %v7242_v36 = vld [vmem:[#allocation16_spill] sm:$0xff] }
 0x30f   :  { %v3496_v62 = vpop.f32.mrf.mxu1  ;;  %v3727_v60 = vpop.f32.mrf.mxu0 }
 0x310   :  { %3935 = vst [vmem:[%s7162_s3 + $0x120] sm:$0xff] %v3871_v14  ;;  %v3874_v24 = vmax.f32 %v3736_v53, 0.0  ;;  %v3728_v7 = vadd.f32 %v3727_v60, %v3439_v8  ;;  %v3495_v14 = vadd.f32 %v7029_v33, %v7241_v41  ;;  %v7243_v33 = vld [vmem:[#allocation24_spill] sm:$0xff] }
 0x311   :  { %v7041_v63 = vpop.f32.mrf.mxu1  ;;  %v4426_v17 = vpop.f32.mrf.mxu0 }
 0x312   :  { %3938 = vst [vmem:[%s7162_s3 + $0x138] sm:$0xff] %v3874_v24  ;;  %v3872_v0 = vmax.f32 %v3728_v7, 0.0  ;;  %v3749_v19 = vadd.f32 %v4426_v17, %v3460_v61  ;;  %v3487_v24 = vadd.f32 %v7006_v47, %v7242_v36 }
 0x313   :  { %v3501_v15 = vpop.f32.mrf.mxu1  ;;  %v3740_v45 = vpop.f32.mrf.mxu0 }
 0x314   :  { %3936 = vst [vmem:[%s7162_s3 + $0x128] sm:$0xff] %v3872_v0  ;;  %v3877_v54 = vmax.f32 %v3749_v19, 0.0  ;;  %v3741_v23 = vadd.f32 %v3740_v45, %v3452_v26 }
 0x315   :  { %v7053_v30 = vpop.f32.mrf.mxu1  ;;  %v4427_v3 = vpop.f32.mrf.mxu0 }
 0x316   :  { %3941 = vst [vmem:[%s7162_s3 + $0x150] sm:$0xff] %v3877_v54  ;;  %v3875_v43 = vmax.f32 %v3741_v23, 0.0  ;;  %v3752_v12 = vadd.f32 %v4427_v3, %v3463_v22  ;;  %v7244_v23 = vld [vmem:[#allocation22_spill] sm:$0xff] }
 0x317   :  { %v3504_v5 = vpop.f32.mrf.mxu1  ;;  %v3743_v25 = vpop.f32.mrf.mxu0  ;;  %v3500_v47 = vadd.f32 %v7041_v63, %v7244_v23 }
 0x318   :  { %3939 = vst [vmem:[%s7162_s3 + $0x140] sm:$0xff] %v3875_v43  ;;  %v3878_v42 = vmax.f32 %v3752_v12, 0.0  ;;  %v3744_v16 = vadd.f32 %v3743_v25, %v3455_v27  ;;  %v7245_v5 = vld [vmem:[#allocation17_spill] sm:$0xff] }
 0x319   :  { %v3507_v10 = vpop.f32.mrf.mxu1  ;;  %v4430_v48 = vpop.f32.mrf.mxu0 }
 0x31a   :  { %3942 = vst [vmem:[%s7162_s3 + $0x158] sm:$0xff] %v3878_v42  ;;  %v3876_v51 = vmax.f32 %v3744_v16, 0.0  ;;  %v3765_v29 = vadd.f32 %v4430_v48, %v3476_v52  ;;  %v3508_v19 = vadd.f32 %v3507_v10, %v7243_v33  ;;  %v7246_v48 = vld [vmem:[#allocation23_spill] sm:$0xff]  ;;  %v7252_v33 = vld [vmem:[#allocation10_spill] sm:$0xff] }
 0x31b   :  { %v3509_v55 = vpop.f32.mrf.mxu1  ;;  %v3756_v44 = vpop.f32.mrf.mxu0  ;;  %v3503_v63 = vadd.f32 %v7053_v30, %v7246_v48 }
 0x31c   :  { %3940 = vst [vmem:[%s7162_s3 + $0x148] sm:$0xff] %v3876_v51  ;;  %v3881_v46 = vmax.f32 %v3765_v29, 0.0  ;;  %v3757_v38 = vadd.f32 %v3756_v44, %v3468_v50  ;;  %v7247_v55 = vld [vmem:[#allocation9_spill] sm:$0xff] }
 0x31d   :  { %v3510_v18 = vpop.f32.mrf.mxu1  ;;  %v4431_v2 = vpop.f32.mrf.mxu0 }
 0x31e   :  { %3945 = vst [vmem:[%s7162_s3 + $0x170] sm:$0xff] %v3881_v46  ;;  %v3879_v40 = vmax.f32 %v3757_v38, 0.0  ;;  %v3768_v28 = vadd.f32 %v4431_v2, %v3479_v49  ;;  %v3511_v25 = vadd.f32 %v3510_v18, %v7245_v5  ;;  %v7248_v2 = vld [vmem:[#allocation18_spill] sm:$0xff] }
 0x31f   :  { %v3512_v59 = vpop.f32.mrf.mxu1  ;;  %v3759_v11 = vpop.f32.mrf.mxu0 }
 0x320   :  { %3943 = vst [vmem:[%s7162_s3 + $0x160] sm:$0xff] %v3879_v40  ;;  %v3882_v37 = vmax.f32 %v3768_v28, 0.0  ;;  %v3760_v4 = vadd.f32 %v3759_v11, %v3471_v31  ;;  %v7249_v59 = vld [vmem:[#allocation2_spill] sm:$0xff] }
 0x321   :  { %v3515_v34 = vpop.f32.mrf.mxu1  ;;  %v4434_v9 = vpop.f32.mrf.mxu0 }
 0x322   :  { %3946 = vst [vmem:[%s7162_s3 + $0x178] sm:$0xff] %v3882_v37  ;;  %v3880_v35 = vmax.f32 %v3760_v4, 0.0  ;;  %v3781_v21 = vadd.f32 %v4434_v9, %v3492_v56  ;;  %v3516_v30 = vadd.f32 %v3515_v34, %v7248_v2  ;;  %v7250_v9 = vld [vmem:[#allocation19_spill] sm:$0xff] }
 0x323   :  { %v3517_v6 = vpop.f32.mrf.mxu1  ;;  %v3772_v8 = vpop.f32.mrf.mxu0 }
 0x324   :  { %3944 = vst [vmem:[%s7162_s3 + $0x168] sm:$0xff] %v3880_v35  ;;  %v3885_v53 = vmax.f32 %v3781_v21, 0.0  ;;  %v3773_v62 = vadd.f32 %v3772_v8, %v3484_v39 }
 0x325   :  { %v3518_v60 = vpop.f32.mrf.mxu1  ;;  %v4435_v61 = vpop.f32.mrf.mxu0 }
 0x326   :  { %3949 = vst [vmem:[%s7162_s3 + $0x190] sm:$0xff] %v3885_v53  ;;  %v3883_v7 = vmax.f32 %v3773_v62, 0.0  ;;  %v3784_v17 = vadd.f32 %v4435_v61, %v3495_v14  ;;  %v3519_v34 = vadd.f32 %v3518_v60, %v7250_v9  ;;  %v7251_v60 = vld [vmem:[#allocation3_spill] sm:$0xff] }
 0x327   :  { %v3520_v26 = vpop.f32.mrf.mxu1  ;;  %v3775_v0 = vpop.f32.mrf.mxu0 }
 0x328   :  { %3947 = vst [vmem:[%s7162_s3 + $0x180] sm:$0xff] %v3883_v7  ;;  %v3886_v15 = vmax.f32 %v3784_v17, 0.0  ;;  %v3776_v45 = vadd.f32 %v3775_v0, %v3487_v24 }
 0x329   :  { %v3523_v22 = vpop.f32.mrf.mxu1  ;;  %v4438_v54 = vpop.f32.mrf.mxu0 }
 0x32a   :  { %3950 = vst [vmem:[%s7162_s3 + $0x198] sm:$0xff] %v3886_v15  ;;  %v3884_v3 = vmax.f32 %v3776_v45, 0.0  ;;  %v3797_v27 = vadd.f32 %v4438_v54, %v3508_v19  ;;  %v3524_v44 = vadd.f32 %v3523_v22, %v7247_v55 }
 0x32b   :  { %v3525_v43 = vpop.f32.mrf.mxu1  ;;  %v3788_v12 = vpop.f32.mrf.mxu0 }
 0x32c   :  { %3948 = vst [vmem:[%s7162_s3 + $0x188] sm:$0xff] %v3884_v3  ;;  %v3889_v52 = vmax.f32 %v3797_v27, 0.0  ;;  %v3789_v42 = vadd.f32 %v3788_v12, %v3500_v47 }
 0x32d   :  { %v3526_v16 = vpop.f32.mrf.mxu1  ;;  %v4439_v10 = vpop.f32.mrf.mxu0 }
 0x32e   :  { %3953 = vst [vmem:[%s7162_s3 + $0x1b0] sm:$0xff] %v3889_v52  ;;  %v3887_v58 = vmax.f32 %v3789_v42, 0.0  ;;  %v3800_v50 = vadd.f32 %v4439_v10, %v3511_v25  ;;  %v3527_v11 = vadd.f32 %v3526_v16, %v7249_v59 }
 0x32f   :  { %v3528_v51 = vpop.f32.mrf.mxu1  ;;  %v3791_v29 = vpop.f32.mrf.mxu0 }
 0x330   :  { %3951 = vst [vmem:[%s7162_s3 + $0x1a0] sm:$0xff] %v3887_v58  ;;  %v3890_v49 = vmax.f32 %v3800_v50, 0.0  ;;  %v3792_v46 = vadd.f32 %v3791_v29, %v3503_v63 }
 0x331   :  { %v3531_v38 = vpop.f32.mrf.mxu1  ;;  %v4442_v18 = vpop.f32.mrf.mxu0 }
 0x332   :  { %3954 = vst [vmem:[%s7162_s3 + $0x1b8] sm:$0xff] %v3890_v49  ;;  %v3888_v13 = vmax.f32 %v3792_v46, 0.0  ;;  %v3813_v31 = vadd.f32 %v4442_v18, %v3524_v44  ;;  %v3532_v53 = vadd.f32 %v3531_v38, %v6814_v20 }
 0x333   :  { %v3533_v40 = vpop.f32.mrf.mxu1  ;;  %v3804_v28 = vpop.f32.mrf.mxu0 }
 0x334   :  { %3952 = vst [vmem:[%s7162_s3 + $0x1a8] sm:$0xff] %v3888_v13  ;;  %v3893_v57 = vmax.f32 %v3813_v31, 0.0  ;;  %v3805_v56 = vadd.f32 %v3804_v28, %v3516_v30 }
 0x335   :  { %v3534_v37 = vpop.f32.mrf.mxu1  ;;  %v4443_v4 = vpop.f32.mrf.mxu0 }
 0x336   :  { %3957 = vst [vmem:[%s7162_s3 + $0x1d0] sm:$0xff] %v3893_v57  ;;  %v3891_v32 = vmax.f32 %v3805_v56, 0.0  ;;  %v3816_v39 = vadd.f32 %v4443_v4, %v3527_v11  ;;  %v3535_v19 = vadd.f32 %v3534_v37, %v7252_v33 }
 0x337   :  { %v3536_v35 = vpop.f32.mrf.mxu1  ;;  %v3807_v21 = vpop.f32.mrf.mxu0 }
 0x338   :  { %3955 = vst [vmem:[%s7162_s3 + $0x1c0] sm:$0xff] %v3891_v32  ;;  %v3894_v6 = vmax.f32 %v3816_v39, 0.0  ;;  %v3808_v8 = vadd.f32 %v3807_v21, %v3519_v34 }
 0x339   :  { %v3539_v41 = vpop.f32.mrf.mxu1  ;;  %v4446_v14 = vpop.f32.mrf.mxu0 }
 0x33a   :  { %3958 = vst [vmem:[%s7162_s3 + $0x1d8] sm:$0xff] %v3894_v6  ;;  %v3892_v62 = vmax.f32 %v3808_v8, 0.0  ;;  %v3540_v61 = vadd.f32 %v3539_v41, %v7251_v60 }
 0x33b   :  { %v3541_v36 = vpop.f32.mrf.mxu1  ;;  %v3820_v24 = vpop.f32.mrf.mxu0 }
 0x33c   :  { %3956 = vst [vmem:[%s7162_s3 + $0x1c8] sm:$0xff] %v3892_v62  ;;  %v3829_v7 = vadd.f32 %v4446_v14, %v3540_v61  ;;  %v3821_v17 = vadd.f32 %v3820_v24, %v3532_v53 }
 0x33d   :  { %v3542_v26 = vpop.f32.mrf.mxu1  ;;  %v4447_v0 = vpop.f32.mrf.mxu0 }
 0x33e   :  { %v3897_v20 = vmax.f32 %v3829_v7, 0.0  ;;  %v3895_v15 = vmax.f32 %v3821_v17, 0.0  ;;  %v3543_v45 = vadd.f32 %v3542_v26, %v6833_v1 }
 0x33f   :  { %v3544_v22 = vpop.f32.mrf.mxu1  ;;  %v3823_v54 = vpop.f32.mrf.mxu0 }
 0x340   :  { %3961 = vst [vmem:[%s7162_s3 + $0x1f0] sm:$0xff] %v3897_v20  ;;  %3959 = vst [vmem:[%s7162_s3 + $0x1e0] sm:$0xff] %v3895_v15  ;;  %v3832_v23 = vadd.f32 %v4447_v0, %v3543_v45  ;;  %v3824_v47 = vadd.f32 %v3823_v54, %v3535_v19 }
 0x342   :  { %v3898_v3 = vmax.f32 %v3832_v23, 0.0  ;;  %v3896_v27 = vmax.f32 %v3824_v47, 0.0 }
 0x344   :  { %3962 = vst [vmem:[%s7162_s3 + $0x1f8] sm:$0xff] %v3898_v3  ;;  %3960 = vst [vmem:[%s7162_s3 + $0x1e8] sm:$0xff] %v3896_v27 }

// kernel: _lambda_.27
= control target key start
LH: loop header
LB: loop body
LE: loop exit
PB: predicated region body
PF: predicated region fallthrough
CT: control target
= control target key end

     0   :  { %s499_s1 = inlined_call_operand.vmem [shape: bf16[128,128], index: 1, kind: input, shape index: {}]   ;;  %s500_s0 = inlined_call_operand.vmem [shape: bf16[128,128], index: 0, kind: input, shape index: {}]   ;;  %s501_s2 = inlined_call_operand.vmem [shape: f32[1,128], index: 2, kind: input, shape index: {}]   ;;  %s502_s3 = inlined_call_operand.vmem [shape: f32[128,128], index: 3, kind: output, shape index: {}]  }
   0x1   :  { %v364_v0 = vld [vmem:[%s499_s1 + $0x38] sm:$0xff]   ;;  %v365_v1 = vld [vmem:[%s499_s1 + $0x30] sm:$0xff]   ;;  %v366_v2 = vld [vmem:[%s499_s1 + $0x28] sm:$0xff]  }
   0x2   :  { %316 = vmatprep.subr.bf16.mxu0 %v364_v0  ;;  %348 = vmatprep.subr.bf16.mxu1 %v364_v0  ;;  %v367_v3 = vld [vmem:[%s499_s1 + $0x20] sm:$0xff]   ;;  %v368_v6 = vld [vmem:[%s499_s1 + $0x18] sm:$0xff]   ;;  %v369_v7 = vld [vmem:[%s499_s1 + $0x10] sm:$0xff]  }
   0x3   :  { %317 = vmatpush3.bf16.msra.mxu0 %v364_v0  ;;  %356 = vmatpush3.bf16.msra.mxu1 %v364_v0  ;;  %v372_v4 = vld [vmem:[%s500_s0] sm:$0xff]   ;;  %v370_v8 = vld [vmem:[%s499_s1 + $0x8] sm:$0xff]   ;;  %v376_v12 = vld [vmem:[%s500_s0 + $0x10] sm:$0xff]  }
   0x4   :  { %318 = vmatprep.subr.bf16.mxu0 %v365_v1  ;;  %349 = vmatprep.subr.bf16.mxu1 %v365_v1  ;;  %v373_v5 = vld [vmem:[%s500_s0 + $0x20] sm:$0xff]   ;;  %v374_v10 = vld [vmem:[%s500_s0 + $0x8] sm:$0xff]   ;;  %v377_v13 = vld [vmem:[%s500_s0 + $0x30] sm:$0xff]  }
   0x5   :  { %332 = vmatprep.mubr.bf16.mxu0 %v372_v4  ;;  %340 = vmatprep.mubr.bf16.mxu1 %v373_v5  ;;  %v371_v9 = vld [vmem:[%s499_s1] sm:$0xff]   ;;  %v375_v11 = vld [vmem:[%s500_s0 + $0x28] sm:$0xff]   ;;  %v378_v14 = vld [vmem:[%s500_s0 + $0x18] sm:$0xff]  }
   0x6   :  { %v379_v15 = vld [vmem:[%s500_s0 + $0x38] sm:$0xff]   ;;  %v283_v16 = vld [vmem:[%s501_s2] ss:$0 sm:$0xff] }
   0x7   :  { %319 = vmatpush3.bf16.msra.mxu0 %v365_v1  ;;  %357 = vmatpush3.bf16.msra.mxu1 %v365_v1 }
   0x8   :  { %320 = vmatprep.subr.bf16.mxu0 %v366_v2  ;;  %350 = vmatprep.subr.bf16.mxu1 %v366_v2 }
   0xb   :  { %321 = vmatpush3.bf16.msra.mxu0 %v366_v2  ;;  %358 = vmatpush3.bf16.msra.mxu1 %v366_v2 }
   0xc   :  { %322 = vmatprep.subr.bf16.mxu0 %v367_v3  ;;  %351 = vmatprep.subr.bf16.mxu1 %v367_v3 }
   0xf   :  { %323 = vmatpush3.bf16.msra.mxu0 %v367_v3  ;;  %359 = vmatpush3.bf16.msra.mxu1 %v367_v3 }
  0x10   :  { %324 = vmatprep.subr.bf16.mxu0 %v368_v6  ;;  %352 = vmatprep.subr.bf16.mxu1 %v368_v6 }
  0x13   :  { %325 = vmatpush3.bf16.msra.mxu0 %v368_v6  ;;  %360 = vmatpush3.bf16.msra.mxu1 %v368_v6 }
  0x14   :  { %326 = vmatprep.subr.bf16.mxu0 %v369_v7  ;;  %353 = vmatprep.subr.bf16.mxu1 %v369_v7 }
  0x17   :  { %327 = vmatpush3.bf16.msra.mxu0 %v369_v7  ;;  %361 = vmatpush3.bf16.msra.mxu1 %v369_v7 }
  0x18   :  { %328 = vmatprep.subr.bf16.mxu0 %v370_v8  ;;  %354 = vmatprep.subr.bf16.mxu1 %v370_v8 }
  0x1b   :  { %329 = vmatpush3.bf16.msra.mxu0 %v370_v8  ;;  %362 = vmatpush3.bf16.msra.mxu1 %v370_v8 }
  0x1c   :  { %330 = vmatprep.subr.bf16.mxu0 %v371_v9  ;;  %355 = vmatprep.subr.bf16.mxu1 %v371_v9 }
  0x1f   :  { %331 = vmatpush3.bf16.msra.mxu0 %v371_v9  ;;  %363 = vmatpush3.bf16.msra.mxu1 %v371_v9 }
  0x22   :  { %333 = vmatmul.mubr.bf16.vlgmr.msra.gmra.mxu0 %v374_v10  ;;  %341 = vmatmul.mubr.bf16.vlgmr.msra.gmra.mxu1 %v375_v11 }
  0x23   :  { %336 = vmatprep.mubr.bf16.mxu0 %v376_v12  ;;  %344 = vmatprep.mubr.bf16.mxu1 %v377_v13 }
  0x2a   :  { %337 = vmatmul.mubr.bf16.gmra.mxu0 %v378_v14  ;;  %345 = vmatmul.mubr.bf16.gmra.mxu1 %v379_v15 }
  0xe2   :  { %v334_v17 = vpop.f32.mrf.mxu0  ;;  %v342_v18 = vpop.f32.mrf.mxu1 }
  0xe3   :  { %v193_v19 = vadd.f32 %v334_v17, %v283_v16  ;;  %v225_v20 = vadd.f32 %v342_v18, %v283_v16 }
  0xe4   :  { %v184_v21 = vpop.f32.mrf.mxu0  ;;  %v216_v22 = vpop.f32.mrf.mxu1 }
  0xe5   :  { %v249_v23 = vmax.f32 %v193_v19, 0.0  ;;  %v257_v24 = vmax.f32 %v225_v20, 0.0  ;;  %v185_v25 = vadd.f32 %v283_v16, %v184_v21  ;;  %v217_v26 = vadd.f32 %v283_v16, %v216_v22 }
  0xe6   :  { %v335_v27 = vpop.f32.mrf.mxu0  ;;  %v343_v28 = vpop.f32.mrf.mxu1 }
  0xe7   :  { %265 = vst [vmem:[%s502_s3 + $0x10] sm:$0xff] %v249_v23  ;;  %273 = vst [vmem:[%s502_s3 + $0x50] sm:$0xff] %v257_v24  ;;  %v247_v29 = vmax.f32 %v185_v25, 0.0  ;;  %v255_v30 = vmax.f32 %v217_v26, 0.0  ;;  %v196_v31 = vadd.f32 %v335_v27, %v283_v16  ;;  %v228_v32 = vadd.f32 %v343_v28, %v283_v16 }
  0xe8   :  { %v187_v33 = vpop.f32.mrf.mxu0  ;;  %v219_v34 = vpop.f32.mrf.mxu1 }
  0xe9   :  { %263 = vst [vmem:[%s502_s3] sm:$0xff] %v247_v29  ;;  %271 = vst [vmem:[%s502_s3 + $0x40] sm:$0xff] %v255_v30  ;;  %v250_v35 = vmax.f32 %v196_v31, 0.0  ;;  %v258_v36 = vmax.f32 %v228_v32, 0.0  ;;  %v188_v37 = vadd.f32 %v283_v16, %v187_v33  ;;  %v220_v38 = vadd.f32 %v283_v16, %v219_v34 }
  0xea   :  { %v338_v39 = vpop.f32.mrf.mxu0  ;;  %v346_v40 = vpop.f32.mrf.mxu1 }
  0xeb   :  { %266 = vst [vmem:[%s502_s3 + $0x18] sm:$0xff] %v250_v35  ;;  %274 = vst [vmem:[%s502_s3 + $0x58] sm:$0xff] %v258_v36  ;;  %v248_v41 = vmax.f32 %v188_v37, 0.0  ;;  %v256_v42 = vmax.f32 %v220_v38, 0.0  ;;  %v209_v43 = vadd.f32 %v338_v39, %v283_v16  ;;  %v241_v44 = vadd.f32 %v346_v40, %v283_v16 }
  0xec   :  { %v200_v45 = vpop.f32.mrf.mxu0  ;;  %v232_v46 = vpop.f32.mrf.mxu1 }
  0xed   :  { %264 = vst [vmem:[%s502_s3 + $0x8] sm:$0xff] %v248_v41  ;;  %272 = vst [vmem:[%s502_s3 + $0x48] sm:$0xff] %v256_v42  ;;  %v253_v47 = vmax.f32 %v209_v43, 0.0  ;;  %v261_v48 = vmax.f32 %v241_v44, 0.0  ;;  %v201_v49 = vadd.f32 %v283_v16, %v200_v45  ;;  %v233_v50 = vadd.f32 %v283_v16, %v232_v46 }
  0xee   :  { %v339_v51 = vpop.f32.mrf.mxu0  ;;  %v347_v52 = vpop.f32.mrf.mxu1 }
  0xef   :  { %269 = vst [vmem:[%s502_s3 + $0x30] sm:$0xff] %v253_v47  ;;  %277 = vst [vmem:[%s502_s3 + $0x70] sm:$0xff] %v261_v48  ;;  %v251_v53 = vmax.f32 %v201_v49, 0.0  ;;  %v259_v54 = vmax.f32 %v233_v50, 0.0  ;;  %v212_v55 = vadd.f32 %v339_v51, %v283_v16  ;;  %v244_v56 = vadd.f32 %v347_v52, %v283_v16 }
  0xf0   :  { %v203_v57 = vpop.f32.mrf.mxu0  ;;  %v235_v58 = vpop.f32.mrf.mxu1 }
  0xf1   :  { %267 = vst [vmem:[%s502_s3 + $0x20] sm:$0xff] %v251_v53  ;;  %275 = vst [vmem:[%s502_s3 + $0x60] sm:$0xff] %v259_v54  ;;  %v254_v59 = vmax.f32 %v212_v55, 0.0  ;;  %v262_v60 = vmax.f32 %v244_v56, 0.0  ;;  %v204_v61 = vadd.f32 %v283_v16, %v203_v57  ;;  %v236_v62 = vadd.f32 %v283_v16, %v235_v58 }
  0xf3   :  { %270 = vst [vmem:[%s502_s3 + $0x38] sm:$0xff] %v254_v59  ;;  %278 = vst [vmem:[%s502_s3 + $0x78] sm:$0xff] %v262_v60  ;;  %v252_v63 = vmax.f32 %v204_v61, 0.0  ;;  %v260_v0 = vmax.f32 %v236_v62, 0.0 }
  0xf5   :  { %268 = vst [vmem:[%s502_s3 + $0x28] sm:$0xff] %v252_v63  ;;  %276 = vst [vmem:[%s502_s3 + $0x68] sm:$0xff] %v260_v0 }

// kernel: _lambda_.24
= control target key start
LH: loop header
LB: loop body
LE: loop exit
PB: predicated region body
PF: predicated region fallthrough
CT: control target
= control target key end

     0   :  { %s2861_s1 = inlined_call_operand.vmem [shape: bf16[1152,128], index: 1, kind: input, shape index: {}]   ;;  %s2862_s0 = inlined_call_operand.vmem [shape: bf16[128,1152], index: 0, kind: input, shape index: {}]   ;;  %s2863_s2 = inlined_call_operand.vmem [shape: f32[1,128], index: 2, kind: input, shape index: {}]   ;;  %s2864_s3 = inlined_call_operand.vmem [shape: f32[128,128], index: 3, kind: output, shape index: {}]  }
   0x1   :  { %v2032_v0 = vld [vmem:[%s2861_s1 + $0x78] sm:$0xff]   ;;  %v2036_v4 = vld [vmem:[%s2861_s1 + $0x70] sm:$0xff]   ;;  %v2040_v8 = vld [vmem:[%s2861_s1 + $0x68] sm:$0xff]  }
   0x2   :  { %v2033_v1 = vld [vmem:[%s2861_s1 + $0xf8] sm:$0xff]   ;;  %1712 = vmatprep.subr.bf16.mxu0 %v2032_v0  ;;  %v2037_v5 = vld [vmem:[%s2861_s1 + $0xf0] sm:$0xff]   ;;  %v2041_v9 = vld [vmem:[%s2861_s1 + $0xe8] sm:$0xff]  }
   0x3   :  { %v2034_v2 = vld [vmem:[%s2861_s1 + $0x38] sm:$0xff]   ;;  %1776 = vmatprep.subr.bf16.mxu1 %v2033_v1  ;;  %v2038_v6 = vld [vmem:[%s2861_s1 + $0x30] sm:$0xff]   ;;  %v2042_v10 = vld [vmem:[%s2861_s1 + $0x28] sm:$0xff]  }
   0x4   :  { %v2035_v3 = vld [vmem:[%s2861_s1 + $0xb8] sm:$0xff]   ;;  %1713 = vmatpush3.bf16.msra.mxu0 %v2034_v2  ;;  %v2039_v7 = vld [vmem:[%s2861_s1 + $0xb0] sm:$0xff]   ;;  %v2043_v11 = vld [vmem:[%s2861_s1 + $0xa8] sm:$0xff]  }
   0x5   :  { %1777 = vmatpush3.bf16.msra.mxu1 %v2035_v3  ;;  %1714 = vmatprep.subr.bf16.mxu0 %v2036_v4  ;;  %v2044_v12 = vld [vmem:[%s2861_s1 + $0x60] sm:$0xff]   ;;  %v2048_v16 = vld [vmem:[%s2861_s1 + $0x58] sm:$0xff]   ;;  %v2052_v20 = vld [vmem:[%s2861_s1 + $0x50] sm:$0xff]  }
   0x6   :  { %1778 = vmatprep.subr.bf16.mxu1 %v2037_v5  ;;  %v2045_v13 = vld [vmem:[%s2861_s1 + $0xe0] sm:$0xff]   ;;  %v2049_v17 = vld [vmem:[%s2861_s1 + $0xd8] sm:$0xff]   ;;  %v2053_v21 = vld [vmem:[%s2861_s1 + $0xd0] sm:$0xff]  }
   0x7   :  { %v2046_v14 = vld [vmem:[%s2861_s1 + $0x20] sm:$0xff]   ;;  %v2050_v18 = vld [vmem:[%s2861_s1 + $0x18] sm:$0xff]   ;;  %v2054_v22 = vld [vmem:[%s2861_s1 + $0x10] sm:$0xff]  }
   0x8   :  { %1715 = vmatpush3.bf16.msra.mxu0 %v2038_v6  ;;  %v2047_v15 = vld [vmem:[%s2861_s1 + $0xa0] sm:$0xff]   ;;  %v2051_v19 = vld [vmem:[%s2861_s1 + $0x98] sm:$0xff]   ;;  %v2055_v23 = vld [vmem:[%s2861_s1 + $0x90] sm:$0xff]  }
   0x9   :  { %1779 = vmatpush3.bf16.msra.mxu1 %v2039_v7  ;;  %1716 = vmatprep.subr.bf16.mxu0 %v2040_v8  ;;  %v2056_v24 = vld [vmem:[%s2861_s1 + $0x48] sm:$0xff]   ;;  %v2060_v28 = vld [vmem:[%s2861_s1 + $0x40] sm:$0xff]   ;;  %v2070_v36 = vld [vmem:[%s2861_s1 + $0x178] sm:$0xff]  }
   0xa   :  { %1780 = vmatprep.subr.bf16.mxu1 %v2041_v9  ;;  %v2057_v25 = vld [vmem:[%s2861_s1 + $0xc8] sm:$0xff]   ;;  %v2061_v29 = vld [vmem:[%s2861_s1 + $0xc0] sm:$0xff]   ;;  %v2071_v37 = vld [vmem:[%s2861_s1 + $0x1f8] sm:$0xff]  }
   0xb   :  { %v2058_v26 = vld [vmem:[%s2861_s1 + $0x8] sm:$0xff]   ;;  %v2062_v30 = vld [vmem:[%s2861_s1] sm:$0xff]   ;;  %v2072_v38 = vld [vmem:[%s2861_s1 + $0x138] sm:$0xff]  }
   0xc   :  { %1717 = vmatpush3.bf16.msra.mxu0 %v2042_v10  ;;  %v2059_v27 = vld [vmem:[%s2861_s1 + $0x88] sm:$0xff]   ;;  %v2063_v31 = vld [vmem:[%s2861_s1 + $0x80] sm:$0xff]   ;;  %v2073_v39 = vld [vmem:[%s2861_s1 + $0x1b8] sm:$0xff]  }
   0xd   :  { %1781 = vmatpush3.bf16.msra.mxu1 %v2043_v11  ;;  %1718 = vmatprep.subr.bf16.mxu0 %v2044_v12  ;;  %v2064_v32 = vld [vmem:[%s2862_s0] ss:$36 sps:$4 sm:$0xff]   ;;  %v2067_v34 = vld [vmem:[%s2862_s0 + $0x8] ss:$36 sps:$4 sm:$0xff]   ;;  %v2076_v41 = vld [vmem:[%s2862_s0 + $0x54] ss:$36 sps:$4 sm:$0xff]  }
   0xe   :  { %1782 = vmatprep.subr.bf16.mxu1 %v2045_v13  ;;  %v2066_v33 = vld [vmem:[%s2862_s0 + $0x4] ss:$36 sps:$4 sm:$0xff]   ;;  %v2069_v35 = vld [vmem:[%s2862_s0 + $0xc] ss:$36 sps:$4 sm:$0xff]   ;;  %v2084_v48 = vld [vmem:[%s2862_s0 + $0x94] ss:$36 sps:$4 sm:$0xff]  }
   0xf   :  { %1078 = vmatprep.mubr.bf16.mxu0 %v2066_v33  ;;  %1175 = vmatprep.mubr.bf16.mxu1 %v2069_v35  ;;  %v2074_v40 = vld [vmem:[%s2862_s0 + $0x4c] ss:$36 sps:$4 sm:$0xff]   ;;  %v2086_v49 = vld [vmem:[%s2862_s0 + $0x9c] ss:$36 sps:$4 sm:$0xff]   ;;  %v2096_v57 = vld [vmem:[%s2862_s0 + $0xe4] ss:$36 sps:$4 sm:$0xff]  }
  0x10   :  { %1719 = vmatpush3.bf16.msra.mxu0 %v2046_v14  ;;  %v2078_v42 = vld [vmem:[%s2862_s0 + $0x48] ss:$36 sps:$4 sm:$0xff]   ;;  %v2079_v43 = vld [vmem:[%s2862_s0 + $0x50] ss:$36 sps:$4 sm:$0xff]   ;;  %v2089_v51 = vld [vmem:[%s2862_s0 + $0x98] ss:$36 sps:$4 sm:$0xff]  }
  0x11   :  { %1783 = vmatpush3.bf16.msra.mxu1 %v2047_v15  ;;  %1720 = vmatprep.subr.bf16.mxu0 %v2048_v16  ;;  %v2080_v44 = vld [vmem:[%s2861_s1 + $0x170] sm:$0xff]   ;;  %v2090_v52 = vld [vmem:[%s2861_s1 + $0x168] sm:$0xff]   ;;  %v2094_v56 = vld [vmem:[%s2862_s0 + $0xdc] ss:$36 sps:$4 sm:$0xff]  }
  0x12   :  { %1784 = vmatprep.subr.bf16.mxu1 %v2049_v17  ;;  %v2081_v45 = vld [vmem:[%s2861_s1 + $0x1f0] sm:$0xff]   ;;  %v2091_v53 = vld [vmem:[%s2861_s1 + $0x1e8] sm:$0xff]   ;;  %v2098_v58 = vld [vmem:[%s2862_s0 + $0xd8] ss:$36 sps:$4 sm:$0xff]  }
  0x13   :  { %v2082_v46 = vld [vmem:[%s2861_s1 + $0x130] sm:$0xff]   ;;  %v2092_v54 = vld [vmem:[%s2861_s1 + $0x128] sm:$0xff]   ;;  %v2099_v59 = vld [vmem:[%s2862_s0 + $0xe0] ss:$36 sps:$4 sm:$0xff]  }
  0x14   :  { %1721 = vmatpush3.bf16.msra.mxu0 %v2050_v18  ;;  %v2083_v47 = vld [vmem:[%s2861_s1 + $0x1b0] sm:$0xff]   ;;  %v2093_v55 = vld [vmem:[%s2861_s1 + $0x1a8] sm:$0xff]   ;;  %v2100_v60 = vld [vmem:[%s2861_s1 + $0x160] sm:$0xff]  }
  0x15   :  { %1785 = vmatpush3.bf16.msra.mxu1 %v2051_v19  ;;  %1722 = vmatprep.subr.bf16.mxu0 %v2052_v20  ;;  %v2088_v50 = vld [vmem:[%s2862_s0 + $0x90] ss:$36 sps:$4 sm:$0xff]   ;;  %v2101_v61 = vld [vmem:[%s2861_s1 + $0x1e0] sm:$0xff]   ;;  %v2110_v3 = vld [vmem:[%s2861_s1 + $0x158] sm:$0xff]  }
  0x16   :  { %1786 = vmatprep.subr.bf16.mxu1 %v2053_v21  ;;  %v2102_v62 = vld [vmem:[%s2861_s1 + $0x120] sm:$0xff]   ;;  %v2106_v1 = vld [vmem:[%s2862_s0 + $0x12c] ss:$36 sps:$4 sm:$0xff]   ;;  %v2111_v5 = vld [vmem:[%s2861_s1 + $0x1d8] sm:$0xff]  }
  0x17   :  { %v2103_v63 = vld [vmem:[%s2861_s1 + $0x1a0] sm:$0xff]   ;;  %v2109_v4 = vld [vmem:[%s2862_s0 + $0x128] ss:$36 sps:$4 sm:$0xff]   ;;  %v2112_v6 = vld [vmem:[%s2861_s1 + $0x118] sm:$0xff]  }
  0x18   :  { %1723 = vmatpush3.bf16.msra.mxu0 %v2054_v22  ;;  %v2104_v0 = vld [vmem:[%s2862_s0 + $0x124] ss:$36 sps:$4 sm:$0xff]   ;;  %v2113_v7 = vld [vmem:[%s2861_s1 + $0x198] sm:$0xff]   ;;  %v2114_v8 = vld [vmem:[%s2862_s0 + $0x16c] ss:$36 sps:$4 sm:$0xff]  }
  0x19   :  { %1787 = vmatpush3.bf16.msra.mxu1 %v2055_v23  ;;  %1724 = vmatprep.subr.bf16.mxu0 %v2056_v24  ;;  %v2108_v2 = vld [vmem:[%s2862_s0 + $0x120] ss:$36 sps:$4 sm:$0xff]   ;;  %v2116_v9 = vld [vmem:[%s2862_s0 + $0x174] ss:$36 sps:$4 sm:$0xff]   ;;  %v2118_v12 = vld [vmem:[%s2862_s0 + $0x168] ss:$36 sps:$4 sm:$0xff]  }
  0x1a   :  { %1788 = vmatprep.subr.bf16.mxu1 %v2057_v25  ;;  %v2120_v10 = vld [vmem:[%s2861_s1 + $0x150] sm:$0xff]   ;;  %v2126_v17 = vld [vmem:[%s2862_s0 + $0x1bc] ss:$36 sps:$4 sm:$0xff]   ;;  %v2130_v18 = vld [vmem:[%s2861_s1 + $0x148] sm:$0xff]  }
  0x1b   :  { %v2121_v11 = vld [vmem:[%s2861_s1 + $0x1d0] sm:$0xff]   ;;  %v2131_v19 = vld [vmem:[%s2861_s1 + $0x1c8] sm:$0xff]   ;;  %v2129_v23 = vld [vmem:[%s2862_s0 + $0x1b8] ss:$36 sps:$4 sm:$0xff]  }
  0x1c   :  { %1725 = vmatpush3.bf16.msra.mxu0 %v2058_v26  ;;  %v2122_v13 = vld [vmem:[%s2861_s1 + $0x110] sm:$0xff]   ;;  %v2132_v20 = vld [vmem:[%s2861_s1 + $0x108] sm:$0xff]   ;;  %v2134_v24 = vld [vmem:[%s2862_s0 + $0x1fc] ss:$36 sps:$4 sm:$0xff]  }
  0x1d   :  { %1789 = vmatpush3.bf16.msra.mxu1 %v2059_v27  ;;  %1726 = vmatprep.subr.bf16.mxu0 %v2060_v28  ;;  %v2123_v14 = vld [vmem:[%s2861_s1 + $0x190] sm:$0xff]   ;;  %v2133_v21 = vld [vmem:[%s2861_s1 + $0x188] sm:$0xff]   ;;  %v2140_v26 = vld [vmem:[%s2861_s1 + $0x140] sm:$0xff]  }
  0x1e   :  { %1790 = vmatprep.subr.bf16.mxu1 %v2061_v29  ;;  %v2119_v15 = vld [vmem:[%s2862_s0 + $0x170] ss:$36 sps:$4 sm:$0xff]   ;;  %v2136_v25 = vld [vmem:[%s2862_s0 + $0x204] ss:$36 sps:$4 sm:$0xff]  }
  0x1f   :  { %v2124_v16 = vld [vmem:[%s2862_s0 + $0x1b4] ss:$36 sps:$4 sm:$0xff]   ;;  %v2141_v27 = vld [vmem:[%s2861_s1 + $0x1c0] sm:$0xff]  }
  0x20   :  { %1727 = vmatpush3.bf16.msra.mxu0 %v2062_v30  ;;  %v2128_v22 = vld [vmem:[%s2862_s0 + $0x1b0] ss:$36 sps:$4 sm:$0xff]   ;;  %v2142_v28 = vld [vmem:[%s2861_s1 + $0x100] sm:$0xff]   ;;  %v2138_v30 = vld [vmem:[%s2862_s0 + $0x1f8] ss:$36 sps:$4 sm:$0xff]  }
  0x21   :  { %1791 = vmatpush3.bf16.msra.mxu1 %v2063_v31  ;;  %1840 = vmatprep.subr.bf16.mxu0 %v2070_v36  ;;  %v2143_v29 = vld [vmem:[%s2861_s1 + $0x180] sm:$0xff]   ;;  %v2146_v33 = vld [vmem:[%s2862_s0 + $0x14] ss:$36 sps:$4 sm:$0xff]  }
  0x22   :  { %1904 = vmatprep.subr.bf16.mxu1 %v2071_v37  ;;  %v2139_v31 = vld [vmem:[%s2862_s0 + $0x200] ss:$36 sps:$4 sm:$0xff]   ;;  %v2144_v35 = vld [vmem:[%s2862_s0 + $0x10] ss:$36 sps:$4 sm:$0xff]   ;;  %v2147_v36 = vld [vmem:[%s2862_s0 + $0x18] ss:$36 sps:$4 sm:$0xff]  }
  0x23   :  { %1079 = vmatmul.mubr.bf16.vlgmr.msra.gmra.mxu0 %v2064_v32  ;;  %v2150_v32 = vld [vmem:[%s2861_s1 + $0x238] sm:$0xff]  }
  0x24   :  { %1176 = vmatmul.mubr.bf16.vlgmr.msra.gmra.mxu1 %v2067_v34  ;;  %1841 = vmatpush3.bf16.msra.mxu0 %v2072_v38  ;;  %v2149_v34 = vld [vmem:[%s2862_s0 + $0x1c] ss:$36 sps:$4 sm:$0xff]   ;;  %v2153_v38 = vld [vmem:[%s2862_s0 + $0x64] ss:$36 sps:$4 sm:$0xff]  }
  0x25   :  { %1905 = vmatpush3.bf16.msra.mxu1 %v2073_v39  ;;  %1086 = vmatprep.mubr.bf16.mxu0 %v2074_v40  ;;  %v2151_v37 = vld [vmem:[%s2862_s0 + $0x5c] ss:$36 sps:$4 sm:$0xff]   ;;  %v2157_v39 = vld [vmem:[%s2861_s1 + $0x230] sm:$0xff]   ;;  %v2164_v40 = vld [vmem:[%s2861_s1 + $0x228] sm:$0xff]  }
  0x26   :  { %1183 = vmatprep.mubr.bf16.mxu1 %v2076_v41  ;;  %1842 = vmatprep.subr.bf16.mxu0 %v2080_v44  ;;  %v2155_v41 = vld [vmem:[%s2862_s0 + $0x58] ss:$36 sps:$4 sm:$0xff]   ;;  %v2160_v44 = vld [vmem:[%s2862_s0 + $0xac] ss:$36 sps:$4 sm:$0xff]  }
  0x27   :  { %1906 = vmatprep.subr.bf16.mxu1 %v2081_v45  ;;  %v2171_v45 = vld [vmem:[%s2861_s1 + $0x220] sm:$0xff]  }
  0x28   :  { %1843 = vmatpush3.bf16.msra.mxu0 %v2082_v46  ;;  %v2178_v46 = vld [vmem:[%s2861_s1 + $0x218] sm:$0xff]  }
  0x29   :  { %1907 = vmatpush3.bf16.msra.mxu1 %v2083_v47  ;;  %1844 = vmatprep.subr.bf16.mxu0 %v2090_v52  ;;  %v2162_v47 = vld [vmem:[%s2862_s0 + $0xa0] ss:$36 sps:$4 sm:$0xff]   ;;  %v2169_v52 = vld [vmem:[%s2862_s0 + $0xe8] ss:$36 sps:$4 sm:$0xff]  }
  0x2a   :  { %1908 = vmatprep.subr.bf16.mxu1 %v2091_v53  ;;  %v2192_v53 = vld [vmem:[%s2861_s1 + $0x208] sm:$0xff]  }
  0x2b   :  { %1087 = vmatmul.mubr.bf16.gmra.mxu0 %v2078_v42  ;;  %v2156_v42 = vld [vmem:[%s2862_s0 + $0x60] ss:$36 sps:$4 sm:$0xff]  }
  0x2c   :  { %1184 = vmatmul.mubr.bf16.gmra.mxu1 %v2079_v43  ;;  %1094 = vmatprep.mubr.bf16.mxu0 %v2084_v48  ;;  %v2158_v43 = vld [vmem:[%s2862_s0 + $0xa4] ss:$36 sps:$4 sm:$0xff]  }
  0x2d   :  { %1191 = vmatprep.mubr.bf16.mxu1 %v2086_v49  ;;  %1845 = vmatpush3.bf16.msra.mxu0 %v2092_v54  ;;  %v2163_v48 = vld [vmem:[%s2862_s0 + $0xa8] ss:$36 sps:$4 sm:$0xff]   ;;  %v2170_v54 = vld [vmem:[%s2862_s0 + $0xf0] ss:$36 sps:$4 sm:$0xff]  }
  0x2e   :  { %1909 = vmatpush3.bf16.msra.mxu1 %v2093_v55  ;;  %1846 = vmatprep.subr.bf16.mxu0 %v2100_v60  ;;  %v2165_v49 = vld [vmem:[%s2862_s0 + $0xec] ss:$36 sps:$4 sm:$0xff]   ;;  %v2172_v55 = vld [vmem:[%s2862_s0 + $0x134] ss:$36 sps:$4 sm:$0xff]   ;;  %v2179_v60 = vld [vmem:[%s2862_s0 + $0x17c] ss:$36 sps:$4 sm:$0xff]  }
  0x2f   :  { %1910 = vmatprep.subr.bf16.mxu1 %v2101_v61  ;;  %v2181_v61 = vld [vmem:[%s2862_s0 + $0x184] ss:$36 sps:$4 sm:$0xff]  }
  0x31   :  { %1847 = vmatpush3.bf16.msra.mxu0 %v2102_v62  ;;  %v2183_v62 = vld [vmem:[%s2862_s0 + $0x178] ss:$36 sps:$4 sm:$0xff]  }
  0x32   :  { %1911 = vmatpush3.bf16.msra.mxu1 %v2103_v63  ;;  %1848 = vmatprep.subr.bf16.mxu0 %v2110_v3  ;;  %v2184_v63 = vld [vmem:[%s2862_s0 + $0x180] ss:$36 sps:$4 sm:$0xff]   ;;  %v2191_v3 = vld [vmem:[%s2862_s0 + $0x1c8] ss:$36 sps:$4 sm:$0xff]  }
  0x33   :  { %1095 = vmatmul.mubr.bf16.gmra.mxu0 %v2088_v50  ;;  %1912 = vmatprep.subr.bf16.mxu1 %v2111_v5  ;;  %v2167_v50 = vld [vmem:[%s2862_s0 + $0xf4] ss:$36 sps:$4 sm:$0xff]  }
  0x34   :  { %1192 = vmatmul.mubr.bf16.gmra.mxu1 %v2089_v51  ;;  %1102 = vmatprep.mubr.bf16.mxu0 %v2094_v56  ;;  %v2185_v51 = vld [vmem:[%s2861_s1 + $0x210] sm:$0xff]   ;;  %v2174_v56 = vld [vmem:[%s2862_s0 + $0x13c] ss:$36 sps:$4 sm:$0xff]  }
  0x35   :  { %1199 = vmatprep.mubr.bf16.mxu1 %v2096_v57  ;;  %1849 = vmatpush3.bf16.msra.mxu0 %v2112_v6  ;;  %v2199_v57 = vld [vmem:[%s2861_s1 + $0x200] sm:$0xff]   ;;  %v2195_v5 = vld [vmem:[%s2862_s0 + $0x214] ss:$36 sps:$4 sm:$0xff]   ;;  %v2197_v6 = vld [vmem:[%s2862_s0 + $0x208] ss:$36 sps:$4 sm:$0xff]  }
  0x36   :  { %1913 = vmatpush3.bf16.msra.mxu1 %v2113_v7  ;;  %1850 = vmatprep.subr.bf16.mxu0 %v2120_v10  ;;  %v2198_v7 = vld [vmem:[%s2862_s0 + $0x210] ss:$36 sps:$4 sm:$0xff]   ;;  %v2202_v10 = vld [vmem:[%s2862_s0 + $0x68] ss:$36 sps:$4 sm:$0xff]  }
  0x37   :  { %1914 = vmatprep.subr.bf16.mxu1 %v2121_v11  ;;  %v2203_v11 = vld [vmem:[%s2862_s0 + $0x188] ss:$36 sps:$4 sm:$0xff]  }
  0x39   :  { %1851 = vmatpush3.bf16.msra.mxu0 %v2122_v13  ;;  %v2205_v13 = vld [vmem:[%s2862_s0 + $0x1d0] ss:$36 sps:$4 sm:$0xff]  }
  0x3a   :  { %1915 = vmatpush3.bf16.msra.mxu1 %v2123_v14  ;;  %1852 = vmatprep.subr.bf16.mxu0 %v2130_v18  ;;  %v2206_v14 = vld [vmem:[%s2862_s0 + $0xf8] ss:$36 sps:$4 sm:$0xff]   ;;  %v2663_v18 = vld [vmem:[%s2863_s2] ss:$0 sm:$0xff] }
  0x3b   :  { %1103 = vmatmul.mubr.bf16.gmra.mxu0 %v2098_v58  ;;  %1916 = vmatprep.subr.bf16.mxu1 %v2131_v19  ;;  %v2176_v58 = vld [vmem:[%s2862_s0 + $0x130] ss:$36 sps:$4 sm:$0xff]  }
  0x3c   :  { %1200 = vmatmul.mubr.bf16.gmra.mxu1 %v2099_v59  ;;  %1110 = vmatprep.mubr.bf16.mxu0 %v2104_v0  ;;  %v2177_v59 = vld [vmem:[%s2862_s0 + $0x138] ss:$36 sps:$4 sm:$0xff]   ;;  %v2186_v0 = vld [vmem:[%s2862_s0 + $0x1c4] ss:$36 sps:$4 sm:$0xff]  }
  0x3d   :  { %1207 = vmatprep.mubr.bf16.mxu1 %v2106_v1  ;;  %1853 = vmatpush3.bf16.msra.mxu0 %v2132_v20  ;;  %v2188_v1 = vld [vmem:[%s2862_s0 + $0x1cc] ss:$36 sps:$4 sm:$0xff]  }
  0x3e   :  { %1917 = vmatpush3.bf16.msra.mxu1 %v2133_v21  ;;  %1854 = vmatprep.subr.bf16.mxu0 %v2140_v26 }
  0x3f   :  { %1918 = vmatprep.subr.bf16.mxu1 %v2141_v27 }
  0x41   :  { %1855 = vmatpush3.bf16.msra.mxu0 %v2142_v28 }
  0x42   :  { %1919 = vmatpush3.bf16.msra.mxu1 %v2143_v29  ;;  %1984 = vmatprep.subr.bf16.mxu0 %v2150_v32 }
  0x43   :  { %1111 = vmatmul.mubr.bf16.gmra.mxu0 %v2108_v2  ;;  %2016 = vmatprep.subr.bf16.mxu1 %v2150_v32  ;;  %v2190_v2 = vld [vmem:[%s2862_s0 + $0x1c0] ss:$36 sps:$4 sm:$0xff]  }
  0x44   :  { %1208 = vmatmul.mubr.bf16.gmra.mxu1 %v2109_v4  ;;  %1118 = vmatprep.mubr.bf16.mxu0 %v2114_v8  ;;  %v2193_v4 = vld [vmem:[%s2862_s0 + $0x20c] ss:$36 sps:$4 sm:$0xff]   ;;  %v2200_v8 = vld [vmem:[%s2862_s0 + $0x20] ss:$36 sps:$4 sm:$0xff]  }
  0x45   :  { %1215 = vmatprep.mubr.bf16.mxu1 %v2116_v9  ;;  %v2201_v9 = vld [vmem:[%s2862_s0 + $0x140] ss:$36 sps:$4 sm:$0xff]  }
  0x4b   :  { %1119 = vmatmul.mubr.bf16.gmra.mxu0 %v2118_v12  ;;  %v2204_v12 = vld [vmem:[%s2862_s0 + $0xb0] ss:$36 sps:$4 sm:$0xff]  }
  0x4c   :  { %1216 = vmatmul.mubr.bf16.gmra.mxu1 %v2119_v15  ;;  %1126 = vmatprep.mubr.bf16.mxu0 %v2124_v16  ;;  %v2207_v15 = vld [vmem:[%s2862_s0 + $0x218] ss:$36 sps:$4 sm:$0xff]  }
  0x4d   :  { %1223 = vmatprep.mubr.bf16.mxu1 %v2126_v17 }
  0x53   :  { %1127 = vmatmul.mubr.bf16.gmra.mxu0 %v2128_v22 }
  0x54   :  { %1224 = vmatmul.mubr.bf16.gmra.mxu1 %v2129_v23  ;;  %1134 = vmatprep.mubr.bf16.mxu0 %v2134_v24 }
  0x55   :  { %1231 = vmatprep.mubr.bf16.mxu1 %v2136_v25 }
  0x5b   :  { %1135 = vmatmul.mubr.bf16.gmra.mxu0 %v2138_v30 }
  0x5c   :  { %1232 = vmatmul.mubr.bf16.gmra.mxu1 %v2139_v31  ;;  %1272 = vmatprep.mubr.bf16.mxu0 %v2146_v33 }
  0x5d   :  { %1369 = vmatprep.mubr.bf16.mxu1 %v2149_v34 }
  0x63   :  { %1273 = vmatmul.mubr.bf16.vlgmr.msra.gmra.mxu0 %v2144_v35 }
  0x64   :  { %1370 = vmatmul.mubr.bf16.vlgmr.msra.gmra.mxu1 %v2147_v36  ;;  %1985 = vmatpush3.bf16.msra.mxu0 %v2150_v32 }
  0x65   :  { %2024 = vmatpush3.bf16.msra.mxu1 %v2150_v32  ;;  %1280 = vmatprep.mubr.bf16.mxu0 %v2151_v37 }
  0x66   :  { %1377 = vmatprep.mubr.bf16.mxu1 %v2153_v38  ;;  %1986 = vmatprep.subr.bf16.mxu0 %v2157_v39 }
  0x67   :  { %2017 = vmatprep.subr.bf16.mxu1 %v2157_v39 }
  0x68   :  { %1987 = vmatpush3.bf16.msra.mxu0 %v2157_v39 }
  0x69   :  { %2025 = vmatpush3.bf16.msra.mxu1 %v2157_v39  ;;  %1988 = vmatprep.subr.bf16.mxu0 %v2164_v40 }
  0x6a   :  { %2018 = vmatprep.subr.bf16.mxu1 %v2164_v40 }
  0x6b   :  { %1281 = vmatmul.mubr.bf16.gmra.mxu0 %v2155_v41 }
  0x6c   :  { %1378 = vmatmul.mubr.bf16.gmra.mxu1 %v2156_v42  ;;  %1288 = vmatprep.mubr.bf16.mxu0 %v2158_v43 }
  0x6d   :  { %1385 = vmatprep.mubr.bf16.mxu1 %v2160_v44  ;;  %1989 = vmatpush3.bf16.msra.mxu0 %v2164_v40 }
  0x6e   :  { %2026 = vmatpush3.bf16.msra.mxu1 %v2164_v40  ;;  %1990 = vmatprep.subr.bf16.mxu0 %v2171_v45 }
  0x6f   :  { %2019 = vmatprep.subr.bf16.mxu1 %v2171_v45 }
  0x71   :  { %1991 = vmatpush3.bf16.msra.mxu0 %v2171_v45 }
  0x72   :  { %2027 = vmatpush3.bf16.msra.mxu1 %v2171_v45  ;;  %1992 = vmatprep.subr.bf16.mxu0 %v2178_v46 }
  0x73   :  { %1289 = vmatmul.mubr.bf16.gmra.mxu0 %v2162_v47  ;;  %2020 = vmatprep.subr.bf16.mxu1 %v2178_v46 }
  0x74   :  { %1386 = vmatmul.mubr.bf16.gmra.mxu1 %v2163_v48  ;;  %1296 = vmatprep.mubr.bf16.mxu0 %v2165_v49 }
  0x75   :  { %1393 = vmatprep.mubr.bf16.mxu1 %v2167_v50  ;;  %1993 = vmatpush3.bf16.msra.mxu0 %v2178_v46 }
  0x76   :  { %2028 = vmatpush3.bf16.msra.mxu1 %v2178_v46  ;;  %1994 = vmatprep.subr.bf16.mxu0 %v2185_v51 }
  0x77   :  { %2021 = vmatprep.subr.bf16.mxu1 %v2185_v51 }
  0x79   :  { %1995 = vmatpush3.bf16.msra.mxu0 %v2185_v51 }
  0x7a   :  { %2029 = vmatpush3.bf16.msra.mxu1 %v2185_v51  ;;  %1996 = vmatprep.subr.bf16.mxu0 %v2192_v53 }
  0x7b   :  { %1297 = vmatmul.mubr.bf16.gmra.mxu0 %v2169_v52  ;;  %2022 = vmatprep.subr.bf16.mxu1 %v2192_v53 }
  0x7c   :  { %1394 = vmatmul.mubr.bf16.gmra.mxu1 %v2170_v54  ;;  %1304 = vmatprep.mubr.bf16.mxu0 %v2172_v55 }
  0x7d   :  { %1401 = vmatprep.mubr.bf16.mxu1 %v2174_v56  ;;  %1997 = vmatpush3.bf16.msra.mxu0 %v2192_v53 }
  0x7e   :  { %2030 = vmatpush3.bf16.msra.mxu1 %v2192_v53  ;;  %1998 = vmatprep.subr.bf16.mxu0 %v2199_v57 }
  0x7f   :  { %2023 = vmatprep.subr.bf16.mxu1 %v2199_v57 }
  0x81   :  { %1999 = vmatpush3.bf16.msra.mxu0 %v2199_v57 }
  0x82   :  { %2031 = vmatpush3.bf16.msra.mxu1 %v2199_v57 }
  0x83   :  { %1305 = vmatmul.mubr.bf16.gmra.mxu0 %v2176_v58 }
  0x84   :  { %1402 = vmatmul.mubr.bf16.gmra.mxu1 %v2177_v59  ;;  %1312 = vmatprep.mubr.bf16.mxu0 %v2179_v60 }
  0x85   :  { %1409 = vmatprep.mubr.bf16.mxu1 %v2181_v61 }
  0x8b   :  { %1313 = vmatmul.mubr.bf16.gmra.mxu0 %v2183_v62 }
  0x8c   :  { %1410 = vmatmul.mubr.bf16.gmra.mxu1 %v2184_v63  ;;  %1320 = vmatprep.mubr.bf16.mxu0 %v2186_v0 }
  0x8d   :  { %1417 = vmatprep.mubr.bf16.mxu1 %v2188_v1 }
  0x93   :  { %1321 = vmatmul.mubr.bf16.gmra.mxu0 %v2190_v2 }
  0x94   :  { %1418 = vmatmul.mubr.bf16.gmra.mxu1 %v2191_v3  ;;  %1328 = vmatprep.mubr.bf16.mxu0 %v2193_v4 }
  0x95   :  { %1425 = vmatprep.mubr.bf16.mxu1 %v2195_v5 }
  0x9b   :  { %1329 = vmatmul.mubr.bf16.gmra.mxu0 %v2197_v6 }
  0x9c   :  { %1426 = vmatmul.mubr.bf16.gmra.mxu1 %v2198_v7  ;;  %2000 = vmatprep.mubr.bf16.mxu0 %v2200_v8 }
  0x9d   :  { %2008 = vmatprep.mubr.bf16.mxu1 %v2201_v9 }
  0xa3   :  { %2001 = vmatmul.mubr.bf16.vlgmr.msra.gmra.mxu0 %v2202_v10 }
  0xa4   :  { %2009 = vmatmul.mubr.bf16.vlgmr.msra.gmra.mxu1 %v2203_v11  ;;  %2004 = vmatprep.mubr.bf16.mxu0 %v2204_v12 }
  0xa5   :  { %2012 = vmatprep.mubr.bf16.mxu1 %v2205_v13 }
  0xab   :  { %2005 = vmatmul.mubr.bf16.gmra.mxu0 %v2206_v14 }
  0xac   :  { %2013 = vmatmul.mubr.bf16.gmra.mxu1 %v2207_v15 }
  0xe3   :  { %v1728_v16 = vpop.f32.mrf.mxu0 }
  0xe4   :  { %v1792_v17 = vpop.f32.mrf.mxu1 }
  0xe5   :  { %v1729_v19 = vpop.f32.mrf.mxu0 }
  0xe6   :  { %v1730_v20 = vadd.f32 %v1729_v19, %v1728_v16  ;;  %v1793_v21 = vpop.f32.mrf.mxu1 }
  0xe7   :  { %v1794_v22 = vadd.f32 %v1793_v21, %v1792_v17  ;;  %v1731_v23 = vpop.f32.mrf.mxu0 }
  0xe8   :  { %v1081_v24 = vadd.f32 %v1730_v20, %v2663_v18  ;;  %v1795_v25 = vpop.f32.mrf.mxu1 }
  0xe9   :  { %v1732_v26 = vpop.f32.mrf.mxu0 }
  0xea   :  { %v2666_v27 = vadd.f32 %v1794_v22, %v1081_v24  ;;  %v1733_v28 = vadd.f32 %v1732_v26, %v1731_v23  ;;  %v1796_v29 = vpop.f32.mrf.mxu1 }
  0xeb   :  { %v1797_v30 = vadd.f32 %v1796_v29, %v1795_v25  ;;  %v1734_v31 = vpop.f32.mrf.mxu0 }
  0xec   :  { %v1084_v32 = vadd.f32 %v1733_v28, %v2663_v18  ;;  %v1798_v33 = vpop.f32.mrf.mxu1 }
  0xed   :  { %v1735_v34 = vpop.f32.mrf.mxu0 }
  0xee   :  { %v2669_v35 = vadd.f32 %v1797_v30, %v1084_v32  ;;  %v1736_v36 = vadd.f32 %v1735_v34, %v1734_v31  ;;  %v1799_v37 = vpop.f32.mrf.mxu1 }
  0xef   :  { %v1800_v38 = vadd.f32 %v1799_v37, %v1798_v33  ;;  %v1737_v39 = vpop.f32.mrf.mxu0 }
  0xf0   :  { %v1089_v40 = vadd.f32 %v1736_v36, %v2663_v18  ;;  %v1801_v41 = vpop.f32.mrf.mxu1 }
  0xf1   :  { %v1738_v42 = vpop.f32.mrf.mxu0 }
  0xf2   :  { %v2672_v43 = vadd.f32 %v1800_v38, %v1089_v40  ;;  %v1739_v44 = vadd.f32 %v1738_v42, %v1737_v39  ;;  %v1802_v45 = vpop.f32.mrf.mxu1 }
  0xf3   :  { %v1803_v46 = vadd.f32 %v1802_v45, %v1801_v41  ;;  %v1740_v47 = vpop.f32.mrf.mxu0 }
  0xf4   :  { %v1092_v48 = vadd.f32 %v1739_v44, %v2663_v18  ;;  %v1804_v49 = vpop.f32.mrf.mxu1 }
  0xf5   :  { %v1741_v50 = vpop.f32.mrf.mxu0 }
  0xf6   :  { %v2675_v51 = vadd.f32 %v1803_v46, %v1092_v48  ;;  %v1742_v52 = vadd.f32 %v1741_v50, %v1740_v47  ;;  %v1805_v53 = vpop.f32.mrf.mxu1 }
  0xf7   :  { %v1806_v54 = vadd.f32 %v1805_v53, %v1804_v49  ;;  %v1743_v55 = vpop.f32.mrf.mxu0 }
  0xf8   :  { %v1097_v56 = vadd.f32 %v1742_v52, %v2663_v18  ;;  %v1807_v57 = vpop.f32.mrf.mxu1 }
  0xf9   :  { %v1744_v58 = vpop.f32.mrf.mxu0 }
  0xfa   :  { %v2678_v59 = vadd.f32 %v1806_v54, %v1097_v56  ;;  %v1745_v60 = vadd.f32 %v1744_v58, %v1743_v55  ;;  %v1808_v61 = vpop.f32.mrf.mxu1 }
  0xfb   :  { %v1809_v62 = vadd.f32 %v1808_v61, %v1807_v57  ;;  %v1746_v63 = vpop.f32.mrf.mxu0 }
  0xfc   :  { %v1100_v0 = vadd.f32 %v1745_v60, %v2663_v18  ;;  %v1810_v1 = vpop.f32.mrf.mxu1 }
  0xfd   :  { %v1747_v2 = vpop.f32.mrf.mxu0 }
  0xfe   :  { %v2681_v3 = vadd.f32 %v1809_v62, %v1100_v0  ;;  %v1748_v4 = vadd.f32 %v1747_v2, %v1746_v63  ;;  %v1811_v5 = vpop.f32.mrf.mxu1 }
  0xff   :  { %v1812_v6 = vadd.f32 %v1811_v5, %v1810_v1  ;;  %v1749_v7 = vpop.f32.mrf.mxu0 }
 0x100   :  { %v1105_v8 = vadd.f32 %v1748_v4, %v2663_v18  ;;  %v1813_v9 = vpop.f32.mrf.mxu1 }
 0x101   :  { %v1750_v10 = vpop.f32.mrf.mxu0 }
 0x102   :  { %v2684_v11 = vadd.f32 %v1812_v6, %v1105_v8  ;;  %v1751_v12 = vadd.f32 %v1750_v10, %v1749_v7  ;;  %v1814_v13 = vpop.f32.mrf.mxu1 }
 0x103   :  { %v1815_v14 = vadd.f32 %v1814_v13, %v1813_v9  ;;  %v1752_v15 = vpop.f32.mrf.mxu0 }
 0x104   :  { %v1108_v16 = vadd.f32 %v1751_v12, %v2663_v18  ;;  %v1816_v17 = vpop.f32.mrf.mxu1 }
 0x105   :  { %v1753_v19 = vpop.f32.mrf.mxu0 }
 0x106   :  { %v2687_v20 = vadd.f32 %v1815_v14, %v1108_v16  ;;  %v1754_v21 = vadd.f32 %v1753_v19, %v1752_v15  ;;  %v1817_v22 = vpop.f32.mrf.mxu1 }
 0x107   :  { %v1818_v23 = vadd.f32 %v1817_v22, %v1816_v17  ;;  %v1755_v24 = vpop.f32.mrf.mxu0 }
 0x108   :  { %2865 = vst [vmem:[#allocation2_spill] sm:$0xff] %v2687_v20  ;;  %v1113_v25 = vadd.f32 %v1754_v21, %v2663_v18  ;;  %v1819_v26 = vpop.f32.mrf.mxu1 }
 0x109   :  { %v1756_v28 = vpop.f32.mrf.mxu0 }
 0x10a   :  { %v2690_v29 = vadd.f32 %v1818_v23, %v1113_v25  ;;  %v1757_v30 = vadd.f32 %v1756_v28, %v1755_v24  ;;  %v1820_v31 = vpop.f32.mrf.mxu1 }
 0x10b   :  { %v1821_v32 = vadd.f32 %v1820_v31, %v1819_v26  ;;  %v1758_v33 = vpop.f32.mrf.mxu0 }
 0x10c   :  { %v1116_v34 = vadd.f32 %v1757_v30, %v2663_v18  ;;  %v1822_v36 = vpop.f32.mrf.mxu1 }
 0x10d   :  { %v1759_v37 = vpop.f32.mrf.mxu0 }
 0x10e   :  { %v2693_v38 = vadd.f32 %v1821_v32, %v1116_v34  ;;  %v1760_v39 = vadd.f32 %v1759_v37, %v1758_v33  ;;  %v1823_v40 = vpop.f32.mrf.mxu1 }
 0x10f   :  { %v1824_v41 = vadd.f32 %v1823_v40, %v1822_v36  ;;  %v1761_v42 = vpop.f32.mrf.mxu0 }
 0x110   :  { %2866 = vst [vmem:[#allocation3_spill] sm:$0xff] %v2693_v38  ;;  %v1121_v44 = vadd.f32 %v1760_v39, %v2663_v18  ;;  %v1825_v45 = vpop.f32.mrf.mxu1 }
 0x111   :  { %v1762_v46 = vpop.f32.mrf.mxu0 }
 0x112   :  { %v2696_v47 = vadd.f32 %v1824_v41, %v1121_v44  ;;  %v1763_v48 = vadd.f32 %v1762_v46, %v1761_v42  ;;  %v1826_v49 = vpop.f32.mrf.mxu1 }
 0x113   :  { %v1827_v50 = vadd.f32 %v1826_v49, %v1825_v45  ;;  %v1764_v52 = vpop.f32.mrf.mxu0 }
 0x114   :  { %v1124_v53 = vadd.f32 %v1763_v48, %v2663_v18  ;;  %v1828_v54 = vpop.f32.mrf.mxu1 }
 0x115   :  { %v1765_v55 = vpop.f32.mrf.mxu0 }
 0x116   :  { %v2699_v56 = vadd.f32 %v1827_v50, %v1124_v53  ;;  %v1766_v57 = vadd.f32 %v1765_v55, %v1764_v52  ;;  %v1829_v58 = vpop.f32.mrf.mxu1 }
 0x117   :  { %v1830_v60 = vadd.f32 %v1829_v58, %v1828_v54  ;;  %v1767_v61 = vpop.f32.mrf.mxu0 }
 0x118   :  { %v1129_v62 = vadd.f32 %v1766_v57, %v2663_v18  ;;  %v1831_v63 = vpop.f32.mrf.mxu1 }
 0x119   :  { %v1768_v0 = vpop.f32.mrf.mxu0 }
 0x11a   :  { %v2702_v1 = vadd.f32 %v1830_v60, %v1129_v62  ;;  %v1769_v2 = vadd.f32 %v1768_v0, %v1767_v61  ;;  %v1832_v4 = vpop.f32.mrf.mxu1 }
 0x11b   :  { %v1833_v5 = vadd.f32 %v1832_v4, %v1831_v63  ;;  %v1770_v6 = vpop.f32.mrf.mxu0 }
 0x11c   :  { %2867 = vst [vmem:[#allocation4_spill] sm:$0xff] %v2702_v1  ;;  %v1132_v7 = vadd.f32 %v1769_v2, %v2663_v18  ;;  %v1834_v8 = vpop.f32.mrf.mxu1 }
 0x11d   :  { %v1771_v9 = vpop.f32.mrf.mxu0 }
 0x11e   :  { %v2705_v10 = vadd.f32 %v1833_v5, %v1132_v7  ;;  %v1772_v12 = vadd.f32 %v1771_v9, %v1770_v6  ;;  %v1835_v13 = vpop.f32.mrf.mxu1 }
 0x11f   :  { %v1836_v14 = vadd.f32 %v1835_v13, %v1834_v8  ;;  %v1773_v15 = vpop.f32.mrf.mxu0 }
 0x120   :  { %2868 = vst [vmem:[#allocation5_spill] sm:$0xff] %v2705_v10  ;;  %v1137_v16 = vadd.f32 %v1772_v12, %v2663_v18  ;;  %v1837_v17 = vpop.f32.mrf.mxu1 }
 0x121   :  { %v1774_v19 = vpop.f32.mrf.mxu0 }
 0x122   :  { %v2708_v21 = vadd.f32 %v1836_v14, %v1137_v16  ;;  %v1775_v22 = vadd.f32 %v1774_v19, %v1773_v15  ;;  %v1838_v23 = vpop.f32.mrf.mxu1 }
 0x123   :  { %v1839_v24 = vadd.f32 %v1838_v23, %v1837_v17  ;;  %v1856_v25 = vpop.f32.mrf.mxu0 }
 0x124   :  { %2869 = vst [vmem:[#allocation6_spill] sm:$0xff] %v2708_v21  ;;  %v1140_v26 = vadd.f32 %v1775_v22, %v2663_v18  ;;  %v2711_v28 = vpop.f32.mrf.mxu1 }
 0x125   :  { %v1857_v30 = vpop.f32.mrf.mxu0 }
 0x126   :  { %v2713_v31 = vadd.f32 %v1839_v24, %v1140_v26  ;;  %v1921_v32 = vpop.f32.mrf.mxu1 }
 0x127   :  { %v1859_v33 = vpop.f32.mrf.mxu0 }
 0x128   :  { %2870 = vst [vmem:[#allocation7_spill] sm:$0xff] %v2713_v31  ;;  %v1923_v34 = vpop.f32.mrf.mxu1 }
 0x129   :  { %v1860_v36 = vpop.f32.mrf.mxu0 }
 0x12a   :  { %v1924_v37 = vpop.f32.mrf.mxu1  ;;  %v1861_v20 = vadd.f32 %v1860_v36, %v1859_v33 }
 0x12b   :  { %v1862_v39 = vpop.f32.mrf.mxu0  ;;  %v1925_v33 = vadd.f32 %v1924_v37, %v1923_v34 }
 0x12c   :  { %v2715_v40 = vpop.f32.mrf.mxu1 }
 0x12d   :  { %v1863_v41 = vpop.f32.mrf.mxu0 }
 0x12e   :  { %v2717_v42 = vpop.f32.mrf.mxu1  ;;  %v1864_v21 = vadd.f32 %v1863_v41, %v1862_v39 }
 0x12f   :  { %v1865_v44 = vpop.f32.mrf.mxu0 }
 0x130   :  { %v2719_v45 = vpop.f32.mrf.mxu1  ;;  %v1283_v36 = vadd.f32 %v1864_v21, %v2672_v43 }
 0x131   :  { %v1866_v18 = vpop.f32.mrf.mxu0 }
 0x132   :  { %v2721_v46 = vpop.f32.mrf.mxu1 }
 0x133   :  { %v1868_v48 = vpop.f32.mrf.mxu0  ;;  %v1931_v43 = vadd.f32 %v2721_v46, %v2719_v45 }
 0x134   :  { %v2723_v49 = vpop.f32.mrf.mxu1 }
 0x135   :  { %v1869_v50 = vpop.f32.mrf.mxu0 }
 0x136   :  { %v2725_v52 = vpop.f32.mrf.mxu1 }
 0x137   :  { %v1871_v53 = vpop.f32.mrf.mxu0  ;;  %v1934_v21 = vadd.f32 %v2725_v52, %v2723_v49 }
 0x138   :  { %v2727_v54 = vpop.f32.mrf.mxu1 }
 0x139   :  { %2871 = vst [vmem:[#allocation8_spill] sm:$0xff] %v2727_v54  ;;  %v1872_v55 = vpop.f32.mrf.mxu0 }
 0x13a   :  { %v2729_v57 = vpop.f32.mrf.mxu1 }
 0x13b   :  { %2872 = vst [vmem:[#allocation9_spill] sm:$0xff] %v2729_v57  ;;  %v1874_v58 = vpop.f32.mrf.mxu0 }
 0x13c   :  { %v2731_v60 = vpop.f32.mrf.mxu1 }
 0x13d   :  { %v1875_v61 = vpop.f32.mrf.mxu0 }
 0x13e   :  { %v2733_v62 = vpop.f32.mrf.mxu1  ;;  %v1876_v39 = vadd.f32 %v1875_v61, %v1874_v58 }
 0x13f   :  { %2873 = vst [vmem:[#allocation10_spill] sm:$0xff] %v2733_v62  ;;  %v2735_v63 = vpop.f32.mrf.mxu0  ;;  %v1922_v62 = vadd.f32 %v1921_v32, %v2711_v28  ;;  %v1928_v28 = vadd.f32 %v2717_v42, %v2715_v40 }
 0x140   :  { %2874 = vst [vmem:[#allocation11_spill] sm:$0xff] %v2735_v63  ;;  %v2737_v0 = vpop.f32.mrf.mxu1  ;;  %v1299_v37 = vadd.f32 %v1876_v39, %v2684_v11  ;;  %v2891_v39 = vld [vmem:[#allocation4_spill] sm:$0xff] }
 0x141   :  { %2875 = vst [vmem:[#allocation12_spill] sm:$0xff] %v2737_v0  ;;  %v2739_v2 = vpop.f32.mrf.mxu0  ;;  %v1858_v0 = vadd.f32 %v1857_v30, %v1856_v25  ;;  %v1278_v25 = vadd.f32 %v1861_v20, %v2669_v35  ;;  %v1380_v42 = vadd.f32 %v1928_v28, %v1283_v36 }
 0x142   :  { %2876 = vst [vmem:[#allocation13_spill] sm:$0xff] %v2739_v2  ;;  %v2741_v4 = vpop.f32.mrf.mxu1  ;;  %v1870_v2 = vadd.f32 %v1869_v50, %v1868_v48  ;;  %v1873_v48 = vadd.f32 %v1872_v55, %v1871_v53 }
 0x143   :  { %2877 = vst [vmem:[#allocation14_spill] sm:$0xff] %v2741_v4  ;;  %v1880_v5 = vpop.f32.mrf.mxu0  ;;  %v1275_v38 = vadd.f32 %v1858_v0, %v2666_v27 }
 0x144   :  { %v2743_v6 = vpop.f32.mrf.mxu1 }
 0x145   :  { %2878 = vst [vmem:[#allocation15_spill] sm:$0xff] %v2743_v6  ;;  %v1881_v7 = vpop.f32.mrf.mxu0  ;;  %v1372_v32 = vadd.f32 %v1922_v62, %v1275_v38 }
 0x146   :  { %v1945_v8 = vpop.f32.mrf.mxu1  ;;  %v1882_v41 = vadd.f32 %v1881_v7, %v1880_v5  ;;  %v2883_v49 = vld [vmem:[#allocation10_spill] sm:$0xff] }
 0x147   :  { %v1883_v9 = vpop.f32.mrf.mxu0  ;;  %v1940_v52 = vadd.f32 %v2883_v49, %v2731_v60 }
 0x148   :  { %v2745_v12 = vpop.f32.mrf.mxu1  ;;  %v1307_v53 = vadd.f32 %v1882_v41, %v2690_v29  ;;  %v2895_v49 = vld [vmem:[#allocation12_spill] sm:$0xff] }
 0x149   :  { %2879 = vst [vmem:[#allocation16_spill] sm:$0xff] %v2745_v12  ;;  %v1884_v13 = vpop.f32.mrf.mxu0  ;;  %v1867_v12 = vadd.f32 %v1866_v18, %v1865_v44  ;;  %v1291_v18 = vadd.f32 %v1870_v2, %v2678_v59  ;;  %v1375_v59 = vadd.f32 %v1925_v33, %v1278_v25  ;;  %v2885_v2 = vld [vmem:[#allocation3_spill] sm:$0xff]  ;;  %v2890_v33 = vld [vmem:[#allocation6_spill] sm:$0xff] }
 0x14a   :  { %v2747_v14 = vpop.f32.mrf.mxu1  ;;  %v1885_v34 = vadd.f32 %v1884_v13, %v1883_v9 }
 0x14b   :  { %2880 = vst [vmem:[#allocation17_spill] sm:$0xff] %v2747_v14  ;;  %v1886_v15 = vpop.f32.mrf.mxu0  ;;  %v1286_v44 = vadd.f32 %v1867_v12, %v2675_v51  ;;  %v2784_v58 = vadd.f32 %v1934_v21, %v1291_v18  ;;  %v2886_v12 = vld [vmem:[#allocation11_spill] sm:$0xff]  ;;  %v2892_v21 = vld [vmem:[#allocation2_spill] sm:$0xff] }
 0x14c   :  { %v1950_v16 = vpop.f32.mrf.mxu1  ;;  %v2884_v61 = vld [vmem:[#allocation15_spill] sm:$0xff]  ;;  %v1310_v5 = vadd.f32 %v1885_v34, %v2885_v2 }
 0x14d   :  { %v1887_v17 = vpop.f32.mrf.mxu0  ;;  %v1383_v46 = vadd.f32 %v1931_v43, %v1286_v44  ;;  %v1946_v62 = vadd.f32 %v1945_v8, %v2884_v61 }
 0x14e   :  { %v1951_v19 = vpop.f32.mrf.mxu1  ;;  %v1888_v6 = vadd.f32 %v1887_v17, %v1886_v15 }
 0x14f   :  { %v1889_v22 = vpop.f32.mrf.mxu0  ;;  %v1952_v55 = vadd.f32 %v1951_v19, %v1950_v16  ;;  %v1404_v17 = vadd.f32 %v1946_v62, %v1307_v53  ;;  %v1396_v19 = vadd.f32 %v1940_v52, %v1299_v37  ;;  %v2896_v52 = vld [vmem:[#allocation14_spill] sm:$0xff] }
 0x150   :  { %v1953_v23 = vpop.f32.mrf.mxu1  ;;  %v1315_v35 = vadd.f32 %v1888_v6, %v2696_v47  ;;  %v2781_v47 = vadd.f32 %v1873_v48, %v2681_v3 }
 0x151   :  { %v1890_v24 = vpop.f32.mrf.mxu0 }
 0x152   :  { %v1954_v26 = vpop.f32.mrf.mxu1  ;;  %v1891_v27 = vadd.f32 %v1890_v24, %v1889_v22  ;;  %v1412_v29 = vadd.f32 %v1952_v55, %v1315_v35  ;;  %v2888_v22 = vld [vmem:[#allocation16_spill] sm:$0xff]  ;;  %v2889_v60 = vld [vmem:[#allocation17_spill] sm:$0xff] }
 0x153   :  { %v1892_v57 = vpop.f32.mrf.mxu0  ;;  %v1955_v6 = vadd.f32 %v1954_v26, %v1953_v23  ;;  %v1949_v24 = vadd.f32 %v2889_v60, %v2888_v22 }
 0x154   :  { %v2749_v54 = vpop.f32.mrf.mxu1  ;;  %v1318_v38 = vadd.f32 %v1891_v27, %v2699_v56  ;;  %v2887_v56 = vld [vmem:[#allocation13_spill] sm:$0xff] }
 0x155   :  { %2881 = vst [vmem:[#allocation18_spill] sm:$0xff] %v2749_v54  ;;  %v1893_v10 = vpop.f32.mrf.mxu0  ;;  %v1879_v13 = vadd.f32 %v2887_v56, %v2886_v12  ;;  %v1407_v27 = vadd.f32 %v1949_v24, %v1310_v5 }
 0x156   :  { %v2751_v4 = vpop.f32.mrf.mxu1  ;;  %v1894_v7 = vadd.f32 %v1893_v10, %v1892_v57  ;;  %v1415_v25 = vadd.f32 %v1955_v6, %v1318_v38 }
 0x157   :  { %v2753_v31 = vpop.f32.mrf.mxu0  ;;  %v1302_v34 = vadd.f32 %v1879_v13, %v2892_v21 }
 0x158   :  { %v2755_v1 = vpop.f32.mrf.mxu1  ;;  %v1323_v41 = vadd.f32 %v1894_v7, %v2891_v39 }
 0x159   :  { %2882 = vst [vmem:[#allocation19_spill] sm:$0xff] %v2755_v1  ;;  %v2757_v14 = vpop.f32.mrf.mxu0 }
 0x15a   :  { %v2759_v63 = vpop.f32.mrf.mxu1  ;;  %v1897_v28 = vadd.f32 %v2757_v14, %v2753_v31 }
 0x15b   :  { %v1898_v54 = vpop.f32.mrf.mxu0 }
 0x15c   :  { %v2764_v30 = vpop.f32.mrf.mxu1  ;;  %v2893_v37 = vld [vmem:[#allocation18_spill] sm:$0xff] }
 0x15d   :  { %v1899_v1 = vpop.f32.mrf.mxu0  ;;  %v1958_v53 = vadd.f32 %v2751_v4, %v2893_v37  ;;  %v1943_v4 = vadd.f32 %v2896_v52, %v2895_v49 }
 0x15e   :  { %v1963_v50 = vpop.f32.mrf.mxu1  ;;  %v1900_v11 = vadd.f32 %v1899_v1, %v1898_v54 }
 0x15f   :  { %v1901_v20 = vpop.f32.mrf.mxu0  ;;  %v1964_v35 = vadd.f32 %v1963_v50, %v2764_v30  ;;  %v2894_v30 = vld [vmem:[#allocation7_spill] sm:$0xff] }
 0x160   :  { %v2776_v51 = vpop.f32.mrf.mxu1  ;;  %v1331_v36 = vadd.f32 %v1900_v11, %v2890_v33  ;;  %v1420_v11 = vadd.f32 %v1958_v53, %v1323_v41 }
 0x161   :  { %v1902_v40 = vpop.f32.mrf.mxu0 }
 0x162   :  { %v1966_v45 = vpop.f32.mrf.mxu1  ;;  %v1903_v23 = vadd.f32 %v1902_v40, %v1901_v20 }
 0x163   :  { %v2002_v0 = vpop.f32.mrf.mxu0  ;;  %v1967_v2 = vadd.f32 %v1966_v45, %v2776_v51  ;;  %v2900_v51 = vld [vmem:[#allocation19_spill] sm:$0xff] }
 0x164   :  { %v1477_v3 = vadd.f32 %v2002_v0, %v1380_v42  ;;  %v2010_v9 = vpop.f32.mrf.mxu1  ;;  %v1334_v50 = vadd.f32 %v1903_v23, %v2894_v30  ;;  %v2897_v0 = vld [vmem:[#allocation5_spill] sm:$0xff]  ;;  %v1961_v45 = vadd.f32 %v2759_v63, %v2900_v51 }
 0x165   :  { %v1509_v15 = vadd.f32 %v2010_v9, %v1412_v29  ;;  %v1468_v16 = vpop.f32.mrf.mxu0  ;;  %v1326_v29 = vadd.f32 %v1897_v28, %v2897_v0  ;;  %v2899_v9 = vld [vmem:[#allocation9_spill] sm:$0xff] }
 0x166   :  { %v1533_v8 = vmax.f32 %v1477_v3, 0.0  ;;  %v1469_v1 = vadd.f32 %v1468_v16, %v1372_v32  ;;  %v1500_v54 = vpop.f32.mrf.mxu1  ;;  %v2898_v3 = vld [vmem:[#allocation8_spill] sm:$0xff]  ;;  %v1399_v16 = vadd.f32 %v1943_v4, %v1302_v34  ;;  %v1431_v60 = vadd.f32 %v1967_v2, %v1334_v50 }
 0x167   :  { %v1541_v10 = vmax.f32 %v1509_v15, 0.0  ;;  %v1501_v57 = vadd.f32 %v1500_v54, %v1404_v17  ;;  %v2003_v26 = vpop.f32.mrf.mxu0  ;;  %v1937_v12 = vadd.f32 %v2899_v9, %v2898_v3  ;;  %v1423_v33 = vadd.f32 %v1961_v45, %v1326_v29 }
 0x168   :  { %1549 = vst [vmem:[%s2864_s3 + $0x10] sm:$0xff] %v1533_v8  ;;  %v1531_v44 = vmax.f32 %v1469_v1, 0.0  ;;  %v1480_v18 = vadd.f32 %v2003_v26, %v1383_v46  ;;  %v2011_v48 = vpop.f32.mrf.mxu1  ;;  %v1428_v46 = vadd.f32 %v1964_v35, %v1331_v36 }
 0x169   :  { %1557 = vst [vmem:[%s2864_s3 + $0x50] sm:$0xff] %v1541_v10  ;;  %v1539_v20 = vmax.f32 %v1501_v57, 0.0  ;;  %v1512_v32 = vadd.f32 %v2011_v48, %v1415_v25  ;;  %v1471_v43 = vpop.f32.mrf.mxu0  ;;  %v1391_v1 = vadd.f32 %v1937_v12, %v2781_v47 }
 0x16a   :  { %1547 = vst [vmem:[%s2864_s3] sm:$0xff] %v1531_v44  ;;  %v1534_v55 = vmax.f32 %v1480_v18, 0.0  ;;  %v1472_v31 = vadd.f32 %v1471_v43, %v1375_v59  ;;  %v1503_v14 = vpop.f32.mrf.mxu1 }
 0x16b   :  { %1555 = vst [vmem:[%s2864_s3 + $0x40] sm:$0xff] %v1539_v20  ;;  %v1542_v40 = vmax.f32 %v1512_v32, 0.0  ;;  %v1504_v42 = vadd.f32 %v1503_v14, %v1407_v27  ;;  %v2006_v38 = vpop.f32.mrf.mxu0 }
 0x16c   :  { %1550 = vst [vmem:[%s2864_s3 + $0x18] sm:$0xff] %v1534_v55  ;;  %v1532_v61 = vmax.f32 %v1472_v31, 0.0  ;;  %v1493_v59 = vadd.f32 %v2006_v38, %v1396_v19  ;;  %v2014_v62 = vpop.f32.mrf.mxu1 }
 0x16d   :  { %1558 = vst [vmem:[%s2864_s3 + $0x58] sm:$0xff] %v1542_v40  ;;  %v1540_v5 = vmax.f32 %v1504_v42, 0.0  ;;  %v1525_v6 = vadd.f32 %v2014_v62, %v1428_v46  ;;  %v1484_v7 = vpop.f32.mrf.mxu0 }
 0x16e   :  { %1548 = vst [vmem:[%s2864_s3 + $0x8] sm:$0xff] %v1532_v61  ;;  %v1537_v56 = vmax.f32 %v1493_v59, 0.0  ;;  %v1485_v13 = vadd.f32 %v1484_v7, %v2784_v58  ;;  %v1516_v15 = vpop.f32.mrf.mxu1 }
 0x16f   :  { %1556 = vst [vmem:[%s2864_s3 + $0x48] sm:$0xff] %v1540_v5  ;;  %v1545_v17 = vmax.f32 %v1525_v6, 0.0  ;;  %v1517_v19 = vadd.f32 %v1516_v15, %v1420_v11  ;;  %v2007_v22 = vpop.f32.mrf.mxu0 }
 0x170   :  { %1553 = vst [vmem:[%s2864_s3 + $0x30] sm:$0xff] %v1537_v56  ;;  %v1535_v24 = vmax.f32 %v1485_v13, 0.0  ;;  %v1496_v8 = vadd.f32 %v2007_v22, %v1399_v16  ;;  %v2015_v58 = vpop.f32.mrf.mxu1 }
 0x171   :  { %1561 = vst [vmem:[%s2864_s3 + $0x70] sm:$0xff] %v1545_v17  ;;  %v1543_v63 = vmax.f32 %v1517_v19, 0.0  ;;  %v1528_v54 = vadd.f32 %v2015_v58, %v1431_v60  ;;  %v1487_v25 = vpop.f32.mrf.mxu0 }
 0x172   :  { %1551 = vst [vmem:[%s2864_s3 + $0x20] sm:$0xff] %v1535_v24  ;;  %v1538_v36 = vmax.f32 %v1496_v8, 0.0  ;;  %v1488_v23 = vadd.f32 %v1487_v25, %v1391_v1  ;;  %v1519_v10 = vpop.f32.mrf.mxu1 }
 0x173   :  { %1559 = vst [vmem:[%s2864_s3 + $0x60] sm:$0xff] %v1543_v63  ;;  %v1546_v47 = vmax.f32 %v1528_v54, 0.0  ;;  %v1520_v57 = vadd.f32 %v1519_v10, %v1423_v33 }
 0x174   :  { %1554 = vst [vmem:[%s2864_s3 + $0x38] sm:$0xff] %v1538_v36  ;;  %v1536_v26 = vmax.f32 %v1488_v23, 0.0 }
 0x175   :  { %1562 = vst [vmem:[%s2864_s3 + $0x78] sm:$0xff] %v1546_v47  ;;  %v1544_v39 = vmax.f32 %v1520_v57, 0.0 }
 0x176   :  { %1552 = vst [vmem:[%s2864_s3 + $0x28] sm:$0xff] %v1536_v26 }
 0x177   :  { %1560 = vst [vmem:[%s2864_s3 + $0x68] sm:$0xff] %v1544_v39 }

// kernel: _lambda_.30
= control target key start
LH: loop header
LB: loop body
LE: loop exit
PB: predicated region body
PF: predicated region fallthrough
CT: control target
= control target key end

     0   :  { %v292_v1 = vmov 0   ;;  %v40_v19 = vlaneseq  ;;  %s423_s1 = inlined_call_operand.vmem [shape: bf16[128,256], index: 1, kind: input, shape index: {}]   ;;  %s424_s0 = inlined_call_operand.vmem [shape: bf16[32,128], index: 0, kind: input, shape index: {}]   ;;  %s425_s2 = inlined_call_operand.vmem [shape: f32[1,256], index: 2, kind: input, shape index: {}]   ;;  %s426_s3 = inlined_call_operand.vmem [shape: f32[32,256], index: 3, kind: input, shape index: {}]   ;;  %s427_s4 = inlined_call_operand.vmem [shape: f32[32,256], index: 4, kind: output, shape index: {}]  }
   0x1   :  { %v266_v0 = vld [vmem:[%s423_s1 + $0x74] ss:$8 sps:$4 sm:$0xff]   ;;  %174 = vmatprep.mubr.bf16.mxu0 %v292_v1  ;;  %184 = vmatprep.mubr.bf16.mxu1 %v292_v1  ;;  %v268_v2 = vld [vmem:[%s423_s1 + $0x70] ss:$8 sps:$4 sm:$0xff]   ;;  %v269_v3 = vld [vmem:[%s423_s1 + $0x64] ss:$8 sps:$4 sm:$0xff]  }
   0x2   :  { %142 = vmatprep.subr.bf16.mxu0 %v266_v0  ;;  %249 = vmatprep.subr.bf16.mxu1 %v266_v0  ;;  %v271_v4 = vld [vmem:[%s423_s1 + $0x60] ss:$8 sps:$4 sm:$0xff]   ;;  %v272_v5 = vld [vmem:[%s423_s1 + $0x54] ss:$8 sps:$4 sm:$0xff]   ;;  %v274_v6 = vld [vmem:[%s423_s1 + $0x50] ss:$8 sps:$4 sm:$0xff]  }
   0x3   :  { %143 = vmatpush1.bf16.msra.mxu0 %v268_v2  ;;  %257 = vmatpush1.bf16.msra.mxu1 %v268_v2  ;;  %v275_v7 = vld [vmem:[%s423_s1 + $0x44] ss:$8 sps:$4 sm:$0xff]   ;;  %v277_v8 = vld [vmem:[%s423_s1 + $0x40] ss:$8 sps:$4 sm:$0xff]   ;;  %v278_v9 = vld [vmem:[%s423_s1 + $0x34] ss:$8 sps:$4 sm:$0xff]  }
   0x4   :  { %144 = vmatprep.subr.bf16.mxu0 %v269_v3  ;;  %250 = vmatprep.subr.bf16.mxu1 %v269_v3  ;;  %v280_v10 = vld [vmem:[%s423_s1 + $0x30] ss:$8 sps:$4 sm:$0xff]   ;;  %v281_v11 = vld [vmem:[%s423_s1 + $0x24] ss:$8 sps:$4 sm:$0xff]   ;;  %v283_v12 = vld [vmem:[%s423_s1 + $0x20] ss:$8 sps:$4 sm:$0xff]  }
   0x5   :  { %v284_v13 = vld [vmem:[%s423_s1 + $0x14] ss:$8 sps:$4 sm:$0xff]   ;;  %v286_v14 = vld [vmem:[%s423_s1 + $0x10] ss:$8 sps:$4 sm:$0xff]   ;;  %v287_v15 = vld [vmem:[%s423_s1 + $0x4] ss:$8 sps:$4 sm:$0xff]  }
   0x6   :  { %v289_v16 = vld [vmem:[%s423_s1] ss:$8 sps:$4 sm:$0xff]   ;;  %v41_v20 = vshrl.u32 %v40_v19, 7  ;;  %v197_v46 = vld [vmem:[%s426_s3 + $0x10] sm:$0xff]  ;;  %v198_v51 = vld [vmem:[%s426_s3 + $0x18] sm:$0xff] }
   0x7   :  { %145 = vmatpush1.bf16.msra.mxu0 %v271_v4  ;;  %258 = vmatpush1.bf16.msra.mxu1 %v271_v4  ;;  %v290_v17 = vld [vmem:[%s424_s0] sm:$0xff]   ;;  %v291_v18 = vld [vmem:[%s424_s0 + $0x8] sm:$0xff]   ;;  %v201_v47 = vld [vmem:[%s426_s3 + $0x30] sm:$0xff] }
   0x8   :  { %146 = vmatprep.subr.bf16.mxu0 %v272_v5  ;;  %251 = vmatprep.subr.bf16.mxu1 %v272_v5  ;;  %v42_v21 = vsub.s32 0, %v41_v20  ;;  %v38_v22 = vld [vmem:[%s425_s2] sm:$0x3]  ;;  %v46_v23 = vsub.s32 1, %v41_v20  ;;  %v196_v33 = vld [vmem:[%s426_s3 + $0x8] sm:$0xff]  ;;  %v202_v53 = vld [vmem:[%s426_s3 + $0x38] sm:$0xff] }
   0x9   :  { %v195_v27 = vld [vmem:[%s426_s3] sm:$0xff]  ;;  %v200_v35 = vld [vmem:[%s426_s3 + $0x28] sm:$0xff] }
   0xa   :  { %v43_v24 = vrot.slane %v38_v22, %v42_v21  ;;  %v47_v25 = vrot.slane %v38_v22, %v46_v23  ;;  %v199_v29 = vld [vmem:[%s426_s3 + $0x20] sm:$0xff] }
   0xb   :  { %147 = vmatpush1.bf16.msra.mxu0 %v274_v6  ;;  %259 = vmatpush1.bf16.msra.mxu1 %v274_v6 }
   0xc   :  { %148 = vmatprep.subr.bf16.mxu0 %v275_v7  ;;  %252 = vmatprep.subr.bf16.mxu1 %v275_v7 }
   0xf   :  { %149 = vmatpush1.bf16.msra.mxu0 %v277_v8  ;;  %260 = vmatpush1.bf16.msra.mxu1 %v277_v8 }
  0x10   :  { %150 = vmatprep.subr.bf16.mxu0 %v278_v9  ;;  %253 = vmatprep.subr.bf16.mxu1 %v278_v9 }
  0x13   :  { %151 = vmatpush1.bf16.msra.mxu0 %v280_v10  ;;  %261 = vmatpush1.bf16.msra.mxu1 %v280_v10 }
  0x14   :  { %152 = vmatprep.subr.bf16.mxu0 %v281_v11  ;;  %254 = vmatprep.subr.bf16.mxu1 %v281_v11 }
  0x17   :  { %153 = vmatpush1.bf16.msra.mxu0 %v283_v12  ;;  %262 = vmatpush1.bf16.msra.mxu1 %v283_v12 }
  0x18   :  { %154 = vmatprep.subr.bf16.mxu0 %v284_v13  ;;  %255 = vmatprep.subr.bf16.mxu1 %v284_v13 }
  0x1b   :  { %155 = vmatpush1.bf16.msra.mxu0 %v286_v14  ;;  %263 = vmatpush1.bf16.msra.mxu1 %v286_v14 }
  0x1c   :  { %156 = vmatprep.subr.bf16.mxu0 %v287_v15  ;;  %256 = vmatprep.subr.bf16.mxu1 %v287_v15 }
  0x1f   :  { %157 = vmatpush1.bf16.msra.mxu0 %v289_v16  ;;  %264 = vmatpush1.bf16.msra.mxu1 %v289_v16 }
  0x22   :  { %175 = vmatmul.mubr.bf16.vlgmr.msra.gmra.mxu0 %v290_v17  ;;  %185 = vmatmul.mubr.bf16.vlgmr.msra.gmra.mxu1 %v291_v18 }
  0xe2   :  { %v176_v26 = vpop.f32.mrf.mxu0  ;;  %v186_v28 = vpop.f32.mrf.mxu1 }
  0xe3   :  { %v177_v30 = vadd.f32 %v176_v26, %v43_v24  ;;  %v187_v31 = vadd.f32 %v186_v28, %v43_v24 }
  0xe4   :  { %v178_v32 = vpop.f32.mrf.mxu0  ;;  %v188_v34 = vpop.f32.mrf.mxu1 }
  0xe5   :  { %v203_v36 = vadd.f32 %v195_v27, %v177_v30  ;;  %v207_v37 = vadd.f32 %v199_v29, %v187_v31  ;;  %v179_v38 = vadd.f32 %v178_v32, %v47_v25  ;;  %v189_v39 = vadd.f32 %v188_v34, %v47_v25 }
  0xe6   :  { %v180_v40 = vpop.f32.mrf.mxu0  ;;  %v190_v41 = vpop.f32.mrf.mxu1 }
  0xe7   :  { %v211_v42 = vmax.f32 %v203_v36, 0.0  ;;  %v215_v43 = vmax.f32 %v207_v37, 0.0  ;;  %v204_v44 = vadd.f32 %v196_v33, %v179_v38  ;;  %v208_v45 = vadd.f32 %v200_v35, %v189_v39 }
  0xe8   :  { %v181_v48 = vadd.f32 %v180_v40, %v43_v24  ;;  %v191_v49 = vadd.f32 %v190_v41, %v43_v24  ;;  %v182_v50 = vpop.f32.mrf.mxu0  ;;  %v192_v52 = vpop.f32.mrf.mxu1 }
  0xe9   :  { %219 = vst [vmem:[%s427_s4] sm:$0xff] %v211_v42  ;;  %223 = vst [vmem:[%s427_s4 + $0x20] sm:$0xff] %v215_v43  ;;  %v212_v54 = vmax.f32 %v204_v44, 0.0  ;;  %v216_v55 = vmax.f32 %v208_v45, 0.0  ;;  %v183_v56 = vadd.f32 %v182_v50, %v47_v25  ;;  %v193_v57 = vadd.f32 %v192_v52, %v47_v25 }
  0xea   :  { %v205_v58 = vadd.f32 %v197_v46, %v181_v48  ;;  %v209_v59 = vadd.f32 %v201_v47, %v191_v49 }
  0xeb   :  { %220 = vst [vmem:[%s427_s4 + $0x8] sm:$0xff] %v212_v54  ;;  %224 = vst [vmem:[%s427_s4 + $0x28] sm:$0xff] %v216_v55  ;;  %v206_v60 = vadd.f32 %v198_v51, %v183_v56  ;;  %v210_v61 = vadd.f32 %v202_v53, %v193_v57 }
  0xec   :  { %v213_v62 = vmax.f32 %v205_v58, 0.0  ;;  %v217_v63 = vmax.f32 %v209_v59, 0.0 }
  0xed   :  { %v214_v0 = vmax.f32 %v206_v60, 0.0  ;;  %v218_v1 = vmax.f32 %v210_v61, 0.0 }
  0xee   :  { %221 = vst [vmem:[%s427_s4 + $0x10] sm:$0xff] %v213_v62  ;;  %225 = vst [vmem:[%s427_s4 + $0x30] sm:$0xff] %v217_v63 }
  0xef   :  { %222 = vst [vmem:[%s427_s4 + $0x18] sm:$0xff] %v214_v0  ;;  %226 = vst [vmem:[%s427_s4 + $0x38] sm:$0xff] %v218_v1 }

// kernel: _lambda_.28
= control target key start
LH: loop header
LB: loop body
LE: loop exit
PB: predicated region body
PF: predicated region fallthrough
CT: control target
= control target key end

     0   :  { %s1603_s1 = inlined_call_operand.vmem [shape: bf16[1152,128], index: 1, kind: input, shape index: {}]   ;;  %s1604_s0 = inlined_call_operand.vmem [shape: bf16[32,1152], index: 0, kind: input, shape index: {}]   ;;  %s1605_s2 = inlined_call_operand.vmem [shape: f32[1,128], index: 2, kind: input, shape index: {}]   ;;  %s1606_s3 = inlined_call_operand.vmem [shape: f32[32,128], index: 3, kind: output, shape index: {}]  }
   0x1   :  { %v1200_v0 = vld [vmem:[%s1603_s1 + $0x78] sm:$0xff]   ;;  %v1204_v4 = vld [vmem:[%s1603_s1 + $0x70] sm:$0xff]   ;;  %v1208_v8 = vld [vmem:[%s1603_s1 + $0x68] sm:$0xff]  }
   0x2   :  { %v1201_v1 = vld [vmem:[%s1603_s1 + $0x38] sm:$0xff]   ;;  %1058 = vmatprep.subr.bf16.mxu0 %v1200_v0  ;;  %v1205_v5 = vld [vmem:[%s1603_s1 + $0x30] sm:$0xff]   ;;  %v1209_v9 = vld [vmem:[%s1603_s1 + $0x28] sm:$0xff]  }
   0x3   :  { %v1202_v2 = vld [vmem:[%s1603_s1 + $0xf8] sm:$0xff]   ;;  %1059 = vmatpush3.bf16.msra.mxu0 %v1201_v1  ;;  %v1206_v6 = vld [vmem:[%s1603_s1 + $0xf0] sm:$0xff]   ;;  %v1210_v10 = vld [vmem:[%s1603_s1 + $0xe8] sm:$0xff]  }
   0x4   :  { %v1203_v3 = vld [vmem:[%s1603_s1 + $0xb8] sm:$0xff]   ;;  %1086 = vmatprep.subr.bf16.mxu1 %v1202_v2  ;;  %1060 = vmatprep.subr.bf16.mxu0 %v1204_v4  ;;  %v1207_v7 = vld [vmem:[%s1603_s1 + $0xb0] sm:$0xff]   ;;  %v1211_v11 = vld [vmem:[%s1603_s1 + $0xa8] sm:$0xff]  }
   0x5   :  { %1087 = vmatpush3.bf16.msra.mxu1 %v1203_v3  ;;  %v1212_v12 = vld [vmem:[%s1603_s1 + $0x60] sm:$0xff]   ;;  %v1216_v16 = vld [vmem:[%s1603_s1 + $0x58] sm:$0xff]   ;;  %v1220_v20 = vld [vmem:[%s1603_s1 + $0x50] sm:$0xff]  }
   0x6   :  { %1088 = vmatprep.subr.bf16.mxu1 %v1206_v6  ;;  %v1213_v13 = vld [vmem:[%s1603_s1 + $0x20] sm:$0xff]   ;;  %v1217_v17 = vld [vmem:[%s1603_s1 + $0x18] sm:$0xff]   ;;  %v1221_v21 = vld [vmem:[%s1603_s1 + $0x10] sm:$0xff]  }
   0x7   :  { %1061 = vmatpush3.bf16.msra.mxu0 %v1205_v5  ;;  %v1214_v14 = vld [vmem:[%s1603_s1 + $0xe0] sm:$0xff]   ;;  %v1218_v18 = vld [vmem:[%s1603_s1 + $0xd8] sm:$0xff]   ;;  %v1222_v22 = vld [vmem:[%s1603_s1 + $0xd0] sm:$0xff]  }
   0x8   :  { %1062 = vmatprep.subr.bf16.mxu0 %v1208_v8  ;;  %v1215_v15 = vld [vmem:[%s1603_s1 + $0xa0] sm:$0xff]   ;;  %v1219_v19 = vld [vmem:[%s1603_s1 + $0x98] sm:$0xff]   ;;  %v1223_v23 = vld [vmem:[%s1603_s1 + $0x90] sm:$0xff]  }
   0x9   :  { %1089 = vmatpush3.bf16.msra.mxu1 %v1207_v7  ;;  %v1224_v24 = vld [vmem:[%s1603_s1 + $0x48] sm:$0xff]   ;;  %v1228_v28 = vld [vmem:[%s1603_s1 + $0x40] sm:$0xff]   ;;  %v1235_v34 = vld [vmem:[%s1603_s1 + $0x178] sm:$0xff]  }
   0xa   :  { %1090 = vmatprep.subr.bf16.mxu1 %v1210_v10  ;;  %v1225_v25 = vld [vmem:[%s1603_s1 + $0x8] sm:$0xff]   ;;  %v1229_v29 = vld [vmem:[%s1603_s1] sm:$0xff]   ;;  %v1239_v37 = vld [vmem:[%s1603_s1 + $0x138] sm:$0xff]  }
   0xb   :  { %1063 = vmatpush3.bf16.msra.mxu0 %v1209_v9  ;;  %v1226_v26 = vld [vmem:[%s1603_s1 + $0xc8] sm:$0xff]   ;;  %v1230_v30 = vld [vmem:[%s1603_s1 + $0xc0] sm:$0xff]   ;;  %v1240_v38 = vld [vmem:[%s1603_s1 + $0x1f8] sm:$0xff]  }
   0xc   :  { %1064 = vmatprep.subr.bf16.mxu0 %v1212_v12  ;;  %v1227_v27 = vld [vmem:[%s1603_s1 + $0x88] sm:$0xff]   ;;  %v1231_v31 = vld [vmem:[%s1604_s0] ss:$36 sps:$4 sm:$0xff]   ;;  %v1241_v39 = vld [vmem:[%s1603_s1 + $0x1b8] sm:$0xff]  }
   0xd   :  { %1091 = vmatpush3.bf16.msra.mxu1 %v1211_v11  ;;  %v1233_v32 = vld [vmem:[%s1604_s0 + $0x4] ss:$36 sps:$4 sm:$0xff]   ;;  %v1238_v36 = vld [vmem:[%s1604_s0 + $0xc] ss:$36 sps:$4 sm:$0xff]   ;;  %v1254_v52 = vld [vmem:[%s1603_s1 + $0x158] sm:$0xff]  }
   0xe   :  { %1092 = vmatprep.subr.bf16.mxu1 %v1214_v14  ;;  %v1234_v33 = vld [vmem:[%s1603_s1 + $0x80] sm:$0xff]   ;;  %742 = vmatprep.mubr.bf16.mxu0 %v1233_v32  ;;  %v1236_v35 = vld [vmem:[%s1604_s0 + $0x8] ss:$36 sps:$4 sm:$0xff]   ;;  %v1242_v40 = vld [vmem:[%s1603_s1 + $0x170] sm:$0xff]  }
   0xf   :  { %1065 = vmatpush3.bf16.msra.mxu0 %v1213_v13  ;;  %791 = vmatprep.mubr.bf16.mxu1 %v1238_v36  ;;  %v1243_v41 = vld [vmem:[%s1603_s1 + $0x130] sm:$0xff]   ;;  %v1246_v44 = vld [vmem:[%s1603_s1 + $0x168] sm:$0xff]   ;;  %v1250_v48 = vld [vmem:[%s1603_s1 + $0x160] sm:$0xff]  }
  0x10   :  { %1066 = vmatprep.subr.bf16.mxu0 %v1216_v16  ;;  %v1244_v42 = vld [vmem:[%s1603_s1 + $0x1f0] sm:$0xff]   ;;  %v1247_v45 = vld [vmem:[%s1603_s1 + $0x128] sm:$0xff]   ;;  %v1251_v49 = vld [vmem:[%s1603_s1 + $0x120] sm:$0xff]  }
  0x11   :  { %1093 = vmatpush3.bf16.msra.mxu1 %v1215_v15  ;;  %v1245_v43 = vld [vmem:[%s1603_s1 + $0x1b0] sm:$0xff]   ;;  %v1248_v46 = vld [vmem:[%s1603_s1 + $0x1e8] sm:$0xff]   ;;  %v1252_v50 = vld [vmem:[%s1603_s1 + $0x1e0] sm:$0xff]  }
  0x12   :  { %1094 = vmatprep.subr.bf16.mxu1 %v1218_v18  ;;  %v1249_v47 = vld [vmem:[%s1603_s1 + $0x1a8] sm:$0xff]   ;;  %v1253_v51 = vld [vmem:[%s1603_s1 + $0x1a0] sm:$0xff]   ;;  %v1255_v53 = vld [vmem:[%s1603_s1 + $0x118] sm:$0xff]  }
  0x13   :  { %1067 = vmatpush3.bf16.msra.mxu0 %v1217_v17  ;;  %v1256_v54 = vld [vmem:[%s1604_s0 + $0x4c] ss:$36 sps:$4 sm:$0xff]   ;;  %v1258_v55 = vld [vmem:[%s1603_s1 + $0x1d8] sm:$0xff]   ;;  %v1272_v4 = vld [vmem:[%s1603_s1 + $0x140] sm:$0xff]  }
  0x14   :  { %1068 = vmatprep.subr.bf16.mxu0 %v1220_v20  ;;  %v1259_v56 = vld [vmem:[%s1604_s0 + $0x48] ss:$36 sps:$4 sm:$0xff]   ;;  %v1260_v57 = vld [vmem:[%s1603_s1 + $0x198] sm:$0xff]   ;;  %v1263_v59 = vld [vmem:[%s1603_s1 + $0x150] sm:$0xff]  }
  0x15   :  { %1095 = vmatpush3.bf16.msra.mxu1 %v1219_v19  ;;  %v1261_v58 = vld [vmem:[%s1604_s0 + $0x54] ss:$36 sps:$4 sm:$0xff]   ;;  %v1268_v0 = vld [vmem:[%s1603_s1 + $0x148] sm:$0xff]   ;;  %v1273_v5 = vld [vmem:[%s1603_s1 + $0x100] sm:$0xff]  }
  0x16   :  { %1096 = vmatprep.subr.bf16.mxu1 %v1222_v22  ;;  %v1264_v60 = vld [vmem:[%s1604_s0 + $0x50] ss:$36 sps:$4 sm:$0xff]   ;;  %v1269_v1 = vld [vmem:[%s1603_s1 + $0x108] sm:$0xff]   ;;  %v1274_v6 = vld [vmem:[%s1603_s1 + $0x1c0] sm:$0xff]  }
  0x17   :  { %1069 = vmatpush3.bf16.msra.mxu0 %v1221_v21  ;;  %v1265_v61 = vld [vmem:[%s1603_s1 + $0x110] sm:$0xff]   ;;  %v1270_v2 = vld [vmem:[%s1603_s1 + $0x1c8] sm:$0xff]   ;;  %v1278_v9 = vld [vmem:[%s1603_s1 + $0x180] sm:$0xff]  }
  0x18   :  { %1070 = vmatprep.subr.bf16.mxu0 %v1224_v24  ;;  %v1266_v62 = vld [vmem:[%s1603_s1 + $0x1d0] sm:$0xff]   ;;  %v1271_v3 = vld [vmem:[%s1603_s1 + $0x188] sm:$0xff]   ;;  %v1279_v10 = vld [vmem:[%s1603_s1 + $0x238] sm:$0xff]  }
  0x19   :  { %1097 = vmatpush3.bf16.msra.mxu1 %v1223_v23  ;;  %v1267_v63 = vld [vmem:[%s1603_s1 + $0x190] sm:$0xff]   ;;  %v1280_v11 = vld [vmem:[%s1604_s0 + $0x18] ss:$36 sps:$4 sm:$0xff]   ;;  %v1287_v16 = vld [vmem:[%s1603_s1 + $0x228] sm:$0xff]  }
  0x1a   :  { %1098 = vmatprep.subr.bf16.mxu1 %v1226_v26  ;;  %v1275_v7 = vld [vmem:[%s1604_s0 + $0x10] ss:$36 sps:$4 sm:$0xff]   ;;  %v1282_v12 = vld [vmem:[%s1604_s0 + $0x1c] ss:$36 sps:$4 sm:$0xff]   ;;  %v1288_v17 = vld [vmem:[%s1604_s0 + $0x64] ss:$36 sps:$4 sm:$0xff]  }
  0x1b   :  { %1071 = vmatpush3.bf16.msra.mxu0 %v1225_v25  ;;  %v1277_v8 = vld [vmem:[%s1604_s0 + $0x14] ss:$36 sps:$4 sm:$0xff]   ;;  %v1284_v14 = vld [vmem:[%s1604_s0 + $0x5c] ss:$36 sps:$4 sm:$0xff]   ;;  %v1294_v23 = vld [vmem:[%s1603_s1 + $0x208] sm:$0xff]  }
  0x1c   :  { %1072 = vmatprep.subr.bf16.mxu0 %v1228_v28  ;;  %v1283_v13 = vld [vmem:[%s1603_s1 + $0x230] sm:$0xff]   ;;  %v1286_v15 = vld [vmem:[%s1604_s0 + $0x58] ss:$36 sps:$4 sm:$0xff]   ;;  %v1290_v18 = vld [vmem:[%s1604_s0 + $0x60] ss:$36 sps:$4 sm:$0xff]  }
  0x1d   :  { %1099 = vmatpush3.bf16.msra.mxu1 %v1227_v27  ;;  %v1291_v19 = vld [vmem:[%s1603_s1 + $0x220] sm:$0xff]   ;;  %v1292_v20 = vld [vmem:[%s1603_s1 + $0x218] sm:$0xff]   ;;  %v1293_v22 = vld [vmem:[%s1603_s1 + $0x210] sm:$0xff]  }
  0x1e   :  { %1100 = vmatprep.subr.bf16.mxu1 %v1230_v30  ;;  %v1296_v21 = vld [vmem:[%s1604_s0 + $0x20] ss:$36 sps:$4 sm:$0xff]   ;;  %v1297_v25 = vld [vmem:[%s1604_s0 + $0x68] ss:$36 sps:$4 sm:$0xff]  }
  0x1f   :  { %1073 = vmatpush3.bf16.msra.mxu0 %v1229_v29  ;;  %v1295_v24 = vld [vmem:[%s1603_s1 + $0x200] sm:$0xff]  }
  0x20   :  { %1114 = vmatprep.subr.bf16.mxu0 %v1235_v34 }
  0x21   :  { %1101 = vmatpush3.bf16.msra.mxu1 %v1234_v33 }
  0x22   :  { %743 = vmatmul.mubr.bf16.vlgmr.msra.gmra.mxu0 %v1231_v31  ;;  %1142 = vmatprep.subr.bf16.mxu1 %v1240_v38 }
  0x23   :  { %1115 = vmatpush3.bf16.msra.mxu0 %v1239_v37  ;;  %750 = vmatprep.mubr.bf16.mxu0 %v1256_v54 }
  0x24   :  { %792 = vmatmul.mubr.bf16.vlgmr.msra.gmra.mxu1 %v1236_v35  ;;  %1116 = vmatprep.subr.bf16.mxu0 %v1242_v40 }
  0x25   :  { %1143 = vmatpush3.bf16.msra.mxu1 %v1241_v39  ;;  %799 = vmatprep.mubr.bf16.mxu1 %v1261_v58 }
  0x26   :  { %1144 = vmatprep.subr.bf16.mxu1 %v1244_v42 }
  0x27   :  { %1117 = vmatpush3.bf16.msra.mxu0 %v1243_v41 }
  0x28   :  { %1118 = vmatprep.subr.bf16.mxu0 %v1246_v44 }
  0x29   :  { %1145 = vmatpush3.bf16.msra.mxu1 %v1245_v43 }
  0x2a   :  { %1146 = vmatprep.subr.bf16.mxu1 %v1248_v46  ;;  %751 = vmatmul.mubr.bf16.gmra.mxu0 %v1259_v56 }
  0x2b   :  { %1119 = vmatpush3.bf16.msra.mxu0 %v1247_v45  ;;  %840 = vmatprep.mubr.bf16.mxu0 %v1277_v8 }
  0x2c   :  { %1120 = vmatprep.subr.bf16.mxu0 %v1250_v48  ;;  %800 = vmatmul.mubr.bf16.gmra.mxu1 %v1264_v60 }
  0x2d   :  { %1147 = vmatpush3.bf16.msra.mxu1 %v1249_v47  ;;  %889 = vmatprep.mubr.bf16.mxu1 %v1282_v12 }
  0x2e   :  { %1148 = vmatprep.subr.bf16.mxu1 %v1252_v50 }
  0x2f   :  { %1121 = vmatpush3.bf16.msra.mxu0 %v1251_v49 }
  0x30   :  { %1122 = vmatprep.subr.bf16.mxu0 %v1254_v52 }
  0x31   :  { %1149 = vmatpush3.bf16.msra.mxu1 %v1253_v51 }
  0x32   :  { %1150 = vmatprep.subr.bf16.mxu1 %v1258_v55  ;;  %v967_v55 = vld [vmem:[%s1605_s2] ss:$0 sm:$0xff] }
  0x33   :  { %1123 = vmatpush3.bf16.msra.mxu0 %v1255_v53 }
  0x34   :  { %1124 = vmatprep.subr.bf16.mxu0 %v1263_v59 }
  0x35   :  { %1151 = vmatpush3.bf16.msra.mxu1 %v1260_v57 }
  0x36   :  { %1152 = vmatprep.subr.bf16.mxu1 %v1266_v62 }
  0x37   :  { %1125 = vmatpush3.bf16.msra.mxu0 %v1265_v61 }
  0x38   :  { %1126 = vmatprep.subr.bf16.mxu0 %v1268_v0 }
  0x39   :  { %1153 = vmatpush3.bf16.msra.mxu1 %v1267_v63 }
  0x3a   :  { %1154 = vmatprep.subr.bf16.mxu1 %v1270_v2 }
  0x3b   :  { %1127 = vmatpush3.bf16.msra.mxu0 %v1269_v1 }
  0x3c   :  { %1128 = vmatprep.subr.bf16.mxu0 %v1272_v4 }
  0x3d   :  { %1155 = vmatpush3.bf16.msra.mxu1 %v1271_v3 }
  0x3e   :  { %1156 = vmatprep.subr.bf16.mxu1 %v1274_v6 }
  0x3f   :  { %1129 = vmatpush3.bf16.msra.mxu0 %v1273_v5 }
  0x40   :  { %1180 = vmatprep.subr.bf16.mxu0 %v1279_v10 }
  0x41   :  { %1157 = vmatpush3.bf16.msra.mxu1 %v1278_v9 }
  0x42   :  { %841 = vmatmul.mubr.bf16.vlgmr.msra.gmra.mxu0 %v1275_v7 }
  0x43   :  { %1181 = vmatpush3.bf16.msra.mxu0 %v1279_v10  ;;  %848 = vmatprep.mubr.bf16.mxu0 %v1284_v14 }
  0x44   :  { %890 = vmatmul.mubr.bf16.vlgmr.msra.gmra.mxu1 %v1280_v11  ;;  %1182 = vmatprep.subr.bf16.mxu0 %v1283_v13 }
  0x45   :  { %897 = vmatprep.mubr.bf16.mxu1 %v1288_v17 }
  0x47   :  { %1183 = vmatpush3.bf16.msra.mxu0 %v1283_v13 }
  0x48   :  { %1184 = vmatprep.subr.bf16.mxu0 %v1287_v16 }
  0x4a   :  { %849 = vmatmul.mubr.bf16.gmra.mxu0 %v1286_v15 }
  0x4b   :  { %1185 = vmatpush3.bf16.msra.mxu0 %v1287_v16  ;;  %1196 = vmatprep.mubr.bf16.mxu0 %v1296_v21 }
  0x4c   :  { %898 = vmatmul.mubr.bf16.gmra.mxu1 %v1290_v18  ;;  %1186 = vmatprep.subr.bf16.mxu0 %v1291_v19 }
  0x4f   :  { %1187 = vmatpush3.bf16.msra.mxu0 %v1291_v19 }
  0x50   :  { %1188 = vmatprep.subr.bf16.mxu0 %v1292_v20 }
  0x53   :  { %1189 = vmatpush3.bf16.msra.mxu0 %v1292_v20 }
  0x54   :  { %1190 = vmatprep.subr.bf16.mxu0 %v1293_v22 }
  0x57   :  { %1191 = vmatpush3.bf16.msra.mxu0 %v1293_v22 }
  0x58   :  { %1192 = vmatprep.subr.bf16.mxu0 %v1294_v23 }
  0x5b   :  { %1193 = vmatpush3.bf16.msra.mxu0 %v1294_v23 }
  0x5c   :  { %1194 = vmatprep.subr.bf16.mxu0 %v1295_v24 }
  0x5f   :  { %1195 = vmatpush3.bf16.msra.mxu0 %v1295_v24 }
  0x62   :  { %1197 = vmatmul.mubr.bf16.vlgmr.msra.gmra.mxu0 %v1297_v25 }
  0xe2   :  { %v1074_v26 = vpop.f32.mrf.mxu0 }
  0xe4   :  { %v1102_v27 = vpop.f32.mrf.mxu1  ;;  %v1075_v28 = vpop.f32.mrf.mxu0 }
  0xe5   :  { %v1076_v54 = vadd.f32 %v1075_v28, %v1074_v26 }
  0xe6   :  { %v1103_v29 = vpop.f32.mrf.mxu1  ;;  %v1077_v30 = vpop.f32.mrf.mxu0 }
  0xe7   :  { %v745_v61 = vadd.f32 %v1076_v54, %v967_v55  ;;  %v1104_v62 = vadd.f32 %v1103_v29, %v1102_v27 }
  0xe8   :  { %v1105_v31 = vpop.f32.mrf.mxu1  ;;  %v1078_v32 = vpop.f32.mrf.mxu0 }
  0xe9   :  { %v1079_v63 = vadd.f32 %v1078_v32, %v1077_v30  ;;  %v794_v7 = vadd.f32 %v1104_v62, %v745_v61 }
  0xea   :  { %v1080_v33 = vpop.f32.mrf.mxu0  ;;  %v1106_v34 = vpop.f32.mrf.mxu1 }
  0xeb   :  { %v748_v8 = vadd.f32 %v1079_v63, %v967_v55  ;;  %v1107_v9 = vadd.f32 %v1106_v34, %v1105_v31 }
  0xec   :  { %v1108_v35 = vpop.f32.mrf.mxu1  ;;  %v1081_v36 = vpop.f32.mrf.mxu0 }
  0xed   :  { %v1082_v53 = vadd.f32 %v1081_v36, %v1080_v33  ;;  %v797_v18 = vadd.f32 %v1107_v9, %v748_v8 }
  0xee   :  { %v1109_v37 = vpop.f32.mrf.mxu1  ;;  %v1083_v38 = vpop.f32.mrf.mxu0 }
  0xef   :  { %v753_v58 = vadd.f32 %v1082_v53, %v967_v55  ;;  %v1110_v59 = vadd.f32 %v1109_v37, %v1108_v35 }
  0xf0   :  { %v1111_v39 = vpop.f32.mrf.mxu1  ;;  %v1084_v40 = vpop.f32.mrf.mxu0 }
  0xf1   :  { %v1085_v60 = vadd.f32 %v1084_v40, %v1083_v38  ;;  %v802_v3 = vadd.f32 %v1110_v59, %v753_v58 }
  0xf2   :  { %v1112_v42 = vpop.f32.mrf.mxu1 }
  0xf3   :  { %v756_v4 = vadd.f32 %v1085_v60, %v967_v55  ;;  %v1113_v5 = vadd.f32 %v1112_v42, %v1111_v39 }
  0xf5   :  { %v805_v14 = vadd.f32 %v1113_v5, %v756_v4 }
 0x102   :  { %v1130_v41 = vpop.f32.mrf.mxu0 }
 0x104   :  { %v1131_v43 = vpop.f32.mrf.mxu0  ;;  %v1158_v44 = vpop.f32.mrf.mxu1 }
 0x105   :  { %v1132_v6 = vadd.f32 %v1131_v43, %v1130_v41 }
 0x106   :  { %v1133_v45 = vpop.f32.mrf.mxu0  ;;  %v1159_v46 = vpop.f32.mrf.mxu1 }
 0x107   :  { %v843_v15 = vadd.f32 %v1132_v6, %v794_v7  ;;  %v1160_v16 = vadd.f32 %v1159_v46, %v1158_v44 }
 0x108   :  { %v1134_v47 = vpop.f32.mrf.mxu0  ;;  %v1161_v48 = vpop.f32.mrf.mxu1 }
 0x109   :  { %v1135_v17 = vadd.f32 %v1134_v47, %v1133_v45  ;;  %v892_v26 = vadd.f32 %v1160_v16, %v843_v15 }
 0x10a   :  { %v1136_v49 = vpop.f32.mrf.mxu0  ;;  %v1162_v50 = vpop.f32.mrf.mxu1 }
 0x10b   :  { %v846_v23 = vadd.f32 %v1135_v17, %v797_v18  ;;  %v1163_v24 = vadd.f32 %v1162_v50, %v1161_v48 }
 0x10c   :  { %v1137_v51 = vpop.f32.mrf.mxu0  ;;  %v1164_v52 = vpop.f32.mrf.mxu1 }
 0x10d   :  { %v1138_v0 = vadd.f32 %v1137_v51, %v1136_v49  ;;  %v895_v34 = vadd.f32 %v1163_v24, %v846_v23 }
 0x10e   :  { %v1139_v56 = vpop.f32.mrf.mxu0  ;;  %v1165_v57 = vpop.f32.mrf.mxu1 }
 0x10f   :  { %v851_v10 = vadd.f32 %v1138_v0, %v802_v3  ;;  %v1166_v11 = vadd.f32 %v1165_v57, %v1164_v52 }
 0x110   :  { %v1140_v1 = vpop.f32.mrf.mxu0  ;;  %v1167_v2 = vpop.f32.mrf.mxu1 }
 0x111   :  { %v1141_v12 = vadd.f32 %v1140_v1, %v1139_v56  ;;  %v900_v21 = vadd.f32 %v1166_v11, %v851_v10 }
 0x112   :  { %v1168_v13 = vpop.f32.mrf.mxu1 }
 0x113   :  { %v854_v19 = vadd.f32 %v1141_v12, %v805_v14  ;;  %v1169_v20 = vadd.f32 %v1168_v13, %v1167_v2 }
 0x115   :  { %v903_v30 = vadd.f32 %v1169_v20, %v854_v19 }
 0x122   :  { %v1198_v22 = vpop.f32.mrf.mxu0 }
 0x123   :  { %v949_v25 = vadd.f32 %v1198_v22, %v900_v21 }
 0x124   :  { %v940_v27 = vpop.f32.mrf.mxu0 }
 0x125   :  { %v957_v28 = vmax.f32 %v949_v25, 0.0  ;;  %v941_v29 = vadd.f32 %v940_v27, %v892_v26 }
 0x126   :  { %v1199_v31 = vpop.f32.mrf.mxu0 }
 0x127   :  { %961 = vst [vmem:[%s1606_s3 + $0x10] sm:$0xff] %v957_v28  ;;  %v955_v32 = vmax.f32 %v941_v29, 0.0  ;;  %v952_v33 = vadd.f32 %v1199_v31, %v903_v30 }
 0x128   :  { %v943_v35 = vpop.f32.mrf.mxu0 }
 0x129   :  { %959 = vst [vmem:[%s1606_s3] sm:$0xff] %v955_v32  ;;  %v958_v36 = vmax.f32 %v952_v33, 0.0  ;;  %v944_v37 = vadd.f32 %v943_v35, %v895_v34 }
 0x12b   :  { %962 = vst [vmem:[%s1606_s3 + $0x18] sm:$0xff] %v958_v36  ;;  %v956_v38 = vmax.f32 %v944_v37, 0.0 }
 0x12d   :  { %960 = vst [vmem:[%s1606_s3 + $0x8] sm:$0xff] %v956_v38 }

// kernel: _lambda_.31
= control target key start
LH: loop header
LB: loop body
LE: loop exit
PB: predicated region body
PF: predicated region fallthrough
CT: control target
= control target key end

     0   :  { %s417_s1 = inlined_call_operand.vmem [shape: bf16[256,128], index: 1, kind: input, shape index: {}]   ;;  %s418_s0 = inlined_call_operand.vmem [shape: bf16[32,256], index: 0, kind: input, shape index: {}]   ;;  %s419_s2 = inlined_call_operand.vmem [shape: f32[1,128], index: 2, kind: input, shape index: {}]   ;;  %s420_s3 = inlined_call_operand.vmem [shape: f32[32,128], index: 3, kind: output, shape index: {}]  }
   0x1   :  { %v300_v0 = vld [vmem:[%s417_s1 + $0x78] sm:$0xff]   ;;  %v302_v2 = vld [vmem:[%s417_s1 + $0x70] sm:$0xff]   ;;  %v304_v4 = vld [vmem:[%s417_s1 + $0x68] sm:$0xff]  }
   0x2   :  { %v301_v1 = vld [vmem:[%s417_s1 + $0x38] sm:$0xff]   ;;  %256 = vmatprep.subr.bf16.mxu0 %v300_v0  ;;  %284 = vmatprep.subr.bf16.mxu1 %v300_v0  ;;  %v303_v3 = vld [vmem:[%s417_s1 + $0x30] sm:$0xff]   ;;  %v305_v5 = vld [vmem:[%s417_s1 + $0x28] sm:$0xff]  }
   0x3   :  { %257 = vmatpush3.bf16.msra.mxu0 %v301_v1  ;;  %292 = vmatpush3.bf16.msra.mxu1 %v301_v1  ;;  %v306_v6 = vld [vmem:[%s417_s1 + $0x60] sm:$0xff]   ;;  %v308_v8 = vld [vmem:[%s417_s1 + $0x58] sm:$0xff]   ;;  %v310_v10 = vld [vmem:[%s417_s1 + $0x50] sm:$0xff]  }
   0x4   :  { %258 = vmatprep.subr.bf16.mxu0 %v302_v2  ;;  %285 = vmatprep.subr.bf16.mxu1 %v302_v2  ;;  %v307_v7 = vld [vmem:[%s417_s1 + $0x20] sm:$0xff]   ;;  %v309_v9 = vld [vmem:[%s417_s1 + $0x18] sm:$0xff]   ;;  %v311_v13 = vld [vmem:[%s417_s1 + $0x10] sm:$0xff]  }
   0x5   :  { %v318_v11 = vld [vmem:[%s418_s0 + $0x4] ss:$8 sps:$4 sm:$0xff]   ;;  %v321_v12 = vld [vmem:[%s418_s0 + $0x14] ss:$8 sps:$4 sm:$0xff]   ;;  %v316_v18 = vld [vmem:[%s418_s0] ss:$8 sps:$4 sm:$0xff]  }
   0x6   :  { %v312_v14 = vld [vmem:[%s417_s1 + $0x48] sm:$0xff]   ;;  %206 = vmatprep.mubr.bf16.mxu0 %v318_v11  ;;  %214 = vmatprep.mubr.bf16.mxu1 %v321_v12  ;;  %v314_v16 = vld [vmem:[%s417_s1 + $0x40] sm:$0xff]   ;;  %v319_v19 = vld [vmem:[%s418_s0 + $0x10] ss:$8 sps:$4 sm:$0xff]  }
   0x7   :  { %259 = vmatpush3.bf16.msra.mxu0 %v303_v3  ;;  %293 = vmatpush3.bf16.msra.mxu1 %v303_v3  ;;  %v313_v15 = vld [vmem:[%s417_s1 + $0x8] sm:$0xff]   ;;  %v315_v17 = vld [vmem:[%s417_s1] sm:$0xff]  }
   0x8   :  { %260 = vmatprep.subr.bf16.mxu0 %v304_v4  ;;  %286 = vmatprep.subr.bf16.mxu1 %v304_v4  ;;  %v235_v22 = vld [vmem:[%s419_s2] ss:$0 sm:$0xff] }
   0xb   :  { %261 = vmatpush3.bf16.msra.mxu0 %v305_v5  ;;  %294 = vmatpush3.bf16.msra.mxu1 %v305_v5 }
   0xc   :  { %262 = vmatprep.subr.bf16.mxu0 %v306_v6  ;;  %287 = vmatprep.subr.bf16.mxu1 %v306_v6 }
   0xf   :  { %263 = vmatpush3.bf16.msra.mxu0 %v307_v7  ;;  %295 = vmatpush3.bf16.msra.mxu1 %v307_v7 }
  0x10   :  { %264 = vmatprep.subr.bf16.mxu0 %v308_v8  ;;  %288 = vmatprep.subr.bf16.mxu1 %v308_v8 }
  0x13   :  { %265 = vmatpush3.bf16.msra.mxu0 %v309_v9  ;;  %296 = vmatpush3.bf16.msra.mxu1 %v309_v9 }
  0x14   :  { %266 = vmatprep.subr.bf16.mxu0 %v310_v10  ;;  %289 = vmatprep.subr.bf16.mxu1 %v310_v10 }
  0x17   :  { %267 = vmatpush3.bf16.msra.mxu0 %v311_v13  ;;  %297 = vmatpush3.bf16.msra.mxu1 %v311_v13 }
  0x18   :  { %268 = vmatprep.subr.bf16.mxu0 %v312_v14  ;;  %290 = vmatprep.subr.bf16.mxu1 %v312_v14 }
  0x1b   :  { %269 = vmatpush3.bf16.msra.mxu0 %v313_v15  ;;  %298 = vmatpush3.bf16.msra.mxu1 %v313_v15 }
  0x1c   :  { %270 = vmatprep.subr.bf16.mxu0 %v314_v16  ;;  %291 = vmatprep.subr.bf16.mxu1 %v314_v16 }
  0x1f   :  { %271 = vmatpush3.bf16.msra.mxu0 %v315_v17  ;;  %299 = vmatpush3.bf16.msra.mxu1 %v315_v17 }
  0x22   :  { %207 = vmatmul.mubr.bf16.vlgmr.msra.gmra.mxu0 %v316_v18  ;;  %215 = vmatmul.mubr.bf16.vlgmr.msra.gmra.mxu1 %v319_v19 }
  0xe2   :  { %v272_v20 = vpop.f32.mrf.mxu0  ;;  %v278_v21 = vpop.f32.mrf.mxu1 }
  0xe4   :  { %v273_v23 = vpop.f32.mrf.mxu0  ;;  %v279_v24 = vpop.f32.mrf.mxu1 }
  0xe5   :  { %v274_v25 = vadd.f32 %v273_v23, %v272_v20  ;;  %v280_v26 = vadd.f32 %v279_v24, %v278_v21 }
  0xe6   :  { %v275_v27 = vpop.f32.mrf.mxu0  ;;  %v281_v28 = vpop.f32.mrf.mxu1 }
  0xe7   :  { %v209_v29 = vadd.f32 %v274_v25, %v235_v22  ;;  %v217_v30 = vadd.f32 %v280_v26, %v235_v22 }
  0xe8   :  { %v276_v31 = vpop.f32.mrf.mxu0  ;;  %v282_v32 = vpop.f32.mrf.mxu1 }
  0xe9   :  { %v223_v33 = vmax.f32 %v209_v29, 0.0  ;;  %v225_v34 = vmax.f32 %v217_v30, 0.0  ;;  %v277_v35 = vadd.f32 %v276_v31, %v275_v27  ;;  %v283_v36 = vadd.f32 %v282_v32, %v281_v28 }
  0xeb   :  { %227 = vst [vmem:[%s420_s3] sm:$0xff] %v223_v33  ;;  %229 = vst [vmem:[%s420_s3 + $0x10] sm:$0xff] %v225_v34  ;;  %v212_v37 = vadd.f32 %v277_v35, %v235_v22  ;;  %v220_v38 = vadd.f32 %v283_v36, %v235_v22 }
  0xed   :  { %v224_v39 = vmax.f32 %v212_v37, 0.0  ;;  %v226_v40 = vmax.f32 %v220_v38, 0.0 }
  0xef   :  { %228 = vst [vmem:[%s420_s3 + $0x8] sm:$0xff] %v224_v39  ;;  %230 = vst [vmem:[%s420_s3 + $0x18] sm:$0xff] %v226_v40 }

// kernel: _lambda_.33
= control target key start
LH: loop header
LB: loop body
LE: loop exit
PB: predicated region body
PF: predicated region fallthrough
CT: control target
= control target key end

     0   :  { %s960_s12 = smov 0   ;;  %s962_s13 = smov 0   ;;  %s1139_s0 = inlined_call_operand.vmem [shape: bf16[8,256], index: 0, kind: input, shape index: {}]   ;;  %s1140_s1 = inlined_call_operand.vmem [shape: bf16[256,512], index: 1, kind: input, shape index: {}]   ;;  %s1141_s2 = inlined_call_operand.vmem [shape: f32[1,512], index: 2, kind: input, shape index: {}]   ;;  %s1142_s3 = inlined_call_operand.vmem [shape: f32[8,512], index: 3, kind: output, shape index: {}]  }
   0x1   :  { %s964_s14 = smov 0   ;;  %s966_s15 = smov 0  }
   0x2   :  { %s968_s16 = smov 0  }
   0x3 LB: > { %s22_s17 = sadd.s32 1, %s934_s15  ;;  %p65_p1 = scmp.ne.s32.totalorder %s926_s13, %s922_s12  ;;  %s938_s16 = sphi %s968_s16, %s13_s16   ;;  %s934_s15 = sphi %s966_s15, %s1146_s15   ;;  %s930_s14 = sphi %s964_s14, %s1145_s14   ;;  %s926_s13 = sphi %s962_s13, %s1144_s13   ;;  %s922_s12 = sphi %s960_s12, %s1143_s12  }
   0x4   : > { %p23_p0 = scmp.ge.s32.totalorder %s22_s17, 2  ;;  %p66_p2 = scmp.eq.s32.totalorder %s938_s16, 0 }
   0x5   : > { %s58_s19 = sadd.s32 1, %s926_s13  ;;  %p764_p5 = scmp.ge.s32.totalorder %s938_s16, 2 }
   0x6   : > { %s1148_s17 = smov (%p23_p0, %s22_s17), 0  ;;  %p67_p3 = por %p66_p2, %p65_p1 }
   0x7   : > { %s55_s18 = ssub.s32 %s934_s15, %s1148_s17  ;;  %153 = sbr.rel (%p764_p5) target bundleno = 32 (0x20), region = 20 }
   0x8   : > { %p56_p4 = scmp.eq.s32.totalorder %s55_s18, 0 }
   0xa   : > { %s995_s20 = scalar_select %p56_p4, %s926_s13, %s58_s19  }
   0xc   : > { %156 = sbr.rel (!%p67_p3) target bundleno = 32 (0x20), region = 24  ;;  %s158_s21 = sand.u32 (%p67_p3), 1, %s926_s13  }
   0xd   : > { %s809_s22 = sshll.u32 (%p67_p3), %s934_s15, 3  ;;  %s765_s23 = sshll.u32 (%p67_p3), %s158_s21, 8 }
   0xe   : > { %s1003_s26 = scalar_lea.vmem (%p67_p3), %s1140_s1, %s809_s22  ;;  %s1008_s27 = scalar_lea.vmem (%p67_p3), [#allocation2], %s765_s23 }
   0xf   : > { %v254_v0 = vld [vmem:[%s1003_s26] sm:$0xff] (%p67_p3)  ;;  %v256_v1 = vld [vmem:[%s1003_s26 + $0x10] sm:$0xff] (%p67_p3) }
  0x10   : > { %v258_v2 = vld [vmem:[%s1003_s26 + $0x20] sm:$0xff] (%p67_p3)  ;;  %255 = vst [vmem:[%s1008_s27] sm:$0xff] (%p67_p3), %v254_v0  ;;  %257 = vst [vmem:[%s1008_s27 + $0x8] sm:$0xff] (%p67_p3), %v256_v1  ;;  %v260_v3 = vld [vmem:[%s1003_s26 + $0x30] sm:$0xff] (%p67_p3) }
  0x11   : > { %259 = vst [vmem:[%s1008_s27 + $0x10] sm:$0xff] %v258_v2  ;;  %v262_v4 = vld [vmem:[%s1003_s26 + $0x40] sm:$0xff]  ;;  %v264_v5 = vld [vmem:[%s1003_s26 + $0x50] sm:$0xff]  ;;  %261 = vst [vmem:[%s1008_s27 + $0x18] sm:$0xff] %v260_v3 }
  0x12   : > { %263 = vst [vmem:[%s1008_s27 + $0x20] sm:$0xff] %v262_v4  ;;  %265 = vst [vmem:[%s1008_s27 + $0x28] sm:$0xff] %v264_v5  ;;  %v266_v6 = vld [vmem:[%s1003_s26 + $0x60] sm:$0xff]  ;;  %v268_v7 = vld [vmem:[%s1003_s26 + $0x70] sm:$0xff] }
  0x13   : > { %v270_v8 = vld [vmem:[%s1003_s26 + $0x80] sm:$0xff]  ;;  %267 = vst [vmem:[%s1008_s27 + $0x30] sm:$0xff] %v266_v6  ;;  %269 = vst [vmem:[%s1008_s27 + $0x38] sm:$0xff] %v268_v7  ;;  %v272_v9 = vld [vmem:[%s1003_s26 + $0x90] sm:$0xff] }
  0x14   : > { %271 = vst [vmem:[%s1008_s27 + $0x40] sm:$0xff] %v270_v8  ;;  %v274_v10 = vld [vmem:[%s1003_s26 + $0xa0] sm:$0xff]  ;;  %v276_v11 = vld [vmem:[%s1003_s26 + $0xb0] sm:$0xff]  ;;  %273 = vst [vmem:[%s1008_s27 + $0x48] sm:$0xff] %v272_v9 }
  0x15   : > { %275 = vst [vmem:[%s1008_s27 + $0x50] sm:$0xff] %v274_v10  ;;  %277 = vst [vmem:[%s1008_s27 + $0x58] sm:$0xff] %v276_v11  ;;  %v278_v12 = vld [vmem:[%s1003_s26 + $0xc0] sm:$0xff]  ;;  %v280_v13 = vld [vmem:[%s1003_s26 + $0xd0] sm:$0xff] }
  0x16   : > { %v282_v14 = vld [vmem:[%s1003_s26 + $0xe0] sm:$0xff]  ;;  %279 = vst [vmem:[%s1008_s27 + $0x60] sm:$0xff] %v278_v12  ;;  %281 = vst [vmem:[%s1008_s27 + $0x68] sm:$0xff] %v280_v13  ;;  %v284_v15 = vld [vmem:[%s1003_s26 + $0xf0] sm:$0xff] }
  0x17   : > { %283 = vst [vmem:[%s1008_s27 + $0x70] sm:$0xff] %v282_v14  ;;  %v286_v16 = vld [vmem:[%s1003_s26 + $0x100] sm:$0xff]  ;;  %v288_v17 = vld [vmem:[%s1003_s26 + $0x110] sm:$0xff]  ;;  %285 = vst [vmem:[%s1008_s27 + $0x78] sm:$0xff] %v284_v15 }
  0x18   : > { %287 = vst [vmem:[%s1008_s27 + $0x80] sm:$0xff] %v286_v16  ;;  %289 = vst [vmem:[%s1008_s27 + $0x88] sm:$0xff] %v288_v17  ;;  %v290_v18 = vld [vmem:[%s1003_s26 + $0x120] sm:$0xff]  ;;  %v292_v19 = vld [vmem:[%s1003_s26 + $0x130] sm:$0xff] }
  0x19   : > { %v294_v20 = vld [vmem:[%s1003_s26 + $0x140] sm:$0xff]  ;;  %291 = vst [vmem:[%s1008_s27 + $0x90] sm:$0xff] %v290_v18  ;;  %293 = vst [vmem:[%s1008_s27 + $0x98] sm:$0xff] %v292_v19  ;;  %v296_v21 = vld [vmem:[%s1003_s26 + $0x150] sm:$0xff] }
  0x1a   : > { %295 = vst [vmem:[%s1008_s27 + $0xa0] sm:$0xff] %v294_v20  ;;  %v298_v22 = vld [vmem:[%s1003_s26 + $0x160] sm:$0xff]  ;;  %v300_v23 = vld [vmem:[%s1003_s26 + $0x170] sm:$0xff]  ;;  %297 = vst [vmem:[%s1008_s27 + $0xa8] sm:$0xff] %v296_v21 }
  0x1b   : > { %299 = vst [vmem:[%s1008_s27 + $0xb0] sm:$0xff] %v298_v22  ;;  %301 = vst [vmem:[%s1008_s27 + $0xb8] sm:$0xff] %v300_v23  ;;  %v302_v24 = vld [vmem:[%s1003_s26 + $0x180] sm:$0xff]  ;;  %v304_v25 = vld [vmem:[%s1003_s26 + $0x190] sm:$0xff] }
  0x1c   : > { %v306_v26 = vld [vmem:[%s1003_s26 + $0x1a0] sm:$0xff]  ;;  %303 = vst [vmem:[%s1008_s27 + $0xc0] sm:$0xff] %v302_v24  ;;  %305 = vst [vmem:[%s1008_s27 + $0xc8] sm:$0xff] %v304_v25  ;;  %v308_v27 = vld [vmem:[%s1003_s26 + $0x1b0] sm:$0xff] }
  0x1d   : > { %307 = vst [vmem:[%s1008_s27 + $0xd0] sm:$0xff] %v306_v26  ;;  %v310_v28 = vld [vmem:[%s1003_s26 + $0x1c0] sm:$0xff]  ;;  %v312_v29 = vld [vmem:[%s1003_s26 + $0x1d0] sm:$0xff]  ;;  %309 = vst [vmem:[%s1008_s27 + $0xd8] sm:$0xff] %v308_v27 }
  0x1e   : > { %311 = vst [vmem:[%s1008_s27 + $0xe0] sm:$0xff] %v310_v28  ;;  %313 = vst [vmem:[%s1008_s27 + $0xe8] sm:$0xff] %v312_v29  ;;  %v314_v30 = vld [vmem:[%s1003_s26 + $0x1e0] sm:$0xff]  ;;  %v316_v31 = vld [vmem:[%s1003_s26 + $0x1f0] sm:$0xff] }
  0x1f   : > { %315 = vst [vmem:[%s1008_s27 + $0xf0] sm:$0xff] %v314_v30  ;;  %317 = vst [vmem:[%s1008_s27 + $0xf8] sm:$0xff] %v316_v31 }
  0x20 PF: > { %p768_p6 = scmp.ge.s32.totalorder %s938_s16, 1  ;;  %p330_p7 = scmp.lt.s32.totalorder %s938_s16, 3 }
  0x22   : > { %p331_p8 = pnand %p768_p6, %p330_p7 }
  0x23   : > { %s337_s28 = sand.u32 (!%p331_p8), 1, %s922_s12   ;;  %s770_s6 = sshll.u32 (!%p331_p8), %s930_s14, 1 }
  0x24   : > { %334 = sbr.rel (%p331_p8) target bundleno = 305 (0x131), region = 66  ;;  %s769_s4 = sshll.u32 (!%p331_p8), %s337_s28, 8 }
  0x25   : > { %s1081_s5 = scalar_lea.vmem (!%p331_p8), [#allocation2], %s769_s4  ;;  %p380_p9 = scmp.lt.s32.totalorder (!%p331_p8), %s770_s6, 3 }
  0x29   : > { %v1077_v32 = vld [vmem:[%s1139_s0] sm:$0xff]  ;;  %v850_v34 = vld [vmem:[%s1081_s5 + $0x74] ss:$8 sps:$4 sm:$0xff]   ;;  %v852_v35 = vld [vmem:[%s1081_s5 + $0x70] ss:$8 sps:$4 sm:$0xff]   ;;  %v429_v3 = vlaneseq  ;;  %s1150_s6 = smov (!%p380_p9, %s770_s6), 3 }
  0x2a   : > { %v774_v33 = vcombine.high %v1077_v32, %v1077_v32  ;;  %606 = vmatprep.subr.bf16.mxu0 %v850_v34  ;;  %v853_v36 = vld [vmem:[%s1081_s5 + $0x64] ss:$8 sps:$4 sm:$0xff]   ;;  %v855_v37 = vld [vmem:[%s1081_s5 + $0x60] ss:$8 sps:$4 sm:$0xff]   ;;  %v856_v38 = vld [vmem:[%s1081_s5 + $0x54] ss:$8 sps:$4 sm:$0xff]   ;;  %v773_v2 = vcombine.low %v1077_v32, %v1077_v32  ;;  %s382_s9 = scalar_lea.vmem %s1141_s2, %s1150_s6 }
  0x2b   : > { %607 = vmatpush1.bf16.msra.mxu0 %v852_v35  ;;  %v858_v39 = vld [vmem:[%s1081_s5 + $0x50] ss:$8 sps:$4 sm:$0xff]   ;;  %v859_v40 = vld [vmem:[%s1081_s5 + $0x44] ss:$8 sps:$4 sm:$0xff]   ;;  %v861_v41 = vld [vmem:[%s1081_s5 + $0x40] ss:$8 sps:$4 sm:$0xff]  }
  0x2c   : > { %638 = vmatprep.mubr.bf16.mxu0 %v774_v33  ;;  %608 = vmatprep.subr.bf16.mxu0 %v853_v36  ;;  %v862_v42 = vld [vmem:[%s1081_s5 + $0x34] ss:$8 sps:$4 sm:$0xff]   ;;  %v864_v43 = vld [vmem:[%s1081_s5 + $0x30] ss:$8 sps:$4 sm:$0xff]   ;;  %v865_v44 = vld [vmem:[%s1081_s5 + $0x24] ss:$8 sps:$4 sm:$0xff]  }
  0x2d   : > { %v867_v45 = vld [vmem:[%s1081_s5 + $0x20] ss:$8 sps:$4 sm:$0xff]   ;;  %v868_v46 = vld [vmem:[%s1081_s5 + $0x14] ss:$8 sps:$4 sm:$0xff]   ;;  %v870_v47 = vld [vmem:[%s1081_s5 + $0x10] ss:$8 sps:$4 sm:$0xff]  }
  0x2e   : > { %v871_v48 = vld [vmem:[%s1081_s5 + $0x4] ss:$8 sps:$4 sm:$0xff]   ;;  %v873_v49 = vld [vmem:[%s1081_s5] ss:$8 sps:$4 sm:$0xff]   ;;  %v874_v50 = vld [vmem:[%s1081_s5 + $0xf4] ss:$8 sps:$4 sm:$0xff]  }
  0x2f   : > { %609 = vmatpush1.bf16.msra.mxu0 %v855_v37  ;;  %v876_v51 = vld [vmem:[%s1081_s5 + $0xf0] ss:$8 sps:$4 sm:$0xff]   ;;  %v877_v52 = vld [vmem:[%s1081_s5 + $0xe4] ss:$8 sps:$4 sm:$0xff]   ;;  %v879_v53 = vld [vmem:[%s1081_s5 + $0xe0] ss:$8 sps:$4 sm:$0xff]  }
  0x30   : > { %610 = vmatprep.subr.bf16.mxu0 %v856_v38  ;;  %v880_v54 = vld [vmem:[%s1081_s5 + $0xd4] ss:$8 sps:$4 sm:$0xff]   ;;  %v882_v55 = vld [vmem:[%s1081_s5 + $0xd0] ss:$8 sps:$4 sm:$0xff]   ;;  %v883_v56 = vld [vmem:[%s1081_s5 + $0xc4] ss:$8 sps:$4 sm:$0xff]  }
  0x31   : > { %v885_v57 = vld [vmem:[%s1081_s5 + $0xc0] ss:$8 sps:$4 sm:$0xff]   ;;  %v886_v58 = vld [vmem:[%s1081_s5 + $0xb4] ss:$8 sps:$4 sm:$0xff]   ;;  %v888_v59 = vld [vmem:[%s1081_s5 + $0xb0] ss:$8 sps:$4 sm:$0xff]  }
  0x32   : > { %v889_v60 = vld [vmem:[%s1081_s5 + $0xa4] ss:$8 sps:$4 sm:$0xff]   ;;  %v891_v61 = vld [vmem:[%s1081_s5 + $0xa0] ss:$8 sps:$4 sm:$0xff]   ;;  %v892_v62 = vld [vmem:[%s1081_s5 + $0x94] ss:$8 sps:$4 sm:$0xff]  }
  0x33   : > { %611 = vmatpush1.bf16.msra.mxu0 %v858_v39  ;;  %v894_v63 = vld [vmem:[%s1081_s5 + $0x90] ss:$8 sps:$4 sm:$0xff]   ;;  %v895_v0 = vld [vmem:[%s1081_s5 + $0x84] ss:$8 sps:$4 sm:$0xff]   ;;  %v897_v1 = vld [vmem:[%s1081_s5 + $0x80] ss:$8 sps:$4 sm:$0xff]  }
  0x34   : > { %612 = vmatprep.subr.bf16.mxu0 %v859_v40  ;;  %v430_v4 = vshrl.u32 %v429_v3, 7  ;;  %v427_v6 = vld [vmem:[%s382_s9] sm:$0x3]  ;;  %s772_s10 = sshll.u32 %s1150_s6, 3 }
  0x35   : > { %s392_s18 = scalar_lea.vmem %s1142_s3, %s772_s10 }
  0x36   : > { %v431_v5 = vsub.s32 0, %v430_v4  ;;  %v435_v7 = vsub.s32 1, %v430_v4 }
  0x37   : > { %613 = vmatpush1.bf16.msra.mxu0 %v861_v41 }
  0x38   : > { %614 = vmatprep.subr.bf16.mxu0 %v862_v42  ;;  %v432_v8 = vrot.slane %v427_v6, %v431_v5  ;;  %v436_v9 = vrot.slane %v427_v6, %v435_v7 }
  0x3b   : > { %615 = vmatpush1.bf16.msra.mxu0 %v864_v43 }
  0x3c   : > { %616 = vmatprep.subr.bf16.mxu0 %v865_v44 }
  0x3f   : > { %617 = vmatpush1.bf16.msra.mxu0 %v867_v45 }
  0x40   : > { %618 = vmatprep.subr.bf16.mxu0 %v868_v46 }
  0x43   : > { %619 = vmatpush1.bf16.msra.mxu0 %v870_v47 }
  0x44   : > { %620 = vmatprep.subr.bf16.mxu0 %v871_v48 }
  0x47   : > { %621 = vmatpush1.bf16.msra.mxu0 %v873_v49 }
  0x48   : > { %622 = vmatprep.subr.bf16.mxu0 %v874_v50 }
  0x4b   : > { %623 = vmatpush2.bf16.msra.mxu0 %v876_v51 }
  0x4c   : > { %624 = vmatprep.subr.bf16.mxu0 %v877_v52 }
  0x4f   : > { %625 = vmatpush2.bf16.msra.mxu0 %v879_v53 }
  0x50   : > { %626 = vmatprep.subr.bf16.mxu0 %v880_v54 }
  0x53   : > { %627 = vmatpush2.bf16.msra.mxu0 %v882_v55 }
  0x54   : > { %628 = vmatprep.subr.bf16.mxu0 %v883_v56 }
  0x57   : > { %629 = vmatpush2.bf16.msra.mxu0 %v885_v57 }
  0x58   : > { %630 = vmatprep.subr.bf16.mxu0 %v886_v58 }
  0x5b   : > { %631 = vmatpush2.bf16.msra.mxu0 %v888_v59 }
  0x5c   : > { %632 = vmatprep.subr.bf16.mxu0 %v889_v60 }
  0x5f   : > { %633 = vmatpush2.bf16.msra.mxu0 %v891_v61 }
  0x60   : > { %634 = vmatprep.subr.bf16.mxu0 %v892_v62 }
  0x63   : > { %635 = vmatpush2.bf16.msra.mxu0 %v894_v63 }
  0x64   : > { %636 = vmatprep.subr.bf16.mxu0 %v895_v0 }
  0x67   : > { %637 = vmatpush2.bf16.msra.mxu0 %v897_v1 }
  0x6a   : > { %639 = vmatmul.mubr.bf16.vlgmr.msra.gmra.mxu0 %v773_v2 }
 0x12a   : > { %v640_v10 = vpop.f32.mrf.mxu0 }
 0x12b   : > { %v641_v11 = vadd.f32 %v640_v10, %v432_v8 }
 0x12c   : > { %v642_v12 = vpop.f32.mrf.mxu0 }
 0x12d   : > { %647 = vst [vmem:[%s392_s18] sm:$0xff] %v641_v11  ;;  %v643_v13 = vadd.f32 %v642_v12, %v436_v9 }
 0x12e   : > { %v644_v14 = vpop.f32.mrf.mxu0 }
 0x12f   : > { %648 = vst [vmem:[%s392_s18 + $0x8] sm:$0xff] %v643_v13 }
 0x130   : > { %v645_v15 = vpop.f32.mrf.mxu0 }
 0x131 PF: > { %s13_s16 = sadd.s32 1, %s938_s16   ;;  %s1143_s12 = smov %s926_s13 }
 0x132   : > { %p10_p10 = scmp.ge.s32.totalorder %s13_s16, 4   ;;  %s1144_s13 = smov %s995_s20 }
 0x133   : > { %s1145_s14 = smov %s934_s15  ;;  %s1146_s15 = smov %s1148_s17 }
 0x134   :  { %12 = sbr.rel (!%p10_p10) target bundleno = 3 (0x3), region = 111 }

// kernel: _lambda_.35
= control target key start
LH: loop header
LB: loop body
LE: loop exit
PB: predicated region body
PF: predicated region fallthrough
CT: control target
= control target key end

     0   :  { %s285_s6 = smov 0   ;;  %s306_s0 = inlined_call_operand.vmem [shape: f32[2,4,512], index: 0, kind: input, shape index: {}]   ;;  %s307_s1 = inlined_call_operand.vmem [shape: f32[2,1,512], index: 1, kind: output, shape index: {}]  }
   0x1 LB: > { %s244_s7 = sadd.s32 4294967295, %s272_s6   ;;  %p248_p0 = scmp.ge.s32.totalorder %s272_s6, 1  ;;  %s272_s6 = sphi %s285_s6, %s11_s6  }
   0x2   : > { %p87_p1 = scmp.lt.s32.totalorder %s272_s6, 3 }
   0x4   : > { %p88_p2 = pnand %p248_p0, %p87_p1 }
   0x5   : > { %p106_p3 = scmp.lt.s32.totalorder (!%p88_p2), %s244_s7, 1 }
   0x6   : > { %91 = sbr.rel (%p88_p2) target bundleno = 41 (0x29), region = 24 }
   0xb   : > { %s309_s7 = smov (!%p106_p3, %s244_s7), 1  ;;  %vm123_vm0 = vcmask 1043456   ;;  %v274_v18 = vmov 1966171168   ;;  %v166_v20 = vlaneseq }
   0xc   : > { %s254_s8 = sshll.u32 %s309_s7, 4  ;;  %v164_v19 = vunpack.c.l.s4 %v274_v18  ;;  %s251_s12 = sshll.u32 %s309_s7, 2 }
   0xd   : > { %s110_s11 = scalar_lea.vmem %s306_s0, %s254_s8  ;;  %v167_v30 = vshrl.u32 %v166_v20, 7  ;;  %s114_s15 = scalar_lea.vmem %s307_s1, %s251_s12  ;;  %vm188_vm1 = vcmp.lt.s32.totalorder %v166_v20, 512 }
   0xe   : > { %v115_v0 = vld [vmem:[%s110_s11] sm:$0xff]  ;;  %v116_v1 = vld [vmem:[%s110_s11 + $0x8] sm:$0xff]  ;;  %v165_v29 = vunpack.c.0.s8 %v164_v19 }
   0xf   : > { %v119_v2 = vcombine.high %v115_v0, %v115_v0  ;;  %v120_v3 = vcombine.high %v116_v1, %v116_v1  ;;  %v124_v4 = vsel %vm123_vm0, %v115_v0, 0.0  ;;  %v138_v5 = vsel %vm123_vm0, %v116_v1, 0.0 }
  0x10   : > { %v125_v6 = vrot.slane %v124_v4, 4  ;;  %v139_v7 = vrot.slane %v138_v5, 4  ;;  %v168_v41 = vsub.s32 %v165_v29, %v167_v30 }
  0x11   : > { %v131_v8 = vsel %vm123_vm0, %v119_v2, 0.0  ;;  %v145_v9 = vsel %vm123_vm0, %v120_v3, 0.0 }
  0x12   : > { %v126_v10 = vadd.f32 %v125_v6, %v124_v4  ;;  %v132_v11 = vrot.slane %v131_v8, 4  ;;  %v140_v12 = vadd.f32 %v139_v7, %v138_v5  ;;  %v146_v13 = vrot.slane %v145_v9, 4 }
  0x14   : > { %v127_v14 = vrot.slane %v126_v10, 2  ;;  %v133_v15 = vadd.f32 %v132_v11, %v131_v8  ;;  %v141_v16 = vrot.slane %v140_v12, 2  ;;  %v147_v17 = vadd.f32 %v146_v13, %v145_v9 }
  0x16   : > { %v128_v21 = vadd.f32 %v127_v14, %v126_v10  ;;  %v134_v22 = vrot.slane %v133_v15, 2  ;;  %v142_v23 = vadd.f32 %v141_v16, %v140_v12  ;;  %v148_v24 = vrot.slane %v147_v17, 2 }
  0x18   : > { %v129_v25 = vrot.slane %v128_v21, 1  ;;  %v135_v26 = vadd.f32 %v134_v22, %v133_v15  ;;  %v143_v27 = vrot.slane %v142_v23, 1  ;;  %v149_v28 = vadd.f32 %v148_v24, %v147_v17 }
  0x1a   : > { %v130_v31 = vadd.f32 %v129_v25, %v128_v21  ;;  %v136_v32 = vrot.slane %v135_v26, 1  ;;  %v144_v33 = vadd.f32 %v143_v27, %v142_v23  ;;  %v150_v34 = vrot.slane %v149_v28, 1 }
  0x1c   : > { %v137_v35 = vadd.f32 %v136_v32, %v135_v26  ;;  %v151_v36 = vadd.f32 %v150_v34, %v149_v28  ;;  %v153_v37 = vmul.f32 0.25, %v130_v31  ;;  %v155_v38 = vmul.f32 0.25, %v144_v33 }
  0x1e   : > { %v154_v39 = vmul.f32 0.25, %v137_v35  ;;  %v156_v40 = vmul.f32 0.25, %v151_v36 }
  0x20   : > { %v161_v42 = vcombine.low %v153_v37, %v154_v39  ;;  %v162_v43 = vcombine.low %v155_v38, %v156_v40 }
  0x22   : > { %v169_v44 = vrot.slane %v161_v42, %v168_v41  ;;  %v176_v45 = vrot.slane %v162_v43, %v168_v41 }
  0x24   : > { %v177_v46 = vcombine.low %v169_v44, %v176_v45 }
  0x26   : > { %v184_v47 = vrot.slane %v177_v46, %v168_v41 }
  0x28   : > { %190 = vst.msk [vmem:[%s114_s15] sm:$0xf] %vm188_vm1, %v184_v47 }
  0x29 PF: > { %s11_s6 = sadd.s32 1, %s272_s6  }
  0x2a   : > { %p8_p4 = scmp.ge.s32.totalorder %s11_s6, 4  }
  0x2c   :  { %10 = sbr.rel (!%p8_p4) target bundleno = 1 (0x1), region = 54 }

// kernel: _lambda_.34
= control target key start
LH: loop header
LB: loop body
LE: loop exit
PB: predicated region body
PF: predicated region fallthrough
CT: control target
= control target key end

     0   :  { %s843_s15 = smov 0   ;;  %s845_s16 = smov 0   ;;  %s935_s0 = inlined_call_operand.vmem [shape: bf16[8,128], index: 0, kind: input, shape index: {}]   ;;  %s936_s1 = inlined_call_operand.vmem [shape: bf16[128,512], index: 1, kind: input, shape index: {}]   ;;  %s937_s2 = inlined_call_operand.vmem [shape: f32[1,512], index: 2, kind: input, shape index: {}]   ;;  %s938_s3 = inlined_call_operand.vmem [shape: f32[8,512], index: 3, kind: input, shape index: {}]   ;;  %s939_s4 = inlined_call_operand.vmem [shape: f32[8,512], index: 4, kind: output, shape index: {}]  }
   0x1   :  { %s847_s17 = smov 0   ;;  %s849_s18 = smov 0  }
   0x2   :  { %s851_s19 = smov 0  }
   0x3 LB: > { %s23_s20 = sadd.s32 1, %s811_s18  ;;  %p66_p1 = scmp.ne.s32.totalorder %s803_s16, %s799_s15  ;;  %s815_s19 = sphi %s851_s19, %s14_s19   ;;  %s811_s18 = sphi %s849_s18, %s943_s18   ;;  %s807_s17 = sphi %s847_s17, %s942_s17   ;;  %s803_s16 = sphi %s845_s16, %s941_s16   ;;  %s799_s15 = sphi %s843_s15, %s940_s15  }
   0x4   : > { %p24_p0 = scmp.ge.s32.totalorder %s23_s20, 2  ;;  %p67_p2 = scmp.eq.s32.totalorder %s815_s19, 0 }
   0x5   : > { %s59_s22 = sadd.s32 1, %s803_s16  ;;  %p682_p5 = scmp.ge.s32.totalorder %s815_s19, 2 }
   0x6   : > { %s945_s20 = smov (%p24_p0, %s23_s20), 0  ;;  %p68_p3 = por %p67_p2, %p66_p1 }
   0x7   : > { %s56_s21 = ssub.s32 %s811_s18, %s945_s20  ;;  %181 = sbr.rel (%p682_p5) target bundleno = 24 (0x18), region = 20 }
   0x8   : > { %p57_p4 = scmp.eq.s32.totalorder %s56_s21, 0 }
   0xa   : > { %s878_s23 = scalar_select %p57_p4, %s803_s16, %s59_s22  }
   0xc   : > { %184 = sbr.rel (!%p68_p3) target bundleno = 24 (0x18), region = 24  ;;  %s186_s24 = sand.u32 (%p68_p3), 1, %s803_s16  }
   0xd   : > { %s711_s25 = sshll.u32 (%p68_p3), %s811_s18, 3  ;;  %s683_s26 = sshll.u32 (%p68_p3), %s186_s24, 7 }
   0xe   : > { %s886_s29 = scalar_lea.vmem (%p68_p3), %s936_s1, %s711_s25  ;;  %s188_s30 = scalar_lea.vmem (%p68_p3), [#allocation2], %s683_s26 }
   0xf   : > { %v250_v0 = vld [vmem:[%s886_s29] sm:$0xff] (%p68_p3)  ;;  %v252_v1 = vld [vmem:[%s886_s29 + $0x10] sm:$0xff] (%p68_p3) }
  0x10   : > { %v254_v2 = vld [vmem:[%s886_s29 + $0x20] sm:$0xff] (%p68_p3)  ;;  %251 = vst [vmem:[%s188_s30] sm:$0xff] (%p68_p3), %v250_v0  ;;  %253 = vst [vmem:[%s188_s30 + $0x8] sm:$0xff] (%p68_p3), %v252_v1  ;;  %v256_v3 = vld [vmem:[%s886_s29 + $0x30] sm:$0xff] (%p68_p3) }
  0x11   : > { %255 = vst [vmem:[%s188_s30 + $0x10] sm:$0xff] %v254_v2  ;;  %v258_v4 = vld [vmem:[%s886_s29 + $0x40] sm:$0xff]  ;;  %v260_v5 = vld [vmem:[%s886_s29 + $0x50] sm:$0xff]  ;;  %257 = vst [vmem:[%s188_s30 + $0x18] sm:$0xff] %v256_v3 }
  0x12   : > { %259 = vst [vmem:[%s188_s30 + $0x20] sm:$0xff] %v258_v4  ;;  %261 = vst [vmem:[%s188_s30 + $0x28] sm:$0xff] %v260_v5  ;;  %v262_v6 = vld [vmem:[%s886_s29 + $0x60] sm:$0xff]  ;;  %v264_v7 = vld [vmem:[%s886_s29 + $0x70] sm:$0xff] }
  0x13   : > { %v266_v8 = vld [vmem:[%s886_s29 + $0x80] sm:$0xff]  ;;  %263 = vst [vmem:[%s188_s30 + $0x30] sm:$0xff] %v262_v6  ;;  %265 = vst [vmem:[%s188_s30 + $0x38] sm:$0xff] %v264_v7  ;;  %v268_v9 = vld [vmem:[%s886_s29 + $0x90] sm:$0xff] }
  0x14   : > { %267 = vst [vmem:[%s188_s30 + $0x40] sm:$0xff] %v266_v8  ;;  %v270_v10 = vld [vmem:[%s886_s29 + $0xa0] sm:$0xff]  ;;  %v272_v11 = vld [vmem:[%s886_s29 + $0xb0] sm:$0xff]  ;;  %269 = vst [vmem:[%s188_s30 + $0x48] sm:$0xff] %v268_v9 }
  0x15   : > { %271 = vst [vmem:[%s188_s30 + $0x50] sm:$0xff] %v270_v10  ;;  %273 = vst [vmem:[%s188_s30 + $0x58] sm:$0xff] %v272_v11  ;;  %v274_v12 = vld [vmem:[%s886_s29 + $0xc0] sm:$0xff]  ;;  %v276_v13 = vld [vmem:[%s886_s29 + $0xd0] sm:$0xff] }
  0x16   : > { %v278_v14 = vld [vmem:[%s886_s29 + $0xe0] sm:$0xff]  ;;  %275 = vst [vmem:[%s188_s30 + $0x60] sm:$0xff] %v274_v12  ;;  %277 = vst [vmem:[%s188_s30 + $0x68] sm:$0xff] %v276_v13  ;;  %v280_v15 = vld [vmem:[%s886_s29 + $0xf0] sm:$0xff] }
  0x17   : > { %279 = vst [vmem:[%s188_s30 + $0x70] sm:$0xff] %v278_v14  ;;  %281 = vst [vmem:[%s188_s30 + $0x78] sm:$0xff] %v280_v15 }
  0x18 PF: > { %p686_p6 = scmp.ge.s32.totalorder %s815_s19, 1  ;;  %p307_p7 = scmp.lt.s32.totalorder %s815_s19, 3 }
  0x1a   : > { %p308_p8 = pnand %p686_p6, %p307_p7 }
  0x1b   : > { %s314_s5 = sand.u32 (!%p308_p8), 1, %s799_s15   ;;  %s688_s10 = sshll.u32 (!%p308_p8), %s807_s17, 1 }
  0x1c   : > { %311 = sbr.rel (%p308_p8) target bundleno = 268 (0x10c), region = 70  ;;  %s687_s6 = sshll.u32 (!%p308_p8), %s314_s5, 7 }
  0x1d   : > { %s316_s7 = scalar_lea.vmem (!%p308_p8), [#allocation2], %s687_s6  ;;  %p366_p9 = scmp.lt.s32.totalorder (!%p308_p8), %s688_s10, 3 }
  0x21   : > { %v817_v16 = vmov 0   ;;  %v753_v17 = vld [vmem:[%s316_s7 + $0x74] ss:$8 sps:$4 sm:$0xff]   ;;  %v755_v18 = vld [vmem:[%s316_s7 + $0x70] ss:$8 sps:$4 sm:$0xff]   ;;  %v410_v34 = vlaneseq  ;;  %s947_s10 = smov (!%p366_p9, %s688_s10), 3 }
  0x22   : > { %532 = vmatprep.mubr.bf16.mxu0 %v817_v16  ;;  %500 = vmatprep.subr.bf16.mxu0 %v753_v17  ;;  %v756_v19 = vld [vmem:[%s316_s7 + $0x64] ss:$8 sps:$4 sm:$0xff]   ;;  %v758_v20 = vld [vmem:[%s316_s7 + $0x60] ss:$8 sps:$4 sm:$0xff]   ;;  %v759_v21 = vld [vmem:[%s316_s7 + $0x54] ss:$8 sps:$4 sm:$0xff]   ;;  %s368_s13 = scalar_lea.vmem %s937_s2, %s947_s10 }
  0x23   : > { %501 = vmatpush1.bf16.msra.mxu0 %v755_v18  ;;  %v761_v22 = vld [vmem:[%s316_s7 + $0x50] ss:$8 sps:$4 sm:$0xff]   ;;  %v762_v23 = vld [vmem:[%s316_s7 + $0x44] ss:$8 sps:$4 sm:$0xff]   ;;  %v764_v24 = vld [vmem:[%s316_s7 + $0x40] ss:$8 sps:$4 sm:$0xff]  }
  0x24   : > { %502 = vmatprep.subr.bf16.mxu0 %v756_v19  ;;  %v765_v25 = vld [vmem:[%s316_s7 + $0x34] ss:$8 sps:$4 sm:$0xff]   ;;  %v767_v26 = vld [vmem:[%s316_s7 + $0x30] ss:$8 sps:$4 sm:$0xff]   ;;  %v768_v27 = vld [vmem:[%s316_s7 + $0x24] ss:$8 sps:$4 sm:$0xff]  }
  0x25   : > { %v770_v28 = vld [vmem:[%s316_s7 + $0x20] ss:$8 sps:$4 sm:$0xff]   ;;  %v771_v29 = vld [vmem:[%s316_s7 + $0x14] ss:$8 sps:$4 sm:$0xff]   ;;  %v773_v30 = vld [vmem:[%s316_s7 + $0x10] ss:$8 sps:$4 sm:$0xff]  }
  0x26   : > { %v774_v31 = vld [vmem:[%s316_s7 + $0x4] ss:$8 sps:$4 sm:$0xff]   ;;  %v776_v32 = vld [vmem:[%s316_s7] ss:$8 sps:$4 sm:$0xff]   ;;  %v411_v35 = vshrl.u32 %v410_v34, 7  ;;  %s690_s14 = sshll.u32 %s947_s10, 3 }
  0x27   : > { %503 = vmatpush1.bf16.msra.mxu0 %v758_v20  ;;  %v391_v33 = vld [vmem:[%s935_s0] sm:$0xf]  ;;  %s378_s22 = scalar_lea.vmem %s938_s3, %s690_s14  ;;  %s388_s25 = scalar_lea.vmem %s939_s4, %s690_s14 }
  0x28   : > { %504 = vmatprep.subr.bf16.mxu0 %v759_v21  ;;  %v412_v36 = vsub.s32 0, %v411_v35  ;;  %v408_v37 = vld [vmem:[%s368_s13] sm:$0x3]  ;;  %v416_v38 = vsub.s32 1, %v411_v35  ;;  %v542_v45 = vld [vmem:[%s378_s22 + $0x8] sm:$0xff] }
  0x29   : > { %v541_v42 = vld [vmem:[%s378_s22] sm:$0xff] }
  0x2a   : > { %v413_v39 = vrot.slane %v408_v37, %v412_v36  ;;  %v417_v40 = vrot.slane %v408_v37, %v416_v38 }
  0x2b   : > { %505 = vmatpush1.bf16.msra.mxu0 %v761_v22 }
  0x2c   : > { %506 = vmatprep.subr.bf16.mxu0 %v762_v23 }
  0x2f   : > { %507 = vmatpush1.bf16.msra.mxu0 %v764_v24 }
  0x30   : > { %508 = vmatprep.subr.bf16.mxu0 %v765_v25 }
  0x33   : > { %509 = vmatpush1.bf16.msra.mxu0 %v767_v26 }
  0x34   : > { %510 = vmatprep.subr.bf16.mxu0 %v768_v27 }
  0x37   : > { %511 = vmatpush1.bf16.msra.mxu0 %v770_v28 }
  0x38   : > { %512 = vmatprep.subr.bf16.mxu0 %v771_v29 }
  0x3b   : > { %513 = vmatpush1.bf16.msra.mxu0 %v773_v30 }
  0x3c   : > { %514 = vmatprep.subr.bf16.mxu0 %v774_v31 }
  0x3f   : > { %515 = vmatpush1.bf16.msra.mxu0 %v776_v32 }
  0x42   : > { %533 = vmatmul.mubr.bf16.vlgmr.msra.gmra.mxu0 %v391_v33 }
 0x102   : > { %v534_v41 = vpop.f32.mrf.mxu0 }
 0x103   : > { %v535_v43 = vadd.f32 %v534_v41, %v413_v39 }
 0x104   : > { %v536_v44 = vpop.f32.mrf.mxu0 }
 0x105   : > { %v543_v46 = vadd.f32 %v541_v42, %v535_v43  ;;  %v537_v47 = vadd.f32 %v536_v44, %v417_v40 }
 0x106   : > { %v538_v48 = vpop.f32.mrf.mxu0 }
 0x107   : > { %v545_v49 = vmax.f32 %v543_v46, 0.0  ;;  %v544_v50 = vadd.f32 %v542_v45, %v537_v47 }
 0x108   : > { %v539_v51 = vpop.f32.mrf.mxu0 }
 0x109   : > { %547 = vst [vmem:[%s388_s25] sm:$0xff] %v545_v49  ;;  %v546_v52 = vmax.f32 %v544_v50, 0.0 }
 0x10b   : > { %548 = vst [vmem:[%s388_s25 + $0x8] sm:$0xff] %v546_v52 }
 0x10c PF: > { %s14_s19 = sadd.s32 1, %s815_s19   ;;  %s940_s15 = smov %s803_s16 }
 0x10d   : > { %p11_p10 = scmp.ge.s32.totalorder %s14_s19, 4   ;;  %s941_s16 = smov %s878_s23 }
 0x10e   : > { %s942_s17 = smov %s811_s18  ;;  %s943_s18 = smov %s945_s20 }
 0x10f   :  { %13 = sbr.rel (!%p11_p10) target bundleno = 3 (0x3), region = 118 }

// kernel: _lambda_.32
= control target key start
LH: loop header
LB: loop body
LE: loop exit
PB: predicated region body
PF: predicated region fallthrough
CT: control target
= control target key end

     0   :  { %vm1124_vm0 = vmmov 0   ;;  %s1382_s1 = inlined_call_operand.vmem [shape: bf16[1152,128], index: 1, kind: input, shape index: {}]   ;;  %s1383_s0 = inlined_call_operand.vmem [shape: bf16[8,1152], index: 0, kind: input, shape index: {}]   ;;  %s1384_s2 = inlined_call_operand.vmem [shape: f32[1,128], index: 2, kind: input, shape index: {}]   ;;  %s1385_s3 = inlined_call_operand.vmem [shape: f32[8,128], index: 3, kind: output, shape index: {}]  }
   0x1   :  { %v1042_v0 = vld [vmem:[%s1382_s1 + $0x78] sm:$0xff]   ;;  %v1046_v4 = vld [vmem:[%s1382_s1 + $0x70] sm:$0xff]   ;;  %v1050_v8 = vld [vmem:[%s1382_s1 + $0x68] sm:$0xff]  }
   0x2   :  { %v1043_v1 = vld [vmem:[%s1382_s1 + $0x38] sm:$0xff]   ;;  %923 = vmatprep.subr.bf16.mxu0 %v1042_v0  ;;  %v1047_v5 = vld [vmem:[%s1382_s1 + $0x30] sm:$0xff]   ;;  %v1051_v9 = vld [vmem:[%s1382_s1 + $0x28] sm:$0xff]  }
   0x3   :  { %v1044_v2 = vld [vmem:[%s1382_s1 + $0xf8] sm:$0xff]   ;;  %924 = vmatpush3.bf16.msra.mxu0 %v1043_v1  ;;  %v1048_v6 = vld [vmem:[%s1382_s1 + $0xf0] sm:$0xff]   ;;  %v1052_v10 = vld [vmem:[%s1382_s1 + $0xe8] sm:$0xff]  }
   0x4   :  { %v1045_v3 = vld [vmem:[%s1382_s1 + $0xb8] sm:$0xff]   ;;  %945 = vmatprep.subr.bf16.mxu1 %v1044_v2  ;;  %925 = vmatprep.subr.bf16.mxu0 %v1046_v4  ;;  %v1049_v7 = vld [vmem:[%s1382_s1 + $0xb0] sm:$0xff]   ;;  %v1053_v11 = vld [vmem:[%s1382_s1 + $0xa8] sm:$0xff]  }
   0x5   :  { %946 = vmatpush3.bf16.msra.mxu1 %v1045_v3  ;;  %v1054_v12 = vld [vmem:[%s1382_s1 + $0x60] sm:$0xff]   ;;  %v1058_v16 = vld [vmem:[%s1382_s1 + $0x58] sm:$0xff]   ;;  %v1062_v20 = vld [vmem:[%s1382_s1 + $0x50] sm:$0xff]  }
   0x6   :  { %947 = vmatprep.subr.bf16.mxu1 %v1048_v6  ;;  %v1055_v13 = vld [vmem:[%s1382_s1 + $0x20] sm:$0xff]   ;;  %v1059_v17 = vld [vmem:[%s1382_s1 + $0x18] sm:$0xff]   ;;  %v1063_v21 = vld [vmem:[%s1382_s1 + $0x10] sm:$0xff]  }
   0x7   :  { %926 = vmatpush3.bf16.msra.mxu0 %v1047_v5  ;;  %v1056_v14 = vld [vmem:[%s1382_s1 + $0xe0] sm:$0xff]   ;;  %v1060_v18 = vld [vmem:[%s1382_s1 + $0xd8] sm:$0xff]   ;;  %v1064_v22 = vld [vmem:[%s1382_s1 + $0xd0] sm:$0xff]  }
   0x8   :  { %927 = vmatprep.subr.bf16.mxu0 %v1050_v8  ;;  %v1057_v15 = vld [vmem:[%s1382_s1 + $0xa0] sm:$0xff]   ;;  %v1061_v19 = vld [vmem:[%s1382_s1 + $0x98] sm:$0xff]   ;;  %v1065_v23 = vld [vmem:[%s1382_s1 + $0x90] sm:$0xff]  }
   0x9   :  { %948 = vmatpush3.bf16.msra.mxu1 %v1049_v7  ;;  %v1066_v24 = vld [vmem:[%s1382_s1 + $0x48] sm:$0xff]   ;;  %v1070_v28 = vld [vmem:[%s1382_s1 + $0x40] sm:$0xff]   ;;  %v1076_v35 = vld [vmem:[%s1382_s1 + $0x178] sm:$0xff]  }
   0xa   :  { %949 = vmatprep.subr.bf16.mxu1 %v1052_v10  ;;  %v1067_v25 = vld [vmem:[%s1382_s1 + $0x8] sm:$0xff]   ;;  %v1071_v29 = vld [vmem:[%s1382_s1] sm:$0xff]   ;;  %v1079_v39 = vld [vmem:[%s1382_s1 + $0x138] sm:$0xff]  }
   0xb   :  { %928 = vmatpush3.bf16.msra.mxu0 %v1051_v9  ;;  %v1068_v26 = vld [vmem:[%s1382_s1 + $0xc8] sm:$0xff]   ;;  %v1072_v30 = vld [vmem:[%s1382_s1 + $0xc0] sm:$0xff]   ;;  %v1080_v40 = vld [vmem:[%s1382_s1 + $0x1f8] sm:$0xff]   ;;  %v1123_v9 = vmov 0.0  }
   0xc   :  { %929 = vmatprep.subr.bf16.mxu0 %v1054_v12  ;;  %v1069_v27 = vld [vmem:[%s1382_s1 + $0x88] sm:$0xff]   ;;  %v15_v31 = vld [vmem:[%s1383_s0] sm:$0xff]  ;;  %v1081_v41 = vld [vmem:[%s1382_s1 + $0x1b8] sm:$0xff]  }
   0xd   :  { %950 = vmatpush3.bf16.msra.mxu1 %v1053_v11  ;;  %v842_v32 = vcombine.low %v15_v31, %v15_v31  ;;  %v843_v33 = vcombine.high %v15_v31, %v15_v31  ;;  %v1075_v34 = vld [vmem:[%s1382_s1 + $0x80] sm:$0xff]   ;;  %v16_v36 = vld [vmem:[%s1383_s0 + $0x8] sm:$0xff]  ;;  %v1082_v42 = vld [vmem:[%s1382_s1 + $0x170] sm:$0xff]  }
   0xe   :  { %951 = vmatprep.subr.bf16.mxu1 %v1056_v14  ;;  %v844_v37 = vcombine.low %v16_v36, %v16_v36  ;;  %v845_v38 = vcombine.high %v16_v36, %v16_v36  ;;  %v1083_v43 = vld [vmem:[%s1382_s1 + $0x130] sm:$0xff]   ;;  %v1086_v46 = vld [vmem:[%s1382_s1 + $0x168] sm:$0xff]   ;;  %v1090_v50 = vld [vmem:[%s1382_s1 + $0x160] sm:$0xff]  }
   0xf   :  { %930 = vmatpush3.bf16.msra.mxu0 %v1055_v13  ;;  %667 = vmatprep.mubr.bf16.mxu0 %v843_v33  ;;  %v1084_v44 = vld [vmem:[%s1382_s1 + $0x1f0] sm:$0xff]   ;;  %v1087_v47 = vld [vmem:[%s1382_s1 + $0x128] sm:$0xff]   ;;  %v1091_v51 = vld [vmem:[%s1382_s1 + $0x120] sm:$0xff]  }
  0x10   :  { %931 = vmatprep.subr.bf16.mxu0 %v1058_v16  ;;  %707 = vmatprep.mubr.bf16.mxu1 %v845_v38  ;;  %v1085_v45 = vld [vmem:[%s1382_s1 + $0x1b0] sm:$0xff]   ;;  %v1088_v48 = vld [vmem:[%s1382_s1 + $0x1e8] sm:$0xff]   ;;  %v1092_v52 = vld [vmem:[%s1382_s1 + $0x1e0] sm:$0xff]  }
  0x11   :  { %952 = vmatpush3.bf16.msra.mxu1 %v1057_v15  ;;  %v1089_v49 = vld [vmem:[%s1382_s1 + $0x1a8] sm:$0xff]   ;;  %v1093_v53 = vld [vmem:[%s1382_s1 + $0x1a0] sm:$0xff]   ;;  %v1094_v54 = vld [vmem:[%s1382_s1 + $0x158] sm:$0xff]  }
  0x12   :  { %953 = vmatprep.subr.bf16.mxu1 %v1060_v18  ;;  %v1095_v55 = vld [vmem:[%s1382_s1 + $0x118] sm:$0xff]   ;;  %v1098_v58 = vld [vmem:[%s1382_s1 + $0x150] sm:$0xff]   ;;  %v1102_v62 = vld [vmem:[%s1382_s1 + $0x148] sm:$0xff]  }
  0x13   :  { %932 = vmatpush3.bf16.msra.mxu0 %v1059_v17  ;;  %v1096_v56 = vld [vmem:[%s1382_s1 + $0x1d8] sm:$0xff]   ;;  %v1099_v59 = vld [vmem:[%s1382_s1 + $0x110] sm:$0xff]   ;;  %v1103_v63 = vld [vmem:[%s1382_s1 + $0x108] sm:$0xff]  }
  0x14   :  { %933 = vmatprep.subr.bf16.mxu0 %v1062_v20  ;;  %v1097_v57 = vld [vmem:[%s1382_s1 + $0x198] sm:$0xff]   ;;  %v1100_v60 = vld [vmem:[%s1382_s1 + $0x1d0] sm:$0xff]   ;;  %v1104_v0 = vld [vmem:[%s1382_s1 + $0x1c8] sm:$0xff]  }
  0x15   :  { %954 = vmatpush3.bf16.msra.mxu1 %v1061_v19  ;;  %v1101_v61 = vld [vmem:[%s1382_s1 + $0x190] sm:$0xff]   ;;  %v1105_v1 = vld [vmem:[%s1382_s1 + $0x188] sm:$0xff]   ;;  %v1106_v2 = vld [vmem:[%s1382_s1 + $0x140] sm:$0xff]  }
  0x16   :  { %955 = vmatprep.subr.bf16.mxu1 %v1064_v22  ;;  %v1107_v3 = vld [vmem:[%s1382_s1 + $0x100] sm:$0xff]   ;;  %v17_v5 = vld [vmem:[%s1383_s0 + $0x10] sm:$0xff]  ;;  %v18_v10 = vld [vmem:[%s1383_s0 + $0x18] sm:$0xff] }
  0x17   :  { %934 = vmatpush3.bf16.msra.mxu0 %v1063_v21  ;;  %v1108_v4 = vld [vmem:[%s1382_s1 + $0x1c0] sm:$0xff]   ;;  %v846_v6 = vcombine.low %v17_v5, %v17_v5  ;;  %v847_v7 = vcombine.high %v17_v5, %v17_v5  ;;  %v848_v11 = vcombine.low %v18_v10, %v18_v10  ;;  %v849_v12 = vcombine.high %v18_v10, %v18_v10  ;;  %v1114_v13 = vld [vmem:[%s1382_s1 + $0x238] sm:$0xff]   ;;  %v1115_v14 = vld [vmem:[%s1382_s1 + $0x230] sm:$0xff]  }
  0x18   :  { %935 = vmatprep.subr.bf16.mxu0 %v1066_v24  ;;  %v1111_v8 = vld [vmem:[%s1382_s1 + $0x180] sm:$0xff]   ;;  %v1116_v15 = vld [vmem:[%s1382_s1 + $0x228] sm:$0xff]   ;;  %v1118_v17 = vld [vmem:[%s1382_s1 + $0x218] sm:$0xff]  }
  0x19   :  { %956 = vmatpush3.bf16.msra.mxu1 %v1065_v23  ;;  %v1117_v16 = vld [vmem:[%s1382_s1 + $0x220] sm:$0xff]   ;;  %v1119_v18 = vld [vmem:[%s1382_s1 + $0x210] sm:$0xff]   ;;  %v1120_v19 = vld [vmem:[%s1382_s1 + $0x208] sm:$0xff]  }
  0x1a   :  { %957 = vmatprep.subr.bf16.mxu1 %v1068_v26  ;;  %v1121_v20 = vld [vmem:[%s1382_s1 + $0x200] sm:$0xff]  }
  0x1b   :  { %936 = vmatpush3.bf16.msra.mxu0 %v1067_v25  ;;  %v1122_v21 = vld [vmem:[%s1383_s0 + $0x20] ss:$0 sps:$4 sm:$0xff]  }
  0x1c   :  { %937 = vmatprep.subr.bf16.mxu0 %v1070_v28 }
  0x1d   :  { %958 = vmatpush3.bf16.msra.mxu1 %v1069_v27 }
  0x1e   :  { %959 = vmatprep.subr.bf16.mxu1 %v1072_v30 }
  0x1f   :  { %938 = vmatpush3.bf16.msra.mxu0 %v1071_v29 }
  0x20   :  { %967 = vmatprep.subr.bf16.mxu0 %v1076_v35 }
  0x21   :  { %960 = vmatpush3.bf16.msra.mxu1 %v1075_v34 }
  0x22   :  { %668 = vmatmul.mubr.bf16.vlgmr.msra.gmra.mxu0 %v842_v32  ;;  %989 = vmatprep.subr.bf16.mxu1 %v1080_v40 }
  0x23   :  { %968 = vmatpush3.bf16.msra.mxu0 %v1079_v39  ;;  %747 = vmatprep.mubr.bf16.mxu0 %v847_v7  ;;  %v841_v39 = vld [vmem:[%s1384_s2] ss:$0 sm:$0xff] }
  0x24   :  { %708 = vmatmul.mubr.bf16.vlgmr.msra.gmra.mxu1 %v844_v37  ;;  %969 = vmatprep.subr.bf16.mxu0 %v1082_v42 }
  0x25   :  { %990 = vmatpush3.bf16.msra.mxu1 %v1081_v41  ;;  %787 = vmatprep.mubr.bf16.mxu1 %v849_v12 }
  0x26   :  { %991 = vmatprep.subr.bf16.mxu1 %v1084_v44 }
  0x27   :  { %970 = vmatpush3.bf16.msra.mxu0 %v1083_v43 }
  0x28   :  { %971 = vmatprep.subr.bf16.mxu0 %v1086_v46 }
  0x29   :  { %992 = vmatpush3.bf16.msra.mxu1 %v1085_v45 }
  0x2a   :  { %993 = vmatprep.subr.bf16.mxu1 %v1088_v48 }
  0x2b   :  { %972 = vmatpush3.bf16.msra.mxu0 %v1087_v47 }
  0x2c   :  { %973 = vmatprep.subr.bf16.mxu0 %v1090_v50 }
  0x2d   :  { %994 = vmatpush3.bf16.msra.mxu1 %v1089_v49 }
  0x2e   :  { %995 = vmatprep.subr.bf16.mxu1 %v1092_v52 }
  0x2f   :  { %974 = vmatpush3.bf16.msra.mxu0 %v1091_v51 }
  0x30   :  { %975 = vmatprep.subr.bf16.mxu0 %v1094_v54 }
  0x31   :  { %996 = vmatpush3.bf16.msra.mxu1 %v1093_v53 }
  0x32   :  { %997 = vmatprep.subr.bf16.mxu1 %v1096_v56 }
  0x33   :  { %976 = vmatpush3.bf16.msra.mxu0 %v1095_v55 }
  0x34   :  { %977 = vmatprep.subr.bf16.mxu0 %v1098_v58 }
  0x35   :  { %998 = vmatpush3.bf16.msra.mxu1 %v1097_v57 }
  0x36   :  { %999 = vmatprep.subr.bf16.mxu1 %v1100_v60 }
  0x37   :  { %978 = vmatpush3.bf16.msra.mxu0 %v1099_v59 }
  0x38   :  { %979 = vmatprep.subr.bf16.mxu0 %v1102_v62 }
  0x39   :  { %1000 = vmatpush3.bf16.msra.mxu1 %v1101_v61 }
  0x3a   :  { %1001 = vmatprep.subr.bf16.mxu1 %v1104_v0 }
  0x3b   :  { %980 = vmatpush3.bf16.msra.mxu0 %v1103_v63 }
  0x3c   :  { %981 = vmatprep.subr.bf16.mxu0 %v1106_v2 }
  0x3d   :  { %1002 = vmatpush3.bf16.msra.mxu1 %v1105_v1 }
  0x3e   :  { %1003 = vmatprep.subr.bf16.mxu1 %v1108_v4 }
  0x3f   :  { %982 = vmatpush3.bf16.msra.mxu0 %v1107_v3 }
  0x40   :  { %1020 = vmatprep.subr.bf16.mxu0 %v1123_v9 }
  0x41   :  { %1004 = vmatpush3.bf16.msra.mxu1 %v1111_v8 }
  0x42   :  { %748 = vmatmul.mubr.bf16.vlgmr.msra.gmra.mxu0 %v846_v6 }
  0x43   :  { %1021 = vmatpush3.bf16.msra.mxu0 %v1114_v13  ;;  %1036 = vmatprep.mubr.msk.bf16.mxu0 %vm1124_vm0, %v1123_v9 }
  0x44   :  { %788 = vmatmul.mubr.bf16.vlgmr.msra.gmra.mxu1 %v848_v11  ;;  %1022 = vmatprep.subr.bf16.mxu0 %v1123_v9 }
  0x47   :  { %1023 = vmatpush3.bf16.msra.mxu0 %v1115_v14 }
  0x48   :  { %1024 = vmatprep.subr.bf16.mxu0 %v1123_v9 }
  0x4b   :  { %1025 = vmatpush3.bf16.msra.mxu0 %v1116_v15 }
  0x4c   :  { %1026 = vmatprep.subr.bf16.mxu0 %v1123_v9 }
  0x4f   :  { %1027 = vmatpush3.bf16.msra.mxu0 %v1117_v16 }
  0x50   :  { %1028 = vmatprep.subr.bf16.mxu0 %v1123_v9 }
  0x53   :  { %1029 = vmatpush3.bf16.msra.mxu0 %v1118_v17 }
  0x54   :  { %1030 = vmatprep.subr.bf16.mxu0 %v1123_v9 }
  0x57   :  { %1031 = vmatpush3.bf16.msra.mxu0 %v1119_v18 }
  0x58   :  { %1032 = vmatprep.subr.bf16.mxu0 %v1123_v9 }
  0x5b   :  { %1033 = vmatpush3.bf16.msra.mxu0 %v1120_v19 }
  0x5c   :  { %1034 = vmatprep.subr.bf16.mxu0 %v1123_v9 }
  0x5f   :  { %1035 = vmatpush3.bf16.msra.mxu0 %v1121_v20 }
  0x62   :  { %1037 = vmatmul.mubr.bf16.vlgmr.msra.gmra.mxu0 %v1122_v21 }
  0xe2   :  { %v939_v22 = vpop.f32.mrf.mxu0 }
  0xe4   :  { %v940_v23 = vpop.f32.mrf.mxu0  ;;  %v961_v24 = vpop.f32.mrf.mxu1 }
  0xe5   :  { %v941_v38 = vadd.f32 %v940_v23, %v939_v22 }
  0xe6   :  { %v942_v25 = vpop.f32.mrf.mxu0  ;;  %v962_v26 = vpop.f32.mrf.mxu1 }
  0xe7   :  { %v670_v40 = vadd.f32 %v941_v38, %v841_v39  ;;  %v963_v41 = vadd.f32 %v962_v26, %v961_v24 }
  0xe8   :  { %v943_v27 = vpop.f32.mrf.mxu0  ;;  %v964_v28 = vpop.f32.mrf.mxu1 }
  0xe9   :  { %v710_v43 = vadd.f32 %v963_v41, %v670_v40 }
  0xea   :  { %v965_v29 = vpop.f32.mrf.mxu1 }
 0x102   :  { %v983_v30 = vpop.f32.mrf.mxu0 }
 0x104   :  { %v984_v31 = vpop.f32.mrf.mxu0  ;;  %v1005_v32 = vpop.f32.mrf.mxu1 }
 0x105   :  { %v985_v42 = vadd.f32 %v984_v31, %v983_v30 }
 0x106   :  { %v986_v33 = vpop.f32.mrf.mxu0  ;;  %v1006_v34 = vpop.f32.mrf.mxu1 }
 0x107   :  { %v750_v44 = vadd.f32 %v985_v42, %v710_v43  ;;  %v1007_v45 = vadd.f32 %v1006_v34, %v1005_v32 }
 0x108   :  { %v987_v35 = vpop.f32.mrf.mxu0  ;;  %v1008_v36 = vpop.f32.mrf.mxu1 }
 0x109   :  { %v790_v46 = vadd.f32 %v1007_v45, %v750_v44 }
 0x10a   :  { %v1009_v37 = vpop.f32.mrf.mxu1 }
 0x122   :  { %v829_v47 = vpop.f32.mrf.mxu0 }
 0x123   :  { %v830_v48 = vadd.f32 %v829_v47, %v790_v46 }
 0x124   :  { %v1038_v49 = vpop.f32.mrf.mxu0 }
 0x125   :  { %v835_v50 = vmax.f32 %v830_v48, 0.0 }
 0x126   :  { %v832_v51 = vpop.f32.mrf.mxu0 }
 0x127   :  { %836 = vst [vmem:[%s1385_s3] sm:$0xff] %v835_v50 }
 0x128   :  { %v1039_v52 = vpop.f32.mrf.mxu0 }

</bundles_post_ra>
